<compile_context>
chip_gen: v7x
topology: tpu7x:2x2x1
jax: 0.10.0
libtpu: 0.0.40
codegen_flags: <defaults>
</compile_context>

<pallas_src>
import jax
import jax.numpy as jnp
from jax.experimental import pallas as pl
from jax.experimental.pallas import tpu as pltpu

INPUTSIZE = 2048
HIDDEN1 = 1024
HIDDEN2 = 512
NUM_CLASSES = 3 * 3 - 1   # num = 3*int(num) - 1 with num=3 -> 8
OUT_PAD = 128             # lane-dense padded output width
BATCH = 64                # module's batch_size


def mlp_kernel(x_ref, w1_ref, w2_ref, w3_ref, o_ref):
    # x_ref : (TILE_B, 2048) f32       w1_ref: (2048, 1024) bf16
    # w2_ref: (1024, 512)   bf16       w3_ref: (512, 128)   bf16 (zero-padded)
    # o_ref : (TILE_B, 128) f32
    x = x_ref[...].astype(jnp.bfloat16)              # in-kernel cast, no extra HBM pass
    h1 = jnp.dot(x, w1_ref[...], preferred_element_type=jnp.float32)
    h1 = jnp.maximum(h1, 0.0).astype(jnp.bfloat16)   # relu in f32, then downcast
    h2 = jnp.dot(h1, w2_ref[...], preferred_element_type=jnp.float32)
    h2 = jnp.maximum(h2, 0.0).astype(jnp.bfloat16)
    o_ref[...] = jnp.dot(h2, w3_ref[...], preferred_element_type=jnp.float32)


def _pick_tile_b(B):
    """Batch tile selection.

    Small batches (<= 512) run as a single grid step: the grid-invariant
    weights (~5.1 MiB bf16) are fetched exactly once and never duplicated
    across v7x's two TensorCores.  Large batches tile at up to 512 rows
    (multiple of 16 -> bf16 sublane-dense) and mark the batch axis parallel.
    """
    if B <= 512:
        return B
    for t in (512, 256, 128, 64, 32, 16):
        if B % t == 0:
            return t
    return B  # odd large batch: single full-array block (still correct)


def simulation_net_forward(x, w1_b, w2_b, w3_b_padded):
    """x: (B, 2048) f32; weights pre-transposed to (in, out), bf16,
    w3 zero-padded to (512, OUT_PAD).  Returns (B, NUM_CLASSES) f32."""
    B = x.shape[0]
    tile_b = _pick_tile_b(B)
    n_steps = B // tile_b
    grid = (n_steps,)

    # Only megacore-split when there are actually multiple grid steps;
    # a single step is marked "arbitrary" so weights are not duplicated.
    dim_sem = ("parallel",) if n_steps > 1 else ("arbitrary",)

    flops = 2 * B * (INPUTSIZE * HIDDEN1 + HIDDEN1 * HIDDEN2 + HIDDEN2 * OUT_PAD)
    bytes_accessed = (
        B * INPUTSIZE * 4                                   # x (f32 in)
        + (INPUTSIZE * HIDDEN1 + HIDDEN1 * HIDDEN2 + HIDDEN2 * OUT_PAD) * 2  # weights bf16
        + B * OUT_PAD * 4                                   # output f32
    )

    out_padded = pl.pallas_call(
        mlp_kernel,
        out_shape=jax.ShapeDtypeStruct((B, OUT_PAD), jnp.float32),
        grid_spec=pltpu.PrefetchScalarGridSpec(
            num_scalar_prefetch=0,
            grid=grid,
            in_specs=[
                pl.BlockSpec((tile_b, INPUTSIZE), lambda i: (i, 0)),
                # Weights are grid-invariant (constant index_map) -> DMA'd once.
                pl.BlockSpec((INPUTSIZE, HIDDEN1), lambda i: (0, 0)),
                pl.BlockSpec((HIDDEN1, HIDDEN2), lambda i: (0, 0)),
                pl.BlockSpec((HIDDEN2, OUT_PAD), lambda i: (0, 0)),
            ],
            out_specs=pl.BlockSpec((tile_b, OUT_PAD), lambda i: (i, 0)),
        ),
        compiler_params=pltpu.CompilerParams(
            dimension_semantics=dim_sem,
            # ~22 MiB worst-case footprint (tile_b=512, f32 ingest, double-
            # buffered); 48 MiB fits v7x's 64 MiB physical VMEM with headroom.
            vmem_limit_bytes=48 << 20,
        ),
        cost_estimate=pl.CostEstimate(
            flops=flops, transcendentals=0, bytes_accessed=bytes_accessed
        ),
    )(x, w1_b, w2_b, w3_b_padded)

    return out_padded[:, :NUM_CLASSES]


def init_params(key):
    """Deterministic parameter init (kaiming-uniform-like, as nn.Linear)."""
    k1, k2, k3 = jax.random.split(key, 3)

    def linear_weight(k, out_f, in_f):
        bound = 1.0 / jnp.sqrt(in_f)
        # PyTorch stores (out, in); transpose to (in, out) for the kernel.
        w = jax.random.uniform(k, (out_f, in_f), jnp.float32, -bound, bound)
        return w.T

    w1 = linear_weight(k1, HIDDEN1, INPUTSIZE)      # (2048, 1024)
    w2 = linear_weight(k2, HIDDEN2, HIDDEN1)        # (1024, 512)
    w3 = linear_weight(k3, NUM_CLASSES, HIDDEN2)    # (512, 8)
    return w1, w2, w3


def prepare_params(w1, w2, w3):
    """Kernel-ready weights: bf16, with w3 zero-padded to a lane-dense width."""
    w1_b = w1.astype(jnp.bfloat16)
    w2_b = w2.astype(jnp.bfloat16)
    w3_b = jnp.pad(w3, ((0, 0), (0, OUT_PAD - w3.shape[1]))).astype(jnp.bfloat16)
    return w1_b, w2_b, w3_b


def reference_forward(x, w1_b, w2_b, w3_b):
    """Plain-JAX reference on the same bf16-operand / f32-accumulate path."""
    xb = x.astype(jnp.bfloat16)
    h1 = jnp.maximum(jnp.dot(xb, w1_b, preferred_element_type=jnp.float32), 0.0)
    h2 = jnp.maximum(
        jnp.dot(h1.astype(jnp.bfloat16), w2_b, preferred_element_type=jnp.float32), 0.0
    )
    return jnp.dot(h2.astype(jnp.bfloat16), w3_b, preferred_element_type=jnp.float32)


def reference_forward_f32(x, w1, w2, w3):
    """Full-precision reference matching the PyTorch f32 module."""
    h1 = jnp.maximum(jnp.dot(x, w1), 0.0)
    h2 = jnp.maximum(jnp.dot(h1, w2), 0.0)
    return jnp.dot(h2, w3)


if __name__ == "__main__":
    key = jax.random.PRNGKey(0)
    kx, kp = jax.random.split(key)

    x = jax.random.normal(kx, (BATCH, INPUTSIZE), jnp.float32)
    w1, w2, w3 = init_params(kp)
    w1_b, w2_b, w3_b_padded = prepare_params(w1, w2, w3)

    out = simulation_net_forward(x, w1_b, w2_b, w3_b_padded)
    out = jax.block_until_ready(out)
    assert out.shape == (BATCH, NUM_CLASSES)

    # Exact-path check: same bf16-operand / f32-accumulate math as the kernel.
    ref_bf16 = reference_forward(x, w1_b, w2_b, w3_b_padded[:, :NUM_CLASSES])
    assert jnp.allclose(out, ref_bf16, atol=1e-2, rtol=1e-2)

    # Drift check vs. the true f32 PyTorch-equivalent module (loose tolerance:
    # bf16 weights/activations intentionally trade a little precision for BW).
    ref_f32 = reference_forward_f32(x, w1, w2, w3)
    assert jnp.allclose(out, ref_f32, atol=5e-1, rtol=5e-2)

    print("KERNEL_OK")
</pallas_src>

<mosaic_0001>
module attributes {stable_mosaic.version = 11 : i64} {
  func.func @mlp_kernel(%arg0: i32, %arg1: memref<64x2048xf32, #tpu.memory_space<vmem>>, %arg2: memref<2048x1024xbf16, #tpu.memory_space<vmem>>, %arg3: memref<1024x512xbf16, #tpu.memory_space<vmem>>, %arg4: memref<512x128xbf16, #tpu.memory_space<vmem>>, %arg5: memref<64x128xf32, #tpu.memory_space<vmem>>) attributes {dimension_semantics = [#tpu.dimension_semantics<arbitrary>], iteration_bounds = array<i64: 1>, scalar_prefetch = 0 : i64, scratch_operands = 0 : i64, tpu.core_type = #tpu.core_type<tc>, window_params = [{transform_indices = @transform_0, window_bounds = array<i64: 64, 2048>}, {pipeline_mode = #tpu.pipeline_mode<synchronous>, transform_indices = @transform_1, window_bounds = array<i64: 2048, 1024>}, {pipeline_mode = #tpu.pipeline_mode<synchronous>, transform_indices = @transform_2, window_bounds = array<i64: 1024, 512>}, {pipeline_mode = #tpu.pipeline_mode<synchronous>, transform_indices = @transform_3, window_bounds = array<i64: 512, 128>}, {transform_indices = @transform_4, window_bounds = array<i64: 64, 128>}]} {
    %c0 = arith.constant 0 : index
    %c0_0 = arith.constant 0 : index
    %0 = vector.load %arg1[%c0, %c0_0] : memref<64x2048xf32, #tpu.memory_space<vmem>>, vector<64x2048xf32>
    %1 = arith.truncf %0 : vector<64x2048xf32> to vector<64x2048xbf16>
    %c0_1 = arith.constant 0 : index
    %c0_2 = arith.constant 0 : index
    %2 = vector.load %arg2[%c0_1, %c0_2] : memref<2048x1024xbf16, #tpu.memory_space<vmem>>, vector<2048x1024xbf16>
    %cst = arith.constant dense<0.000000e+00> : vector<64x1024xf32>
    %3 = tpu.matmul %1, %2, %cst {dimension_numbers = #tpu.dot_dimension_numbers<[1], [0], [0], [1], [0, 0, 1, 1], [], []>} : vector<64x2048xbf16>, vector<2048x1024xbf16>, vector<64x1024xf32> -> vector<64x1024xf32>
    %cst_3 = arith.constant 0.000000e+00 : f32
    %4 = vector.broadcast %cst_3 : f32 to vector<64x1024xf32>
    %5 = arith.maximumf %3, %4 : vector<64x1024xf32>
    %6 = arith.truncf %5 : vector<64x1024xf32> to vector<64x1024xbf16>
    %c0_4 = arith.constant 0 : index
    %c0_5 = arith.constant 0 : index
    %7 = vector.load %arg3[%c0_4, %c0_5] : memref<1024x512xbf16, #tpu.memory_space<vmem>>, vector<1024x512xbf16>
    %cst_6 = arith.constant dense<0.000000e+00> : vector<64x512xf32>
    %8 = tpu.matmul %6, %7, %cst_6 {dimension_numbers = #tpu.dot_dimension_numbers<[1], [0], [0], [1], [0, 0, 1, 1], [], []>} : vector<64x1024xbf16>, vector<1024x512xbf16>, vector<64x512xf32> -> vector<64x512xf32>
    %cst_7 = arith.constant 0.000000e+00 : f32
    %9 = vector.broadcast %cst_7 : f32 to vector<64x512xf32>
    %10 = arith.maximumf %8, %9 : vector<64x512xf32>
    %11 = arith.truncf %10 : vector<64x512xf32> to vector<64x512xbf16>
    %c0_8 = arith.constant 0 : index
    %c0_9 = arith.constant 0 : index
    %12 = vector.load %arg4[%c0_8, %c0_9] : memref<512x128xbf16, #tpu.memory_space<vmem>>, vector<512x128xbf16>
    %cst_10 = arith.constant dense<0.000000e+00> : vector<64x128xf32>
    %13 = tpu.matmul %11, %12, %cst_10 {dimension_numbers = #tpu.dot_dimension_numbers<[1], [0], [0], [1], [0, 0, 1, 1], [], []>} : vector<64x512xbf16>, vector<512x128xbf16>, vector<64x128xf32> -> vector<64x128xf32>
    %c0_11 = arith.constant 0 : index
    %c0_12 = arith.constant 0 : index
    %14 = vector.load %arg5[%c0_11, %c0_12] : memref<64x128xf32, #tpu.memory_space<vmem>>, vector<64x128xf32>
    tpu.vector_store %arg5[%c0_11, %c0_12], %13 {strides = array<i32>} : memref<64x128xf32, #tpu.memory_space<vmem>>, vector<64x128xf32>,
    return
  }
  func.func @transform_0(%arg0: i32) -> (i32, i32) {
    %c0_i32 = arith.constant 0 : i32
    %c0_i32_0 = arith.constant 0 : i32
    return %arg0, %c0_i32 : i32, i32
  }
  func.func @transform_1(%arg0: i32) -> (i32, i32) {
    %c0_i32 = arith.constant 0 : i32
    %c0_i32_0 = arith.constant 0 : i32
    %c0_i32_1 = arith.constant 0 : i32
    return %c0_i32, %c0_i32_0 : i32, i32
  }
  func.func @transform_2(%arg0: i32) -> (i32, i32) {
    %c0_i32 = arith.constant 0 : i32
    %c0_i32_0 = arith.constant 0 : i32
    %c0_i32_1 = arith.constant 0 : i32
    return %c0_i32, %c0_i32_0 : i32, i32
  }
  func.func @transform_3(%arg0: i32) -> (i32, i32) {
    %c0_i32 = arith.constant 0 : i32
    %c0_i32_0 = arith.constant 0 : i32
    %c0_i32_1 = arith.constant 0 : i32
    return %c0_i32, %c0_i32_0 : i32, i32
  }
  func.func @transform_4(%arg0: i32) -> (i32, i32) {
    %c0_i32 = arith.constant 0 : i32
    %c0_i32_0 = arith.constant 0 : i32
    return %arg0, %c0_i32 : i32, i32
  }
}

</mosaic_0001>

<bundles_post_ra>
// kernel: tpu_custom_call.1
= control target key start
LH: loop header
LB: loop body
LE: loop exit
PB: predicated region body
PF: predicated region fallthrough
CT: control target
= control target key end

     0   :  { %9 = vsyncpa [#allocation3], 0  ;;  %s14493_s0 = inlined_call_operand.hbm [shape: f32[64,2048], index: 0, kind: input, shape index: {}]   ;;  %s14494_s1 = inlined_call_operand.hbm [shape: bf16[2048,1024], index: 1, kind: input, shape index: {}]   ;;  %s14495_s2 = inlined_call_operand.hbm [shape: bf16[1024,512], index: 2, kind: input, shape index: {}]   ;;  %s14496_s3 = inlined_call_operand.hbm [shape: bf16[512,128], index: 3, kind: input, shape index: {}]   ;;  %s14497_s4 = inlined_call_operand.hbm [shape: f32[64,128], index: 4, kind: output, shape index: {}]  }
   0x1   :  { %10 = vsyncpa [#allocation6], 0 }
   0x2   :  { %11 = vsyncpa [#allocation9], 0 }
   0x3   :  { %12 = vsyncpa [#allocation4], 0  ;;  %s13907_s15 = smov [#allocation5]   ;;  %s13789_s19 = scalar_lea.hbm %s14494_s1, 131072 }
   0x4   :  { %s30_s16 = sshll.u32 %s13907_s15, 4  ;;  %p13790_p0 = scmp.ne.s32.totalorder %s14494_s1, %s13789_s19  ;;  %s31_s16 = int_to_ptr.vmem [resolvable:$true] %s30_s16 }
   0x5   :  { %p13793_p1 = scmp.lt.u32.totalorder %s13789_s19, %s14494_s1 }
   0x7   :  { %p13795_p2 = pnand %p13793_p1, %p13790_p0 }
   0x9   :  { %13798 = shalt.err (!%p13795_p2)
}
   0xa   :  { %s13799_s24 = scalar_lea.vmem %s31_s16, 131072  ;;  %p13804_p4 = scmp.lt.s32.totalorder %s31_s16, %s31_s16 }
   0xb   :  { %p13800_p3 = scmp.ne.s32.totalorder %s31_s16, %s13799_s24  ;;  %p13805_p5 = scmp.lt.s32.totalorder %s13799_s24, %s13799_s24 }
   0xd   :  { %p13806_p6 = por %p13805_p5, %p13804_p4 }
   0xf   :  { %p13807_p7 = pnand %p13806_p6, %p13800_p3 }
  0x11   :  { %13810 = shalt.err (!%p13807_p7)
}
  0x12   :  { %s13908_s25 = smov 512   ;;  %s13909_s26 = smov 32  }
  0x13   :  { %36 = dma.hbm_to_vmem [thread:$0]  %s14494_s1, 131072, %s31_s16, [#allocation6], %s13908_s25, %s13908_s25, %s13909_s26  }
  0x14   :  { %s13910_s29 = smov [#allocation2]   ;;  %s13811_s7 = scalar_lea.hbm %s14493_s0, 16384 }
  0x15   :  { %s18_s30 = sshll.u32 %s13910_s29, 4  ;;  %p13812_p8 = scmp.ne.s32.totalorder %s14493_s0, %s13811_s7  ;;  %s19_s30 = int_to_ptr.vmem [resolvable:$true] %s18_s30 }
  0x16   :  { %p13815_p9 = scmp.lt.u32.totalorder %s13811_s7, %s14493_s0 }
  0x18   :  { %p13817_p10 = pnand %p13815_p9, %p13812_p8 }
  0x1a   :  { %13820 = shalt.err (!%p13817_p10)
}
  0x1b   :  { %s13821_s12 = scalar_lea.vmem %s19_s30, 16384  ;;  %p13826_p12 = scmp.lt.s32.totalorder %s19_s30, %s19_s30 }
  0x1c   :  { %p13822_p11 = scmp.ne.s32.totalorder %s19_s30, %s13821_s12  ;;  %p13827_p13 = scmp.lt.s32.totalorder %s13821_s12, %s13821_s12 }
  0x1e   :  { %p13828_p0 = por %p13827_p13, %p13826_p12 }
  0x20   :  { %p13829_p1 = pnand %p13828_p0, %p13822_p11 }
  0x22   :  { %13832 = shalt.err (!%p13829_p1)
}
  0x23   :  { %s13911_s1 = smov 2048   ;;  %s13912_s13 = smov 128  }
  0x24   :  { %24 = dma.hbm_to_vmem [thread:$0]  %s14493_s0, 16384, %s19_s30, [#allocation3], %s13911_s1, %s13911_s1, %s13912_s13  }
  0x25   :  { %s13913_s16 = smov [#allocation7]   ;;  %s13833_s20 = scalar_lea.hbm %s14495_s2, 32768 }
  0x26   :  { %s42_s17 = sshll.u32 %s13913_s16, 4  ;;  %p13834_p2 = scmp.ne.s32.totalorder %s14495_s2, %s13833_s20  ;;  %s43_s17 = int_to_ptr.vmem [resolvable:$true] %s42_s17 }
  0x27   :  { %p13837_p3 = scmp.lt.u32.totalorder %s13833_s20, %s14495_s2 }
  0x29   :  { %p13839_p4 = pnand %p13837_p3, %p13834_p2 }
  0x2b   :  { %13842 = shalt.err (!%p13839_p4)
}
  0x2c   :  { %s13843_s25 = scalar_lea.vmem %s43_s17, 32768  ;;  %p13848_p6 = scmp.lt.s32.totalorder %s43_s17, %s43_s17 }
  0x2d   :  { %p13844_p5 = scmp.ne.s32.totalorder %s43_s17, %s13843_s25  ;;  %p13849_p7 = scmp.lt.s32.totalorder %s13843_s25, %s13843_s25 }
  0x2f   :  { %p13850_p8 = por %p13849_p7, %p13848_p6 }
  0x31   :  { %p13851_p9 = pnand %p13850_p8, %p13844_p5 }
  0x33   :  { %13854 = shalt.err (!%p13851_p9)
}
  0x34   :  { %s13914_s0 = smov 256   ;;  %s13915_s26 = smov 16  }
  0x35   :  { %48 = dma.hbm_to_vmem [thread:$0]  %s14495_s2, 32768, %s43_s17, [#allocation6], %s13914_s0, %s13914_s0, %s13915_s26  }
  0x36   :  { %s13916_s29 = smov [#allocation8]   ;;  %s13855_s7 = scalar_lea.hbm %s14496_s3, 4096 }
  0x37   :  { %s54_s30 = sshll.u32 %s13916_s29, 4  ;;  %p13856_p10 = scmp.ne.s32.totalorder %s14496_s3, %s13855_s7  ;;  %s55_s30 = int_to_ptr.vmem [resolvable:$true] %s54_s30 }
  0x38   :  { %p13859_p11 = scmp.lt.u32.totalorder %s13855_s7, %s14496_s3 }
  0x3a   :  { %p13861_p12 = pnand %p13859_p11, %p13856_p10 }
  0x3c   :  { %13864 = shalt.err (!%p13861_p12)
}
  0x3d   :  { %s13865_s12 = scalar_lea.vmem %s55_s30, 4096  ;;  %p13870_p0 = scmp.lt.s32.totalorder %s55_s30, %s55_s30 }
  0x3e   :  { %p13866_p13 = scmp.ne.s32.totalorder %s55_s30, %s13865_s12  ;;  %p13871_p1 = scmp.lt.s32.totalorder %s13865_s12, %s13865_s12 }
  0x40   :  { %p13872_p2 = por %p13871_p1, %p13870_p0 }
  0x42   :  { %p13873_p3 = pnand %p13872_p2, %p13866_p13 }
  0x44   :  { %13876 = shalt.err (!%p13873_p3)
}
  0x45   :  { %s13917_s2 = smov 64   ;;  %s13918_s1 = smov 4  }
  0x46   :  { %60 = dma.hbm_to_vmem [thread:$0]  %s14496_s3, 4096, %s55_s30, [#allocation9], %s13917_s2, %s13917_s2, %s13918_s1  }
  0x47   :  { %13899 = dma.done.wait [#allocation3], 16384  }
  0x48   :  { %13900 = vsyncadd [#allocation3], 4294950912 }
  0x49   :  { %13901 = dma.done.wait [#allocation6], 163840  }
  0x4a   :  { %13902 = vsyncadd [#allocation6], 4294803456 }
  0x4b   :  { %13903 = dma.done.wait [#allocation9], 4096  }
  0x4c   :  { %13904 = vsyncadd [#allocation9], 4294963200  ;;  %v266_v0 = vld [vmem:[#allocation5] sm:$0xff]  ;;  %v267_v2 = vld [vmem:[#allocation5 + $0x8] sm:$0xff]  ;;  %s13919_s3 = smov [#allocation10]  }
  0x4d   :  { %v270_v1 = vld [vmem:[#allocation5 + $0x20] sm:$0xff]  ;;  %v271_v4 = vld [vmem:[#allocation5 + $0x28] sm:$0xff]  ;;  %s11409_s16 = sshll.u32 %s13919_s3, 4  ;;  %s11410_s16 = int_to_ptr.vmem [resolvable:$true] %s11409_s16 }
  0x4e   :  { %v11424_v3 = vcombine.high %v266_v0, %v270_v1  ;;  %v11423_v5 = vcombine.low %v266_v0, %v270_v1  ;;  %v274_v6 = vld [vmem:[#allocation5 + $0x40] sm:$0xff]  ;;  %v11426_v8 = vcombine.high %v267_v2, %v271_v4  ;;  %v11425_v9 = vcombine.low %v267_v2, %v271_v4  ;;  %v275_v11 = vld [vmem:[#allocation5 + $0x48] sm:$0xff]  ;;  %s13877_s17 = scalar_lea.vmem %s11410_s16, 1024  ;;  %p13882_p5 = scmp.lt.s32.totalorder %s11410_s16, %s11410_s16 }
  0x4f   :  { %v278_v7 = vld [vmem:[#allocation5 + $0x60] sm:$0xff]  ;;  %v279_v12 = vld [vmem:[#allocation5 + $0x68] sm:$0xff]  ;;  %p13878_p4 = scmp.ne.s32.totalorder %s11410_s16, %s13877_s17  ;;  %p13883_p6 = scmp.lt.s32.totalorder %s13877_s17, %s13877_s17 }
  0x50   :  { %v11432_v10 = vcombine.high %v274_v6, %v278_v7  ;;  %v282_v13 = vld [vmem:[#allocation5 + $0x80] sm:$0xff]  ;;  %6410 = vmatprep.subr.bf16.mxu0 %v11424_v3  ;;  %v11434_v14 = vcombine.high %v275_v11, %v279_v12  ;;  %v283_v16 = vld [vmem:[#allocation5 + $0x88] sm:$0xff]  ;;  %6994 = vmatprep.subr.bf16.mxu1 %v11426_v8  ;;  %v11431_v18 = vcombine.low %v274_v6, %v278_v7 }
  0x51   :  { %v286_v15 = vld [vmem:[#allocation5 + $0xa0] sm:$0xff]  ;;  %v287_v17 = vld [vmem:[#allocation5 + $0xa8] sm:$0xff]  ;;  %6411 = vmatpush1.bf16.msra.mxu0 %v11423_v5  ;;  %6995 = vmatpush1.bf16.msra.mxu1 %v11425_v9  ;;  %v11433_v19 = vcombine.low %v275_v11, %v279_v12  ;;  %p13884_p7 = por %p13883_p6, %p13882_p5 }
  0x52   :  { %6412 = vmatprep.subr.bf16.mxu0 %v11432_v10  ;;  %v11440_v20 = vcombine.high %v282_v13, %v286_v15  ;;  %6996 = vmatprep.subr.bf16.mxu1 %v11434_v14  ;;  %v11442_v21 = vcombine.high %v283_v16, %v287_v17  ;;  %v290_v22 = vld [vmem:[#allocation5 + $0xc0] sm:$0xff]  ;;  %v291_v24 = vld [vmem:[#allocation5 + $0xc8] sm:$0xff]  ;;  %v11439_v26 = vcombine.low %v282_v13, %v286_v15 }
  0x53   :  { %v294_v23 = vld [vmem:[#allocation5 + $0xe0] sm:$0xff]  ;;  %v295_v25 = vld [vmem:[#allocation5 + $0xe8] sm:$0xff]  ;;  %v11441_v27 = vcombine.low %v283_v16, %v287_v17  ;;  %p13885_p8 = pnand %p13884_p7, %p13878_p4 }
  0x54   :  { %v11448_v28 = vcombine.high %v290_v22, %v294_v23  ;;  %v11450_v29 = vcombine.high %v291_v24, %v295_v25  ;;  %v298_v30 = vld [vmem:[#allocation5 + $0x100] sm:$0xff]  ;;  %v299_v32 = vld [vmem:[#allocation5 + $0x108] sm:$0xff]  ;;  %v11447_v34 = vcombine.low %v290_v22, %v294_v23  ;;  %v11449_v35 = vcombine.low %v291_v24, %v295_v25 }
  0x55   :  { %6413 = vmatpush1.bf16.msra.mxu0 %v11431_v18  ;;  %6997 = vmatpush1.bf16.msra.mxu1 %v11433_v19  ;;  %v302_v31 = vld [vmem:[#allocation5 + $0x120] sm:$0xff]  ;;  %v303_v33 = vld [vmem:[#allocation5 + $0x128] sm:$0xff] }
  0x56   :  { %6414 = vmatprep.subr.bf16.mxu0 %v11440_v20  ;;  %6998 = vmatprep.subr.bf16.mxu1 %v11442_v21  ;;  %v11456_v36 = vcombine.high %v298_v30, %v302_v31  ;;  %v11458_v37 = vcombine.high %v299_v32, %v303_v33  ;;  %v306_v38 = vld [vmem:[#allocation5 + $0x140] sm:$0xff]  ;;  %v307_v40 = vld [vmem:[#allocation5 + $0x148] sm:$0xff]  ;;  %v11455_v42 = vcombine.low %v298_v30, %v302_v31 }
  0x57   :  { %v310_v39 = vld [vmem:[#allocation5 + $0x160] sm:$0xff]  ;;  %v311_v41 = vld [vmem:[#allocation5 + $0x168] sm:$0xff]  ;;  %v11457_v43 = vcombine.low %v299_v32, %v303_v33 }
  0x58   :  { %v11464_v44 = vcombine.high %v306_v38, %v310_v39  ;;  %v11466_v45 = vcombine.high %v307_v40, %v311_v41  ;;  %v314_v46 = vld [vmem:[#allocation5 + $0x180] sm:$0xff]  ;;  %v315_v48 = vld [vmem:[#allocation5 + $0x188] sm:$0xff]  ;;  %v11463_v50 = vcombine.low %v306_v38, %v310_v39  ;;  %v11465_v51 = vcombine.low %v307_v40, %v311_v41 }
  0x59   :  { %6415 = vmatpush1.bf16.msra.mxu0 %v11439_v26  ;;  %6999 = vmatpush1.bf16.msra.mxu1 %v11441_v27  ;;  %v318_v47 = vld [vmem:[#allocation5 + $0x1a0] sm:$0xff]  ;;  %v319_v49 = vld [vmem:[#allocation5 + $0x1a8] sm:$0xff] }
  0x5a   :  { %6416 = vmatprep.subr.bf16.mxu0 %v11448_v28  ;;  %7000 = vmatprep.subr.bf16.mxu1 %v11450_v29  ;;  %v11472_v52 = vcombine.high %v314_v46, %v318_v47  ;;  %v75_v53 = vld [vmem:[#allocation2 + $0x8] sm:$0xff]  ;;  %v11474_v55 = vcombine.high %v315_v48, %v319_v49  ;;  %v322_v56 = vld [vmem:[#allocation5 + $0x1c0] sm:$0xff]  ;;  %v11471_v61 = vcombine.low %v314_v46, %v318_v47 }
  0x5b   :  { %v91_v54 = vld [vmem:[#allocation2 + $0x88] sm:$0xff]  ;;  %v326_v57 = vld [vmem:[#allocation5 + $0x1e0] sm:$0xff]  ;;  %v11473_v62 = vcombine.low %v315_v48, %v319_v49 }
  0x5c   :  { %v13995_v58 = vpack.c.bf16 %v91_v54, %v75_v53  ;;  %v323_v59 = vld [vmem:[#allocation5 + $0x1c8] sm:$0xff]  ;;  %v11480_v63 = vcombine.high %v322_v56, %v326_v57  ;;  %v330_v1 = vld [vmem:[#allocation5 + $0x200] sm:$0xff]  ;;  %v11479_v5 = vcombine.low %v322_v56, %v326_v57 }
  0x5d   :  { %6417 = vmatpush1.bf16.msra.mxu0 %v11447_v34  ;;  %7001 = vmatpush1.bf16.msra.mxu1 %v11449_v35  ;;  %v327_v60 = vld [vmem:[#allocation5 + $0x1e8] sm:$0xff]  ;;  %v334_v2 = vld [vmem:[#allocation5 + $0x220] sm:$0xff] }
  0x5e   :  { %6418 = vmatprep.subr.bf16.mxu0 %v11456_v36  ;;  %7002 = vmatprep.subr.bf16.mxu1 %v11458_v37  ;;  %v11482_v0 = vcombine.high %v323_v59, %v327_v60  ;;  %v331_v3 = vld [vmem:[#allocation5 + $0x208] sm:$0xff]  ;;  %v11481_v6 = vcombine.low %v323_v59, %v327_v60  ;;  %v11488_v7 = vcombine.high %v330_v1, %v334_v2  ;;  %v338_v9 = vld [vmem:[#allocation5 + $0x240] sm:$0xff] }
  0x5f   :  { %6442 = vmatprep.mubr.bf16.mxu0 %v13995_v58  ;;  %7026 = vmatprep.mubr.bf16.mxu1 %v13995_v58  ;;  %v335_v4 = vld [vmem:[#allocation5 + $0x228] sm:$0xff]  ;;  %v342_v10 = vld [vmem:[#allocation5 + $0x260] sm:$0xff]  ;;  %v11487_v13 = vcombine.low %v330_v1, %v334_v2 }
  0x60   :  { %v11490_v8 = vcombine.high %v331_v3, %v335_v4  ;;  %v339_v11 = vld [vmem:[#allocation5 + $0x248] sm:$0xff]  ;;  %v11489_v14 = vcombine.low %v331_v3, %v335_v4  ;;  %v11496_v15 = vcombine.high %v338_v9, %v342_v10  ;;  %v346_v17 = vld [vmem:[#allocation5 + $0x280] sm:$0xff]  ;;  %v11495_v21 = vcombine.low %v338_v9, %v342_v10 }
  0x61   :  { %6419 = vmatpush1.bf16.msra.mxu0 %v11455_v42  ;;  %7003 = vmatpush1.bf16.msra.mxu1 %v11457_v43  ;;  %v343_v12 = vld [vmem:[#allocation5 + $0x268] sm:$0xff]  ;;  %v350_v18 = vld [vmem:[#allocation5 + $0x2a0] sm:$0xff] }
  0x62   :  { %6420 = vmatprep.subr.bf16.mxu0 %v11464_v44  ;;  %7004 = vmatprep.subr.bf16.mxu1 %v11466_v45  ;;  %v11498_v16 = vcombine.high %v339_v11, %v343_v12  ;;  %v347_v19 = vld [vmem:[#allocation5 + $0x288] sm:$0xff]  ;;  %v11497_v22 = vcombine.low %v339_v11, %v343_v12  ;;  %v11504_v23 = vcombine.high %v346_v17, %v350_v18  ;;  %v354_v25 = vld [vmem:[#allocation5 + $0x2c0] sm:$0xff] }
  0x63   :  { %v351_v20 = vld [vmem:[#allocation5 + $0x2a8] sm:$0xff]  ;;  %v358_v26 = vld [vmem:[#allocation5 + $0x2e0] sm:$0xff]  ;;  %v11503_v29 = vcombine.low %v346_v17, %v350_v18 }
  0x64   :  { %v11506_v24 = vcombine.high %v347_v19, %v351_v20  ;;  %v355_v27 = vld [vmem:[#allocation5 + $0x2c8] sm:$0xff]  ;;  %v11505_v30 = vcombine.low %v347_v19, %v351_v20  ;;  %v11512_v31 = vcombine.high %v354_v25, %v358_v26  ;;  %v362_v33 = vld [vmem:[#allocation5 + $0x300] sm:$0xff]  ;;  %v11511_v37 = vcombine.low %v354_v25, %v358_v26 }
  0x65   :  { %6421 = vmatpush1.bf16.msra.mxu0 %v11463_v50  ;;  %7005 = vmatpush1.bf16.msra.mxu1 %v11465_v51  ;;  %v359_v28 = vld [vmem:[#allocation5 + $0x2e8] sm:$0xff]  ;;  %v366_v34 = vld [vmem:[#allocation5 + $0x320] sm:$0xff] }
  0x66   :  { %6422 = vmatprep.subr.bf16.mxu0 %v11472_v52  ;;  %7006 = vmatprep.subr.bf16.mxu1 %v11474_v55  ;;  %v11514_v32 = vcombine.high %v355_v27, %v359_v28  ;;  %v363_v35 = vld [vmem:[#allocation5 + $0x308] sm:$0xff]  ;;  %v11513_v38 = vcombine.low %v355_v27, %v359_v28  ;;  %v11520_v39 = vcombine.high %v362_v33, %v366_v34  ;;  %v370_v41 = vld [vmem:[#allocation5 + $0x340] sm:$0xff] }
  0x67   :  { %v367_v36 = vld [vmem:[#allocation5 + $0x328] sm:$0xff]  ;;  %v374_v42 = vld [vmem:[#allocation5 + $0x360] sm:$0xff]  ;;  %v11519_v45 = vcombine.low %v362_v33, %v366_v34 }
  0x68   :  { %v11522_v40 = vcombine.high %v363_v35, %v367_v36  ;;  %v371_v43 = vld [vmem:[#allocation5 + $0x348] sm:$0xff]  ;;  %v11521_v46 = vcombine.low %v363_v35, %v367_v36  ;;  %v11528_v47 = vcombine.high %v370_v41, %v374_v42  ;;  %v378_v49 = vld [vmem:[#allocation5 + $0x380] sm:$0xff]  ;;  %v11527_v53 = vcombine.low %v370_v41, %v374_v42 }
  0x69   :  { %6423 = vmatpush1.bf16.msra.mxu0 %v11471_v61  ;;  %7007 = vmatpush1.bf16.msra.mxu1 %v11473_v62  ;;  %v375_v44 = vld [vmem:[#allocation5 + $0x368] sm:$0xff]  ;;  %v382_v50 = vld [vmem:[#allocation5 + $0x3a0] sm:$0xff] }
  0x6a   :  { %6424 = vmatprep.subr.bf16.mxu0 %v11480_v63  ;;  %7008 = vmatprep.subr.bf16.mxu1 %v11482_v0  ;;  %v11530_v48 = vcombine.high %v371_v43, %v375_v44  ;;  %v379_v51 = vld [vmem:[#allocation5 + $0x388] sm:$0xff]  ;;  %v11529_v54 = vcombine.low %v371_v43, %v375_v44  ;;  %v11536_v55 = vcombine.high %v378_v49, %v382_v50  ;;  %v386_v57 = vld [vmem:[#allocation5 + $0x3c0] sm:$0xff] }
  0x6b   :  { %v383_v52 = vld [vmem:[#allocation5 + $0x3a8] sm:$0xff]  ;;  %v390_v59 = vld [vmem:[#allocation5 + $0x3e0] sm:$0xff]  ;;  %v11535_v62 = vcombine.low %v378_v49, %v382_v50 }
  0x6c   :  { %v11538_v56 = vcombine.high %v379_v51, %v383_v52  ;;  %v387_v60 = vld [vmem:[#allocation5 + $0x3c8] sm:$0xff]  ;;  %v11537_v63 = vcombine.low %v379_v51, %v383_v52  ;;  %v11544_v0 = vcombine.high %v386_v57, %v390_v59  ;;  %v394_v2 = vld [vmem:[#allocation5 + $0x400] sm:$0xff] }
  0x6d   :  { %6425 = vmatpush1.bf16.msra.mxu0 %v11479_v5  ;;  %7009 = vmatpush1.bf16.msra.mxu1 %v11481_v6  ;;  %v391_v61 = vld [vmem:[#allocation5 + $0x3e8] sm:$0xff]  ;;  %v398_v3 = vld [vmem:[#allocation5 + $0x420] sm:$0xff]  ;;  %v11543_v6 = vcombine.low %v386_v57, %v390_v59 }
  0x6e   :  { %6426 = vmatprep.subr.bf16.mxu0 %v11488_v7  ;;  %7010 = vmatprep.subr.bf16.mxu1 %v11490_v8  ;;  %v11546_v1 = vcombine.high %v387_v60, %v391_v61  ;;  %v395_v4 = vld [vmem:[#allocation5 + $0x408] sm:$0xff]  ;;  %v74_v7 = vld [vmem:[#allocation2] sm:$0xff]  ;;  %v11545_v9 = vcombine.low %v387_v60, %v391_v61  ;;  %v11552_v10 = vcombine.high %v394_v2, %v398_v3 }
  0x6f   :  { %v399_v5 = vld [vmem:[#allocation5 + $0x428] sm:$0xff]  ;;  %v90_v8 = vld [vmem:[#allocation2 + $0x80] sm:$0xff]  ;;  %v11551_v19 = vcombine.low %v394_v2, %v398_v3 }
  0x70   :  { %v11554_v11 = vcombine.high %v395_v4, %v399_v5  ;;  %v402_v12 = vld [vmem:[#allocation5 + $0x440] sm:$0xff]  ;;  %v107_v17 = vld [vmem:[#allocation2 + $0x108] sm:$0xff]  ;;  %v11553_v20 = vcombine.low %v395_v4, %v399_v5 }
  0x71   :  { %6427 = vmatpush1.bf16.msra.mxu0 %v11487_v13  ;;  %7011 = vmatpush1.bf16.msra.mxu1 %v11489_v14  ;;  %v406_v13 = vld [vmem:[#allocation5 + $0x460] sm:$0xff]  ;;  %v403_v14 = vld [vmem:[#allocation5 + $0x448] sm:$0xff] }
  0x72   :  { %6428 = vmatprep.subr.bf16.mxu0 %v11496_v15  ;;  %7012 = vmatprep.subr.bf16.mxu1 %v11498_v16  ;;  %v13999_v15 = vpack.c.bf16 %v90_v8, %v74_v7  ;;  %v407_v16 = vld [vmem:[#allocation5 + $0x468] sm:$0xff]  ;;  %v11559_v28 = vcombine.low %v402_v12, %v406_v13  ;;  %v418_v34 = vld [vmem:[#allocation5 + $0x4c0] sm:$0xff] }
  0x73   :  { %v123_v18 = vld [vmem:[#allocation2 + $0x188] sm:$0xff]  ;;  %v422_v35 = vld [vmem:[#allocation5 + $0x4e0] sm:$0xff] }
  0x74   :  { %v14001_v25 = vpack.c.bf16 %v123_v18, %v107_v17  ;;  %v411_v26 = vld [vmem:[#allocation5 + $0x488] sm:$0xff]  ;;  %v11576_v43 = vcombine.high %v418_v34, %v422_v35  ;;  %v11575_v50 = vcombine.low %v418_v34, %v422_v35  ;;  %v138_v51 = vld [vmem:[#allocation2 + $0x200] sm:$0xff] }
  0x75   :  { %6429 = vmatpush1.bf16.msra.mxu0 %v11495_v21  ;;  %7013 = vmatpush1.bf16.msra.mxu1 %v11497_v22  ;;  %v11560_v21 = vcombine.high %v402_v12, %v406_v13  ;;  %v11562_v22 = vcombine.high %v403_v14, %v407_v16  ;;  %v415_v27 = vld [vmem:[#allocation5 + $0x4a8] sm:$0xff]  ;;  %v154_v52 = vld [vmem:[#allocation2 + $0x280] sm:$0xff] }
  0x76   :  { %6430 = vmatprep.subr.bf16.mxu0 %v11504_v23  ;;  %7014 = vmatprep.subr.bf16.mxu1 %v11506_v24  ;;  %v410_v23 = vld [vmem:[#allocation5 + $0x480] sm:$0xff]  ;;  %v11570_v33 = vcombine.high %v411_v26, %v415_v27  ;;  %v419_v36 = vld [vmem:[#allocation5 + $0x4c8] sm:$0xff]  ;;  %v11569_v42 = vcombine.low %v411_v26, %v415_v27  ;;  %v14015_v61 = vpack.c.bf16 %v154_v52, %v138_v51 }
  0x77   :  { %v414_v24 = vld [vmem:[#allocation5 + $0x4a0] sm:$0xff]  ;;  %v431_v49 = vld [vmem:[#allocation5 + $0x528] sm:$0xff] }
  0x78   :  { %v11567_v41 = vcombine.low %v410_v23, %v414_v24  ;;  %v438_v57 = vld [vmem:[#allocation5 + $0x560] sm:$0xff]  ;;  %v435_v59 = vld [vmem:[#allocation5 + $0x548] sm:$0xff] }
  0x79   :  { %6431 = vmatpush1.bf16.msra.mxu0 %v11503_v29  ;;  %7015 = vmatpush1.bf16.msra.mxu1 %v11505_v30  ;;  %v106_v29 = vld [vmem:[#allocation2 + $0x100] sm:$0xff]  ;;  %v439_v60 = vld [vmem:[#allocation5 + $0x568] sm:$0xff] }
  0x7a   :  { %6432 = vmatprep.subr.bf16.mxu0 %v11512_v31  ;;  %7016 = vmatprep.subr.bf16.mxu1 %v11514_v32  ;;  %v122_v30 = vld [vmem:[#allocation2 + $0x180] sm:$0xff]  ;;  %v11561_v31 = vcombine.low %v403_v14, %v407_v16  ;;  %v11568_v32 = vcombine.high %v410_v23, %v414_v24  ;;  %v443_v5 = vld [vmem:[#allocation5 + $0x588] sm:$0xff]  ;;  %v11594_v7 = vcombine.high %v435_v59, %v439_v60 }
  0x7b   :  { %v446_v4 = vld [vmem:[#allocation5 + $0x5a0] sm:$0xff]  ;;  %v11593_v14 = vcombine.low %v435_v59, %v439_v60  ;;  %v451_v17 = vld [vmem:[#allocation5 + $0x5c8] sm:$0xff] }
  0x7c   :  { %v450_v12 = vld [vmem:[#allocation5 + $0x5c0] sm:$0xff]  ;;  %v455_v18 = vld [vmem:[#allocation5 + $0x5e8] sm:$0xff] }
  0x7d   :  { %6433 = vmatpush1.bf16.msra.mxu0 %v11511_v37  ;;  %7017 = vmatpush1.bf16.msra.mxu1 %v11513_v38  ;;  %v423_v37 = vld [vmem:[#allocation5 + $0x4e8] sm:$0xff]  ;;  %v14007_v38 = vpack.c.bf16 %v122_v30, %v106_v29  ;;  %v454_v13 = vld [vmem:[#allocation5 + $0x5e0] sm:$0xff]  ;;  %v11610_v30 = vcombine.high %v451_v17, %v455_v18  ;;  %v11609_v34 = vcombine.low %v451_v17, %v455_v18 }
  0x7e   :  { %6434 = vmatprep.subr.bf16.mxu0 %v11520_v39  ;;  %7018 = vmatprep.subr.bf16.mxu1 %v11522_v40  ;;  %v139_v39 = vld [vmem:[#allocation2 + $0x208] sm:$0xff]  ;;  %v11578_v44 = vcombine.high %v419_v36, %v423_v37  ;;  %v11608_v26 = vcombine.high %v450_v12, %v454_v13  ;;  %v458_v27 = vld [vmem:[#allocation5 + $0x600] sm:$0xff] }
  0x7f   :  { %v155_v40 = vld [vmem:[#allocation2 + $0x288] sm:$0xff] }
  0x80   :  { %v459_v29 = vld [vmem:[#allocation5 + $0x608] sm:$0xff] }
  0x81   :  { %6435 = vmatpush1.bf16.msra.mxu0 %v11519_v45  ;;  %7019 = vmatpush1.bf16.msra.mxu1 %v11521_v46  ;;  %v426_v45 = vld [vmem:[#allocation5 + $0x500] sm:$0xff]  ;;  %v487_v59 = vld [vmem:[#allocation5 + $0x6e8] sm:$0xff] }
  0x82   :  { %6436 = vmatprep.subr.bf16.mxu0 %v11528_v47  ;;  %7020 = vmatprep.subr.bf16.mxu1 %v11530_v48  ;;  %v430_v46 = vld [vmem:[#allocation5 + $0x520] sm:$0xff]  ;;  %v14009_v47 = vpack.c.bf16 %v155_v40, %v139_v39  ;;  %v427_v48 = vld [vmem:[#allocation5 + $0x508] sm:$0xff] }
  0x83   :  { %v11585_v2 = vcombine.low %v427_v48, %v431_v49  ;;  %v467_v39 = vld [vmem:[#allocation5 + $0x648] sm:$0xff] }
  0x85   :  { %6437 = vmatpush1.bf16.msra.mxu0 %v11527_v53  ;;  %7021 = vmatpush1.bf16.msra.mxu1 %v11529_v54  ;;  %v11577_v53 = vcombine.low %v419_v36, %v423_v37  ;;  %v11584_v54 = vcombine.high %v426_v45, %v430_v46  ;;  %v466_v36 = vld [vmem:[#allocation5 + $0x640] sm:$0xff] }
  0x86   :  { %6438 = vmatprep.subr.bf16.mxu0 %v11536_v55  ;;  %7022 = vmatprep.subr.bf16.mxu1 %v11538_v56  ;;  %v11586_v55 = vcombine.high %v427_v48, %v431_v49  ;;  %v434_v56 = vld [vmem:[#allocation5 + $0x540] sm:$0xff]  ;;  %v475_v48 = vld [vmem:[#allocation5 + $0x688] sm:$0xff] }
  0x87   :  { %v11592_v3 = vcombine.high %v434_v56, %v438_v57  ;;  %v470_v37 = vld [vmem:[#allocation5 + $0x660] sm:$0xff] }
  0x88   :  { %v11623_v51 = vcombine.low %v466_v36, %v470_v37 }
  0x89   :  { %6439 = vmatpush1.bf16.msra.mxu0 %v11535_v62  ;;  %7023 = vmatpush1.bf16.msra.mxu1 %v11537_v63  ;;  %v171_v62 = vld [vmem:[#allocation2 + $0x308] sm:$0xff] }
  0x8a   :  { %6440 = vmatprep.subr.bf16.mxu0 %v11544_v0  ;;  %7024 = vmatprep.subr.bf16.mxu1 %v11546_v1  ;;  %v187_v63 = vld [vmem:[#allocation2 + $0x388] sm:$0xff]  ;;  %v11583_v0 = vcombine.low %v426_v45, %v430_v46  ;;  %v442_v1 = vld [vmem:[#allocation5 + $0x580] sm:$0xff] }
  0x8b   :  { %v14017_v8 = vpack.c.bf16 %v187_v63, %v171_v62  ;;  %v11600_v16 = vcombine.high %v442_v1, %v446_v4  ;;  %v11599_v23 = vcombine.low %v442_v1, %v446_v4  ;;  %v474_v45 = vld [vmem:[#allocation5 + $0x680] sm:$0xff]  ;;  %v495_v4 = vld [vmem:[#allocation5 + $0x728] sm:$0xff] }
  0x8c   :  { %v478_v46 = vld [vmem:[#allocation5 + $0x6a0] sm:$0xff] }
  0x8d   :  { %6441 = vmatpush1.bf16.msra.mxu0 %v11543_v6  ;;  %7025 = vmatpush1.bf16.msra.mxu1 %v11545_v9  ;;  %v447_v6 = vld [vmem:[#allocation5 + $0x5a8] sm:$0xff]  ;;  %v170_v9 = vld [vmem:[#allocation2 + $0x300] sm:$0xff]  ;;  %v11631_v60 = vcombine.low %v474_v45, %v478_v46 }
  0x8e   :  { %6483 = vmatprep.subr.bf16.mxu0 %v11552_v10  ;;  %7067 = vmatprep.subr.bf16.mxu1 %v11554_v11  ;;  %v186_v10 = vld [vmem:[#allocation2 + $0x380] sm:$0xff]  ;;  %v11591_v11 = vcombine.low %v434_v56, %v438_v57  ;;  %v11601_v24 = vcombine.low %v443_v5, %v447_v6  ;;  %v483_v56 = vld [vmem:[#allocation5 + $0x6c8] sm:$0xff] }
  0x8f   :  { %v490_v1 = vld [vmem:[#allocation5 + $0x700] sm:$0xff] }
  0x90   :  { %6443 = vmatmul.mubr.bf16.vlgmr.msra.gmra.mrb[0].mxu0 %v13999_v15  ;;  %7027 = vmatmul.mubr.bf16.vlgmr.msra.gmra.mrb[0].mxu1 %v13999_v15 }
  0x91   :  { %6484 = vmatpush1.bf16.msra.mxu0 %v11551_v19  ;;  %7068 = vmatpush1.bf16.msra.mxu1 %v11553_v20  ;;  %v77_v19 = vld [vmem:[#allocation2 + $0x18] sm:$0xff]  ;;  %v11602_v20 = vcombine.high %v443_v5, %v447_v6  ;;  %v11641_v6 = vcombine.low %v483_v56, %v487_v59 }
  0x92   :  { %6485 = vmatprep.subr.bf16.mxu0 %v11560_v21  ;;  %7069 = vmatprep.subr.bf16.mxu1 %v11562_v22  ;;  %v93_v21 = vld [vmem:[#allocation2 + $0x98] sm:$0xff]  ;;  %v14023_v22 = vpack.c.bf16 %v186_v10, %v170_v9  ;;  %v498_v9 = vld [vmem:[#allocation5 + $0x740] sm:$0xff] }
  0x93   :  { %6452 = vmatprep.mubr.bf16.mxu0 %v14001_v25  ;;  %7036 = vmatprep.mubr.bf16.mxu1 %v14001_v25  ;;  %v502_v10 = vld [vmem:[#allocation5 + $0x760] sm:$0xff] }
  0x94   :  { %v11656_v17 = vcombine.high %v498_v9, %v502_v10 }
  0x95   :  { %6486 = vmatpush1.bf16.msra.mxu0 %v11559_v28  ;;  %7070 = vmatpush1.bf16.msra.mxu1 %v11561_v31  ;;  %v462_v28 = vld [vmem:[#allocation5 + $0x620] sm:$0xff]  ;;  %v463_v31 = vld [vmem:[#allocation5 + $0x628] sm:$0xff] }
  0x96   :  { %6487 = vmatprep.subr.bf16.mxu0 %v11568_v32  ;;  %7071 = vmatprep.subr.bf16.mxu1 %v11570_v33  ;;  %v14025_v32 = vpack.c.bf16 %v93_v21, %v77_v19  ;;  %v11607_v33 = vcombine.low %v450_v12, %v454_v13  ;;  %v11616_v35 = vcombine.high %v458_v27, %v462_v28  ;;  %v503_v13 = vld [vmem:[#allocation5 + $0x768] sm:$0xff]  ;;  %v506_v19 = vld [vmem:[#allocation5 + $0x780] sm:$0xff] }
  0x97   :  { %v11618_v40 = vcombine.high %v459_v29, %v463_v31  ;;  %v507_v21 = vld [vmem:[#allocation5 + $0x788] sm:$0xff] }
  0x98   :  { %6453 = vmatmul.mubr.bf16.gmra.mrb[4].mxu0 %v14007_v38  ;;  %7037 = vmatmul.mubr.bf16.gmra.mrb[4].mxu1 %v14007_v38 }
  0x99   :  { %6488 = vmatpush1.bf16.msra.mxu0 %v11567_v41  ;;  %7072 = vmatpush1.bf16.msra.mxu1 %v11569_v42  ;;  %v471_v41 = vld [vmem:[#allocation5 + $0x668] sm:$0xff]  ;;  %v11615_v42 = vcombine.low %v458_v27, %v462_v28  ;;  %v514_v28 = vld [vmem:[#allocation5 + $0x7c0] sm:$0xff] }
  0x9a   :  { %6489 = vmatprep.subr.bf16.mxu0 %v11576_v43  ;;  %7073 = vmatprep.subr.bf16.mxu1 %v11578_v44  ;;  %v11617_v43 = vcombine.low %v459_v29, %v463_v31  ;;  %v11624_v44 = vcombine.high %v466_v36, %v470_v37  ;;  %v11626_v49 = vcombine.high %v467_v39, %v471_v41  ;;  %v518_v29 = vld [vmem:[#allocation5 + $0x7e0] sm:$0xff] }
  0x9b   :  { %6462 = vmatprep.mubr.bf16.mxu0 %v14009_v47  ;;  %7046 = vmatprep.mubr.bf16.mxu1 %v14009_v47  ;;  %v11625_v52 = vcombine.low %v467_v39, %v471_v41  ;;  %v11672_v36 = vcombine.high %v514_v28, %v518_v29  ;;  %v522_v37 = vld [vmem:[#allocation5 + $0x800] sm:$0xff]  ;;  %v523_v41 = vld [vmem:[#allocation5 + $0x808] sm:$0xff] }
  0x9d   :  { %6490 = vmatpush1.bf16.msra.mxu0 %v11575_v50  ;;  %7074 = vmatpush1.bf16.msra.mxu1 %v11577_v53  ;;  %v479_v50 = vld [vmem:[#allocation5 + $0x6a8] sm:$0xff]  ;;  %v11632_v53 = vcombine.high %v474_v45, %v478_v46  ;;  %v11671_v45 = vcombine.low %v514_v28, %v518_v29  ;;  %v530_v46 = vld [vmem:[#allocation5 + $0x840] sm:$0xff] }
  0x9e   :  { %6491 = vmatprep.subr.bf16.mxu0 %v11584_v54  ;;  %7075 = vmatprep.subr.bf16.mxu1 %v11586_v55  ;;  %v482_v54 = vld [vmem:[#allocation5 + $0x6c0] sm:$0xff]  ;;  %v11634_v57 = vcombine.high %v475_v48, %v479_v50  ;;  %v11633_v62 = vcombine.low %v475_v48, %v479_v50 }
  0x9f   :  { %v486_v55 = vld [vmem:[#allocation5 + $0x6e0] sm:$0xff] }
  0xa0   :  { %6463 = vmatmul.mubr.bf16.gmra.mrb[8].mxu0 %v14015_v61  ;;  %7047 = vmatmul.mubr.bf16.gmra.mrb[8].mxu1 %v14015_v61  ;;  %v11640_v63 = vcombine.high %v482_v54, %v486_v55  ;;  %v11639_v5 = vcombine.low %v482_v54, %v486_v55  ;;  %v534_v48 = vld [vmem:[#allocation5 + $0x860] sm:$0xff]  ;;  %v125_v55 = vld [vmem:[#allocation2 + $0x198] sm:$0xff] }
  0xa1   :  { %6492 = vmatpush1.bf16.msra.mxu0 %v11583_v0  ;;  %7076 = vmatpush1.bf16.msra.mxu1 %v11585_v2  ;;  %v11642_v0 = vcombine.high %v483_v56, %v487_v59  ;;  %v494_v2 = vld [vmem:[#allocation5 + $0x720] sm:$0xff] }
  0xa2   :  { %6493 = vmatprep.subr.bf16.mxu0 %v11592_v3  ;;  %7077 = vmatprep.subr.bf16.mxu1 %v11594_v7  ;;  %v491_v3 = vld [vmem:[#allocation5 + $0x708] sm:$0xff]  ;;  %v11648_v7 = vcombine.high %v490_v1, %v494_v2 }
  0xa3   :  { %6472 = vmatprep.mubr.bf16.mxu0 %v14017_v8  ;;  %7056 = vmatprep.mubr.bf16.mxu1 %v14017_v8  ;;  %v11650_v12 = vcombine.high %v491_v3, %v495_v4 }
  0xa5   :  { %6494 = vmatpush1.bf16.msra.mxu0 %v11591_v11  ;;  %7078 = vmatpush1.bf16.msra.mxu1 %v11593_v14  ;;  %v499_v11 = vld [vmem:[#allocation5 + $0x748] sm:$0xff]  ;;  %v11647_v14 = vcombine.low %v490_v1, %v494_v2 }
  0xa6   :  { %6495 = vmatprep.subr.bf16.mxu0 %v11600_v16  ;;  %7079 = vmatprep.subr.bf16.mxu1 %v11602_v20  ;;  %v11649_v16 = vcombine.low %v491_v3, %v495_v4  ;;  %v11658_v18 = vcombine.high %v499_v11, %v503_v13  ;;  %v510_v20 = vld [vmem:[#allocation5 + $0x7a0] sm:$0xff]  ;;  %v539_v1 = vld [vmem:[#allocation5 + $0x888] sm:$0xff]  ;;  %v108_v4 = vld [vmem:[#allocation2 + $0x110] sm:$0xff] }
  0xa7   :  { %v11664_v27 = vcombine.high %v506_v19, %v510_v20  ;;  %v543_v2 = vld [vmem:[#allocation5 + $0x8a8] sm:$0xff] }
  0xa8   :  { %6473 = vmatmul.mubr.bf16.gmra.mrb[12].mxu0 %v14023_v22  ;;  %7057 = vmatmul.mubr.bf16.gmra.mrb[12].mxu1 %v14023_v22 }
  0xa9   :  { %6496 = vmatpush1.bf16.msra.mxu0 %v11599_v23  ;;  %7080 = vmatpush1.bf16.msra.mxu1 %v11601_v24  ;;  %v511_v23 = vld [vmem:[#allocation5 + $0x7a8] sm:$0xff]  ;;  %v11655_v24 = vcombine.low %v498_v9, %v502_v10  ;;  %v550_v9 = vld [vmem:[#allocation5 + $0x8e0] sm:$0xff] }
  0xaa   :  { %6497 = vmatprep.subr.bf16.mxu0 %v11608_v26  ;;  %7081 = vmatprep.subr.bf16.mxu1 %v11610_v30  ;;  %v11657_v26 = vcombine.low %v499_v11, %v503_v13  ;;  %v515_v30 = vld [vmem:[#allocation5 + $0x7c8] sm:$0xff]  ;;  %v11666_v31 = vcombine.high %v507_v21, %v511_v23 }
  0xab   :  { %6515 = vmatprep.mubr.bf16.mxu0 %v14025_v32  ;;  %7099 = vmatprep.mubr.bf16.mxu1 %v14025_v32  ;;  %v551_v13 = vld [vmem:[#allocation5 + $0x8e8] sm:$0xff] }
  0xad   :  { %6498 = vmatpush1.bf16.msra.mxu0 %v11607_v33  ;;  %7082 = vmatpush1.bf16.msra.mxu1 %v11609_v34  ;;  %v519_v33 = vld [vmem:[#allocation5 + $0x7e8] sm:$0xff]  ;;  %v11663_v34 = vcombine.low %v506_v19, %v510_v20  ;;  %v554_v20 = vld [vmem:[#allocation5 + $0x900] sm:$0xff] }
  0xae   :  { %6499 = vmatprep.subr.bf16.mxu0 %v11616_v35  ;;  %7083 = vmatprep.subr.bf16.mxu1 %v11618_v40  ;;  %v11665_v35 = vcombine.low %v507_v21, %v511_v23  ;;  %v11674_v39 = vcombine.high %v515_v30, %v519_v33  ;;  %v526_v40 = vld [vmem:[#allocation5 + $0x820] sm:$0xff]  ;;  %v11697_v21 = vcombine.low %v539_v1, %v543_v2 }
  0xaf   :  { %v11680_v50 = vcombine.high %v522_v37, %v526_v40 }
  0xb1   :  { %6500 = vmatpush1.bf16.msra.mxu0 %v11615_v42  ;;  %7084 = vmatpush1.bf16.msra.mxu1 %v11617_v43  ;;  %v527_v42 = vld [vmem:[#allocation5 + $0x828] sm:$0xff]  ;;  %v76_v43 = vld [vmem:[#allocation2 + $0x10] sm:$0xff] }
  0xb2   :  { %6501 = vmatprep.subr.bf16.mxu0 %v11624_v44  ;;  %7085 = vmatprep.subr.bf16.mxu1 %v11626_v49  ;;  %v92_v44 = vld [vmem:[#allocation2 + $0x90] sm:$0xff]  ;;  %v11673_v49 = vcombine.low %v515_v30, %v519_v33  ;;  %v11682_v54 = vcombine.high %v523_v41, %v527_v42  ;;  %v11681_v59 = vcombine.low %v523_v41, %v527_v42  ;;  %v173_v41 = vld [vmem:[#allocation2 + $0x318] sm:$0xff] }
  0xb3   :  { %v14031_v56 = vpack.c.bf16 %v92_v44, %v76_v43  ;;  %v140_v30 = vld [vmem:[#allocation2 + $0x210] sm:$0xff]  ;;  %v189_v43 = vld [vmem:[#allocation2 + $0x398] sm:$0xff] }
  0xb5   :  { %6502 = vmatpush1.bf16.msra.mxu0 %v11623_v51  ;;  %7086 = vmatpush1.bf16.msra.mxu1 %v11625_v52  ;;  %v531_v51 = vld [vmem:[#allocation5 + $0x848] sm:$0xff] }
  0xb6   :  { %6503 = vmatprep.subr.bf16.mxu0 %v11632_v53  ;;  %7087 = vmatprep.subr.bf16.mxu1 %v11634_v57  ;;  %v535_v52 = vld [vmem:[#allocation5 + $0x868] sm:$0xff]  ;;  %v109_v53 = vld [vmem:[#allocation2 + $0x118] sm:$0xff]  ;;  %v11679_v57 = vcombine.low %v522_v37, %v526_v40 }
  0xb7   :  { %v14033_v3 = vpack.c.bf16 %v125_v55, %v109_v53  ;;  %v11689_v10 = vcombine.low %v531_v51, %v535_v52  ;;  %v567_v40 = vld [vmem:[#allocation5 + $0x968] sm:$0xff]  ;;  %v172_v55 = vld [vmem:[#allocation2 + $0x310] sm:$0xff] }
  0xb9   :  { %6504 = vmatpush1.bf16.msra.mxu0 %v11631_v60  ;;  %7088 = vmatpush1.bf16.msra.mxu1 %v11633_v62  ;;  %v11688_v60 = vcombine.high %v530_v46, %v534_v48  ;;  %v538_v62 = vld [vmem:[#allocation5 + $0x880] sm:$0xff] }
  0xba   :  { %6505 = vmatprep.subr.bf16.mxu0 %v11640_v63  ;;  %7089 = vmatprep.subr.bf16.mxu1 %v11642_v0  ;;  %v11690_v63 = vcombine.high %v531_v51, %v535_v52  ;;  %v542_v0 = vld [vmem:[#allocation5 + $0x8a0] sm:$0xff]  ;;  %v571_v51 = vld [vmem:[#allocation5 + $0x988] sm:$0xff] }
  0xbb   :  { %v11696_v11 = vcombine.high %v538_v62, %v542_v0  ;;  %v11695_v19 = vcombine.low %v538_v62, %v542_v0  ;;  %v575_v52 = vld [vmem:[#allocation5 + $0x9a8] sm:$0xff]  ;;  %v582_v62 = vld [vmem:[#allocation5 + $0x9e0] sm:$0xff] }
  0xbd   :  { %6506 = vmatpush1.bf16.msra.mxu0 %v11639_v5  ;;  %7090 = vmatpush1.bf16.msra.mxu1 %v11641_v6  ;;  %v124_v5 = vld [vmem:[#allocation2 + $0x190] sm:$0xff]  ;;  %v11687_v6 = vcombine.low %v530_v46, %v534_v48  ;;  %v570_v46 = vld [vmem:[#allocation5 + $0x980] sm:$0xff] }
  0xbe   :  { %6507 = vmatprep.subr.bf16.mxu0 %v11648_v7  ;;  %7091 = vmatprep.subr.bf16.mxu1 %v11650_v12  ;;  %v546_v7 = vld [vmem:[#allocation5 + $0x8c0] sm:$0xff]  ;;  %v547_v12 = vld [vmem:[#allocation5 + $0x8c8] sm:$0xff] }
  0xbf   :  { %v11704_v23 = vcombine.high %v546_v7, %v550_v9  ;;  %v11706_v28 = vcombine.high %v547_v12, %v551_v13  ;;  %v11703_v33 = vcombine.low %v546_v7, %v550_v9 }
  0xc1   :  { %6508 = vmatpush1.bf16.msra.mxu0 %v11647_v14  ;;  %7092 = vmatpush1.bf16.msra.mxu1 %v11649_v16  ;;  %v141_v14 = vld [vmem:[#allocation2 + $0x218] sm:$0xff]  ;;  %v11698_v16 = vcombine.high %v539_v1, %v543_v2  ;;  %v579_v1 = vld [vmem:[#allocation5 + $0x9c8] sm:$0xff] }
  0xc2   :  { %6509 = vmatprep.subr.bf16.mxu0 %v11656_v17  ;;  %7093 = vmatprep.subr.bf16.mxu1 %v11658_v18  ;;  %v157_v17 = vld [vmem:[#allocation2 + $0x298] sm:$0xff]  ;;  %v14039_v18 = vpack.c.bf16 %v124_v5, %v108_v4  ;;  %v583_v2 = vld [vmem:[#allocation5 + $0x9e8] sm:$0xff]  ;;  %v11730_v5 = vcombine.high %v571_v51, %v575_v52 }
  0xc3   :  { %v14041_v29 = vpack.c.bf16 %v157_v17, %v141_v14  ;;  %v79_v4 = vld [vmem:[#allocation2 + $0x28] sm:$0xff] }
  0xc4   :  { %v587_v14 = vld [vmem:[#allocation5 + $0xa08] sm:$0xff] }
  0xc5   :  { %6510 = vmatpush1.bf16.msra.mxu0 %v11655_v24  ;;  %7094 = vmatpush1.bf16.msra.mxu1 %v11657_v26  ;;  %v558_v24 = vld [vmem:[#allocation5 + $0x920] sm:$0xff]  ;;  %v555_v26 = vld [vmem:[#allocation5 + $0x908] sm:$0xff] }
  0xc6   :  { %6511 = vmatprep.subr.bf16.mxu0 %v11664_v27  ;;  %7095 = vmatprep.subr.bf16.mxu1 %v11666_v31  ;;  %v559_v27 = vld [vmem:[#allocation5 + $0x928] sm:$0xff]  ;;  %v156_v31 = vld [vmem:[#allocation2 + $0x290] sm:$0xff]  ;;  %v11712_v37 = vcombine.high %v554_v20, %v558_v24 }
  0xc7   :  { %v11714_v42 = vcombine.high %v555_v26, %v559_v27  ;;  %v14047_v44 = vpack.c.bf16 %v156_v31, %v140_v30  ;;  %v11713_v48 = vcombine.low %v555_v26, %v559_v27  ;;  %v591_v17 = vld [vmem:[#allocation5 + $0xa28] sm:$0xff]  ;;  %v598_v26 = vld [vmem:[#allocation5 + $0xa60] sm:$0xff] }
  0xc8   :  { %v595_v27 = vld [vmem:[#allocation5 + $0xa48] sm:$0xff] }
  0xc9   :  { %6512 = vmatpush1.bf16.msra.mxu0 %v11663_v34  ;;  %7096 = vmatpush1.bf16.msra.mxu1 %v11665_v35  ;;  %v562_v34 = vld [vmem:[#allocation5 + $0x940] sm:$0xff]  ;;  %v599_v30 = vld [vmem:[#allocation5 + $0xa68] sm:$0xff] }
  0xca   :  { %6513 = vmatprep.subr.bf16.mxu0 %v11672_v36  ;;  %7097 = vmatprep.subr.bf16.mxu1 %v11674_v39  ;;  %v566_v35 = vld [vmem:[#allocation5 + $0x960] sm:$0xff]  ;;  %v11705_v36 = vcombine.low %v547_v12, %v551_v13  ;;  %v563_v39 = vld [vmem:[#allocation5 + $0x948] sm:$0xff] }
  0xcb   :  { %v11722_v53 = vcombine.high %v563_v39, %v567_v40  ;;  %v586_v12 = vld [vmem:[#allocation5 + $0xa00] sm:$0xff] }
  0xcc   :  { %v590_v13 = vld [vmem:[#allocation5 + $0xa20] sm:$0xff] }
  0xcd   :  { %6514 = vmatpush1.bf16.msra.mxu0 %v11671_v45  ;;  %7098 = vmatpush1.bf16.msra.mxu1 %v11673_v49  ;;  %v11711_v45 = vcombine.low %v554_v20, %v558_v24  ;;  %v11720_v49 = vcombine.high %v562_v34, %v566_v35  ;;  %v594_v24 = vld [vmem:[#allocation5 + $0xa40] sm:$0xff]  ;;  %v11743_v31 = vcombine.low %v586_v12, %v590_v13 }
  0xce   :  { %6556 = vmatprep.subr.bf16.mxu0 %v11680_v50  ;;  %7140 = vmatprep.subr.bf16.mxu1 %v11682_v54  ;;  %v574_v50 = vld [vmem:[#allocation5 + $0x9a0] sm:$0xff]  ;;  %v14049_v54 = vpack.c.bf16 %v189_v43, %v173_v41  ;;  %v11751_v41 = vcombine.low %v594_v24, %v598_v26 }
  0xcf   :  { %v11728_v0 = vcombine.high %v570_v46, %v574_v50  ;;  %v11727_v9 = vcombine.low %v570_v46, %v574_v50  ;;  %v614_v46 = vld [vmem:[#allocation5 + $0xae0] sm:$0xff]  ;;  %v615_v50 = vld [vmem:[#allocation5 + $0xae8] sm:$0xff] }
  0xd0   :  { %6516 = vmatmul.mubr.bf16.vlgmr.msra.gmra.mrb[0].mxu0 %v14031_v56  ;;  %7100 = vmatmul.mubr.bf16.vlgmr.msra.gmra.mrb[0].mxu1 %v14031_v56 }
  0xd1   :  { %6557 = vmatpush1.bf16.msra.mxu0 %v11679_v57  ;;  %7141 = vmatpush1.bf16.msra.mxu1 %v11681_v59  ;;  %v188_v57 = vld [vmem:[#allocation2 + $0x390] sm:$0xff]  ;;  %v11719_v59 = vcombine.low %v562_v34, %v566_v35  ;;  %v11752_v34 = vcombine.high %v594_v24, %v598_v26  ;;  %v602_v35 = vld [vmem:[#allocation5 + $0xa80] sm:$0xff] }
  0xd2   :  { %6558 = vmatprep.subr.bf16.mxu0 %v11688_v60  ;;  %7142 = vmatprep.subr.bf16.mxu1 %v11690_v63  ;;  %v578_v60 = vld [vmem:[#allocation5 + $0x9c0] sm:$0xff]  ;;  %v11721_v63 = vcombine.low %v563_v39, %v567_v40  ;;  %v14055_v7 = vpack.c.bf16 %v188_v57, %v172_v55  ;;  %v11754_v39 = vcombine.high %v595_v27, %v599_v30  ;;  %v607_v40 = vld [vmem:[#allocation5 + $0xaa8] sm:$0xff] }
  0xd3   :  { %6525 = vmatprep.mubr.bf16.mxu0 %v14033_v3  ;;  %7109 = vmatprep.mubr.bf16.mxu1 %v14033_v3  ;;  %v11735_v20 = vcombine.low %v578_v60, %v582_v62  ;;  %v618_v57 = vld [vmem:[#allocation5 + $0xb00] sm:$0xff] }
  0xd4   :  { %v642_v26 = vld [vmem:[#allocation5 + $0xbc0] sm:$0xff] }
  0xd5   :  { %6559 = vmatpush1.bf16.msra.mxu0 %v11687_v6  ;;  %7143 = vmatpush1.bf16.msra.mxu1 %v11689_v10  ;;  %v95_v6 = vld [vmem:[#allocation2 + $0xa8] sm:$0xff]  ;;  %v11729_v10 = vcombine.low %v571_v51, %v575_v52 }
  0xd6   :  { %6560 = vmatprep.subr.bf16.mxu0 %v11696_v11  ;;  %7144 = vmatprep.subr.bf16.mxu1 %v11698_v16  ;;  %v11736_v11 = vcombine.high %v578_v60, %v582_v62  ;;  %v11738_v16 = vcombine.high %v579_v1, %v583_v2  ;;  %v619_v60 = vld [vmem:[#allocation5 + $0xb08] sm:$0xff] }
  0xd7   :  { %v623_v62 = vld [vmem:[#allocation5 + $0xb28] sm:$0xff] }
  0xd8   :  { %6526 = vmatmul.mubr.bf16.gmra.mrb[4].mxu0 %v14039_v18  ;;  %7110 = vmatmul.mubr.bf16.gmra.mrb[4].mxu1 %v14039_v18 }
  0xd9   :  { %6561 = vmatpush1.bf16.msra.mxu0 %v11695_v19  ;;  %7145 = vmatpush1.bf16.msra.mxu1 %v11697_v21  ;;  %v14057_v19 = vpack.c.bf16 %v95_v6, %v79_v4  ;;  %v11737_v21 = vcombine.low %v579_v1, %v583_v2  ;;  %v626_v2 = vld [vmem:[#allocation5 + $0xb40] sm:$0xff]  ;;  %v11778_v6 = vcombine.high %v619_v60, %v623_v62 }
  0xda   :  { %6562 = vmatprep.subr.bf16.mxu0 %v11704_v23  ;;  %7146 = vmatprep.subr.bf16.mxu1 %v11706_v28  ;;  %v11744_v23 = vcombine.high %v586_v12, %v590_v13  ;;  %v11746_v28 = vcombine.high %v587_v14, %v591_v17  ;;  %v630_v4 = vld [vmem:[#allocation5 + $0xb60] sm:$0xff] }
  0xdb   :  { %6535 = vmatprep.mubr.bf16.mxu0 %v14041_v29  ;;  %7119 = vmatprep.mubr.bf16.mxu1 %v14041_v29  ;;  %v11784_v12 = vcombine.high %v626_v2, %v630_v4 }
  0xdd   :  { %6563 = vmatpush1.bf16.msra.mxu0 %v11703_v33  ;;  %7147 = vmatpush1.bf16.msra.mxu1 %v11705_v36  ;;  %v11745_v33 = vcombine.low %v587_v14, %v591_v17  ;;  %v606_v36 = vld [vmem:[#allocation5 + $0xaa0] sm:$0xff]  ;;  %v635_v17 = vld [vmem:[#allocation5 + $0xb88] sm:$0xff] }
  0xde   :  { %6564 = vmatprep.subr.bf16.mxu0 %v11712_v37  ;;  %7148 = vmatprep.subr.bf16.mxu1 %v11714_v42  ;;  %v603_v37 = vld [vmem:[#allocation5 + $0xa88] sm:$0xff]  ;;  %v11753_v42 = vcombine.low %v595_v27, %v599_v30  ;;  %v11760_v43 = vcombine.high %v602_v35, %v606_v36  ;;  %v11759_v51 = vcombine.low %v602_v35, %v606_v36  ;;  %v634_v14 = vld [vmem:[#allocation5 + $0xb80] sm:$0xff] }
  0xdf   :  { %v11761_v52 = vcombine.low %v603_v37, %v607_v40  ;;  %v646_v27 = vld [vmem:[#allocation5 + $0xbe0] sm:$0xff] }
  0xe0   :  { %6536 = vmatmul.mubr.bf16.gmra.mrb[8].mxu0 %v14047_v44  ;;  %7120 = vmatmul.mubr.bf16.gmra.mrb[8].mxu1 %v14047_v44  ;;  %v11800_v35 = vcombine.high %v642_v26, %v646_v27  ;;  %v650_v36 = vld [vmem:[#allocation5 + $0xc00] sm:$0xff] }
  0xe1   :  { %6565 = vmatpush1.bf16.msra.mxu0 %v11711_v45  ;;  %7149 = vmatpush1.bf16.msra.mxu1 %v11713_v48  ;;  %v610_v45 = vld [vmem:[#allocation5 + $0xac0] sm:$0xff]  ;;  %v611_v48 = vld [vmem:[#allocation5 + $0xac8] sm:$0xff] }
  0xe2   :  { %6566 = vmatprep.subr.bf16.mxu0 %v11720_v49  ;;  %7150 = vmatprep.subr.bf16.mxu1 %v11722_v53  ;;  %v11762_v49 = vcombine.high %v603_v37, %v607_v40  ;;  %v11768_v53 = vcombine.high %v610_v45, %v614_v46  ;;  %v11770_v55 = vcombine.high %v611_v48, %v615_v50  ;;  %v651_v40 = vld [vmem:[#allocation5 + $0xc08] sm:$0xff] }
  0xe3   :  { %6545 = vmatprep.mubr.bf16.mxu0 %v14049_v54  ;;  %7129 = vmatprep.mubr.bf16.mxu1 %v14049_v54 }
  0xe5   :  { %6567 = vmatpush1.bf16.msra.mxu0 %v11719_v59  ;;  %7151 = vmatpush1.bf16.msra.mxu1 %v11721_v63  ;;  %v622_v59 = vld [vmem:[#allocation5 + $0xb20] sm:$0xff]  ;;  %v11767_v63 = vcombine.low %v610_v45, %v614_v46  ;;  %v11799_v45 = vcombine.low %v642_v26, %v646_v27 }
  0xe6   :  { %6568 = vmatprep.subr.bf16.mxu0 %v11728_v0  ;;  %7152 = vmatprep.subr.bf16.mxu1 %v11730_v5  ;;  %v11769_v0 = vcombine.low %v611_v48, %v615_v50  ;;  %v11776_v1 = vcombine.high %v618_v57, %v622_v59  ;;  %v627_v5 = vld [vmem:[#allocation5 + $0xb48] sm:$0xff]  ;;  %v658_v46 = vld [vmem:[#allocation5 + $0xc40] sm:$0xff] }
  0xe7   :  { %v662_v48 = vld [vmem:[#allocation5 + $0xc60] sm:$0xff] }
  0xe8   :  { %6546 = vmatmul.mubr.bf16.gmra.mrb[12].mxu0 %v14055_v7  ;;  %7130 = vmatmul.mubr.bf16.gmra.mrb[12].mxu1 %v14055_v7 }
  0xe9   :  { %6569 = vmatpush1.bf16.msra.mxu0 %v11727_v9  ;;  %7153 = vmatpush1.bf16.msra.mxu1 %v11729_v10  ;;  %v631_v9 = vld [vmem:[#allocation5 + $0xb68] sm:$0xff]  ;;  %v11775_v10 = vcombine.low %v618_v57, %v622_v59 }
  0xea   :  { %6570 = vmatprep.subr.bf16.mxu0 %v11736_v11  ;;  %7154 = vmatprep.subr.bf16.mxu1 %v11738_v16  ;;  %v11777_v11 = vcombine.low %v619_v60, %v623_v62  ;;  %v11786_v13 = vcombine.high %v627_v5, %v631_v9  ;;  %v638_v16 = vld [vmem:[#allocation5 + $0xba0] sm:$0xff]  ;;  %v127_v57 = vld [vmem:[#allocation2 + $0x1a8] sm:$0xff] }
  0xeb   :  { %6588 = vmatprep.mubr.bf16.mxu0 %v14057_v19  ;;  %7172 = vmatprep.mubr.bf16.mxu1 %v14057_v19  ;;  %v11792_v24 = vcombine.high %v634_v14, %v638_v16 }
  0xed   :  { %6571 = vmatpush1.bf16.msra.mxu0 %v11735_v20  ;;  %7155 = vmatpush1.bf16.msra.mxu1 %v11737_v21  ;;  %v639_v20 = vld [vmem:[#allocation5 + $0xba8] sm:$0xff]  ;;  %v11783_v21 = vcombine.low %v626_v2, %v630_v4  ;;  %v670_v2 = vld [vmem:[#allocation5 + $0xca0] sm:$0xff] }
  0xee   :  { %6572 = vmatprep.subr.bf16.mxu0 %v11744_v23  ;;  %7156 = vmatprep.subr.bf16.mxu1 %v11746_v28  ;;  %v11785_v23 = vcombine.low %v627_v5, %v631_v9  ;;  %v643_v28 = vld [vmem:[#allocation5 + $0xbc8] sm:$0xff]  ;;  %v11794_v30 = vcombine.high %v635_v17, %v639_v20  ;;  %v110_v9 = vld [vmem:[#allocation2 + $0x120] sm:$0xff] }
  0xef   :  { %v667_v4 = vld [vmem:[#allocation5 + $0xc88] sm:$0xff] }
  0xf0   :  { %v671_v5 = vld [vmem:[#allocation5 + $0xca8] sm:$0xff] }
  0xf1   :  { %6573 = vmatpush1.bf16.msra.mxu0 %v11743_v31  ;;  %7157 = vmatpush1.bf16.msra.mxu1 %v11745_v33  ;;  %v647_v31 = vld [vmem:[#allocation5 + $0xbe8] sm:$0xff]  ;;  %v11791_v33 = vcombine.low %v634_v14, %v638_v16 }
  0xf2   :  { %6574 = vmatprep.subr.bf16.mxu0 %v11752_v34  ;;  %7158 = vmatprep.subr.bf16.mxu1 %v11754_v39  ;;  %v11793_v34 = vcombine.low %v635_v17, %v639_v20  ;;  %v11802_v37 = vcombine.high %v643_v28, %v647_v31  ;;  %v654_v39 = vld [vmem:[#allocation5 + $0xc20] sm:$0xff]  ;;  %v675_v17 = vld [vmem:[#allocation5 + $0xcc8] sm:$0xff] }
  0xf3   :  { %v11808_v50 = vcombine.high %v650_v36, %v654_v39  ;;  %v11807_v60 = vcombine.low %v650_v36, %v654_v39  ;;  %v679_v20 = vld [vmem:[#allocation5 + $0xce8] sm:$0xff]  ;;  %v142_v39 = vld [vmem:[#allocation2 + $0x220] sm:$0xff] }
  0xf4   :  { %v11834_v36 = vcombine.high %v675_v17, %v679_v20 }
  0xf5   :  { %6575 = vmatpush1.bf16.msra.mxu0 %v11751_v41  ;;  %7159 = vmatpush1.bf16.msra.mxu1 %v11753_v42  ;;  %v655_v41 = vld [vmem:[#allocation5 + $0xc28] sm:$0xff]  ;;  %v78_v42 = vld [vmem:[#allocation2 + $0x20] sm:$0xff] }
  0xf6   :  { %6576 = vmatprep.subr.bf16.mxu0 %v11760_v43  ;;  %7160 = vmatprep.subr.bf16.mxu1 %v11762_v49  ;;  %v94_v43 = vld [vmem:[#allocation2 + $0xa0] sm:$0xff]  ;;  %v11801_v49 = vcombine.low %v643_v28, %v647_v31  ;;  %v11809_v62 = vcombine.low %v651_v40, %v655_v41 }
  0xf7   :  { %v14063_v59 = vpack.c.bf16 %v94_v43, %v78_v42  ;;  %v682_v28 = vld [vmem:[#allocation5 + $0xd00] sm:$0xff] }
  0xf8   :  { %v690_v42 = vld [vmem:[#allocation5 + $0xd40] sm:$0xff] }
  0xf9   :  { %6577 = vmatpush1.bf16.msra.mxu0 %v11759_v51  ;;  %7161 = vmatpush1.bf16.msra.mxu1 %v11761_v52  ;;  %v659_v51 = vld [vmem:[#allocation5 + $0xc48] sm:$0xff]  ;;  %v694_v43 = vld [vmem:[#allocation5 + $0xd60] sm:$0xff] }
  0xfa   :  { %6578 = vmatprep.subr.bf16.mxu0 %v11768_v53  ;;  %7162 = vmatprep.subr.bf16.mxu1 %v11770_v55  ;;  %v663_v52 = vld [vmem:[#allocation5 + $0xc68] sm:$0xff]  ;;  %v11810_v55 = vcombine.high %v651_v40, %v655_v41  ;;  %v158_v40 = vld [vmem:[#allocation2 + $0x2a0] sm:$0xff] }
  0xfb   :  { %v111_v53 = vld [vmem:[#allocation2 + $0x128] sm:$0xff]  ;;  %v11817_v14 = vcombine.low %v659_v51, %v663_v52 }
  0xfd   :  { %6579 = vmatpush1.bf16.msra.mxu0 %v11767_v63  ;;  %7163 = vmatpush1.bf16.msra.mxu1 %v11769_v0  ;;  %v11816_v63 = vcombine.high %v658_v46, %v662_v48  ;;  %v666_v0 = vld [vmem:[#allocation5 + $0xc80] sm:$0xff] }
  0xfe   :  { %6580 = vmatprep.subr.bf16.mxu0 %v11776_v1  ;;  %7164 = vmatprep.subr.bf16.mxu1 %v11778_v6  ;;  %v11818_v1 = vcombine.high %v659_v51, %v663_v52  ;;  %v14065_v6 = vpack.c.bf16 %v127_v57, %v111_v53  ;;  %v11824_v16 = vcombine.high %v666_v0, %v670_v2  ;;  %v191_v52 = vld [vmem:[#allocation2 + $0x3a8] sm:$0xff]  ;;  %v698_v57 = vld [vmem:[#allocation5 + $0xd80] sm:$0xff] }
  0xff   :  { %v11823_v27 = vcombine.low %v666_v0, %v670_v2  ;;  %v14079_v53 = vpack.c.bf16 %v158_v40, %v142_v39  ;;  %v699_v0 = vld [vmem:[#allocation5 + $0xd88] sm:$0xff] }
 0x101   :  { %6581 = vmatpush1.bf16.msra.mxu0 %v11775_v10  ;;  %7165 = vmatpush1.bf16.msra.mxu1 %v11777_v11  ;;  %v126_v10 = vld [vmem:[#allocation2 + $0x1a0] sm:$0xff]  ;;  %v11815_v11 = vcombine.low %v658_v46, %v662_v48  ;;  %v691_v48 = vld [vmem:[#allocation5 + $0xd48] sm:$0xff] }
 0x102   :  { %6582 = vmatprep.subr.bf16.mxu0 %v11784_v12  ;;  %7166 = vmatprep.subr.bf16.mxu1 %v11786_v13  ;;  %v674_v12 = vld [vmem:[#allocation5 + $0xcc0] sm:$0xff]  ;;  %v14071_v26 = vpack.c.bf16 %v126_v10, %v110_v9  ;;  %v11847_v10 = vcombine.low %v690_v42, %v694_v43 }
 0x103   :  { %v678_v13 = vld [vmem:[#allocation5 + $0xce0] sm:$0xff] }
 0x104   :  { %v11832_v31 = vcombine.high %v674_v12, %v678_v13  ;;  %v11831_v41 = vcombine.low %v674_v12, %v678_v13  ;;  %v190_v9 = vld [vmem:[#allocation2 + $0x3a0] sm:$0xff] }
 0x105   :  { %6583 = vmatpush1.bf16.msra.mxu0 %v11783_v21  ;;  %7167 = vmatpush1.bf16.msra.mxu1 %v11785_v23  ;;  %v143_v21 = vld [vmem:[#allocation2 + $0x228] sm:$0xff]  ;;  %v11826_v23 = vcombine.high %v667_v4, %v671_v5  ;;  %v710_v12 = vld [vmem:[#allocation5 + $0xde0] sm:$0xff] }
 0x106   :  { %6584 = vmatprep.subr.bf16.mxu0 %v11792_v24  ;;  %7168 = vmatprep.subr.bf16.mxu1 %v11794_v30  ;;  %v159_v24 = vld [vmem:[#allocation2 + $0x2a8] sm:$0xff]  ;;  %v11825_v30 = vcombine.low %v667_v4, %v671_v5  ;;  %v174_v5 = vld [vmem:[#allocation2 + $0x320] sm:$0xff] }
 0x109   :  { %6585 = vmatpush1.bf16.msra.mxu0 %v11791_v33  ;;  %7169 = vmatpush1.bf16.msra.mxu1 %v11793_v34  ;;  %v686_v33 = vld [vmem:[#allocation5 + $0xd20] sm:$0xff]  ;;  %v683_v34 = vld [vmem:[#allocation5 + $0xd08] sm:$0xff] }
 0x10a   :  { %6586 = vmatprep.subr.bf16.mxu0 %v11800_v35  ;;  %7170 = vmatprep.subr.bf16.mxu1 %v11802_v37  ;;  %v687_v35 = vld [vmem:[#allocation5 + $0xd28] sm:$0xff]  ;;  %v14073_v37 = vpack.c.bf16 %v159_v24, %v143_v21  ;;  %v11840_v46 = vcombine.high %v682_v28, %v686_v33  ;;  %v14087_v24 = vpack.c.bf16 %v190_v9, %v174_v5  ;;  %v738_v5 = vld [vmem:[#allocation5 + $0xec0] sm:$0xff] }
 0x10b   :  { %v11842_v51 = vcombine.high %v683_v34, %v687_v35  ;;  %v742_v9 = vld [vmem:[#allocation5 + $0xee0] sm:$0xff] }
 0x10d   :  { %6587 = vmatpush1.bf16.msra.mxu0 %v11799_v45  ;;  %7171 = vmatpush1.bf16.msra.mxu1 %v11801_v49  ;;  %v11833_v45 = vcombine.low %v675_v17, %v679_v20  ;;  %v695_v49 = vld [vmem:[#allocation5 + $0xd68] sm:$0xff]  ;;  %v81_v20 = vld [vmem:[#allocation2 + $0x38] sm:$0xff] }
 0x10e   :  { %6629 = vmatprep.subr.bf16.mxu0 %v11808_v50  ;;  %7213 = vmatprep.subr.bf16.mxu1 %v11810_v55  ;;  %v175_v50 = vld [vmem:[#allocation2 + $0x328] sm:$0xff]  ;;  %v11839_v55 = vcombine.low %v682_v28, %v686_v33  ;;  %v11850_v2 = vcombine.high %v691_v48, %v695_v49  ;;  %v11849_v13 = vcombine.low %v691_v48, %v695_v49  ;;  %v718_v33 = vld [vmem:[#allocation5 + $0xe20] sm:$0xff] }
 0x10f   :  { %v14081_v4 = vpack.c.bf16 %v191_v52, %v175_v50  ;;  %v711_v17 = vld [vmem:[#allocation5 + $0xde8] sm:$0xff] }
 0x110   :  { %6589 = vmatmul.mubr.bf16.vlgmr.msra.gmra.mrb[0].mxu0 %v14063_v59  ;;  %7173 = vmatmul.mubr.bf16.vlgmr.msra.gmra.mrb[0].mxu1 %v14063_v59  ;;  %v727_v49 = vld [vmem:[#allocation5 + $0xe68] sm:$0xff] }
 0x111   :  { %6630 = vmatpush1.bf16.msra.mxu0 %v11807_v60  ;;  %7214 = vmatpush1.bf16.msra.mxu1 %v11809_v62  ;;  %v11841_v60 = vcombine.low %v683_v34, %v687_v35  ;;  %v11848_v62 = vcombine.high %v690_v42, %v694_v43  ;;  %v715_v34 = vld [vmem:[#allocation5 + $0xe08] sm:$0xff]  ;;  %v722_v43 = vld [vmem:[#allocation5 + $0xe40] sm:$0xff] }
 0x112   :  { %6631 = vmatprep.subr.bf16.mxu0 %v11816_v63  ;;  %7215 = vmatprep.subr.bf16.mxu1 %v11818_v1  ;;  %v702_v63 = vld [vmem:[#allocation5 + $0xda0] sm:$0xff]  ;;  %v703_v1 = vld [vmem:[#allocation5 + $0xda8] sm:$0xff] }
 0x113   :  { %6598 = vmatprep.mubr.bf16.mxu0 %v14065_v6  ;;  %7182 = vmatprep.mubr.bf16.mxu1 %v14065_v6  ;;  %v11858_v21 = vcombine.high %v699_v0, %v703_v1  ;;  %v11857_v28 = vcombine.low %v699_v0, %v703_v1 }
 0x115   :  { %6632 = vmatpush1.bf16.msra.mxu0 %v11815_v11  ;;  %7216 = vmatpush1.bf16.msra.mxu1 %v11817_v14  ;;  %v706_v11 = vld [vmem:[#allocation5 + $0xdc0] sm:$0xff]  ;;  %v11856_v14 = vcombine.high %v698_v57, %v702_v63 }
 0x116   :  { %6633 = vmatprep.subr.bf16.mxu0 %v11824_v16  ;;  %7217 = vmatprep.subr.bf16.mxu1 %v11826_v23  ;;  %v707_v16 = vld [vmem:[#allocation5 + $0xdc8] sm:$0xff]  ;;  %v97_v23 = vld [vmem:[#allocation2 + $0xb8] sm:$0xff]  ;;  %v11863_v40 = vcombine.low %v706_v11, %v710_v12 }
 0x117   :  { %v11866_v35 = vcombine.high %v707_v16, %v711_v17  ;;  %v14089_v39 = vpack.c.bf16 %v97_v23, %v81_v20  ;;  %v746_v20 = vld [vmem:[#allocation5 + $0xf00] sm:$0xff]  ;;  %v747_v23 = vld [vmem:[#allocation5 + $0xf08] sm:$0xff] }
 0x118   :  { %6599 = vmatmul.mubr.bf16.gmra.mrb[4].mxu0 %v14071_v26  ;;  %7183 = vmatmul.mubr.bf16.gmra.mrb[4].mxu1 %v14071_v26 }
 0x119   :  { %6634 = vmatpush1.bf16.msra.mxu0 %v11823_v27  ;;  %7218 = vmatpush1.bf16.msra.mxu1 %v11825_v30  ;;  %v11855_v27 = vcombine.low %v698_v57, %v702_v63  ;;  %v11864_v30 = vcombine.high %v706_v11, %v710_v12  ;;  %v734_v57 = vld [vmem:[#allocation5 + $0xea0] sm:$0xff]  ;;  %v735_v63 = vld [vmem:[#allocation5 + $0xea8] sm:$0xff] }
 0x11a   :  { %6635 = vmatprep.subr.bf16.mxu0 %v11832_v31  ;;  %7219 = vmatprep.subr.bf16.mxu1 %v11834_v36  ;;  %v714_v31 = vld [vmem:[#allocation5 + $0xe00] sm:$0xff]  ;;  %v719_v36 = vld [vmem:[#allocation5 + $0xe28] sm:$0xff] }
 0x11b   :  { %6608 = vmatprep.mubr.bf16.mxu0 %v14073_v37  ;;  %7192 = vmatprep.mubr.bf16.mxu1 %v14073_v37  ;;  %v11872_v42 = vcombine.high %v714_v31, %v718_v33  ;;  %v11874_v48 = vcombine.high %v715_v34, %v719_v36  ;;  %v11871_v50 = vcombine.low %v714_v31, %v718_v33  ;;  %v743_v12 = vld [vmem:[#allocation5 + $0xee8] sm:$0xff]  ;;  %v754_v33 = vld [vmem:[#allocation5 + $0xf40] sm:$0xff] }
 0x11d   :  { %6636 = vmatpush1.bf16.msra.mxu0 %v11831_v41  ;;  %7220 = vmatpush1.bf16.msra.mxu1 %v11833_v45  ;;  %v11865_v41 = vcombine.low %v707_v16, %v711_v17  ;;  %v726_v45 = vld [vmem:[#allocation5 + $0xe60] sm:$0xff]  ;;  %v11896_v16 = vcombine.high %v738_v5, %v742_v9 }
 0x11e   :  { %6637 = vmatprep.subr.bf16.mxu0 %v11840_v46  ;;  %7221 = vmatprep.subr.bf16.mxu1 %v11842_v51  ;;  %v723_v46 = vld [vmem:[#allocation5 + $0xe48] sm:$0xff]  ;;  %v11873_v51 = vcombine.low %v715_v34, %v719_v36  ;;  %v11880_v52 = vcombine.high %v722_v43, %v726_v45  ;;  %v11879_v0 = vcombine.low %v722_v43, %v726_v45  ;;  %v758_v34 = vld [vmem:[#allocation5 + $0xf60] sm:$0xff] }
 0x11f   :  { %v11881_v1 = vcombine.low %v723_v46, %v727_v49  ;;  %v11912_v43 = vcombine.high %v754_v33, %v758_v34 }
 0x120   :  { %6609 = vmatmul.mubr.bf16.gmra.mrb[8].mxu0 %v14079_v53  ;;  %7193 = vmatmul.mubr.bf16.gmra.mrb[8].mxu1 %v14079_v53 }
 0x121   :  { %6638 = vmatpush1.bf16.msra.mxu0 %v11839_v55  ;;  %7222 = vmatpush1.bf16.msra.mxu1 %v11841_v60  ;;  %v730_v55 = vld [vmem:[#allocation5 + $0xe80] sm:$0xff]  ;;  %v731_v60 = vld [vmem:[#allocation5 + $0xe88] sm:$0xff] }
 0x122   :  { %6639 = vmatprep.subr.bf16.mxu0 %v11848_v62  ;;  %7223 = vmatprep.subr.bf16.mxu1 %v11850_v2  ;;  %v11882_v62 = vcombine.high %v723_v46, %v727_v49  ;;  %v11888_v2 = vcombine.high %v730_v55, %v734_v57  ;;  %v11890_v11 = vcombine.high %v731_v60, %v735_v63  ;;  %v762_v46 = vld [vmem:[#allocation5 + $0xf80] sm:$0xff]  ;;  %v763_v49 = vld [vmem:[#allocation5 + $0xf88] sm:$0xff] }
 0x123   :  { %6618 = vmatprep.mubr.bf16.mxu0 %v14081_v4  ;;  %7202 = vmatprep.mubr.bf16.mxu1 %v14081_v4 }
 0x125   :  { %6640 = vmatpush1.bf16.msra.mxu0 %v11847_v10  ;;  %7224 = vmatpush1.bf16.msra.mxu1 %v11849_v13  ;;  %v739_v10 = vld [vmem:[#allocation5 + $0xec8] sm:$0xff]  ;;  %v11887_v13 = vcombine.low %v730_v55, %v734_v57  ;;  %v770_v57 = vld [vmem:[#allocation5 + $0xfc0] sm:$0xff] }
 0x126   :  { %6641 = vmatprep.subr.bf16.mxu0 %v11856_v14  ;;  %7225 = vmatprep.subr.bf16.mxu1 %v11858_v21  ;;  %v11889_v14 = vcombine.low %v731_v60, %v735_v63  ;;  %v11898_v17 = vcombine.high %v739_v10, %v743_v12  ;;  %v750_v21 = vld [vmem:[#allocation5 + $0xf20] sm:$0xff] }
 0x127   :  { %v11904_v31 = vcombine.high %v746_v20, %v750_v21  ;;  %v774_v60 = vld [vmem:[#allocation5 + $0xfe0] sm:$0xff] }
 0x128   :  { %6619 = vmatmul.mubr.bf16.gmra.mrb[12].mxu0 %v14087_v24  ;;  %7203 = vmatmul.mubr.bf16.gmra.mrb[12].mxu1 %v14087_v24 }
 0x129   :  { %6642 = vmatpush1.bf16.msra.mxu0 %v11855_v27  ;;  %7226 = vmatpush1.bf16.msra.mxu1 %v11857_v28  ;;  %v751_v27 = vld [vmem:[#allocation5 + $0xf28] sm:$0xff]  ;;  %v11895_v28 = vcombine.low %v738_v5, %v742_v9  ;;  %v11928_v5 = vcombine.high %v770_v57, %v774_v60  ;;  %v778_v9 = vld [vmem:[#allocation5 + $0x1000] sm:$0xff] }
 0x12a   :  { %6643 = vmatprep.subr.bf16.mxu0 %v11864_v30  ;;  %7227 = vmatprep.subr.bf16.mxu1 %v11866_v35  ;;  %v11897_v30 = vcombine.low %v739_v10, %v743_v12  ;;  %v755_v35 = vld [vmem:[#allocation5 + $0xf48] sm:$0xff]  ;;  %v11906_v36 = vcombine.high %v747_v23, %v751_v27 }
 0x12b   :  { %6661 = vmatprep.mubr.bf16.mxu0 %v14089_v39  ;;  %7245 = vmatprep.mubr.bf16.mxu1 %v14089_v39  ;;  %v779_v12 = vld [vmem:[#allocation5 + $0x1008] sm:$0xff] }
 0x12d   :  { %6644 = vmatpush1.bf16.msra.mxu0 %v11863_v40  ;;  %7228 = vmatpush1.bf16.msra.mxu1 %v11865_v41  ;;  %v759_v40 = vld [vmem:[#allocation5 + $0xf68] sm:$0xff]  ;;  %v11903_v41 = vcombine.low %v746_v20, %v750_v21  ;;  %v786_v20 = vld [vmem:[#allocation5 + $0x1040] sm:$0xff] }
 0x12e   :  { %6645 = vmatprep.subr.bf16.mxu0 %v11872_v42  ;;  %7229 = vmatprep.subr.bf16.mxu1 %v11874_v48  ;;  %v11905_v42 = vcombine.low %v747_v23, %v751_v27  ;;  %v11914_v45 = vcombine.high %v755_v35, %v759_v40  ;;  %v766_v48 = vld [vmem:[#allocation5 + $0xfa0] sm:$0xff] }
 0x12f   :  { %v11920_v55 = vcombine.high %v762_v46, %v766_v48  ;;  %v790_v21 = vld [vmem:[#allocation5 + $0x1060] sm:$0xff] }
 0x131   :  { %6646 = vmatpush1.bf16.msra.mxu0 %v11871_v50  ;;  %7230 = vmatpush1.bf16.msra.mxu1 %v11873_v51  ;;  %v767_v50 = vld [vmem:[#allocation5 + $0xfa8] sm:$0xff]  ;;  %v11911_v51 = vcombine.low %v754_v33, %v758_v34  ;;  %v129_v34 = vld [vmem:[#allocation2 + $0x1b8] sm:$0xff] }
 0x132   :  { %6647 = vmatprep.subr.bf16.mxu0 %v11880_v52  ;;  %7231 = vmatprep.subr.bf16.mxu1 %v11882_v62  ;;  %v11913_v52 = vcombine.low %v755_v35, %v759_v40  ;;  %v771_v62 = vld [vmem:[#allocation5 + $0xfc8] sm:$0xff]  ;;  %v11922_v63 = vcombine.high %v763_v49, %v767_v50 }
 0x135   :  { %6648 = vmatpush1.bf16.msra.mxu0 %v11879_v0  ;;  %7232 = vmatpush1.bf16.msra.mxu1 %v11881_v1  ;;  %v775_v0 = vld [vmem:[#allocation5 + $0xfe8] sm:$0xff]  ;;  %v11919_v1 = vcombine.low %v762_v46, %v766_v48 }
 0x136   :  { %6649 = vmatprep.subr.bf16.mxu0 %v11888_v2  ;;  %7233 = vmatprep.subr.bf16.mxu1 %v11890_v11  ;;  %v11921_v2 = vcombine.low %v763_v49, %v767_v50  ;;  %v11930_v10 = vcombine.high %v771_v62, %v775_v0  ;;  %v782_v11 = vld [vmem:[#allocation5 + $0x1020] sm:$0xff]  ;;  %v11929_v23 = vcombine.low %v771_v62, %v775_v0  ;;  %v795_v46 = vld [vmem:[#allocation5 + $0x1088] sm:$0xff]  ;;  %v112_v50 = vld [vmem:[#allocation2 + $0x130] sm:$0xff] }
 0x137   :  { %v11936_v27 = vcombine.high %v778_v9, %v782_v11  ;;  %v799_v48 = vld [vmem:[#allocation5 + $0x10a8] sm:$0xff] }
 0x138   :  { %v807_v0 = vld [vmem:[#allocation5 + $0x10e8] sm:$0xff] }
 0x139   :  { %6650 = vmatpush1.bf16.msra.mxu0 %v11887_v13  ;;  %7234 = vmatpush1.bf16.msra.mxu1 %v11889_v14  ;;  %v783_v13 = vld [vmem:[#allocation5 + $0x1028] sm:$0xff]  ;;  %v80_v14 = vld [vmem:[#allocation2 + $0x30] sm:$0xff] }
 0x13a   :  { %6651 = vmatprep.subr.bf16.mxu0 %v11896_v16  ;;  %7235 = vmatprep.subr.bf16.mxu1 %v11898_v17  ;;  %v96_v16 = vld [vmem:[#allocation2 + $0xb0] sm:$0xff]  ;;  %v11927_v17 = vcombine.low %v770_v57, %v774_v60  ;;  %v11938_v33 = vcombine.high %v779_v12, %v783_v13  ;;  %v11937_v40 = vcombine.low %v779_v12, %v783_v13  ;;  %v806_v57 = vld [vmem:[#allocation5 + $0x10e0] sm:$0xff] }
 0x13b   :  { %v14095_v35 = vpack.c.bf16 %v96_v16, %v80_v14  ;;  %v810_v14 = vld [vmem:[#allocation5 + $0x1100] sm:$0xff] }
 0x13c   :  { %v814_v16 = vld [vmem:[#allocation5 + $0x1120] sm:$0xff] }
 0x13d   :  { %6652 = vmatpush1.bf16.msra.mxu0 %v11895_v28  ;;  %7236 = vmatpush1.bf16.msra.mxu1 %v11897_v30  ;;  %v787_v28 = vld [vmem:[#allocation5 + $0x1048] sm:$0xff] }
 0x13e   :  { %6653 = vmatprep.subr.bf16.mxu0 %v11904_v31  ;;  %7237 = vmatprep.subr.bf16.mxu1 %v11906_v36  ;;  %v791_v30 = vld [vmem:[#allocation5 + $0x1068] sm:$0xff]  ;;  %v113_v31 = vld [vmem:[#allocation2 + $0x138] sm:$0xff]  ;;  %v11935_v36 = vcombine.low %v778_v9, %v782_v11  ;;  %v11953_v11 = vcombine.low %v795_v46, %v799_v48 }
 0x13f   :  { %v14097_v49 = vpack.c.bf16 %v129_v34, %v113_v31  ;;  %v11945_v60 = vcombine.low %v787_v28, %v791_v30  ;;  %v11968_v31 = vcombine.high %v810_v14, %v814_v16  ;;  %v818_v34 = vld [vmem:[#allocation5 + $0x1140] sm:$0xff] }
 0x141   :  { %6654 = vmatpush1.bf16.msra.mxu0 %v11903_v41  ;;  %7238 = vmatpush1.bf16.msra.mxu1 %v11905_v42  ;;  %v11944_v41 = vcombine.high %v786_v20, %v790_v21  ;;  %v794_v42 = vld [vmem:[#allocation5 + $0x1080] sm:$0xff] }
 0x142   :  { %6655 = vmatprep.subr.bf16.mxu0 %v11912_v43  ;;  %7239 = vmatprep.subr.bf16.mxu1 %v11914_v45  ;;  %v11946_v43 = vcombine.high %v787_v28, %v791_v30  ;;  %v798_v45 = vld [vmem:[#allocation5 + $0x10a0] sm:$0xff]  ;;  %v160_v28 = vld [vmem:[#allocation2 + $0x2b0] sm:$0xff] }
 0x143   :  { %v11952_v62 = vcombine.high %v794_v42, %v798_v45 }
 0x145   :  { %6656 = vmatpush1.bf16.msra.mxu0 %v11911_v51  ;;  %7240 = vmatpush1.bf16.msra.mxu1 %v11913_v52  ;;  %v128_v51 = vld [vmem:[#allocation2 + $0x1b0] sm:$0xff]  ;;  %v11943_v52 = vcombine.low %v786_v20, %v790_v21  ;;  %v811_v20 = vld [vmem:[#allocation5 + $0x1108] sm:$0xff] }
 0x146   :  { %6657 = vmatprep.subr.bf16.mxu0 %v11920_v55  ;;  %7241 = vmatprep.subr.bf16.mxu1 %v11922_v63  ;;  %v802_v55 = vld [vmem:[#allocation5 + $0x10c0] sm:$0xff]  ;;  %v803_v63 = vld [vmem:[#allocation5 + $0x10c8] sm:$0xff]  ;;  %v14103_v9 = vpack.c.bf16 %v128_v51, %v112_v50 }
 0x147   :  { %v11960_v12 = vcombine.high %v802_v55, %v806_v57  ;;  %v11962_v13 = vcombine.high %v803_v63, %v807_v0  ;;  %v815_v21 = vld [vmem:[#allocation5 + $0x1128] sm:$0xff]  ;;  %v11961_v30 = vcombine.low %v803_v63, %v807_v0  ;;  %v176_v0 = vld [vmem:[#allocation2 + $0x330] sm:$0xff] }
 0x149   :  { %6658 = vmatpush1.bf16.msra.mxu0 %v11919_v1  ;;  %7242 = vmatpush1.bf16.msra.mxu1 %v11921_v2  ;;  %v145_v1 = vld [vmem:[#allocation2 + $0x238] sm:$0xff]  ;;  %v11954_v2 = vcombine.high %v795_v46, %v799_v48  ;;  %v11967_v46 = vcombine.low %v810_v14, %v814_v16  ;;  %v11969_v48 = vcombine.low %v811_v20, %v815_v21  ;;  %v839_v14 = vld [vmem:[#allocation5 + $0x11e8] sm:$0xff] }
 0x14a   :  { %6659 = vmatprep.subr.bf16.mxu0 %v11928_v5  ;;  %7243 = vmatprep.subr.bf16.mxu1 %v11930_v10  ;;  %v161_v5 = vld [vmem:[#allocation2 + $0x2b8] sm:$0xff]  ;;  %v11951_v10 = vcombine.low %v794_v42, %v798_v45 }
 0x14b   :  { %v193_v45 = vld [vmem:[#allocation2 + $0x3b8] sm:$0xff] }
 0x14d   :  { %6660 = vmatpush1.bf16.msra.mxu0 %v11927_v17  ;;  %7244 = vmatpush1.bf16.msra.mxu1 %v11929_v23  ;;  %v14105_v17 = vpack.c.bf16 %v161_v5, %v145_v1  ;;  %v11959_v23 = vcombine.low %v802_v55, %v806_v57  ;;  %v830_v55 = vld [vmem:[#allocation5 + $0x11a0] sm:$0xff]  ;;  %v192_v1 = vld [vmem:[#allocation2 + $0x3b0] sm:$0xff] }
 0x14e   :  { %6702 = vmatprep.subr.bf16.mxu0 %v11936_v27  ;;  %7286 = vmatprep.subr.bf16.mxu1 %v11938_v33  ;;  %v144_v27 = vld [vmem:[#allocation2 + $0x230] sm:$0xff]  ;;  %v11970_v33 = vcombine.high %v811_v20, %v815_v21  ;;  %v14119_v16 = vpack.c.bf16 %v192_v1, %v176_v0  ;;  %v83_v20 = vld [vmem:[#allocation2 + $0x48] sm:$0xff]  ;;  %v858_v0 = vld [vmem:[#allocation5 + $0x1280] sm:$0xff] }
 0x14f   :  { %v14111_v42 = vpack.c.bf16 %v160_v28, %v144_v27  ;;  %v99_v21 = vld [vmem:[#allocation2 + $0xc8] sm:$0xff]  ;;  %v862_v1 = vld [vmem:[#allocation5 + $0x12a0] sm:$0xff] }
 0x150   :  { %6662 = vmatmul.mubr.bf16.vlgmr.msra.gmra.mrb[0].mxu0 %v14095_v35  ;;  %7246 = vmatmul.mubr.bf16.vlgmr.msra.gmra.mrb[0].mxu1 %v14095_v35 }
 0x151   :  { %6703 = vmatpush1.bf16.msra.mxu0 %v11935_v36  ;;  %7287 = vmatpush1.bf16.msra.mxu1 %v11937_v40  ;;  %v822_v36 = vld [vmem:[#allocation5 + $0x1160] sm:$0xff]  ;;  %v819_v40 = vld [vmem:[#allocation5 + $0x1148] sm:$0xff] }
 0x152   :  { %6704 = vmatprep.subr.bf16.mxu0 %v11944_v41  ;;  %7288 = vmatprep.subr.bf16.mxu1 %v11946_v43  ;;  %v823_v41 = vld [vmem:[#allocation5 + $0x1168] sm:$0xff]  ;;  %v177_v43 = vld [vmem:[#allocation2 + $0x338] sm:$0xff]  ;;  %v11976_v50 = vcombine.high %v818_v34, %v822_v36  ;;  %v11975_v63 = vcombine.low %v818_v34, %v822_v36  ;;  %v14121_v34 = vpack.c.bf16 %v99_v21, %v83_v20  ;;  %v870_v20 = vld [vmem:[#allocation5 + $0x12e0] sm:$0xff] }
 0x153   :  { %6671 = vmatprep.mubr.bf16.mxu0 %v14097_v49  ;;  %7255 = vmatprep.mubr.bf16.mxu1 %v14097_v49  ;;  %v11978_v51 = vcombine.high %v819_v40, %v823_v41  ;;  %v14113_v57 = vpack.c.bf16 %v193_v45, %v177_v43  ;;  %v843_v36 = vld [vmem:[#allocation5 + $0x1208] sm:$0xff] }
 0x154   :  { %v867_v21 = vld [vmem:[#allocation5 + $0x12c8] sm:$0xff] }
 0x155   :  { %6705 = vmatpush1.bf16.msra.mxu0 %v11943_v52  ;;  %7289 = vmatpush1.bf16.msra.mxu1 %v11945_v60  ;;  %v826_v52 = vld [vmem:[#allocation5 + $0x1180] sm:$0xff]  ;;  %v827_v60 = vld [vmem:[#allocation5 + $0x1188] sm:$0xff] }
 0x156   :  { %6706 = vmatprep.subr.bf16.mxu0 %v11952_v62  ;;  %7290 = vmatprep.subr.bf16.mxu1 %v11954_v2  ;;  %v831_v62 = vld [vmem:[#allocation5 + $0x11a8] sm:$0xff]  ;;  %v11977_v2 = vcombine.low %v819_v40, %v823_v41  ;;  %v11984_v5 = vcombine.high %v826_v52, %v830_v55 }
 0x157   :  { %v11985_v27 = vcombine.low %v827_v60, %v831_v62  ;;  %v847_v40 = vld [vmem:[#allocation5 + $0x1228] sm:$0xff] }
 0x158   :  { %6672 = vmatmul.mubr.bf16.gmra.mrb[4].mxu0 %v14103_v9  ;;  %7256 = vmatmul.mubr.bf16.gmra.mrb[4].mxu1 %v14103_v9 }
 0x159   :  { %6707 = vmatpush1.bf16.msra.mxu0 %v11951_v10  ;;  %7291 = vmatpush1.bf16.msra.mxu1 %v11953_v11  ;;  %v11986_v10 = vcombine.high %v827_v60, %v831_v62  ;;  %v834_v11 = vld [vmem:[#allocation5 + $0x11c0] sm:$0xff]  ;;  %v12001_v60 = vcombine.low %v843_v36, %v847_v40 }
 0x15a   :  { %6708 = vmatprep.subr.bf16.mxu0 %v11960_v12  ;;  %7292 = vmatprep.subr.bf16.mxu1 %v11962_v13  ;;  %v838_v12 = vld [vmem:[#allocation5 + $0x11e0] sm:$0xff]  ;;  %v835_v13 = vld [vmem:[#allocation5 + $0x11c8] sm:$0xff] }
 0x15b   :  { %6681 = vmatprep.mubr.bf16.mxu0 %v14105_v17  ;;  %7265 = vmatprep.mubr.bf16.mxu1 %v14105_v17  ;;  %v11992_v28 = vcombine.high %v834_v11, %v838_v12  ;;  %v11991_v41 = vcombine.low %v834_v11, %v838_v12  ;;  %v11993_v43 = vcombine.low %v835_v13, %v839_v14 }
 0x15c   :  { %v12016_v12 = vcombine.high %v858_v0, %v862_v1 }
 0x15d   :  { %6709 = vmatpush1.bf16.msra.mxu0 %v11959_v23  ;;  %7293 = vmatpush1.bf16.msra.mxu1 %v11961_v30  ;;  %v11983_v23 = vcombine.low %v826_v52, %v830_v55  ;;  %v11994_v30 = vcombine.high %v835_v13, %v839_v14  ;;  %v855_v52 = vld [vmem:[#allocation5 + $0x1268] sm:$0xff]  ;;  %v866_v14 = vld [vmem:[#allocation5 + $0x12c0] sm:$0xff] }
 0x15e   :  { %6710 = vmatprep.subr.bf16.mxu0 %v11968_v31  ;;  %7294 = vmatprep.subr.bf16.mxu1 %v11970_v33  ;;  %v842_v31 = vld [vmem:[#allocation5 + $0x1200] sm:$0xff] }
 0x15f   :  { %v846_v33 = vld [vmem:[#allocation5 + $0x1220] sm:$0xff] }
 0x160   :  { %6682 = vmatmul.mubr.bf16.gmra.mrb[8].mxu0 %v14111_v42  ;;  %7266 = vmatmul.mubr.bf16.gmra.mrb[8].mxu1 %v14111_v42  ;;  %v12000_v45 = vcombine.high %v842_v31, %v846_v33  ;;  %v11999_v55 = vcombine.low %v842_v31, %v846_v33  ;;  %v874_v33 = vld [vmem:[#allocation5 + $0x1300] sm:$0xff] }
 0x161   :  { %6711 = vmatpush1.bf16.msra.mxu0 %v11967_v46  ;;  %7295 = vmatpush1.bf16.msra.mxu1 %v11969_v48  ;;  %v12002_v46 = vcombine.high %v843_v36, %v847_v40  ;;  %v850_v48 = vld [vmem:[#allocation5 + $0x1240] sm:$0xff]  ;;  %v875_v40 = vld [vmem:[#allocation5 + $0x1308] sm:$0xff] }
 0x162   :  { %6712 = vmatprep.subr.bf16.mxu0 %v11976_v50  ;;  %7296 = vmatprep.subr.bf16.mxu1 %v11978_v51  ;;  %v854_v50 = vld [vmem:[#allocation5 + $0x1260] sm:$0xff]  ;;  %v851_v51 = vld [vmem:[#allocation5 + $0x1248] sm:$0xff] }
 0x163   :  { %6691 = vmatprep.mubr.bf16.mxu0 %v14113_v57  ;;  %7275 = vmatprep.mubr.bf16.mxu1 %v14113_v57  ;;  %v12008_v62 = vcombine.high %v850_v48, %v854_v50  ;;  %v12009_v11 = vcombine.low %v851_v51, %v855_v52  ;;  %v878_v36 = vld [vmem:[#allocation5 + $0x1320] sm:$0xff] }
 0x165   :  { %6713 = vmatpush1.bf16.msra.mxu0 %v11975_v63  ;;  %7297 = vmatpush1.bf16.msra.mxu1 %v11977_v2  ;;  %v12010_v63 = vcombine.high %v851_v51, %v855_v52  ;;  %v859_v2 = vld [vmem:[#allocation5 + $0x1288] sm:$0xff]  ;;  %v886_v51 = vld [vmem:[#allocation5 + $0x1360] sm:$0xff] }
 0x166   :  { %6714 = vmatprep.subr.bf16.mxu0 %v11984_v5  ;;  %7298 = vmatprep.subr.bf16.mxu1 %v11986_v10  ;;  %v863_v5 = vld [vmem:[#allocation5 + $0x12a8] sm:$0xff]  ;;  %v12007_v10 = vcombine.low %v850_v48, %v854_v50  ;;  %v882_v50 = vld [vmem:[#allocation5 + $0x1340] sm:$0xff] }
 0x167   :  { %v12018_v13 = vcombine.high %v859_v2, %v863_v5  ;;  %v883_v52 = vld [vmem:[#allocation5 + $0x1348] sm:$0xff] }
 0x168   :  { %6692 = vmatmul.mubr.bf16.gmra.mrb[12].mxu0 %v14119_v16  ;;  %7276 = vmatmul.mubr.bf16.gmra.mrb[12].mxu1 %v14119_v16 }
 0x169   :  { %6715 = vmatpush1.bf16.msra.mxu0 %v11983_v23  ;;  %7299 = vmatpush1.bf16.msra.mxu1 %v11985_v27  ;;  %v871_v23 = vld [vmem:[#allocation5 + $0x12e8] sm:$0xff]  ;;  %v12015_v27 = vcombine.low %v858_v0, %v862_v1  ;;  %v890_v1 = vld [vmem:[#allocation5 + $0x1380] sm:$0xff] }
 0x16a   :  { %6716 = vmatprep.subr.bf16.mxu0 %v11992_v28  ;;  %7300 = vmatprep.subr.bf16.mxu1 %v11994_v30  ;;  %v12017_v28 = vcombine.low %v859_v2, %v863_v5  ;;  %v12024_v30 = vcombine.high %v866_v14, %v870_v20  ;;  %v12026_v31 = vcombine.high %v867_v21, %v871_v23  ;;  %v894_v2 = vld [vmem:[#allocation5 + $0x13a0] sm:$0xff]  ;;  %v891_v5 = vld [vmem:[#allocation5 + $0x1388] sm:$0xff] }
 0x16b   :  { %6734 = vmatprep.mubr.bf16.mxu0 %v14121_v34  ;;  %7318 = vmatprep.mubr.bf16.mxu1 %v14121_v34 }
 0x16d   :  { %6717 = vmatpush1.bf16.msra.mxu0 %v11991_v41  ;;  %7301 = vmatpush1.bf16.msra.mxu1 %v11993_v43  ;;  %v879_v41 = vld [vmem:[#allocation5 + $0x1328] sm:$0xff]  ;;  %v12023_v43 = vcombine.low %v866_v14, %v870_v20  ;;  %v898_v20 = vld [vmem:[#allocation5 + $0x13c0] sm:$0xff] }
 0x16e   :  { %6718 = vmatprep.subr.bf16.mxu0 %v12000_v45  ;;  %7302 = vmatprep.subr.bf16.mxu1 %v12002_v46  ;;  %v12025_v45 = vcombine.low %v867_v21, %v871_v23  ;;  %v12032_v46 = vcombine.high %v874_v33, %v878_v36  ;;  %v12034_v48 = vcombine.high %v875_v40, %v879_v41  ;;  %v902_v21 = vld [vmem:[#allocation5 + $0x13e0] sm:$0xff]  ;;  %v899_v23 = vld [vmem:[#allocation5 + $0x13c8] sm:$0xff] }
 0x171   :  { %6719 = vmatpush1.bf16.msra.mxu0 %v11999_v55  ;;  %7303 = vmatpush1.bf16.msra.mxu1 %v12001_v60  ;;  %v887_v55 = vld [vmem:[#allocation5 + $0x1368] sm:$0xff]  ;;  %v12031_v60 = vcombine.low %v874_v33, %v878_v36  ;;  %v906_v36 = vld [vmem:[#allocation5 + $0x1400] sm:$0xff] }
 0x172   :  { %6720 = vmatprep.subr.bf16.mxu0 %v12008_v62  ;;  %7304 = vmatprep.subr.bf16.mxu1 %v12010_v63  ;;  %v12033_v62 = vcombine.low %v875_v40, %v879_v41  ;;  %v12040_v63 = vcombine.high %v882_v50, %v886_v51  ;;  %v12042_v0 = vcombine.high %v883_v52, %v887_v55  ;;  %v910_v40 = vld [vmem:[#allocation5 + $0x1420] sm:$0xff]  ;;  %v907_v41 = vld [vmem:[#allocation5 + $0x1408] sm:$0xff] }
 0x175   :  { %6721 = vmatpush1.bf16.msra.mxu0 %v12007_v10  ;;  %7305 = vmatpush1.bf16.msra.mxu1 %v12009_v11  ;;  %v895_v10 = vld [vmem:[#allocation5 + $0x13a8] sm:$0xff]  ;;  %v12039_v11 = vcombine.low %v882_v50, %v886_v51  ;;  %v12064_v51 = vcombine.high %v906_v36, %v910_v40 }
 0x176   :  { %6722 = vmatprep.subr.bf16.mxu0 %v12016_v12  ;;  %7306 = vmatprep.subr.bf16.mxu1 %v12018_v13  ;;  %v12041_v12 = vcombine.low %v883_v52, %v887_v55  ;;  %v12048_v13 = vcombine.high %v890_v1, %v894_v2  ;;  %v12050_v14 = vcombine.high %v891_v5, %v895_v10  ;;  %v914_v55 = vld [vmem:[#allocation5 + $0x1440] sm:$0xff] }
 0x179   :  { %6723 = vmatpush1.bf16.msra.mxu0 %v12015_v27  ;;  %7307 = vmatpush1.bf16.msra.mxu1 %v12017_v28  ;;  %v903_v27 = vld [vmem:[#allocation5 + $0x13e8] sm:$0xff]  ;;  %v12047_v28 = vcombine.low %v890_v1, %v894_v2 }
 0x17a   :  { %6724 = vmatprep.subr.bf16.mxu0 %v12024_v30  ;;  %7308 = vmatprep.subr.bf16.mxu1 %v12026_v31  ;;  %v12049_v30 = vcombine.low %v891_v5, %v895_v10  ;;  %v12056_v31 = vcombine.high %v898_v20, %v902_v21  ;;  %v12058_v33 = vcombine.high %v899_v23, %v903_v27  ;;  %v115_v1 = vld [vmem:[#allocation2 + $0x148] sm:$0xff] }
 0x17b   :  { %v12057_v50 = vcombine.low %v899_v23, %v903_v27  ;;  %v131_v2 = vld [vmem:[#allocation2 + $0x1c8] sm:$0xff]  ;;  %v12063_v5 = vcombine.low %v906_v36, %v910_v40  ;;  %v930_v40 = vld [vmem:[#allocation5 + $0x14c0] sm:$0xff] }
 0x17c   :  { %v927_v23 = vld [vmem:[#allocation5 + $0x14a8] sm:$0xff] }
 0x17d   :  { %6725 = vmatpush1.bf16.msra.mxu0 %v12023_v43  ;;  %7309 = vmatpush1.bf16.msra.mxu1 %v12025_v45  ;;  %v911_v43 = vld [vmem:[#allocation5 + $0x1428] sm:$0xff]  ;;  %v12055_v45 = vcombine.low %v898_v20, %v902_v21  ;;  %v14129_v20 = vpack.c.bf16 %v131_v2, %v115_v1 }
 0x17e   :  { %6726 = vmatprep.subr.bf16.mxu0 %v12032_v46  ;;  %7310 = vmatprep.subr.bf16.mxu1 %v12034_v48  ;;  %v82_v46 = vld [vmem:[#allocation2 + $0x40] sm:$0xff]  ;;  %v12066_v52 = vcombine.high %v907_v41, %v911_v43  ;;  %v12065_v10 = vcombine.low %v907_v41, %v911_v43  ;;  %v923_v21 = vld [vmem:[#allocation5 + $0x1488] sm:$0xff] }
 0x17f   :  { %v98_v48 = vld [vmem:[#allocation2 + $0xc0] sm:$0xff]  ;;  %v12082_v36 = vcombine.high %v923_v21, %v927_v23  ;;  %v931_v43 = vld [vmem:[#allocation5 + $0x14c8] sm:$0xff] }
 0x180   :  { %v934_v41 = vld [vmem:[#allocation5 + $0x14e0] sm:$0xff]  ;;  %v939_v2 = vld [vmem:[#allocation5 + $0x1508] sm:$0xff] }
 0x181   :  { %6727 = vmatpush1.bf16.msra.mxu0 %v12031_v60  ;;  %7311 = vmatpush1.bf16.msra.mxu1 %v12033_v62  ;;  %v918_v60 = vld [vmem:[#allocation5 + $0x1460] sm:$0xff]  ;;  %v915_v62 = vld [vmem:[#allocation5 + $0x1448] sm:$0xff] }
 0x182   :  { %6728 = vmatprep.subr.bf16.mxu0 %v12040_v63  ;;  %7312 = vmatprep.subr.bf16.mxu1 %v12042_v0  ;;  %v14127_v63 = vpack.c.bf16 %v98_v48, %v82_v46  ;;  %v919_v0 = vld [vmem:[#allocation5 + $0x1468] sm:$0xff]  ;;  %v12071_v27 = vcombine.low %v914_v55, %v918_v60 }
 0x183   :  { %v147_v48 = vld [vmem:[#allocation2 + $0x248] sm:$0xff] }
 0x185   :  { %6729 = vmatpush1.bf16.msra.mxu0 %v12039_v11  ;;  %7313 = vmatpush1.bf16.msra.mxu1 %v12041_v12  ;;  %v12072_v11 = vcombine.high %v914_v55, %v918_v60  ;;  %v12074_v12 = vcombine.high %v915_v62, %v919_v0  ;;  %v12088_v55 = vcombine.high %v930_v40, %v934_v41 }
 0x186   :  { %6730 = vmatprep.subr.bf16.mxu0 %v12048_v13  ;;  %7314 = vmatprep.subr.bf16.mxu1 %v12050_v14  ;;  %v922_v13 = vld [vmem:[#allocation5 + $0x1480] sm:$0xff] }
 0x187   :  { %v926_v14 = vld [vmem:[#allocation5 + $0x14a0] sm:$0xff] }
 0x189   :  { %6731 = vmatpush1.bf16.msra.mxu0 %v12047_v28  ;;  %7315 = vmatpush1.bf16.msra.mxu1 %v12049_v30  ;;  %v114_v28 = vld [vmem:[#allocation2 + $0x140] sm:$0xff] }
 0x18a   :  { %6732 = vmatprep.subr.bf16.mxu0 %v12056_v31  ;;  %7316 = vmatprep.subr.bf16.mxu1 %v12058_v33  ;;  %v130_v30 = vld [vmem:[#allocation2 + $0x1c0] sm:$0xff]  ;;  %v12073_v31 = vcombine.low %v915_v62, %v919_v0  ;;  %v12080_v33 = vcombine.high %v922_v13, %v926_v14 }
 0x18b   :  { %v14135_v46 = vpack.c.bf16 %v130_v30, %v114_v28  ;;  %v938_v62 = vld [vmem:[#allocation5 + $0x1500] sm:$0xff]  ;;  %v947_v28 = vld [vmem:[#allocation5 + $0x1548] sm:$0xff] }
 0x18c   :  { %v942_v0 = vld [vmem:[#allocation5 + $0x1520] sm:$0xff]  ;;  %v951_v30 = vld [vmem:[#allocation5 + $0x1568] sm:$0xff] }
 0x18d   :  { %6733 = vmatpush1.bf16.msra.mxu0 %v12055_v45  ;;  %7317 = vmatpush1.bf16.msra.mxu1 %v12057_v50  ;;  %v935_v45 = vld [vmem:[#allocation5 + $0x14e8] sm:$0xff] }
 0x18e   :  { %6775 = vmatprep.subr.bf16.mxu0 %v12064_v51  ;;  %7359 = vmatprep.subr.bf16.mxu1 %v12066_v52  ;;  %v163_v50 = vld [vmem:[#allocation2 + $0x2c8] sm:$0xff]  ;;  %v12079_v51 = vcombine.low %v922_v13, %v926_v14  ;;  %v12081_v52 = vcombine.low %v923_v21, %v927_v23  ;;  %v12090_v60 = vcombine.high %v931_v43, %v935_v45  ;;  %v946_v23 = vld [vmem:[#allocation5 + $0x1540] sm:$0xff] }
 0x18f   :  { %v14137_v1 = vpack.c.bf16 %v163_v50, %v147_v48  ;;  %v12089_v13 = vcombine.low %v931_v43, %v935_v45  ;;  %v12096_v14 = vcombine.high %v938_v62, %v942_v0  ;;  %v12106_v45 = vcombine.high %v947_v28, %v951_v30  ;;  %v954_v48 = vld [vmem:[#allocation5 + $0x1580] sm:$0xff] }
 0x190   :  { %6735 = vmatmul.mubr.bf16.vlgmr.msra.gmra.mrb[0].mxu0 %v14127_v63  ;;  %7319 = vmatmul.mubr.bf16.vlgmr.msra.gmra.mrb[0].mxu1 %v14127_v63  ;;  %v958_v50 = vld [vmem:[#allocation5 + $0x15a0] sm:$0xff] }
 0x191   :  { %6776 = vmatpush1.bf16.msra.mxu0 %v12063_v5  ;;  %7360 = vmatpush1.bf16.msra.mxu1 %v12065_v10  ;;  %v943_v5 = vld [vmem:[#allocation5 + $0x1528] sm:$0xff]  ;;  %v12087_v10 = vcombine.low %v930_v40, %v934_v41  ;;  %v12095_v40 = vcombine.low %v938_v62, %v942_v0  ;;  %v194_v62 = vld [vmem:[#allocation2 + $0x3c0] sm:$0xff]  ;;  %v12105_v0 = vcombine.low %v947_v28, %v951_v30 }
 0x192   :  { %6777 = vmatprep.subr.bf16.mxu0 %v12072_v11  ;;  %7361 = vmatprep.subr.bf16.mxu1 %v12074_v12  ;;  %v146_v11 = vld [vmem:[#allocation2 + $0x240] sm:$0xff]  ;;  %v12098_v21 = vcombine.high %v939_v2, %v943_v5  ;;  %v12097_v41 = vcombine.low %v939_v2, %v943_v5  ;;  %v12112_v2 = vcombine.high %v954_v48, %v958_v50 }
 0x193   :  { %6744 = vmatprep.mubr.bf16.mxu0 %v14129_v20  ;;  %7328 = vmatprep.mubr.bf16.mxu1 %v14129_v20  ;;  %v162_v12 = vld [vmem:[#allocation2 + $0x2c0] sm:$0xff] }
 0x195   :  { %6778 = vmatpush1.bf16.msra.mxu0 %v12071_v27  ;;  %7362 = vmatpush1.bf16.msra.mxu1 %v12073_v31  ;;  %v950_v27 = vld [vmem:[#allocation5 + $0x1560] sm:$0xff]  ;;  %v14143_v31 = vpack.c.bf16 %v162_v12, %v146_v11 }
 0x196   :  { %6779 = vmatprep.subr.bf16.mxu0 %v12080_v33  ;;  %7363 = vmatprep.subr.bf16.mxu1 %v12082_v36  ;;  %v179_v33 = vld [vmem:[#allocation2 + $0x348] sm:$0xff]  ;;  %v12104_v43 = vcombine.high %v946_v23, %v950_v27  ;;  %v962_v11 = vld [vmem:[#allocation5 + $0x15c0] sm:$0xff] }
 0x197   :  { %14544 = vst [vmem:[#allocation15_spill] sm:$0xff] %v14143_v31  ;;  %v195_v36 = vld [vmem:[#allocation2 + $0x3c8] sm:$0xff]  ;;  %v966_v12 = vld [vmem:[#allocation5 + $0x15e0] sm:$0xff] }
 0x198   :  { %6745 = vmatmul.mubr.bf16.gmra.mrb[4].mxu0 %v14135_v46  ;;  %7329 = vmatmul.mubr.bf16.gmra.mrb[4].mxu1 %v14135_v46  ;;  %v12120_v30 = vcombine.high %v962_v11, %v966_v12 }
 0x199   :  { %6780 = vmatpush1.bf16.msra.mxu0 %v12079_v51  ;;  %7364 = vmatpush1.bf16.msra.mxu1 %v12081_v52  ;;  %v14145_v51 = vpack.c.bf16 %v195_v36, %v179_v33  ;;  %v955_v52 = vld [vmem:[#allocation5 + $0x1588] sm:$0xff]  ;;  %v12111_v33 = vcombine.low %v954_v48, %v958_v50 }
 0x19a   :  { %6781 = vmatprep.subr.bf16.mxu0 %v12088_v55  ;;  %7365 = vmatprep.subr.bf16.mxu1 %v12090_v60  ;;  %v959_v55 = vld [vmem:[#allocation5 + $0x15a8] sm:$0xff]  ;;  %v12103_v60 = vcombine.low %v946_v23, %v950_v27  ;;  %v85_v23 = vld [vmem:[#allocation2 + $0x58] sm:$0xff] }
 0x19b   :  { %6754 = vmatprep.mubr.bf16.mxu0 %v14137_v1  ;;  %7338 = vmatprep.mubr.bf16.mxu1 %v14137_v1  ;;  %14545 = vst [vmem:[#allocation16_spill] sm:$0xff] %v14145_v51  ;;  %v12114_v5 = vcombine.high %v955_v52, %v959_v55  ;;  %v101_v27 = vld [vmem:[#allocation2 + $0xd8] sm:$0xff]  ;;  %v12113_v28 = vcombine.low %v955_v52, %v959_v55  ;;  %v978_v55 = vld [vmem:[#allocation5 + $0x1640] sm:$0xff] }
 0x19d   :  { %6782 = vmatpush1.bf16.msra.mxu0 %v12087_v10  ;;  %7366 = vmatpush1.bf16.msra.mxu1 %v12089_v13  ;;  %v178_v10 = vld [vmem:[#allocation2 + $0x340] sm:$0xff]  ;;  %v963_v13 = vld [vmem:[#allocation5 + $0x15c8] sm:$0xff] }
 0x19e   :  { %6783 = vmatprep.subr.bf16.mxu0 %v12096_v14  ;;  %7367 = vmatprep.subr.bf16.mxu1 %v12098_v21  ;;  %v967_v14 = vld [vmem:[#allocation5 + $0x15e8] sm:$0xff]  ;;  %v14151_v21 = vpack.c.bf16 %v194_v62, %v178_v10  ;;  %v12119_v10 = vcombine.low %v962_v11, %v966_v12 }
 0x19f   :  { %v12122_v36 = vcombine.high %v963_v13, %v967_v14  ;;  %v12121_v48 = vcombine.low %v963_v13, %v967_v14  ;;  %v979_v62 = vld [vmem:[#allocation5 + $0x1648] sm:$0xff]  ;;  %v986_v13 = vld [vmem:[#allocation5 + $0x1680] sm:$0xff] }
 0x1a0   :  { %6755 = vmatmul.mubr.bf16.gmra.mrb[8].mxu0 %v14143_v31  ;;  %7339 = vmatmul.mubr.bf16.gmra.mrb[8].mxu1 %v14143_v31  ;;  %14546 = vst [vmem:[#allocation17_spill] sm:$0xff] %v14151_v21  ;;  %v975_v31 = vld [vmem:[#allocation5 + $0x1628] sm:$0xff]  ;;  %v990_v14 = vld [vmem:[#allocation5 + $0x16a0] sm:$0xff] }
 0x1a1   :  { %6784 = vmatpush1.bf16.msra.mxu0 %v12095_v40  ;;  %7368 = vmatpush1.bf16.msra.mxu1 %v12097_v41  ;;  %v970_v40 = vld [vmem:[#allocation5 + $0x1600] sm:$0xff] }
 0x1a2   :  { %6785 = vmatprep.subr.bf16.mxu0 %v12104_v43  ;;  %7369 = vmatprep.subr.bf16.mxu1 %v12106_v45  ;;  %v974_v41 = vld [vmem:[#allocation5 + $0x1620] sm:$0xff]  ;;  %v14153_v43 = vpack.c.bf16 %v101_v27, %v85_v23  ;;  %v971_v45 = vld [vmem:[#allocation5 + $0x1608] sm:$0xff] }
 0x1a3   :  { %6764 = vmatprep.mubr.bf16.mxu0 %v14145_v51  ;;  %7348 = vmatprep.mubr.bf16.mxu1 %v14145_v51  ;;  %v12128_v50 = vcombine.high %v970_v40, %v974_v41  ;;  %v12130_v52 = vcombine.high %v971_v45, %v975_v31  ;;  %v987_v23 = vld [vmem:[#allocation5 + $0x1688] sm:$0xff] }
 0x1a4   :  { %14547 = vst [vmem:[#allocation18_spill] sm:$0xff] %v14153_v43  ;;  %v991_v27 = vld [vmem:[#allocation5 + $0x16a8] sm:$0xff] }
 0x1a5   :  { %6786 = vmatpush1.bf16.msra.mxu0 %v12103_v60  ;;  %7370 = vmatpush1.bf16.msra.mxu1 %v12105_v0  ;;  %v982_v60 = vld [vmem:[#allocation5 + $0x1660] sm:$0xff]  ;;  %v983_v0 = vld [vmem:[#allocation5 + $0x1668] sm:$0xff] }
 0x1a6   :  { %6787 = vmatprep.subr.bf16.mxu0 %v12112_v2  ;;  %7371 = vmatprep.subr.bf16.mxu1 %v12114_v5  ;;  %v12127_v2 = vcombine.low %v970_v40, %v974_v41  ;;  %v12129_v5 = vcombine.low %v971_v45, %v975_v31  ;;  %v12136_v11 = vcombine.high %v978_v55, %v982_v60  ;;  %v998_v40 = vld [vmem:[#allocation5 + $0x16e0] sm:$0xff]  ;;  %v995_v41 = vld [vmem:[#allocation5 + $0x16c8] sm:$0xff] }
 0x1a7   :  { %v12138_v12 = vcombine.high %v979_v62, %v983_v0  ;;  %v12143_v31 = vcombine.low %v986_v13, %v990_v14  ;;  %v12145_v45 = vcombine.low %v987_v23, %v991_v27  ;;  %v1071_v51 = vld [vmem:[#allocation5 + $0x1928] sm:$0xff] }
 0x1a8   :  { %6765 = vmatmul.mubr.bf16.gmra.mrb[12].mxu0 %v14151_v21  ;;  %7349 = vmatmul.mubr.bf16.gmra.mrb[12].mxu1 %v14151_v21 }
 0x1a9   :  { %6788 = vmatpush1.bf16.msra.mxu0 %v12111_v33  ;;  %7372 = vmatpush1.bf16.msra.mxu1 %v12113_v28  ;;  %v12135_v33 = vcombine.low %v978_v55, %v982_v60  ;;  %v12137_v28 = vcombine.low %v979_v62, %v983_v0  ;;  %v1006_v55 = vld [vmem:[#allocation5 + $0x1720] sm:$0xff]  ;;  %v1003_v60 = vld [vmem:[#allocation5 + $0x1708] sm:$0xff] }
 0x1aa   :  { %6789 = vmatprep.subr.bf16.mxu0 %v12120_v30  ;;  %7373 = vmatprep.subr.bf16.mxu1 %v12122_v36  ;;  %v12144_v30 = vcombine.high %v986_v13, %v990_v14  ;;  %v12146_v36 = vcombine.high %v987_v23, %v991_v27  ;;  %v1014_v13 = vld [vmem:[#allocation5 + $0x1760] sm:$0xff]  ;;  %v1011_v14 = vld [vmem:[#allocation5 + $0x1748] sm:$0xff] }
 0x1ab   :  { %6807 = vmatprep.mubr.bf16.mxu0 %v14153_v43  ;;  %7391 = vmatprep.mubr.bf16.mxu1 %v14153_v43 }
 0x1ad   :  { %6790 = vmatpush1.bf16.msra.mxu0 %v12119_v10  ;;  %7374 = vmatpush1.bf16.msra.mxu1 %v12121_v48  ;;  %v994_v10 = vld [vmem:[#allocation5 + $0x16c0] sm:$0xff]  ;;  %v999_v48 = vld [vmem:[#allocation5 + $0x16e8] sm:$0xff] }
 0x1ae   :  { %6791 = vmatprep.subr.bf16.mxu0 %v12128_v50  ;;  %7375 = vmatprep.subr.bf16.mxu1 %v12130_v52  ;;  %v12152_v50 = vcombine.high %v994_v10, %v998_v40  ;;  %v12154_v52 = vcombine.high %v995_v41, %v999_v48  ;;  %v12151_v62 = vcombine.low %v994_v10, %v998_v40  ;;  %v1022_v10 = vld [vmem:[#allocation5 + $0x17a0] sm:$0xff]  ;;  %v1019_v40 = vld [vmem:[#allocation5 + $0x1788] sm:$0xff] }
 0x1af   :  { %v12153_v0 = vcombine.low %v995_v41, %v999_v48 }
 0x1b1   :  { %6792 = vmatpush1.bf16.msra.mxu0 %v12127_v2  ;;  %7376 = vmatpush1.bf16.msra.mxu1 %v12129_v5  ;;  %v1002_v2 = vld [vmem:[#allocation5 + $0x1700] sm:$0xff]  ;;  %v1007_v5 = vld [vmem:[#allocation5 + $0x1728] sm:$0xff] }
 0x1b2   :  { %6793 = vmatprep.subr.bf16.mxu0 %v12136_v11  ;;  %7377 = vmatprep.subr.bf16.mxu1 %v12138_v12  ;;  %v12160_v11 = vcombine.high %v1002_v2, %v1006_v55  ;;  %v12162_v12 = vcombine.high %v1003_v60, %v1007_v5  ;;  %v12159_v23 = vcombine.low %v1002_v2, %v1006_v55  ;;  %v1030_v2 = vld [vmem:[#allocation5 + $0x17e0] sm:$0xff]  ;;  %v1027_v55 = vld [vmem:[#allocation5 + $0x17c8] sm:$0xff] }
 0x1b3   :  { %v12161_v27 = vcombine.low %v1003_v60, %v1007_v5 }
 0x1b5   :  { %6794 = vmatpush1.bf16.msra.mxu0 %v12135_v33  ;;  %7378 = vmatpush1.bf16.msra.mxu1 %v12137_v28  ;;  %v1010_v33 = vld [vmem:[#allocation5 + $0x1740] sm:$0xff]  ;;  %v1015_v28 = vld [vmem:[#allocation5 + $0x1768] sm:$0xff] }
 0x1b6   :  { %6795 = vmatprep.subr.bf16.mxu0 %v12144_v30  ;;  %7379 = vmatprep.subr.bf16.mxu1 %v12146_v36  ;;  %v12168_v30 = vcombine.high %v1010_v33, %v1014_v13  ;;  %v12170_v36 = vcombine.high %v1011_v14, %v1015_v28  ;;  %v12167_v41 = vcombine.low %v1010_v33, %v1014_v13  ;;  %v1038_v33 = vld [vmem:[#allocation5 + $0x1820] sm:$0xff]  ;;  %v1035_v13 = vld [vmem:[#allocation5 + $0x1808] sm:$0xff] }
 0x1b7   :  { %v12169_v48 = vcombine.low %v1011_v14, %v1015_v28  ;;  %v84_v28 = vld [vmem:[#allocation2 + $0x50] sm:$0xff] }
 0x1b9   :  { %6796 = vmatpush1.bf16.msra.mxu0 %v12143_v31  ;;  %7380 = vmatpush1.bf16.msra.mxu1 %v12145_v45  ;;  %v1018_v31 = vld [vmem:[#allocation5 + $0x1780] sm:$0xff]  ;;  %v1023_v45 = vld [vmem:[#allocation5 + $0x17a8] sm:$0xff] }
 0x1ba   :  { %6797 = vmatprep.subr.bf16.mxu0 %v12152_v50  ;;  %7381 = vmatprep.subr.bf16.mxu1 %v12154_v52  ;;  %v12176_v50 = vcombine.high %v1018_v31, %v1022_v10  ;;  %v12178_v52 = vcombine.high %v1019_v40, %v1023_v45  ;;  %v12175_v60 = vcombine.low %v1018_v31, %v1022_v10  ;;  %v1042_v10 = vld [vmem:[#allocation5 + $0x1840] sm:$0xff] }
 0x1bb   :  { %v12177_v5 = vcombine.low %v1019_v40, %v1023_v45  ;;  %v1043_v40 = vld [vmem:[#allocation5 + $0x1848] sm:$0xff] }
 0x1bd   :  { %6798 = vmatpush1.bf16.msra.mxu0 %v12151_v62  ;;  %7382 = vmatpush1.bf16.msra.mxu1 %v12153_v0  ;;  %v1026_v62 = vld [vmem:[#allocation5 + $0x17c0] sm:$0xff]  ;;  %v1031_v0 = vld [vmem:[#allocation5 + $0x17e8] sm:$0xff] }
 0x1be   :  { %6799 = vmatprep.subr.bf16.mxu0 %v12160_v11  ;;  %7383 = vmatprep.subr.bf16.mxu1 %v12162_v12  ;;  %v12184_v11 = vcombine.high %v1026_v62, %v1030_v2  ;;  %v12186_v12 = vcombine.high %v1027_v55, %v1031_v0  ;;  %v12183_v14 = vcombine.low %v1026_v62, %v1030_v2 }
 0x1c1   :  { %6800 = vmatpush1.bf16.msra.mxu0 %v12159_v23  ;;  %7384 = vmatpush1.bf16.msra.mxu1 %v12161_v27  ;;  %v1034_v23 = vld [vmem:[#allocation5 + $0x1800] sm:$0xff]  ;;  %v1039_v27 = vld [vmem:[#allocation5 + $0x1828] sm:$0xff] }
 0x1c2   :  { %6801 = vmatprep.subr.bf16.mxu0 %v12168_v30  ;;  %7385 = vmatprep.subr.bf16.mxu1 %v12170_v36  ;;  %v100_v30 = vld [vmem:[#allocation2 + $0xd0] sm:$0xff]  ;;  %v12185_v36 = vcombine.low %v1027_v55, %v1031_v0  ;;  %v12192_v43 = vcombine.high %v1034_v23, %v1038_v33  ;;  %v12194_v31 = vcombine.high %v1035_v13, %v1039_v27  ;;  %v1050_v55 = vld [vmem:[#allocation5 + $0x1880] sm:$0xff] }
 0x1c3   :  { %v14159_v45 = vpack.c.bf16 %v100_v30, %v84_v28  ;;  %v12191_v21 = vcombine.low %v1034_v23, %v1038_v33  ;;  %v12193_v62 = vcombine.low %v1035_v13, %v1039_v27  ;;  %v1054_v0 = vld [vmem:[#allocation5 + $0x18a0] sm:$0xff]  ;;  %v132_v23 = vld [vmem:[#allocation2 + $0x1d0] sm:$0xff] }
 0x1c4   :  { %v12208_v33 = vcombine.high %v1050_v55, %v1054_v0  ;;  %v1058_v27 = vld [vmem:[#allocation5 + $0x18c0] sm:$0xff] }
 0x1c5   :  { %6802 = vmatpush1.bf16.msra.mxu0 %v12167_v41  ;;  %7386 = vmatpush1.bf16.msra.mxu1 %v12169_v48  ;;  %v1046_v41 = vld [vmem:[#allocation5 + $0x1860] sm:$0xff]  ;;  %14548 = vst [vmem:[#allocation19_spill] sm:$0xff] %v14159_v45  ;;  %v1047_v48 = vld [vmem:[#allocation5 + $0x1868] sm:$0xff] }
 0x1c6   :  { %6803 = vmatprep.subr.bf16.mxu0 %v12176_v50  ;;  %7387 = vmatprep.subr.bf16.mxu1 %v12178_v52  ;;  %v117_v50 = vld [vmem:[#allocation2 + $0x158] sm:$0xff]  ;;  %v12200_v2 = vcombine.high %v1042_v10, %v1046_v41  ;;  %v12199_v28 = vcombine.low %v1042_v10, %v1046_v41  ;;  %v1062_v30 = vld [vmem:[#allocation5 + $0x18e0] sm:$0xff]  ;;  %v12207_v41 = vcombine.low %v1050_v55, %v1054_v0  ;;  %v164_v55 = vld [vmem:[#allocation2 + $0x2d0] sm:$0xff] }
 0x1c7   :  { %v133_v52 = vld [vmem:[#allocation2 + $0x1d8] sm:$0xff] }
 0x1c8   :  { %v165_v10 = vld [vmem:[#allocation2 + $0x2d8] sm:$0xff] }
 0x1c9   :  { %6804 = vmatpush1.bf16.msra.mxu0 %v12175_v60  ;;  %7388 = vmatpush1.bf16.msra.mxu1 %v12177_v5  ;;  %v12202_v60 = vcombine.high %v1043_v40, %v1047_v48  ;;  %v14161_v5 = vpack.c.bf16 %v133_v52, %v117_v50  ;;  %v149_v50 = vld [vmem:[#allocation2 + $0x258] sm:$0xff] }
 0x1ca   :  { %6805 = vmatprep.subr.bf16.mxu0 %v12184_v11  ;;  %7389 = vmatprep.subr.bf16.mxu1 %v12186_v12  ;;  %v1051_v11 = vld [vmem:[#allocation5 + $0x1888] sm:$0xff] }
 0x1cb   :  { %14549 = vst [vmem:[#allocation20_spill] sm:$0xff] %v14161_v5  ;;  %v1055_v12 = vld [vmem:[#allocation5 + $0x18a8] sm:$0xff] }
 0x1cc   :  { %v12210_v13 = vcombine.high %v1051_v11, %v1055_v12 }
 0x1cd   :  { %6806 = vmatpush1.bf16.msra.mxu0 %v12183_v14  ;;  %7390 = vmatpush1.bf16.msra.mxu1 %v12185_v36  ;;  %v116_v14 = vld [vmem:[#allocation2 + $0x150] sm:$0xff]  ;;  %v1059_v36 = vld [vmem:[#allocation5 + $0x18c8] sm:$0xff] }
 0x1ce   :  { %6848 = vmatprep.subr.bf16.mxu0 %v12192_v43  ;;  %7432 = vmatprep.subr.bf16.mxu1 %v12194_v31  ;;  %v12201_v43 = vcombine.low %v1043_v40, %v1047_v48  ;;  %v1063_v31 = vld [vmem:[#allocation5 + $0x18e8] sm:$0xff]  ;;  %v12209_v40 = vcombine.low %v1051_v11, %v1055_v12  ;;  %v12216_v48 = vcombine.high %v1058_v27, %v1062_v30 }
 0x1cf   :  { %v12218_v52 = vcombine.high %v1059_v36, %v1063_v31  ;;  %v12217_v0 = vcombine.low %v1059_v36, %v1063_v31 }
 0x1d0   :  { %6808 = vmatmul.mubr.bf16.vlgmr.msra.gmra.mrb[0].mxu0 %v14159_v45  ;;  %7392 = vmatmul.mubr.bf16.vlgmr.msra.gmra.mrb[0].mxu1 %v14159_v45  ;;  %v1067_v45 = vld [vmem:[#allocation5 + $0x1908] sm:$0xff] }
 0x1d1   :  { %6849 = vmatpush1.bf16.msra.mxu0 %v12191_v21  ;;  %7433 = vmatpush1.bf16.msra.mxu1 %v12193_v62  ;;  %v14167_v21 = vpack.c.bf16 %v132_v23, %v116_v14  ;;  %v1066_v62 = vld [vmem:[#allocation5 + $0x1900] sm:$0xff]  ;;  %v12215_v14 = vcombine.low %v1058_v27, %v1062_v30  ;;  %v12226_v12 = vcombine.high %v1067_v45, %v1071_v51  ;;  %v181_v27 = vld [vmem:[#allocation2 + $0x358] sm:$0xff] }
 0x1d2   :  { %6850 = vmatprep.subr.bf16.mxu0 %v12200_v2  ;;  %7434 = vmatprep.subr.bf16.mxu1 %v12202_v60  ;;  %v1070_v2 = vld [vmem:[#allocation5 + $0x1920] sm:$0xff]  ;;  %v14169_v60 = vpack.c.bf16 %v165_v10, %v149_v50  ;;  %v197_v30 = vld [vmem:[#allocation2 + $0x3d8] sm:$0xff]  ;;  %v12225_v36 = vcombine.low %v1067_v45, %v1071_v51 }
 0x1d3   :  { %6817 = vmatprep.mubr.bf16.mxu0 %v14161_v5  ;;  %7401 = vmatprep.mubr.bf16.mxu1 %v14161_v5  ;;  %14550 = vst [vmem:[#allocation21_spill] sm:$0xff] %v14167_v21  ;;  %v12224_v11 = vcombine.high %v1066_v62, %v1070_v2  ;;  %v1074_v23 = vld [vmem:[#allocation5 + $0x1940] sm:$0xff]  ;;  %v12223_v10 = vcombine.low %v1066_v62, %v1070_v2  ;;  %v1087_v5 = vld [vmem:[#allocation5 + $0x19a8] sm:$0xff]  ;;  %v196_v62 = vld [vmem:[#allocation2 + $0x3d0] sm:$0xff] }
 0x1d4   :  { %14551 = vst [vmem:[#allocation22_spill] sm:$0xff] %v14169_v60 }
 0x1d5   :  { %6851 = vmatpush1.bf16.msra.mxu0 %v12199_v28  ;;  %7435 = vmatpush1.bf16.msra.mxu1 %v12201_v43  ;;  %v148_v28 = vld [vmem:[#allocation2 + $0x250] sm:$0xff]  ;;  %v1078_v43 = vld [vmem:[#allocation5 + $0x1960] sm:$0xff] }
 0x1d6   :  { %6852 = vmatprep.subr.bf16.mxu0 %v12208_v33  ;;  %7436 = vmatprep.subr.bf16.mxu1 %v12210_v13  ;;  %v1075_v33 = vld [vmem:[#allocation5 + $0x1948] sm:$0xff]  ;;  %v14175_v50 = vpack.c.bf16 %v164_v55, %v148_v28  ;;  %v12232_v31 = vcombine.high %v1074_v23, %v1078_v43  ;;  %v12231_v28 = vcombine.low %v1074_v23, %v1078_v43  ;;  %v1090_v55 = vld [vmem:[#allocation5 + $0x19c0] sm:$0xff] }
 0x1d7   :  { %v1079_v13 = vld [vmem:[#allocation5 + $0x1968] sm:$0xff] }
 0x1d8   :  { %6818 = vmatmul.mubr.bf16.gmra.mrb[4].mxu0 %v14167_v21  ;;  %7402 = vmatmul.mubr.bf16.gmra.mrb[4].mxu1 %v14167_v21  ;;  %14552 = vst [vmem:[#allocation23_spill] sm:$0xff] %v14175_v50  ;;  %v1083_v21 = vld [vmem:[#allocation5 + $0x1988] sm:$0xff]  ;;  %v12233_v51 = vcombine.low %v1075_v33, %v1079_v13 }
 0x1d9   :  { %6853 = vmatpush1.bf16.msra.mxu0 %v12207_v41  ;;  %7437 = vmatpush1.bf16.msra.mxu1 %v12209_v40  ;;  %v12234_v41 = vcombine.high %v1075_v33, %v1079_v13  ;;  %v1082_v40 = vld [vmem:[#allocation5 + $0x1980] sm:$0xff]  ;;  %v12242_v2 = vcombine.high %v1083_v21, %v1087_v5  ;;  %v87_v23 = vld [vmem:[#allocation2 + $0x68] sm:$0xff]  ;;  %v12241_v33 = vcombine.low %v1083_v21, %v1087_v5 }
 0x1da   :  { %6854 = vmatprep.subr.bf16.mxu0 %v12216_v48  ;;  %7438 = vmatprep.subr.bf16.mxu1 %v12218_v52  ;;  %v1086_v48 = vld [vmem:[#allocation5 + $0x19a0] sm:$0xff]  ;;  %v14177_v52 = vpack.c.bf16 %v197_v30, %v181_v27  ;;  %v103_v43 = vld [vmem:[#allocation2 + $0xe8] sm:$0xff] }
 0x1db   :  { %6827 = vmatprep.mubr.bf16.mxu0 %v14169_v60  ;;  %7411 = vmatprep.mubr.bf16.mxu1 %v14169_v60  ;;  %v12240_v45 = vcombine.high %v1082_v40, %v1086_v48  ;;  %v12239_v30 = vcombine.low %v1082_v40, %v1086_v48  ;;  %v1103_v60 = vld [vmem:[#allocation5 + $0x1a28] sm:$0xff]  ;;  %v1106_v21 = vld [vmem:[#allocation5 + $0x1a40] sm:$0xff] }
 0x1dc   :  { %14553 = vst [vmem:[#allocation24_spill] sm:$0xff] %v14177_v52 }
 0x1dd   :  { %6855 = vmatpush1.bf16.msra.mxu0 %v12215_v14  ;;  %7439 = vmatpush1.bf16.msra.mxu1 %v12217_v0  ;;  %v180_v14 = vld [vmem:[#allocation2 + $0x350] sm:$0xff]  ;;  %v1094_v0 = vld [vmem:[#allocation5 + $0x19e0] sm:$0xff] }
 0x1de   :  { %6856 = vmatprep.subr.bf16.mxu0 %v12224_v11  ;;  %7440 = vmatprep.subr.bf16.mxu1 %v12226_v12  ;;  %v1091_v11 = vld [vmem:[#allocation5 + $0x19c8] sm:$0xff]  ;;  %v14183_v27 = vpack.c.bf16 %v196_v62, %v180_v14  ;;  %v12248_v13 = vcombine.high %v1090_v55, %v1094_v0  ;;  %v12247_v14 = vcombine.low %v1090_v55, %v1094_v0 }
 0x1df   :  { %v1095_v12 = vld [vmem:[#allocation5 + $0x19e8] sm:$0xff] }
 0x1e0   :  { %6828 = vmatmul.mubr.bf16.gmra.mrb[8].mxu0 %v14175_v50  ;;  %7412 = vmatmul.mubr.bf16.gmra.mrb[8].mxu1 %v14175_v50  ;;  %14554 = vst [vmem:[#allocation25_spill] sm:$0xff] %v14183_v27  ;;  %v1099_v50 = vld [vmem:[#allocation5 + $0x1a08] sm:$0xff]  ;;  %v12249_v40 = vcombine.low %v1091_v11, %v1095_v12 }
 0x1e1   :  { %6857 = vmatpush1.bf16.msra.mxu0 %v12223_v10  ;;  %7441 = vmatpush1.bf16.msra.mxu1 %v12225_v36  ;;  %v12250_v10 = vcombine.high %v1091_v11, %v1095_v12  ;;  %v1098_v36 = vld [vmem:[#allocation5 + $0x1a00] sm:$0xff]  ;;  %v12258_v5 = vcombine.high %v1099_v50, %v1103_v60  ;;  %v1107_v62 = vld [vmem:[#allocation5 + $0x1a48] sm:$0xff] }
 0x1e2   :  { %6858 = vmatprep.subr.bf16.mxu0 %v12232_v31  ;;  %7442 = vmatprep.subr.bf16.mxu1 %v12234_v41  ;;  %v1102_v31 = vld [vmem:[#allocation5 + $0x1a20] sm:$0xff]  ;;  %v14185_v41 = vpack.c.bf16 %v103_v43, %v87_v23  ;;  %v1115_v23 = vld [vmem:[#allocation5 + $0x1a88] sm:$0xff] }
 0x1e3   :  { %6837 = vmatprep.mubr.bf16.mxu0 %v14177_v52  ;;  %7421 = vmatprep.mubr.bf16.mxu1 %v14177_v52  ;;  %v12256_v48 = vcombine.high %v1098_v36, %v1102_v31  ;;  %v1114_v11 = vld [vmem:[#allocation5 + $0x1a80] sm:$0xff]  ;;  %v1119_v43 = vld [vmem:[#allocation5 + $0x1aa8] sm:$0xff] }
 0x1e4   :  { %14555 = vst [vmem:[#allocation26_spill] sm:$0xff] %v14185_v41  ;;  %v1118_v12 = vld [vmem:[#allocation5 + $0x1aa0] sm:$0xff]  ;;  %v1199_v52 = vld [vmem:[#allocation5 + $0x1d28] sm:$0xff] }
 0x1e5   :  { %6859 = vmatpush1.bf16.msra.mxu0 %v12231_v28  ;;  %7443 = vmatpush1.bf16.msra.mxu1 %v12233_v51  ;;  %v1110_v28 = vld [vmem:[#allocation5 + $0x1a60] sm:$0xff]  ;;  %v1111_v51 = vld [vmem:[#allocation5 + $0x1a68] sm:$0xff] }
 0x1e6   :  { %6860 = vmatprep.subr.bf16.mxu0 %v12240_v45  ;;  %7444 = vmatprep.subr.bf16.mxu1 %v12242_v2  ;;  %v12255_v45 = vcombine.low %v1098_v36, %v1102_v31  ;;  %v12257_v2 = vcombine.low %v1099_v50, %v1103_v60  ;;  %v12264_v55 = vcombine.high %v1106_v21, %v1110_v28  ;;  %v1126_v36 = vld [vmem:[#allocation5 + $0x1ae0] sm:$0xff]  ;;  %v1123_v31 = vld [vmem:[#allocation5 + $0x1ac8] sm:$0xff] }
 0x1e7   :  { %v12266_v0 = vcombine.high %v1107_v62, %v1111_v51  ;;  %v12271_v60 = vcombine.low %v1114_v11, %v1118_v12  ;;  %v12273_v50 = vcombine.low %v1115_v23, %v1119_v43 }
 0x1e8   :  { %6838 = vmatmul.mubr.bf16.gmra.mrb[12].mxu0 %v14183_v27  ;;  %7422 = vmatmul.mubr.bf16.gmra.mrb[12].mxu1 %v14183_v27 }
 0x1e9   :  { %6861 = vmatpush1.bf16.msra.mxu0 %v12239_v30  ;;  %7445 = vmatpush1.bf16.msra.mxu1 %v12241_v33  ;;  %v12263_v30 = vcombine.low %v1106_v21, %v1110_v28  ;;  %v12265_v33 = vcombine.low %v1107_v62, %v1111_v51  ;;  %v1134_v21 = vld [vmem:[#allocation5 + $0x1b20] sm:$0xff]  ;;  %v1131_v28 = vld [vmem:[#allocation5 + $0x1b08] sm:$0xff] }
 0x1ea   :  { %6862 = vmatprep.subr.bf16.mxu0 %v12248_v13  ;;  %7446 = vmatprep.subr.bf16.mxu1 %v12250_v10  ;;  %v12272_v13 = vcombine.high %v1114_v11, %v1118_v12  ;;  %v12274_v10 = vcombine.high %v1115_v23, %v1119_v43  ;;  %v1142_v11 = vld [vmem:[#allocation5 + $0x1b60] sm:$0xff]  ;;  %v1139_v12 = vld [vmem:[#allocation5 + $0x1b48] sm:$0xff] }
 0x1eb   :  { %6880 = vmatprep.mubr.bf16.mxu0 %v14185_v41  ;;  %7464 = vmatprep.mubr.bf16.mxu1 %v14185_v41 }
 0x1ed   :  { %6863 = vmatpush1.bf16.msra.mxu0 %v12247_v14  ;;  %7447 = vmatpush1.bf16.msra.mxu1 %v12249_v40  ;;  %v1122_v14 = vld [vmem:[#allocation5 + $0x1ac0] sm:$0xff]  ;;  %v1127_v40 = vld [vmem:[#allocation5 + $0x1ae8] sm:$0xff] }
 0x1ee   :  { %6864 = vmatprep.subr.bf16.mxu0 %v12256_v48  ;;  %7448 = vmatprep.subr.bf16.mxu1 %v12258_v5  ;;  %v12280_v48 = vcombine.high %v1122_v14, %v1126_v36  ;;  %v12282_v5 = vcombine.high %v1123_v31, %v1127_v40  ;;  %v12279_v62 = vcombine.low %v1122_v14, %v1126_v36  ;;  %v1150_v14 = vld [vmem:[#allocation5 + $0x1ba0] sm:$0xff]  ;;  %v1147_v36 = vld [vmem:[#allocation5 + $0x1b88] sm:$0xff] }
 0x1ef   :  { %v12281_v51 = vcombine.low %v1123_v31, %v1127_v40 }
 0x1f1   :  { %6865 = vmatpush1.bf16.msra.mxu0 %v12255_v45  ;;  %7449 = vmatpush1.bf16.msra.mxu1 %v12257_v2  ;;  %v1130_v45 = vld [vmem:[#allocation5 + $0x1b00] sm:$0xff]  ;;  %v1135_v2 = vld [vmem:[#allocation5 + $0x1b28] sm:$0xff] }
 0x1f2   :  { %6866 = vmatprep.subr.bf16.mxu0 %v12264_v55  ;;  %7450 = vmatprep.subr.bf16.mxu1 %v12266_v0  ;;  %v12288_v55 = vcombine.high %v1130_v45, %v1134_v21  ;;  %v12290_v0 = vcombine.high %v1131_v28, %v1135_v2  ;;  %v12287_v23 = vcombine.low %v1130_v45, %v1134_v21  ;;  %v1158_v45 = vld [vmem:[#allocation5 + $0x1be0] sm:$0xff]  ;;  %v1155_v21 = vld [vmem:[#allocation5 + $0x1bc8] sm:$0xff] }
 0x1f3   :  { %v12289_v43 = vcombine.low %v1131_v28, %v1135_v2 }
 0x1f5   :  { %6867 = vmatpush1.bf16.msra.mxu0 %v12263_v30  ;;  %7451 = vmatpush1.bf16.msra.mxu1 %v12265_v33  ;;  %v1138_v30 = vld [vmem:[#allocation5 + $0x1b40] sm:$0xff]  ;;  %v1143_v33 = vld [vmem:[#allocation5 + $0x1b68] sm:$0xff] }
 0x1f6   :  { %6868 = vmatprep.subr.bf16.mxu0 %v12272_v13  ;;  %7452 = vmatprep.subr.bf16.mxu1 %v12274_v10  ;;  %v12296_v13 = vcombine.high %v1138_v30, %v1142_v11  ;;  %v12298_v10 = vcombine.high %v1139_v12, %v1143_v33  ;;  %v12295_v31 = vcombine.low %v1138_v30, %v1142_v11  ;;  %v1166_v30 = vld [vmem:[#allocation5 + $0x1c20] sm:$0xff]  ;;  %v1163_v11 = vld [vmem:[#allocation5 + $0x1c08] sm:$0xff] }
 0x1f7   :  { %v12297_v40 = vcombine.low %v1139_v12, %v1143_v33  ;;  %v86_v33 = vld [vmem:[#allocation2 + $0x60] sm:$0xff] }
 0x1f9   :  { %6869 = vmatpush1.bf16.msra.mxu0 %v12271_v60  ;;  %7453 = vmatpush1.bf16.msra.mxu1 %v12273_v50  ;;  %v1146_v60 = vld [vmem:[#allocation5 + $0x1b80] sm:$0xff]  ;;  %v1151_v50 = vld [vmem:[#allocation5 + $0x1ba8] sm:$0xff] }
 0x1fa   :  { %6870 = vmatprep.subr.bf16.mxu0 %v12280_v48  ;;  %7454 = vmatprep.subr.bf16.mxu1 %v12282_v5  ;;  %v12304_v48 = vcombine.high %v1146_v60, %v1150_v14  ;;  %v12306_v5 = vcombine.high %v1147_v36, %v1151_v50  ;;  %v12303_v28 = vcombine.low %v1146_v60, %v1150_v14  ;;  %v1170_v14 = vld [vmem:[#allocation5 + $0x1c40] sm:$0xff] }
 0x1fb   :  { %v12305_v2 = vcombine.low %v1147_v36, %v1151_v50  ;;  %v1171_v36 = vld [vmem:[#allocation5 + $0x1c48] sm:$0xff] }
 0x1fd   :  { %6871 = vmatpush1.bf16.msra.mxu0 %v12279_v62  ;;  %7455 = vmatpush1.bf16.msra.mxu1 %v12281_v51  ;;  %v1154_v62 = vld [vmem:[#allocation5 + $0x1bc0] sm:$0xff]  ;;  %v1159_v51 = vld [vmem:[#allocation5 + $0x1be8] sm:$0xff] }
 0x1fe   :  { %6872 = vmatprep.subr.bf16.mxu0 %v12288_v55  ;;  %7456 = vmatprep.subr.bf16.mxu1 %v12290_v0  ;;  %v12312_v55 = vcombine.high %v1154_v62, %v1158_v45  ;;  %v12314_v0 = vcombine.high %v1155_v21, %v1159_v51  ;;  %v12311_v12 = vcombine.low %v1154_v62, %v1158_v45 }
 0x201   :  { %6873 = vmatpush1.bf16.msra.mxu0 %v12287_v23  ;;  %7457 = vmatpush1.bf16.msra.mxu1 %v12289_v43  ;;  %v1162_v23 = vld [vmem:[#allocation5 + $0x1c00] sm:$0xff]  ;;  %v1167_v43 = vld [vmem:[#allocation5 + $0x1c28] sm:$0xff] }
 0x202   :  { %6874 = vmatprep.subr.bf16.mxu0 %v12296_v13  ;;  %7458 = vmatprep.subr.bf16.mxu1 %v12298_v10  ;;  %v102_v13 = vld [vmem:[#allocation2 + $0xe0] sm:$0xff]  ;;  %v12313_v10 = vcombine.low %v1155_v21, %v1159_v51  ;;  %v12320_v41 = vcombine.high %v1162_v23, %v1166_v30  ;;  %v12322_v60 = vcombine.high %v1163_v11, %v1167_v43 }
 0x203   :  { %v14191_v50 = vpack.c.bf16 %v102_v13, %v86_v33  ;;  %v12319_v27 = vcombine.low %v1162_v23, %v1166_v30  ;;  %v12321_v62 = vcombine.low %v1163_v11, %v1167_v43  ;;  %v1178_v21 = vld [vmem:[#allocation5 + $0x1c80] sm:$0xff] }
 0x204   :  { %v1182_v51 = vld [vmem:[#allocation5 + $0x1ca0] sm:$0xff] }
 0x205   :  { %6875 = vmatpush1.bf16.msra.mxu0 %v12295_v31  ;;  %7459 = vmatpush1.bf16.msra.mxu1 %v12297_v40  ;;  %v1174_v31 = vld [vmem:[#allocation5 + $0x1c60] sm:$0xff]  ;;  %14556 = vst [vmem:[#allocation27_spill] sm:$0xff] %v14191_v50  ;;  %v1175_v40 = vld [vmem:[#allocation5 + $0x1c68] sm:$0xff]  ;;  %v12336_v30 = vcombine.high %v1178_v21, %v1182_v51 }
 0x206   :  { %6876 = vmatprep.subr.bf16.mxu0 %v12304_v48  ;;  %7460 = vmatprep.subr.bf16.mxu1 %v12306_v5  ;;  %v119_v48 = vld [vmem:[#allocation2 + $0x168] sm:$0xff]  ;;  %v12328_v45 = vcombine.high %v1170_v14, %v1174_v31  ;;  %v12327_v33 = vcombine.low %v1170_v14, %v1174_v31  ;;  %v134_v23 = vld [vmem:[#allocation2 + $0x1e0] sm:$0xff]  ;;  %v12335_v31 = vcombine.low %v1178_v21, %v1182_v51 }
 0x207   :  { %v135_v5 = vld [vmem:[#allocation2 + $0x1e8] sm:$0xff]  ;;  %v1186_v43 = vld [vmem:[#allocation5 + $0x1cc0] sm:$0xff] }
 0x208   :  { %v1190_v13 = vld [vmem:[#allocation5 + $0x1ce0] sm:$0xff]  ;;  %v167_v14 = vld [vmem:[#allocation2 + $0x2e8] sm:$0xff] }
 0x209   :  { %6877 = vmatpush1.bf16.msra.mxu0 %v12303_v28  ;;  %7461 = vmatpush1.bf16.msra.mxu1 %v12305_v2  ;;  %v12330_v28 = vcombine.high %v1171_v36, %v1175_v40  ;;  %v14193_v2 = vpack.c.bf16 %v135_v5, %v119_v48  ;;  %v151_v48 = vld [vmem:[#allocation2 + $0x268] sm:$0xff]  ;;  %v166_v21 = vld [vmem:[#allocation2 + $0x2e0] sm:$0xff] }
 0x20a   :  { %6878 = vmatprep.subr.bf16.mxu0 %v12312_v55  ;;  %7462 = vmatprep.subr.bf16.mxu1 %v12314_v0  ;;  %v1179_v55 = vld [vmem:[#allocation5 + $0x1c88] sm:$0xff] }
 0x20b   :  { %14557 = vst [vmem:[#allocation28_spill] sm:$0xff] %v14193_v2  ;;  %v1183_v0 = vld [vmem:[#allocation5 + $0x1ca8] sm:$0xff] }
 0x20c   :  { %v12338_v11 = vcombine.high %v1179_v55, %v1183_v0 }
 0x20d   :  { %6879 = vmatpush1.bf16.msra.mxu0 %v12311_v12  ;;  %7463 = vmatpush1.bf16.msra.mxu1 %v12313_v10  ;;  %v118_v12 = vld [vmem:[#allocation2 + $0x160] sm:$0xff]  ;;  %v1187_v10 = vld [vmem:[#allocation5 + $0x1cc8] sm:$0xff] }
 0x20e   :  { %6921 = vmatprep.subr.bf16.mxu0 %v12320_v41  ;;  %7505 = vmatprep.subr.bf16.mxu1 %v12322_v60  ;;  %v12329_v41 = vcombine.low %v1171_v36, %v1175_v40  ;;  %v1191_v60 = vld [vmem:[#allocation5 + $0x1ce8] sm:$0xff]  ;;  %v12337_v36 = vcombine.low %v1179_v55, %v1183_v0  ;;  %v12344_v40 = vcombine.high %v1186_v43, %v1190_v13 }
 0x20f   :  { %v12346_v5 = vcombine.high %v1187_v10, %v1191_v60  ;;  %v12345_v51 = vcombine.low %v1187_v10, %v1191_v60 }
 0x210   :  { %6881 = vmatmul.mubr.bf16.vlgmr.msra.gmra.mrb[0].mxu0 %v14191_v50  ;;  %7465 = vmatmul.mubr.bf16.vlgmr.msra.gmra.mrb[0].mxu1 %v14191_v50  ;;  %v1195_v50 = vld [vmem:[#allocation5 + $0x1d08] sm:$0xff] }
 0x211   :  { %6922 = vmatpush1.bf16.msra.mxu0 %v12319_v27  ;;  %7506 = vmatpush1.bf16.msra.mxu1 %v12321_v62  ;;  %v14199_v27 = vpack.c.bf16 %v134_v23, %v118_v12  ;;  %v1194_v62 = vld [vmem:[#allocation5 + $0x1d00] sm:$0xff]  ;;  %v12343_v12 = vcombine.low %v1186_v43, %v1190_v13  ;;  %v12354_v0 = vcombine.high %v1195_v50, %v1199_v52  ;;  %v183_v43 = vld [vmem:[#allocation2 + $0x368] sm:$0xff] }
 0x212   :  { %6923 = vmatprep.subr.bf16.mxu0 %v12328_v45  ;;  %7507 = vmatprep.subr.bf16.mxu1 %v12330_v28  ;;  %v1198_v45 = vld [vmem:[#allocation5 + $0x1d20] sm:$0xff]  ;;  %v14201_v28 = vpack.c.bf16 %v167_v14, %v151_v48  ;;  %v199_v13 = vld [vmem:[#allocation2 + $0x3e8] sm:$0xff]  ;;  %v12353_v10 = vcombine.low %v1195_v50, %v1199_v52 }
 0x213   :  { %6890 = vmatprep.mubr.bf16.mxu0 %v14193_v2  ;;  %7474 = vmatprep.mubr.bf16.mxu1 %v14193_v2  ;;  %14558 = vst [vmem:[#allocation29_spill] sm:$0xff] %v14199_v27  ;;  %v12352_v55 = vcombine.high %v1194_v62, %v1198_v45  ;;  %v1202_v23 = vld [vmem:[#allocation5 + $0x1d40] sm:$0xff]  ;;  %v12351_v14 = vcombine.low %v1194_v62, %v1198_v45  ;;  %v1215_v2 = vld [vmem:[#allocation5 + $0x1da8] sm:$0xff] }
 0x214   :  { %14559 = vst [vmem:[#allocation30_spill] sm:$0xff] %v14201_v28  ;;  %v198_v62 = vld [vmem:[#allocation2 + $0x3e0] sm:$0xff] }
 0x215   :  { %6924 = vmatpush1.bf16.msra.mxu0 %v12327_v33  ;;  %7508 = vmatpush1.bf16.msra.mxu1 %v12329_v41  ;;  %v150_v33 = vld [vmem:[#allocation2 + $0x260] sm:$0xff] }
 0x216   :  { %6925 = vmatprep.subr.bf16.mxu0 %v12336_v30  ;;  %7509 = vmatprep.subr.bf16.mxu1 %v12338_v11  ;;  %v1206_v41 = vld [vmem:[#allocation5 + $0x1d60] sm:$0xff]  ;;  %v1203_v30 = vld [vmem:[#allocation5 + $0x1d48] sm:$0xff]  ;;  %v14207_v48 = vpack.c.bf16 %v166_v21, %v150_v33 }
 0x217   :  { %v1207_v11 = vld [vmem:[#allocation5 + $0x1d68] sm:$0xff]  ;;  %v12360_v60 = vcombine.high %v1202_v23, %v1206_v41  ;;  %v12359_v33 = vcombine.low %v1202_v23, %v1206_v41  ;;  %v1218_v21 = vld [vmem:[#allocation5 + $0x1dc0] sm:$0xff]  ;;  %v89_v23 = vld [vmem:[#allocation2 + $0x78] sm:$0xff] }
 0x218   :  { %6891 = vmatmul.mubr.bf16.gmra.mrb[4].mxu0 %v14199_v27  ;;  %7475 = vmatmul.mubr.bf16.gmra.mrb[4].mxu1 %v14199_v27  ;;  %14560 = vst [vmem:[#allocation31_spill] sm:$0xff] %v14207_v48  ;;  %v1211_v27 = vld [vmem:[#allocation5 + $0x1d88] sm:$0xff]  ;;  %v12361_v52 = vcombine.low %v1203_v30, %v1207_v11  ;;  %v105_v41 = vld [vmem:[#allocation2 + $0xf8] sm:$0xff] }
 0x219   :  { %6926 = vmatpush1.bf16.msra.mxu0 %v12335_v31  ;;  %7510 = vmatpush1.bf16.msra.mxu1 %v12337_v36  ;;  %v12362_v31 = vcombine.high %v1203_v30, %v1207_v11  ;;  %v1210_v36 = vld [vmem:[#allocation5 + $0x1d80] sm:$0xff]  ;;  %v12370_v45 = vcombine.high %v1211_v27, %v1215_v2  ;;  %v12369_v30 = vcombine.low %v1211_v27, %v1215_v2 }
 0x21a   :  { %6927 = vmatprep.subr.bf16.mxu0 %v12344_v40  ;;  %7511 = vmatprep.subr.bf16.mxu1 %v12346_v5  ;;  %v1214_v40 = vld [vmem:[#allocation5 + $0x1da0] sm:$0xff]  ;;  %v14209_v5 = vpack.c.bf16 %v199_v13, %v183_v43 }
 0x21b   :  { %6900 = vmatprep.mubr.bf16.mxu0 %v14201_v28  ;;  %7484 = vmatprep.mubr.bf16.mxu1 %v14201_v28  ;;  %v12368_v50 = vcombine.high %v1210_v36, %v1214_v40  ;;  %v12367_v13 = vcombine.low %v1210_v36, %v1214_v40  ;;  %v1231_v28 = vld [vmem:[#allocation5 + $0x1e28] sm:$0xff]  ;;  %v1234_v27 = vld [vmem:[#allocation5 + $0x1e40] sm:$0xff] }
 0x21d   :  { %6928 = vmatpush1.bf16.msra.mxu0 %v12343_v12  ;;  %7512 = vmatpush1.bf16.msra.mxu1 %v12345_v51  ;;  %v182_v12 = vld [vmem:[#allocation2 + $0x360] sm:$0xff] }
 0x21e   :  { %6929 = vmatprep.subr.bf16.mxu0 %v12352_v55  ;;  %7513 = vmatprep.subr.bf16.mxu1 %v12354_v0  ;;  %v1222_v51 = vld [vmem:[#allocation5 + $0x1de0] sm:$0xff]  ;;  %v1219_v55 = vld [vmem:[#allocation5 + $0x1dc8] sm:$0xff]  ;;  %v14215_v43 = vpack.c.bf16 %v198_v62, %v182_v12 }
 0x21f   :  { %v1223_v0 = vld [vmem:[#allocation5 + $0x1de8] sm:$0xff]  ;;  %v12376_v11 = vcombine.high %v1218_v21, %v1222_v51  ;;  %v12375_v12 = vcombine.low %v1218_v21, %v1222_v51 }
 0x220   :  { %6901 = vmatmul.mubr.bf16.gmra.mrb[8].mxu0 %v14207_v48  ;;  %7485 = vmatmul.mubr.bf16.gmra.mrb[8].mxu1 %v14207_v48  ;;  %14561 = vst [vmem:[#allocation32_spill] sm:$0xff] %v14215_v43  ;;  %v1227_v48 = vld [vmem:[#allocation5 + $0x1e08] sm:$0xff]  ;;  %v12377_v36 = vcombine.low %v1219_v55, %v1223_v0 }
 0x221   :  { %6930 = vmatpush1.bf16.msra.mxu0 %v12351_v14  ;;  %7514 = vmatpush1.bf16.msra.mxu1 %v12353_v10  ;;  %v12378_v14 = vcombine.high %v1219_v55, %v1223_v0  ;;  %v1226_v10 = vld [vmem:[#allocation5 + $0x1e00] sm:$0xff]  ;;  %v12386_v2 = vcombine.high %v1227_v48, %v1231_v28  ;;  %v1235_v62 = vld [vmem:[#allocation5 + $0x1e48] sm:$0xff] }
 0x222   :  { %6931 = vmatprep.subr.bf16.mxu0 %v12360_v60  ;;  %7515 = vmatprep.subr.bf16.mxu1 %v12362_v31  ;;  %v1230_v60 = vld [vmem:[#allocation5 + $0x1e20] sm:$0xff]  ;;  %v14217_v31 = vpack.c.bf16 %v105_v41, %v89_v23  ;;  %v1243_v23 = vld [vmem:[#allocation5 + $0x1e88] sm:$0xff] }
 0x223   :  { %6910 = vmatprep.mubr.bf16.mxu0 %v14209_v5  ;;  %7494 = vmatprep.mubr.bf16.mxu1 %v14209_v5  ;;  %v12384_v40 = vcombine.high %v1226_v10, %v1230_v60  ;;  %v1242_v55 = vld [vmem:[#allocation5 + $0x1e80] sm:$0xff]  ;;  %v1247_v41 = vld [vmem:[#allocation5 + $0x1ea8] sm:$0xff] }
 0x224   :  { %14562 = vst [vmem:[#allocation33_spill] sm:$0xff] %v14217_v31  ;;  %v1246_v0 = vld [vmem:[#allocation5 + $0x1ea0] sm:$0xff] }
 0x225   :  { %6932 = vmatpush1.bf16.msra.mxu0 %v12359_v33  ;;  %7516 = vmatpush1.bf16.msra.mxu1 %v12361_v52  ;;  %v1238_v33 = vld [vmem:[#allocation5 + $0x1e60] sm:$0xff]  ;;  %v1239_v52 = vld [vmem:[#allocation5 + $0x1e68] sm:$0xff] }
 0x226   :  { %6933 = vmatprep.subr.bf16.mxu0 %v12368_v50  ;;  %7517 = vmatprep.subr.bf16.mxu1 %v12370_v45  ;;  %v12383_v50 = vcombine.low %v1226_v10, %v1230_v60  ;;  %v12385_v45 = vcombine.low %v1227_v48, %v1231_v28  ;;  %v12392_v21 = vcombine.high %v1234_v27, %v1238_v33  ;;  %v1254_v10 = vld [vmem:[#allocation5 + $0x1ee0] sm:$0xff]  ;;  %v1251_v60 = vld [vmem:[#allocation5 + $0x1ec8] sm:$0xff] }
 0x227   :  { %v12394_v51 = vcombine.high %v1235_v62, %v1239_v52  ;;  %v12399_v28 = vcombine.low %v1242_v55, %v1246_v0  ;;  %v12401_v48 = vcombine.low %v1243_v23, %v1247_v41 }
 0x228   :  { %6911 = vmatmul.mubr.bf16.gmra.mrb[12].mxu0 %v14215_v43  ;;  %7495 = vmatmul.mubr.bf16.gmra.mrb[12].mxu1 %v14215_v43 }
 0x229   :  { %6934 = vmatpush1.bf16.msra.mxu0 %v12367_v13  ;;  %7518 = vmatpush1.bf16.msra.mxu1 %v12369_v30  ;;  %v12391_v13 = vcombine.low %v1234_v27, %v1238_v33  ;;  %v12393_v30 = vcombine.low %v1235_v62, %v1239_v52  ;;  %v1262_v27 = vld [vmem:[#allocation5 + $0x1f20] sm:$0xff]  ;;  %v1259_v33 = vld [vmem:[#allocation5 + $0x1f08] sm:$0xff] }
 0x22a   :  { %6935 = vmatprep.subr.bf16.mxu0 %v12376_v11  ;;  %7519 = vmatprep.subr.bf16.mxu1 %v12378_v14  ;;  %v12400_v11 = vcombine.high %v1242_v55, %v1246_v0  ;;  %v12402_v14 = vcombine.high %v1243_v23, %v1247_v41  ;;  %v1270_v55 = vld [vmem:[#allocation5 + $0x1f60] sm:$0xff]  ;;  %v1267_v0 = vld [vmem:[#allocation5 + $0x1f48] sm:$0xff] }
 0x22b   :  { %6953 = vmatprep.mubr.bf16.mxu0 %v14217_v31  ;;  %7537 = vmatprep.mubr.bf16.mxu1 %v14217_v31 }
 0x22d   :  { %6936 = vmatpush1.bf16.msra.mxu0 %v12375_v12  ;;  %7520 = vmatpush1.bf16.msra.mxu1 %v12377_v36  ;;  %v1250_v12 = vld [vmem:[#allocation5 + $0x1ec0] sm:$0xff]  ;;  %v1255_v36 = vld [vmem:[#allocation5 + $0x1ee8] sm:$0xff] }
 0x22e   :  { %6937 = vmatprep.subr.bf16.mxu0 %v12384_v40  ;;  %7521 = vmatprep.subr.bf16.mxu1 %v12386_v2  ;;  %v12408_v40 = vcombine.high %v1250_v12, %v1254_v10  ;;  %v12410_v2 = vcombine.high %v1251_v60, %v1255_v36  ;;  %v12407_v62 = vcombine.low %v1250_v12, %v1254_v10  ;;  %v1278_v12 = vld [vmem:[#allocation5 + $0x1fa0] sm:$0xff]  ;;  %v1275_v10 = vld [vmem:[#allocation5 + $0x1f88] sm:$0xff] }
 0x22f   :  { %v12409_v52 = vcombine.low %v1251_v60, %v1255_v36 }
 0x231   :  { %6938 = vmatpush1.bf16.msra.mxu0 %v12383_v50  ;;  %7522 = vmatpush1.bf16.msra.mxu1 %v12385_v45  ;;  %v1258_v50 = vld [vmem:[#allocation5 + $0x1f00] sm:$0xff]  ;;  %v1263_v45 = vld [vmem:[#allocation5 + $0x1f28] sm:$0xff] }
 0x232   :  { %6939 = vmatprep.subr.bf16.mxu0 %v12392_v21  ;;  %7523 = vmatprep.subr.bf16.mxu1 %v12394_v51  ;;  %v12416_v21 = vcombine.high %v1258_v50, %v1262_v27  ;;  %v12418_v51 = vcombine.high %v1259_v33, %v1263_v45  ;;  %v12415_v23 = vcombine.low %v1258_v50, %v1262_v27  ;;  %v1286_v50 = vld [vmem:[#allocation5 + $0x1fe0] sm:$0xff]  ;;  %v1283_v27 = vld [vmem:[#allocation5 + $0x1fc8] sm:$0xff] }
 0x233   :  { %v12417_v41 = vcombine.low %v1259_v33, %v1263_v45 }
 0x235   :  { %6940 = vmatpush1.bf16.msra.mxu0 %v12391_v13  ;;  %7524 = vmatpush1.bf16.msra.mxu1 %v12393_v30  ;;  %v1266_v13 = vld [vmem:[#allocation5 + $0x1f40] sm:$0xff]  ;;  %v1271_v30 = vld [vmem:[#allocation5 + $0x1f68] sm:$0xff] }
 0x236   :  { %6941 = vmatprep.subr.bf16.mxu0 %v12400_v11  ;;  %7525 = vmatprep.subr.bf16.mxu1 %v12402_v14  ;;  %v12424_v11 = vcombine.high %v1266_v13, %v1270_v55  ;;  %v12426_v14 = vcombine.high %v1267_v0, %v1271_v30  ;;  %v12423_v60 = vcombine.low %v1266_v13, %v1270_v55  ;;  %v272_v13 = vld [vmem:[#allocation5 + $0x30] sm:$0xff]  ;;  %v269_v55 = vld [vmem:[#allocation5 + $0x18] sm:$0xff] }
 0x237   :  { %v12425_v36 = vcombine.low %v1267_v0, %v1271_v30  ;;  %v88_v30 = vld [vmem:[#allocation2 + $0x70] sm:$0xff] }
 0x239   :  { %6942 = vmatpush1.bf16.msra.mxu0 %v12399_v28  ;;  %7526 = vmatpush1.bf16.msra.mxu1 %v12401_v48  ;;  %v1274_v28 = vld [vmem:[#allocation5 + $0x1f80] sm:$0xff]  ;;  %v1279_v48 = vld [vmem:[#allocation5 + $0x1fa8] sm:$0xff] }
 0x23a   :  { %6943 = vmatprep.subr.bf16.mxu0 %v12408_v40  ;;  %7527 = vmatprep.subr.bf16.mxu1 %v12410_v2  ;;  %v12432_v40 = vcombine.high %v1274_v28, %v1278_v12  ;;  %v12434_v2 = vcombine.high %v1275_v10, %v1279_v48  ;;  %v12431_v33 = vcombine.low %v1274_v28, %v1278_v12  ;;  %v276_v12 = vld [vmem:[#allocation5 + $0x50] sm:$0xff] }
 0x23b   :  { %v12433_v45 = vcombine.low %v1275_v10, %v1279_v48  ;;  %v277_v10 = vld [vmem:[#allocation5 + $0x58] sm:$0xff] }
 0x23d   :  { %6944 = vmatpush1.bf16.msra.mxu0 %v12407_v62  ;;  %7528 = vmatpush1.bf16.msra.mxu1 %v12409_v52  ;;  %v1282_v62 = vld [vmem:[#allocation5 + $0x1fc0] sm:$0xff]  ;;  %v1287_v52 = vld [vmem:[#allocation5 + $0x1fe8] sm:$0xff] }
 0x23e   :  { %6945 = vmatprep.subr.bf16.mxu0 %v12416_v21  ;;  %7529 = vmatprep.subr.bf16.mxu1 %v12418_v51  ;;  %v12440_v21 = vcombine.high %v1282_v62, %v1286_v50  ;;  %v12442_v51 = vcombine.high %v1283_v27, %v1287_v52  ;;  %v12439_v0 = vcombine.low %v1282_v62, %v1286_v50 }
 0x241   :  { %6946 = vmatpush1.bf16.msra.mxu0 %v12415_v23  ;;  %7530 = vmatpush1.bf16.msra.mxu1 %v12417_v41  ;;  %v268_v23 = vld [vmem:[#allocation5 + $0x10] sm:$0xff]  ;;  %v273_v41 = vld [vmem:[#allocation5 + $0x38] sm:$0xff] }
 0x242   :  { %6947 = vmatprep.subr.bf16.mxu0 %v12424_v11  ;;  %7531 = vmatprep.subr.bf16.mxu1 %v12426_v14  ;;  %v104_v11 = vld [vmem:[#allocation2 + $0xf0] sm:$0xff]  ;;  %v12441_v14 = vcombine.low %v1283_v27, %v1287_v52  ;;  %v11428_v31 = vcombine.high %v268_v23, %v272_v13  ;;  %v11430_v28 = vcombine.high %v269_v55, %v273_v41 }
 0x243   :  { %v14223_v48 = vpack.c.bf16 %v104_v11, %v88_v30  ;;  %v11427_v43 = vcombine.low %v268_v23, %v272_v13  ;;  %v11429_v62 = vcombine.low %v269_v55, %v273_v41  ;;  %v284_v52 = vld [vmem:[#allocation5 + $0x90] sm:$0xff] }
 0x244   :  { %v136_v23 = vld [vmem:[#allocation2 + $0x1f0] sm:$0xff] }
 0x245   :  { %6948 = vmatpush1.bf16.msra.mxu0 %v12423_v60  ;;  %7532 = vmatpush1.bf16.msra.mxu1 %v12425_v36  ;;  %v280_v60 = vld [vmem:[#allocation5 + $0x70] sm:$0xff]  ;;  %v281_v36 = vld [vmem:[#allocation5 + $0x78] sm:$0xff] }
 0x246   :  { %6949 = vmatprep.subr.bf16.mxu0 %v12432_v40  ;;  %7533 = vmatprep.subr.bf16.mxu1 %v12434_v2  ;;  %v121_v40 = vld [vmem:[#allocation2 + $0x178] sm:$0xff]  ;;  %v11436_v50 = vcombine.high %v276_v12, %v280_v60  ;;  %v11435_v30 = vcombine.low %v276_v12, %v280_v60  ;;  %v292_v41 = vld [vmem:[#allocation5 + $0xd0] sm:$0xff] }
 0x247   :  { %v137_v2 = vld [vmem:[#allocation2 + $0x1f8] sm:$0xff]  ;;  %v296_v11 = vld [vmem:[#allocation5 + $0xf0] sm:$0xff] }
 0x248   :  { %v14225_v27 = vpack.c.bf16 %v137_v2, %v121_v40  ;;  %v297_v40 = vld [vmem:[#allocation5 + $0xf8] sm:$0xff] }
 0x249   :  { %6950 = vmatpush1.bf16.msra.mxu0 %v12431_v33  ;;  %7534 = vmatpush1.bf16.msra.mxu1 %v12433_v45  ;;  %v11438_v33 = vcombine.high %v277_v10, %v281_v36  ;;  %v288_v45 = vld [vmem:[#allocation5 + $0xb0] sm:$0xff]  ;;  %v169_v12 = vld [vmem:[#allocation2 + $0x2f8] sm:$0xff] }
 0x24a   :  { %6951 = vmatprep.subr.bf16.mxu0 %v12440_v21  ;;  %7535 = vmatprep.subr.bf16.mxu1 %v12442_v51  ;;  %14563 = vst [vmem:[#allocation34_spill] sm:$0xff] %v14225_v27  ;;  %v285_v21 = vld [vmem:[#allocation5 + $0x98] sm:$0xff]  ;;  %v11444_v13 = vcombine.high %v284_v52, %v288_v45  ;;  %v11443_v60 = vcombine.low %v284_v52, %v288_v45  ;;  %v168_v52 = vld [vmem:[#allocation2 + $0x2f0] sm:$0xff] }
 0x24b   :  { %v289_v51 = vld [vmem:[#allocation5 + $0xb8] sm:$0xff] }
 0x24c   :  { %v11446_v55 = vcombine.high %v285_v21, %v289_v51 }
 0x24d   :  { %6952 = vmatpush1.bf16.msra.mxu0 %v12439_v0  ;;  %7536 = vmatpush1.bf16.msra.mxu1 %v12441_v14  ;;  %v120_v0 = vld [vmem:[#allocation2 + $0x170] sm:$0xff]  ;;  %v293_v14 = vld [vmem:[#allocation5 + $0xd8] sm:$0xff] }
 0x24e   :  { %7578 = vmatprep.subr.bf16.mxu0 %v11428_v31  ;;  %8162 = vmatprep.subr.bf16.mxu1 %v11430_v28  ;;  %v11437_v31 = vcombine.low %v277_v10, %v281_v36  ;;  %v14231_v28 = vpack.c.bf16 %v136_v23, %v120_v0  ;;  %v11445_v10 = vcombine.low %v285_v21, %v289_v51  ;;  %v305_v0 = vld [vmem:[#allocation5 + $0x138] sm:$0xff] }
 0x24f   :  { %v11452_v36 = vcombine.high %v292_v41, %v296_v11  ;;  %v11454_v2 = vcombine.high %v293_v14, %v297_v40  ;;  %v11451_v23 = vcombine.low %v292_v41, %v296_v11  ;;  %v11453_v45 = vcombine.low %v293_v14, %v297_v40  ;;  %v201_v41 = vld [vmem:[#allocation2 + $0x3f8] sm:$0xff] }
 0x250   :  { %6954 = vmatmul.mubr.bf16.vlgmr.msra.gmra.mrb[0].mxu0 %v14223_v48  ;;  %7538 = vmatmul.mubr.bf16.vlgmr.msra.gmra.mrb[0].mxu1 %v14223_v48  ;;  %14564 = vst [vmem:[#allocation35_spill] sm:$0xff] %v14231_v28 }
 0x251   :  { %7579 = vmatpush1.bf16.msra.mxu0 %v11427_v43  ;;  %8163 = vmatpush1.bf16.msra.mxu1 %v11429_v62  ;;  %v153_v43 = vld [vmem:[#allocation2 + $0x278] sm:$0xff] }
 0x252   :  { %7580 = vmatprep.subr.bf16.mxu0 %v11436_v50  ;;  %8164 = vmatprep.subr.bf16.mxu1 %v11438_v33  ;;  %v14233_v62 = vpack.c.bf16 %v169_v12, %v153_v43  ;;  %v300_v50 = vld [vmem:[#allocation5 + $0x110] sm:$0xff]  ;;  %v313_v12 = vld [vmem:[#allocation5 + $0x178] sm:$0xff] }
 0x253   :  { %6963 = vmatprep.mubr.bf16.mxu0 %v14225_v27  ;;  %7547 = vmatprep.mubr.bf16.mxu1 %v14225_v27  ;;  %v304_v33 = vld [vmem:[#allocation5 + $0x130] sm:$0xff]  ;;  %v301_v27 = vld [vmem:[#allocation5 + $0x118] sm:$0xff] }
 0x254   :  { %14565 = vst [vmem:[#allocation36_spill] sm:$0xff] %v14233_v62  ;;  %v11460_v21 = vcombine.high %v300_v50, %v304_v33  ;;  %v11462_v51 = vcombine.high %v301_v27, %v305_v0  ;;  %v11459_v11 = vcombine.low %v300_v50, %v304_v33  ;;  %v11461_v14 = vcombine.low %v301_v27, %v305_v0  ;;  %v200_v50 = vld [vmem:[#allocation2 + $0x3f0] sm:$0xff] }
 0x255   :  { %7581 = vmatpush1.bf16.msra.mxu0 %v11435_v30  ;;  %8165 = vmatpush1.bf16.msra.mxu1 %v11437_v31  ;;  %v152_v30 = vld [vmem:[#allocation2 + $0x270] sm:$0xff] }
 0x256   :  { %7582 = vmatprep.subr.bf16.mxu0 %v11444_v13  ;;  %8166 = vmatprep.subr.bf16.mxu1 %v11446_v55  ;;  %v308_v31 = vld [vmem:[#allocation5 + $0x150] sm:$0xff]  ;;  %v309_v55 = vld [vmem:[#allocation5 + $0x158] sm:$0xff]  ;;  %v14239_v43 = vpack.c.bf16 %v168_v52, %v152_v30 }
 0x257   :  { %v312_v13 = vld [vmem:[#allocation5 + $0x170] sm:$0xff]  ;;  %v321_v30 = vld [vmem:[#allocation5 + $0x1b8] sm:$0xff]  ;;  %v11469_v27 = vcombine.low %v309_v55, %v313_v12 }
 0x258   :  { %6964 = vmatmul.mubr.bf16.gmra.mrb[4].mxu0 %v14231_v28  ;;  %7548 = vmatmul.mubr.bf16.gmra.mrb[4].mxu1 %v14231_v28  ;;  %v11468_v40 = vcombine.high %v308_v31, %v312_v13  ;;  %v320_v28 = vld [vmem:[#allocation5 + $0x1b0] sm:$0xff]  ;;  %v11467_v52 = vcombine.low %v308_v31, %v312_v13 }
 0x259   :  { %7583 = vmatpush1.bf16.msra.mxu0 %v11443_v60  ;;  %8167 = vmatpush1.bf16.msra.mxu1 %v11445_v10  ;;  %v185_v60 = vld [vmem:[#allocation2 + $0x378] sm:$0xff]  ;;  %v11470_v10 = vcombine.high %v309_v55, %v313_v12  ;;  %v332_v12 = vld [vmem:[#allocation5 + $0x210] sm:$0xff] }
 0x25a   :  { %7584 = vmatprep.subr.bf16.mxu0 %v11452_v36  ;;  %8168 = vmatprep.subr.bf16.mxu1 %v11454_v2  ;;  %v14241_v36 = vpack.c.bf16 %v201_v41, %v185_v60  ;;  %v316_v2 = vld [vmem:[#allocation5 + $0x190] sm:$0xff]  ;;  %v325_v60 = vld [vmem:[#allocation5 + $0x1d8] sm:$0xff] }
 0x25b   :  { %6973 = vmatprep.mubr.bf16.mxu0 %v14233_v62  ;;  %7557 = vmatprep.mubr.bf16.mxu1 %v14233_v62  ;;  %v317_v62 = vld [vmem:[#allocation5 + $0x198] sm:$0xff]  ;;  %v11476_v33 = vcombine.high %v316_v2, %v320_v28  ;;  %v11475_v31 = vcombine.low %v316_v2, %v320_v28 }
 0x25c   :  { %v11478_v0 = vcombine.high %v317_v62, %v321_v30  ;;  %v329_v41 = vld [vmem:[#allocation5 + $0x1f8] sm:$0xff]  ;;  %v11477_v13 = vcombine.low %v317_v62, %v321_v30  ;;  %v340_v62 = vld [vmem:[#allocation5 + $0x250] sm:$0xff] }
 0x25d   :  { %7585 = vmatpush1.bf16.msra.mxu0 %v11451_v23  ;;  %8169 = vmatpush1.bf16.msra.mxu1 %v11453_v45  ;;  %v184_v23 = vld [vmem:[#allocation2 + $0x370] sm:$0xff]  ;;  %v11486_v55 = vcombine.high %v325_v60, %v329_v41 }
 0x25e   :  { %7586 = vmatprep.subr.bf16.mxu0 %v11460_v21  ;;  %8170 = vmatprep.subr.bf16.mxu1 %v11462_v51  ;;  %v324_v45 = vld [vmem:[#allocation5 + $0x1d0] sm:$0xff]  ;;  %v14247_v51 = vpack.c.bf16 %v200_v50, %v184_v23  ;;  %v341_v50 = vld [vmem:[#allocation5 + $0x258] sm:$0xff] }
 0x25f   :  { %v328_v21 = vld [vmem:[#allocation5 + $0x1f0] sm:$0xff] }
 0x260   :  { %6974 = vmatmul.mubr.bf16.gmra.mrb[8].mxu0 %v14239_v43  ;;  %7558 = vmatmul.mubr.bf16.gmra.mrb[8].mxu1 %v14239_v43  ;;  %14566 = vst [vmem:[#allocation37_spill] sm:$0xff] %v14247_v51  ;;  %v11483_v23 = vcombine.low %v324_v45, %v328_v21  ;;  %v344_v30 = vld [vmem:[#allocation5 + $0x270] sm:$0xff] }
 0x261   :  { %7587 = vmatpush1.bf16.msra.mxu0 %v11459_v11  ;;  %8171 = vmatpush1.bf16.msra.mxu1 %v11461_v14  ;;  %v11484_v11 = vcombine.high %v324_v45, %v328_v21  ;;  %v336_v14 = vld [vmem:[#allocation5 + $0x230] sm:$0xff]  ;;  %v11500_v45 = vcombine.high %v340_v62, %v344_v30 }
 0x262   :  { %7588 = vmatprep.subr.bf16.mxu0 %v11468_v40  ;;  %8172 = vmatprep.subr.bf16.mxu1 %v11470_v10  ;;  %v333_v40 = vld [vmem:[#allocation5 + $0x218] sm:$0xff]  ;;  %v11492_v28 = vcombine.high %v332_v12, %v336_v14 }
 0x263   :  { %6983 = vmatprep.mubr.bf16.mxu0 %v14241_v36  ;;  %7567 = vmatprep.mubr.bf16.mxu1 %v14241_v36  ;;  %v337_v10 = vld [vmem:[#allocation5 + $0x238] sm:$0xff] }
 0x264   :  { %v11494_v2 = vcombine.high %v333_v40, %v337_v10 }
 0x265   :  { %7589 = vmatpush1.bf16.msra.mxu0 %v11467_v52  ;;  %8173 = vmatpush1.bf16.msra.mxu1 %v11469_v27  ;;  %v11485_v52 = vcombine.low %v325_v60, %v329_v41  ;;  %v345_v27 = vld [vmem:[#allocation5 + $0x278] sm:$0xff]  ;;  %v348_v60 = vld [vmem:[#allocation5 + $0x290] sm:$0xff] }
 0x266   :  { %7590 = vmatprep.subr.bf16.mxu0 %v11476_v33  ;;  %8174 = vmatprep.subr.bf16.mxu1 %v11478_v0  ;;  %v11491_v33 = vcombine.low %v332_v12, %v336_v14  ;;  %v11493_v0 = vcombine.low %v333_v40, %v337_v10  ;;  %v11502_v21 = vcombine.high %v341_v50, %v345_v27  ;;  %v352_v41 = vld [vmem:[#allocation5 + $0x2b0] sm:$0xff]  ;;  %v357_v14 = vld [vmem:[#allocation5 + $0x2d8] sm:$0xff] }
 0x267   :  { %v360_v12 = vld [vmem:[#allocation5 + $0x2f0] sm:$0xff]  ;;  %v11507_v40 = vcombine.low %v348_v60, %v352_v41 }
 0x268   :  { %6984 = vmatmul.mubr.bf16.gmra.mrb[12].mxu0 %v14247_v51  ;;  %7568 = vmatmul.mubr.bf16.gmra.mrb[12].mxu1 %v14247_v51  ;;  %v11508_v51 = vcombine.high %v348_v60, %v352_v41  ;;  %v376_v60 = vld [vmem:[#allocation5 + $0x370] sm:$0xff]  ;;  %v373_v41 = vld [vmem:[#allocation5 + $0x358] sm:$0xff] }
 0x269   :  { %7591 = vmatpush1.bf16.msra.mxu0 %v11475_v31  ;;  %8175 = vmatpush1.bf16.msra.mxu1 %v11477_v13  ;;  %v349_v31 = vld [vmem:[#allocation5 + $0x298] sm:$0xff] }
 0x26a   :  { %7592 = vmatprep.subr.bf16.mxu0 %v11484_v11  ;;  %8176 = vmatprep.subr.bf16.mxu1 %v11486_v55  ;;  %v353_v13 = vld [vmem:[#allocation5 + $0x2b8] sm:$0xff]  ;;  %v11499_v11 = vcombine.low %v340_v62, %v344_v30  ;;  %v11501_v55 = vcombine.low %v341_v50, %v345_v27  ;;  %v368_v62 = vld [vmem:[#allocation5 + $0x330] sm:$0xff] }
 0x26b   :  { %7610 = vmatprep.mubr.bf16.mxu0 %v13995_v58  ;;  %8194 = vmatprep.mubr.bf16.mxu1 %v13995_v58  ;;  %v11510_v58 = vcombine.high %v349_v31, %v353_v13  ;;  %v11509_v10 = vcombine.low %v349_v31, %v353_v13  ;;  %v365_v30 = vld [vmem:[#allocation5 + $0x318] sm:$0xff] }
 0x26d   :  { %7593 = vmatpush1.bf16.msra.mxu0 %v11483_v23  ;;  %8177 = vmatpush1.bf16.msra.mxu1 %v11485_v52  ;;  %v356_v23 = vld [vmem:[#allocation5 + $0x2d0] sm:$0xff]  ;;  %v361_v52 = vld [vmem:[#allocation5 + $0x2f8] sm:$0xff] }
 0x26e   :  { %7594 = vmatprep.subr.bf16.mxu0 %v11492_v28  ;;  %8178 = vmatprep.subr.bf16.mxu1 %v11494_v2  ;;  %v11516_v28 = vcombine.high %v356_v23, %v360_v12  ;;  %v11518_v2 = vcombine.high %v357_v14, %v361_v52  ;;  %v11515_v50 = vcombine.low %v356_v23, %v360_v12  ;;  %v384_v23 = vld [vmem:[#allocation5 + $0x3b0] sm:$0xff]  ;;  %v381_v12 = vld [vmem:[#allocation5 + $0x398] sm:$0xff] }
 0x26f   :  { %v11517_v27 = vcombine.low %v357_v14, %v361_v52 }
 0x271   :  { %7595 = vmatpush1.bf16.msra.mxu0 %v11491_v33  ;;  %8179 = vmatpush1.bf16.msra.mxu1 %v11493_v0  ;;  %v364_v33 = vld [vmem:[#allocation5 + $0x310] sm:$0xff]  ;;  %v369_v0 = vld [vmem:[#allocation5 + $0x338] sm:$0xff] }
 0x272   :  { %7596 = vmatprep.subr.bf16.mxu0 %v11500_v45  ;;  %8180 = vmatprep.subr.bf16.mxu1 %v11502_v21  ;;  %v11524_v45 = vcombine.high %v364_v33, %v368_v62  ;;  %v11526_v21 = vcombine.high %v365_v30, %v369_v0  ;;  %v11523_v31 = vcombine.low %v364_v33, %v368_v62  ;;  %v392_v33 = vld [vmem:[#allocation5 + $0x3f0] sm:$0xff]  ;;  %v389_v62 = vld [vmem:[#allocation5 + $0x3d8] sm:$0xff] }
 0x273   :  { %v11525_v13 = vcombine.low %v365_v30, %v369_v0 }
 0x275   :  { %7597 = vmatpush1.bf16.msra.mxu0 %v11499_v11  ;;  %8181 = vmatpush1.bf16.msra.mxu1 %v11501_v55  ;;  %v372_v11 = vld [vmem:[#allocation5 + $0x350] sm:$0xff] }
 0x276   :  { %7598 = vmatprep.subr.bf16.mxu0 %v11508_v51  ;;  %8182 = vmatprep.subr.bf16.mxu1 %v11510_v58  ;;  %v377_v51 = vld [vmem:[#allocation5 + $0x378] sm:$0xff]  ;;  %v11532_v55 = vcombine.high %v372_v11, %v376_v60  ;;  %v11531_v14 = vcombine.low %v372_v11, %v376_v60  ;;  %v400_v11 = vld [vmem:[#allocation5 + $0x430] sm:$0xff] }
 0x277   :  { %v11534_v58 = vcombine.high %v373_v41, %v377_v51  ;;  %v11533_v52 = vcombine.low %v373_v41, %v377_v51  ;;  %v397_v60 = vld [vmem:[#allocation5 + $0x418] sm:$0xff] }
 0x279   :  { %7599 = vmatpush1.bf16.msra.mxu0 %v11507_v40  ;;  %8183 = vmatpush1.bf16.msra.mxu1 %v11509_v10  ;;  %v380_v40 = vld [vmem:[#allocation5 + $0x390] sm:$0xff]  ;;  %v385_v10 = vld [vmem:[#allocation5 + $0x3b8] sm:$0xff] }
 0x27a   :  { %7600 = vmatprep.subr.bf16.mxu0 %v11516_v28  ;;  %8184 = vmatprep.subr.bf16.mxu1 %v11518_v2  ;;  %v11540_v28 = vcombine.high %v380_v40, %v384_v23  ;;  %v11542_v2 = vcombine.high %v381_v12, %v385_v10  ;;  %v11539_v30 = vcombine.low %v380_v40, %v384_v23  ;;  %v408_v40 = vld [vmem:[#allocation5 + $0x470] sm:$0xff]  ;;  %v405_v23 = vld [vmem:[#allocation5 + $0x458] sm:$0xff] }
 0x27b   :  { %v11541_v0 = vcombine.low %v381_v12, %v385_v10 }
 0x27d   :  { %7601 = vmatpush1.bf16.msra.mxu0 %v11515_v50  ;;  %8185 = vmatpush1.bf16.msra.mxu1 %v11517_v27  ;;  %v388_v50 = vld [vmem:[#allocation5 + $0x3d0] sm:$0xff]  ;;  %v393_v27 = vld [vmem:[#allocation5 + $0x3f8] sm:$0xff] }
 0x27e   :  { %7602 = vmatprep.subr.bf16.mxu0 %v11524_v45  ;;  %8186 = vmatprep.subr.bf16.mxu1 %v11526_v21  ;;  %v11548_v45 = vcombine.high %v388_v50, %v392_v33  ;;  %v11550_v21 = vcombine.high %v389_v62, %v393_v27  ;;  %v11547_v41 = vcombine.low %v388_v50, %v392_v33  ;;  %v416_v50 = vld [vmem:[#allocation5 + $0x4b0] sm:$0xff]  ;;  %v413_v33 = vld [vmem:[#allocation5 + $0x498] sm:$0xff] }
 0x27f   :  { %v11549_v51 = vcombine.low %v389_v62, %v393_v27  ;;  %v417_v62 = vld [vmem:[#allocation5 + $0x4b8] sm:$0xff] }
 0x281   :  { %7603 = vmatpush1.bf16.msra.mxu0 %v11523_v31  ;;  %8187 = vmatpush1.bf16.msra.mxu1 %v11525_v13  ;;  %v396_v31 = vld [vmem:[#allocation5 + $0x410] sm:$0xff]  ;;  %v401_v13 = vld [vmem:[#allocation5 + $0x438] sm:$0xff] }
 0x282   :  { %7604 = vmatprep.subr.bf16.mxu0 %v11532_v55  ;;  %8188 = vmatprep.subr.bf16.mxu1 %v11534_v58  ;;  %v11556_v55 = vcombine.high %v396_v31, %v400_v11  ;;  %v11558_v58 = vcombine.high %v397_v60, %v401_v13  ;;  %v11555_v12 = vcombine.low %v396_v31, %v400_v11  ;;  %v420_v31 = vld [vmem:[#allocation5 + $0x4d0] sm:$0xff] }
 0x283   :  { %v11557_v10 = vcombine.low %v397_v60, %v401_v13  ;;  %v424_v11 = vld [vmem:[#allocation5 + $0x4f0] sm:$0xff]  ;;  %v421_v60 = vld [vmem:[#allocation5 + $0x4d8] sm:$0xff] }
 0x284   :  { %v425_v13 = vld [vmem:[#allocation5 + $0x4f8] sm:$0xff] }
 0x285   :  { %7605 = vmatpush1.bf16.msra.mxu0 %v11531_v14  ;;  %8189 = vmatpush1.bf16.msra.mxu1 %v11533_v52  ;;  %v404_v14 = vld [vmem:[#allocation5 + $0x450] sm:$0xff]  ;;  %v409_v52 = vld [vmem:[#allocation5 + $0x478] sm:$0xff] }
 0x286   :  { %7606 = vmatprep.subr.bf16.mxu0 %v11540_v28  ;;  %8190 = vmatprep.subr.bf16.mxu1 %v11542_v2  ;;  %v11564_v28 = vcombine.high %v404_v14, %v408_v40  ;;  %v11566_v2 = vcombine.high %v405_v23, %v409_v52  ;;  %v11563_v27 = vcombine.low %v404_v14, %v408_v40  ;;  %v432_v14 = vld [vmem:[#allocation5 + $0x530] sm:$0xff]  ;;  %v429_v40 = vld [vmem:[#allocation5 + $0x518] sm:$0xff] }
 0x289   :  { %7607 = vmatpush1.bf16.msra.mxu0 %v11539_v30  ;;  %8191 = vmatpush1.bf16.msra.mxu1 %v11541_v0  ;;  %v412_v30 = vld [vmem:[#allocation5 + $0x490] sm:$0xff]  ;;  %v11565_v0 = vcombine.low %v405_v23, %v409_v52  ;;  %v433_v23 = vld [vmem:[#allocation5 + $0x538] sm:$0xff]  ;;  %v11579_v52 = vcombine.low %v420_v31, %v424_v11 }
 0x28a   :  { %7608 = vmatprep.subr.bf16.mxu0 %v11548_v45  ;;  %8192 = vmatprep.subr.bf16.mxu1 %v11550_v21  ;;  %v11572_v45 = vcombine.high %v412_v30, %v416_v50  ;;  %v11574_v21 = vcombine.high %v413_v33, %v417_v62 }
 0x28d   :  { %7609 = vmatpush1.bf16.msra.mxu0 %v11547_v41  ;;  %8193 = vmatpush1.bf16.msra.mxu1 %v11549_v51  ;;  %v11571_v41 = vcombine.low %v412_v30, %v416_v50  ;;  %v11580_v51 = vcombine.high %v420_v31, %v424_v11  ;;  %v437_v30 = vld [vmem:[#allocation5 + $0x558] sm:$0xff] }
 0x28e   :  { %7651 = vmatprep.subr.bf16.mxu0 %v11556_v55  ;;  %8235 = vmatprep.subr.bf16.mxu1 %v11558_v58  ;;  %v11582_v55 = vcombine.high %v421_v60, %v425_v13  ;;  %v428_v58 = vld [vmem:[#allocation5 + $0x510] sm:$0xff]  ;;  %v441_v50 = vld [vmem:[#allocation5 + $0x578] sm:$0xff] }
 0x28f   :  { %v449_v31 = vld [vmem:[#allocation5 + $0x5b8] sm:$0xff] }
 0x290   :  { %7611 = vmatmul.mubr.bf16.vlgmr.msra.gmra.mrb[16].mxu0 %v13999_v15  ;;  %8195 = vmatmul.mubr.bf16.vlgmr.msra.gmra.mrb[16].mxu1 %v13999_v15  ;;  %v11573_v15 = vcombine.low %v413_v33, %v417_v62  ;;  %v11587_v33 = vcombine.low %v428_v58, %v432_v14  ;;  %v11589_v62 = vcombine.low %v429_v40, %v433_v23 }
 0x291   :  { %7652 = vmatpush1.bf16.msra.mxu0 %v11555_v12  ;;  %8236 = vmatpush1.bf16.msra.mxu1 %v11557_v10  ;;  %v11588_v12 = vcombine.high %v428_v58, %v432_v14  ;;  %v11590_v10 = vcombine.high %v429_v40, %v433_v23  ;;  %v460_v23 = vld [vmem:[#allocation5 + $0x610] sm:$0xff] }
 0x292   :  { %7653 = vmatprep.subr.bf16.mxu0 %v11564_v28  ;;  %8237 = vmatprep.subr.bf16.mxu1 %v11566_v2  ;;  %v436_v28 = vld [vmem:[#allocation5 + $0x550] sm:$0xff] }
 0x293   :  { %7620 = vmatprep.mubr.bf16.mxu0 %v14001_v25  ;;  %8204 = vmatprep.mubr.bf16.mxu1 %v14001_v25  ;;  %v11581_v25 = vcombine.low %v421_v60, %v425_v13  ;;  %v440_v2 = vld [vmem:[#allocation5 + $0x570] sm:$0xff] }
 0x294   :  { %v11595_v11 = vcombine.low %v436_v28, %v440_v2 }
 0x295   :  { %7654 = vmatpush1.bf16.msra.mxu0 %v11563_v27  ;;  %8238 = vmatpush1.bf16.msra.mxu1 %v11565_v0  ;;  %v11598_v27 = vcombine.high %v437_v30, %v441_v50  ;;  %v444_v0 = vld [vmem:[#allocation5 + $0x590] sm:$0xff] }
 0x296   :  { %7655 = vmatprep.subr.bf16.mxu0 %v11572_v45  ;;  %8239 = vmatprep.subr.bf16.mxu1 %v11574_v21  ;;  %v448_v45 = vld [vmem:[#allocation5 + $0x5b0] sm:$0xff]  ;;  %v445_v21 = vld [vmem:[#allocation5 + $0x598] sm:$0xff] }
 0x297   :  { %v11604_v60 = vcombine.high %v444_v0, %v448_v45  ;;  %v11606_v13 = vcombine.high %v445_v21, %v449_v31  ;;  %v11603_v58 = vcombine.low %v444_v0, %v448_v45  ;;  %v11605_v14 = vcombine.low %v445_v21, %v449_v31  ;;  %v476_v45 = vld [vmem:[#allocation5 + $0x690] sm:$0xff]  ;;  %v477_v31 = vld [vmem:[#allocation5 + $0x698] sm:$0xff] }
 0x298   :  { %7621 = vmatmul.mubr.bf16.gmra.mrb[20].mxu0 %v14007_v38  ;;  %8205 = vmatmul.mubr.bf16.gmra.mrb[20].mxu1 %v14007_v38  ;;  %v11596_v38 = vcombine.high %v436_v28, %v440_v2  ;;  %v480_v21 = vld [vmem:[#allocation5 + $0x6b0] sm:$0xff] }
 0x299   :  { %7656 = vmatpush1.bf16.msra.mxu0 %v11571_v41  ;;  %8240 = vmatpush1.bf16.msra.mxu1 %v11573_v15  ;;  %v452_v41 = vld [vmem:[#allocation5 + $0x5d0] sm:$0xff] }
 0x29a   :  { %7657 = vmatprep.subr.bf16.mxu0 %v11580_v51  ;;  %8241 = vmatprep.subr.bf16.mxu1 %v11582_v55  ;;  %v456_v15 = vld [vmem:[#allocation5 + $0x5f0] sm:$0xff]  ;;  %v453_v51 = vld [vmem:[#allocation5 + $0x5d8] sm:$0xff] }
 0x29b   :  { %7630 = vmatprep.mubr.bf16.mxu0 %v14009_v47  ;;  %8214 = vmatprep.mubr.bf16.mxu1 %v14009_v47  ;;  %v11597_v47 = vcombine.low %v437_v30, %v441_v50  ;;  %v457_v55 = vld [vmem:[#allocation5 + $0x5f8] sm:$0xff]  ;;  %v468_v30 = vld [vmem:[#allocation5 + $0x650] sm:$0xff] }
 0x29c   :  { %v11614_v40 = vcombine.high %v453_v51, %v457_v55  ;;  %v472_v50 = vld [vmem:[#allocation5 + $0x670] sm:$0xff] }
 0x29d   :  { %7658 = vmatpush1.bf16.msra.mxu0 %v11579_v52  ;;  %8242 = vmatpush1.bf16.msra.mxu1 %v11581_v25  ;;  %v464_v52 = vld [vmem:[#allocation5 + $0x630] sm:$0xff]  ;;  %v461_v25 = vld [vmem:[#allocation5 + $0x618] sm:$0xff] }
 0x29e   :  { %7659 = vmatprep.subr.bf16.mxu0 %v11588_v12  ;;  %8243 = vmatprep.subr.bf16.mxu1 %v11590_v10  ;;  %v465_v12 = vld [vmem:[#allocation5 + $0x638] sm:$0xff]  ;;  %v11611_v10 = vcombine.low %v452_v41, %v456_v15  ;;  %v11620_v28 = vcombine.high %v460_v23, %v464_v52 }
 0x29f   :  { %v11622_v2 = vcombine.high %v461_v25, %v465_v12 }
 0x2a0   :  { %7631 = vmatmul.mubr.bf16.gmra.mrb[24].mxu0 %v14015_v61  ;;  %8215 = vmatmul.mubr.bf16.gmra.mrb[24].mxu1 %v14015_v61  ;;  %v11612_v61 = vcombine.high %v452_v41, %v456_v15  ;;  %v484_v41 = vld [vmem:[#allocation5 + $0x6d0] sm:$0xff] }
 0x2a1   :  { %7660 = vmatpush1.bf16.msra.mxu0 %v11587_v33  ;;  %8244 = vmatpush1.bf16.msra.mxu1 %v11589_v62  ;;  %v469_v33 = vld [vmem:[#allocation5 + $0x658] sm:$0xff]  ;;  %v488_v15 = vld [vmem:[#allocation5 + $0x6f0] sm:$0xff] }
 0x2a2   :  { %7661 = vmatprep.subr.bf16.mxu0 %v11596_v38  ;;  %8245 = vmatprep.subr.bf16.mxu1 %v11598_v27  ;;  %v473_v62 = vld [vmem:[#allocation5 + $0x678] sm:$0xff]  ;;  %v11619_v38 = vcombine.low %v460_v23, %v464_v52  ;;  %v11621_v27 = vcombine.low %v461_v25, %v465_v12  ;;  %v492_v23 = vld [vmem:[#allocation5 + $0x710] sm:$0xff] }
 0x2a3   :  { %7640 = vmatprep.mubr.bf16.mxu0 %v14017_v8  ;;  %8224 = vmatprep.mubr.bf16.mxu1 %v14017_v8  ;;  %v11613_v8 = vcombine.low %v453_v51, %v457_v55  ;;  %v11630_v0 = vcombine.high %v469_v33, %v473_v62  ;;  %v485_v51 = vld [vmem:[#allocation5 + $0x6d8] sm:$0xff]  ;;  %v496_v52 = vld [vmem:[#allocation5 + $0x730] sm:$0xff] }
 0x2a4   :  { %v489_v55 = vld [vmem:[#allocation5 + $0x6f8] sm:$0xff] }
 0x2a5   :  { %7662 = vmatpush1.bf16.msra.mxu0 %v11595_v11  ;;  %8246 = vmatpush1.bf16.msra.mxu1 %v11597_v47  ;;  %v481_v11 = vld [vmem:[#allocation5 + $0x6b8] sm:$0xff]  ;;  %v11627_v47 = vcombine.low %v468_v30, %v472_v50 }
 0x2a6   :  { %7663 = vmatprep.subr.bf16.mxu0 %v11604_v60  ;;  %8247 = vmatprep.subr.bf16.mxu1 %v11606_v13  ;;  %v11629_v60 = vcombine.low %v469_v33, %v473_v62  ;;  %v11636_v13 = vcombine.high %v476_v45, %v480_v21  ;;  %v493_v25 = vld [vmem:[#allocation5 + $0x718] sm:$0xff] }
 0x2a7   :  { %v497_v12 = vld [vmem:[#allocation5 + $0x738] sm:$0xff] }
 0x2a8   :  { %7641 = vmatmul.mubr.bf16.gmra.mrb[28].mxu0 %v14023_v22  ;;  %8225 = vmatmul.mubr.bf16.gmra.mrb[28].mxu1 %v14023_v22  ;;  %v11628_v22 = vcombine.high %v468_v30, %v472_v50  ;;  %v500_v30 = vld [vmem:[#allocation5 + $0x750] sm:$0xff]  ;;  %v501_v33 = vld [vmem:[#allocation5 + $0x758] sm:$0xff] }
 0x2a9   :  { %7664 = vmatpush1.bf16.msra.mxu0 %v11603_v58  ;;  %8248 = vmatpush1.bf16.msra.mxu1 %v11605_v14  ;;  %v11635_v58 = vcombine.low %v476_v45, %v480_v21  ;;  %v11637_v14 = vcombine.low %v477_v31, %v481_v11  ;;  %v504_v50 = vld [vmem:[#allocation5 + $0x770] sm:$0xff]  ;;  %v505_v62 = vld [vmem:[#allocation5 + $0x778] sm:$0xff] }
 0x2aa   :  { %7665 = vmatprep.subr.bf16.mxu0 %v11612_v61  ;;  %8249 = vmatprep.subr.bf16.mxu1 %v11614_v40  ;;  %v11644_v61 = vcombine.high %v484_v41, %v488_v15  ;;  %v11646_v40 = vcombine.high %v485_v51, %v489_v55  ;;  %v508_v45 = vld [vmem:[#allocation5 + $0x790] sm:$0xff] }
 0x2ab   :  { %7683 = vmatprep.mubr.bf16.mxu0 %v14025_v32  ;;  %8267 = vmatprep.mubr.bf16.mxu1 %v14025_v32  ;;  %v11638_v32 = vcombine.high %v477_v31, %v481_v11  ;;  %v512_v21 = vld [vmem:[#allocation5 + $0x7b0] sm:$0xff]  ;;  %v509_v31 = vld [vmem:[#allocation5 + $0x798] sm:$0xff] }
 0x2ac   :  { %v513_v11 = vld [vmem:[#allocation5 + $0x7b8] sm:$0xff] }
 0x2ad   :  { %7666 = vmatpush1.bf16.msra.mxu0 %v11611_v10  ;;  %8250 = vmatpush1.bf16.msra.mxu1 %v11613_v8  ;;  %v11643_v10 = vcombine.low %v484_v41, %v488_v15  ;;  %v11645_v8 = vcombine.low %v485_v51, %v489_v55  ;;  %v516_v41 = vld [vmem:[#allocation5 + $0x7d0] sm:$0xff]  ;;  %v517_v51 = vld [vmem:[#allocation5 + $0x7d8] sm:$0xff] }
 0x2ae   :  { %7667 = vmatprep.subr.bf16.mxu0 %v11620_v28  ;;  %8251 = vmatprep.subr.bf16.mxu1 %v11622_v2  ;;  %v11652_v28 = vcombine.high %v492_v23, %v496_v52  ;;  %v11654_v2 = vcombine.high %v493_v25, %v497_v12  ;;  %v520_v15 = vld [vmem:[#allocation5 + $0x7f0] sm:$0xff]  ;;  %v521_v55 = vld [vmem:[#allocation5 + $0x7f8] sm:$0xff] }
 0x2b1   :  { %7668 = vmatpush1.bf16.msra.mxu0 %v11619_v38  ;;  %8252 = vmatpush1.bf16.msra.mxu1 %v11621_v27  ;;  %v11651_v38 = vcombine.low %v492_v23, %v496_v52  ;;  %v11653_v27 = vcombine.low %v493_v25, %v497_v12  ;;  %v524_v23 = vld [vmem:[#allocation5 + $0x810] sm:$0xff]  ;;  %v525_v25 = vld [vmem:[#allocation5 + $0x818] sm:$0xff] }
 0x2b2   :  { %7669 = vmatprep.subr.bf16.mxu0 %v11628_v22  ;;  %8253 = vmatprep.subr.bf16.mxu1 %v11630_v0  ;;  %v11660_v22 = vcombine.high %v500_v30, %v504_v50  ;;  %v11662_v0 = vcombine.high %v501_v33, %v505_v62  ;;  %v528_v52 = vld [vmem:[#allocation5 + $0x830] sm:$0xff]  ;;  %v529_v12 = vld [vmem:[#allocation5 + $0x838] sm:$0xff] }
 0x2b5   :  { %7670 = vmatpush1.bf16.msra.mxu0 %v11627_v47  ;;  %8254 = vmatpush1.bf16.msra.mxu1 %v11629_v60  ;;  %v11659_v47 = vcombine.low %v500_v30, %v504_v50  ;;  %v11661_v60 = vcombine.low %v501_v33, %v505_v62  ;;  %v532_v30 = vld [vmem:[#allocation5 + $0x850] sm:$0xff]  ;;  %v533_v33 = vld [vmem:[#allocation5 + $0x858] sm:$0xff] }
 0x2b6   :  { %7671 = vmatprep.subr.bf16.mxu0 %v11636_v13  ;;  %8255 = vmatprep.subr.bf16.mxu1 %v11638_v32  ;;  %v11668_v13 = vcombine.high %v508_v45, %v512_v21  ;;  %v11670_v32 = vcombine.high %v509_v31, %v513_v11  ;;  %v536_v50 = vld [vmem:[#allocation5 + $0x870] sm:$0xff]  ;;  %v537_v62 = vld [vmem:[#allocation5 + $0x878] sm:$0xff] }
 0x2b9   :  { %7672 = vmatpush1.bf16.msra.mxu0 %v11635_v58  ;;  %8256 = vmatpush1.bf16.msra.mxu1 %v11637_v14  ;;  %v11667_v58 = vcombine.low %v508_v45, %v512_v21  ;;  %v11669_v14 = vcombine.low %v509_v31, %v513_v11  ;;  %v540_v45 = vld [vmem:[#allocation5 + $0x890] sm:$0xff]  ;;  %v541_v31 = vld [vmem:[#allocation5 + $0x898] sm:$0xff] }
 0x2ba   :  { %7673 = vmatprep.subr.bf16.mxu0 %v11644_v61  ;;  %8257 = vmatprep.subr.bf16.mxu1 %v11646_v40  ;;  %v11676_v61 = vcombine.high %v516_v41, %v520_v15  ;;  %v11678_v40 = vcombine.high %v517_v51, %v521_v55  ;;  %v544_v21 = vld [vmem:[#allocation5 + $0x8b0] sm:$0xff]  ;;  %v545_v11 = vld [vmem:[#allocation5 + $0x8b8] sm:$0xff] }
 0x2bd   :  { %7674 = vmatpush1.bf16.msra.mxu0 %v11643_v10  ;;  %8258 = vmatpush1.bf16.msra.mxu1 %v11645_v8  ;;  %v11675_v10 = vcombine.low %v516_v41, %v520_v15  ;;  %v11677_v8 = vcombine.low %v517_v51, %v521_v55  ;;  %v548_v41 = vld [vmem:[#allocation5 + $0x8d0] sm:$0xff]  ;;  %v549_v51 = vld [vmem:[#allocation5 + $0x8d8] sm:$0xff] }
 0x2be   :  { %7675 = vmatprep.subr.bf16.mxu0 %v11652_v28  ;;  %8259 = vmatprep.subr.bf16.mxu1 %v11654_v2  ;;  %v11684_v28 = vcombine.high %v524_v23, %v528_v52  ;;  %v11686_v2 = vcombine.high %v525_v25, %v529_v12  ;;  %v552_v15 = vld [vmem:[#allocation5 + $0x8f0] sm:$0xff]  ;;  %v553_v55 = vld [vmem:[#allocation5 + $0x8f8] sm:$0xff] }
 0x2c1   :  { %7676 = vmatpush1.bf16.msra.mxu0 %v11651_v38  ;;  %8260 = vmatpush1.bf16.msra.mxu1 %v11653_v27  ;;  %v11683_v38 = vcombine.low %v524_v23, %v528_v52  ;;  %v11685_v27 = vcombine.low %v525_v25, %v529_v12  ;;  %v560_v23 = vld [vmem:[#allocation5 + $0x930] sm:$0xff]  ;;  %v557_v52 = vld [vmem:[#allocation5 + $0x918] sm:$0xff]  ;;  %v11707_v12 = vcombine.low %v548_v41, %v552_v15 }
 0x2c2   :  { %7677 = vmatprep.subr.bf16.mxu0 %v11660_v22  ;;  %8261 = vmatprep.subr.bf16.mxu1 %v11662_v0  ;;  %v11692_v22 = vcombine.high %v532_v30, %v536_v50  ;;  %v11694_v0 = vcombine.high %v533_v33, %v537_v62  ;;  %v561_v25 = vld [vmem:[#allocation5 + $0x938] sm:$0xff] }
 0x2c5   :  { %7678 = vmatpush1.bf16.msra.mxu0 %v11659_v47  ;;  %8262 = vmatpush1.bf16.msra.mxu1 %v11661_v60  ;;  %v11691_v47 = vcombine.low %v532_v30, %v536_v50  ;;  %v11693_v60 = vcombine.low %v533_v33, %v537_v62  ;;  %v565_v30 = vld [vmem:[#allocation5 + $0x958] sm:$0xff]  ;;  %v11717_v62 = vcombine.low %v557_v52, %v561_v25 }
 0x2c6   :  { %7679 = vmatprep.subr.bf16.mxu0 %v11668_v13  ;;  %8263 = vmatprep.subr.bf16.mxu1 %v11670_v32  ;;  %v11700_v13 = vcombine.high %v540_v45, %v544_v21  ;;  %v11702_v32 = vcombine.high %v541_v31, %v545_v11  ;;  %v569_v50 = vld [vmem:[#allocation5 + $0x978] sm:$0xff] }
 0x2c9   :  { %7680 = vmatpush1.bf16.msra.mxu0 %v11667_v58  ;;  %8264 = vmatpush1.bf16.msra.mxu1 %v11669_v14  ;;  %v11699_v58 = vcombine.low %v540_v45, %v544_v21  ;;  %v11708_v14 = vcombine.high %v548_v41, %v552_v15  ;;  %v577_v45 = vld [vmem:[#allocation5 + $0x9b8] sm:$0xff] }
 0x2ca   :  { %7681 = vmatprep.subr.bf16.mxu0 %v11676_v61  ;;  %8265 = vmatprep.subr.bf16.mxu1 %v11678_v40  ;;  %v11710_v61 = vcombine.high %v549_v51, %v553_v55  ;;  %v556_v40 = vld [vmem:[#allocation5 + $0x910] sm:$0xff] }
 0x2cb   :  { %v11715_v33 = vcombine.low %v556_v40, %v560_v23 }
 0x2cd   :  { %7682 = vmatpush1.bf16.msra.mxu0 %v11675_v10  ;;  %8266 = vmatpush1.bf16.msra.mxu1 %v11677_v8  ;;  %v11716_v10 = vcombine.high %v556_v40, %v560_v23  ;;  %v11718_v8 = vcombine.high %v557_v52, %v561_v25  ;;  %v596_v52 = vld [vmem:[#allocation5 + $0xa50] sm:$0xff] }
 0x2ce   :  { %7724 = vmatprep.subr.bf16.mxu0 %v11684_v28  ;;  %8308 = vmatprep.subr.bf16.mxu1 %v11686_v2  ;;  %v564_v28 = vld [vmem:[#allocation5 + $0x950] sm:$0xff] }
 0x2cf   :  { %v568_v2 = vld [vmem:[#allocation5 + $0x970] sm:$0xff] }
 0x2d0   :  { %7684 = vmatmul.mubr.bf16.vlgmr.msra.gmra.mrb[16].mxu0 %v14031_v56  ;;  %8268 = vmatmul.mubr.bf16.vlgmr.msra.gmra.mrb[16].mxu1 %v14031_v56  ;;  %v11701_v56 = vcombine.low %v541_v31, %v545_v11  ;;  %v11723_v21 = vcombine.low %v564_v28, %v568_v2  ;;  %v600_v25 = vld [vmem:[#allocation5 + $0xa70] sm:$0xff] }
 0x2d1   :  { %7725 = vmatpush1.bf16.msra.mxu0 %v11683_v38  ;;  %8309 = vmatpush1.bf16.msra.mxu1 %v11685_v27  ;;  %v11726_v38 = vcombine.high %v565_v30, %v569_v50  ;;  %v572_v27 = vld [vmem:[#allocation5 + $0x990] sm:$0xff] }
 0x2d2   :  { %7726 = vmatprep.subr.bf16.mxu0 %v11692_v22  ;;  %8310 = vmatprep.subr.bf16.mxu1 %v11694_v0  ;;  %v576_v22 = vld [vmem:[#allocation5 + $0x9b0] sm:$0xff]  ;;  %v573_v0 = vld [vmem:[#allocation5 + $0x998] sm:$0xff] }
 0x2d3   :  { %7693 = vmatprep.mubr.bf16.mxu0 %v14033_v3  ;;  %8277 = vmatprep.mubr.bf16.mxu1 %v14033_v3  ;;  %v11709_v3 = vcombine.low %v549_v51, %v553_v55  ;;  %v11732_v31 = vcombine.high %v572_v27, %v576_v22  ;;  %v11734_v11 = vcombine.high %v573_v0, %v577_v45  ;;  %v588_v55 = vld [vmem:[#allocation5 + $0xa10] sm:$0xff] }
 0x2d4   :  { %v11731_v41 = vcombine.low %v572_v27, %v576_v22  ;;  %v11733_v15 = vcombine.low %v573_v0, %v577_v45  ;;  %v612_v27 = vld [vmem:[#allocation5 + $0xad0] sm:$0xff]  ;;  %v613_v0 = vld [vmem:[#allocation5 + $0xad8] sm:$0xff] }
 0x2d5   :  { %7727 = vmatpush1.bf16.msra.mxu0 %v11691_v47  ;;  %8311 = vmatpush1.bf16.msra.mxu1 %v11693_v60  ;;  %v580_v47 = vld [vmem:[#allocation5 + $0x9d0] sm:$0xff]  ;;  %v617_v45 = vld [vmem:[#allocation5 + $0xaf8] sm:$0xff] }
 0x2d6   :  { %7728 = vmatprep.subr.bf16.mxu0 %v11700_v13  ;;  %8312 = vmatprep.subr.bf16.mxu1 %v11702_v32  ;;  %v584_v60 = vld [vmem:[#allocation5 + $0x9f0] sm:$0xff]  ;;  %v581_v13 = vld [vmem:[#allocation5 + $0x9d8] sm:$0xff] }
 0x2d7   :  { %v585_v32 = vld [vmem:[#allocation5 + $0x9f8] sm:$0xff]  ;;  %v616_v22 = vld [vmem:[#allocation5 + $0xaf0] sm:$0xff] }
 0x2d8   :  { %7694 = vmatmul.mubr.bf16.gmra.mrb[20].mxu0 %v14039_v18  ;;  %8278 = vmatmul.mubr.bf16.gmra.mrb[20].mxu1 %v14039_v18  ;;  %v11724_v18 = vcombine.high %v564_v28, %v568_v2  ;;  %v11742_v51 = vcombine.high %v581_v13, %v585_v32  ;;  %v604_v2 = vld [vmem:[#allocation5 + $0xa90] sm:$0xff] }
 0x2d9   :  { %7729 = vmatpush1.bf16.msra.mxu0 %v11699_v58  ;;  %8313 = vmatpush1.bf16.msra.mxu1 %v11701_v56  ;;  %v592_v58 = vld [vmem:[#allocation5 + $0xa30] sm:$0xff]  ;;  %v589_v56 = vld [vmem:[#allocation5 + $0xa18] sm:$0xff] }
 0x2da   :  { %7730 = vmatprep.subr.bf16.mxu0 %v11708_v14  ;;  %8314 = vmatprep.subr.bf16.mxu1 %v11710_v61  ;;  %v593_v14 = vld [vmem:[#allocation5 + $0xa38] sm:$0xff]  ;;  %v11739_v61 = vcombine.low %v580_v47, %v584_v60  ;;  %v11748_v40 = vcombine.high %v588_v55, %v592_v58 }
 0x2db   :  { %7703 = vmatprep.mubr.bf16.mxu0 %v14041_v29  ;;  %8287 = vmatprep.mubr.bf16.mxu1 %v14041_v29  ;;  %v11725_v29 = vcombine.low %v565_v30, %v569_v50  ;;  %v11750_v23 = vcombine.high %v589_v56, %v593_v14  ;;  %v608_v30 = vld [vmem:[#allocation5 + $0xab0] sm:$0xff]  ;;  %v605_v50 = vld [vmem:[#allocation5 + $0xa98] sm:$0xff] }
 0x2dd   :  { %7731 = vmatpush1.bf16.msra.mxu0 %v11707_v12  ;;  %8315 = vmatpush1.bf16.msra.mxu1 %v11709_v3  ;;  %v597_v12 = vld [vmem:[#allocation5 + $0xa58] sm:$0xff] }
 0x2de   :  { %7732 = vmatprep.subr.bf16.mxu0 %v11716_v10  ;;  %8316 = vmatprep.subr.bf16.mxu1 %v11718_v8  ;;  %v601_v3 = vld [vmem:[#allocation5 + $0xa78] sm:$0xff]  ;;  %v11747_v10 = vcombine.low %v588_v55, %v592_v58  ;;  %v11749_v8 = vcombine.low %v589_v56, %v593_v14  ;;  %v628_v55 = vld [vmem:[#allocation5 + $0xb50] sm:$0xff] }
 0x2df   :  { %v11758_v28 = vcombine.high %v597_v12, %v601_v3  ;;  %v632_v58 = vld [vmem:[#allocation5 + $0xb70] sm:$0xff]  ;;  %v629_v56 = vld [vmem:[#allocation5 + $0xb58] sm:$0xff] }
 0x2e0   :  { %7704 = vmatmul.mubr.bf16.gmra.mrb[24].mxu0 %v14047_v44  ;;  %8288 = vmatmul.mubr.bf16.gmra.mrb[24].mxu1 %v14047_v44  ;;  %v11740_v44 = vcombine.high %v580_v47, %v584_v60  ;;  %v620_v47 = vld [vmem:[#allocation5 + $0xb10] sm:$0xff]  ;;  %v633_v14 = vld [vmem:[#allocation5 + $0xb78] sm:$0xff] }
 0x2e1   :  { %7733 = vmatpush1.bf16.msra.mxu0 %v11715_v33  ;;  %8317 = vmatpush1.bf16.msra.mxu1 %v11717_v62  ;;  %v609_v33 = vld [vmem:[#allocation5 + $0xab8] sm:$0xff]  ;;  %v11755_v62 = vcombine.low %v596_v52, %v600_v25  ;;  %v624_v60 = vld [vmem:[#allocation5 + $0xb30] sm:$0xff] }
 0x2e2   :  { %7734 = vmatprep.subr.bf16.mxu0 %v11724_v18  ;;  %8318 = vmatprep.subr.bf16.mxu1 %v11726_v38  ;;  %v11757_v18 = vcombine.low %v597_v12, %v601_v3  ;;  %v11764_v38 = vcombine.high %v604_v2, %v608_v30  ;;  %v637_v12 = vld [vmem:[#allocation5 + $0xb98] sm:$0xff] }
 0x2e3   :  { %7713 = vmatprep.mubr.bf16.mxu0 %v14049_v54  ;;  %8297 = vmatprep.mubr.bf16.mxu1 %v14049_v54  ;;  %v11741_v54 = vcombine.low %v581_v13, %v585_v32  ;;  %v621_v13 = vld [vmem:[#allocation5 + $0xb18] sm:$0xff] }
 0x2e4   :  { %v625_v32 = vld [vmem:[#allocation5 + $0xb38] sm:$0xff] }
 0x2e5   :  { %7735 = vmatpush1.bf16.msra.mxu0 %v11723_v21  ;;  %8319 = vmatpush1.bf16.msra.mxu1 %v11725_v29  ;;  %v11763_v21 = vcombine.low %v604_v2, %v608_v30  ;;  %v11765_v29 = vcombine.low %v605_v50, %v609_v33  ;;  %v641_v3 = vld [vmem:[#allocation5 + $0xbb8] sm:$0xff]  ;;  %v644_v2 = vld [vmem:[#allocation5 + $0xbd0] sm:$0xff] }
 0x2e6   :  { %7736 = vmatprep.subr.bf16.mxu0 %v11732_v31  ;;  %8320 = vmatprep.subr.bf16.mxu1 %v11734_v11  ;;  %v11772_v31 = vcombine.high %v612_v27, %v616_v22  ;;  %v11774_v11 = vcombine.high %v613_v0, %v617_v45  ;;  %v648_v30 = vld [vmem:[#allocation5 + $0xbf0] sm:$0xff] }
 0x2e8   :  { %7714 = vmatmul.mubr.bf16.gmra.mrb[28].mxu0 %v14055_v7  ;;  %8298 = vmatmul.mubr.bf16.gmra.mrb[28].mxu1 %v14055_v7  ;;  %v11756_v7 = vcombine.high %v596_v52, %v600_v25  ;;  %v636_v52 = vld [vmem:[#allocation5 + $0xb90] sm:$0xff] }
 0x2e9   :  { %7737 = vmatpush1.bf16.msra.mxu0 %v11731_v41  ;;  %8321 = vmatpush1.bf16.msra.mxu1 %v11733_v15  ;;  %v11771_v41 = vcombine.low %v612_v27, %v616_v22  ;;  %v11773_v15 = vcombine.low %v613_v0, %v617_v45  ;;  %v640_v25 = vld [vmem:[#allocation5 + $0xbb0] sm:$0xff]  ;;  %v653_v0 = vld [vmem:[#allocation5 + $0xc18] sm:$0xff] }
 0x2ea   :  { %7738 = vmatprep.subr.bf16.mxu0 %v11740_v44  ;;  %8322 = vmatprep.subr.bf16.mxu1 %v11742_v51  ;;  %v11780_v44 = vcombine.high %v620_v47, %v624_v60  ;;  %v11782_v51 = vcombine.high %v621_v13, %v625_v32  ;;  %v652_v27 = vld [vmem:[#allocation5 + $0xc10] sm:$0xff]  ;;  %v657_v45 = vld [vmem:[#allocation5 + $0xc38] sm:$0xff] }
 0x2eb   :  { %7756 = vmatprep.mubr.bf16.mxu0 %v14057_v19  ;;  %8340 = vmatprep.mubr.bf16.mxu1 %v14057_v19  ;;  %v11766_v19 = vcombine.high %v605_v50, %v609_v33  ;;  %v645_v50 = vld [vmem:[#allocation5 + $0xbd8] sm:$0xff]  ;;  %v656_v22 = vld [vmem:[#allocation5 + $0xc30] sm:$0xff] }
 0x2ec   :  { %v649_v33 = vld [vmem:[#allocation5 + $0xbf8] sm:$0xff] }
 0x2ed   :  { %7739 = vmatpush1.bf16.msra.mxu0 %v11739_v61  ;;  %8323 = vmatpush1.bf16.msra.mxu1 %v11741_v54  ;;  %v11779_v61 = vcombine.low %v620_v47, %v624_v60  ;;  %v11781_v54 = vcombine.low %v621_v13, %v625_v32  ;;  %v660_v47 = vld [vmem:[#allocation5 + $0xc50] sm:$0xff]  ;;  %v661_v13 = vld [vmem:[#allocation5 + $0xc58] sm:$0xff] }
 0x2ee   :  { %7740 = vmatprep.subr.bf16.mxu0 %v11748_v40  ;;  %8324 = vmatprep.subr.bf16.mxu1 %v11750_v23  ;;  %v11788_v40 = vcombine.high %v628_v55, %v632_v58  ;;  %v11790_v23 = vcombine.high %v629_v56, %v633_v14  ;;  %v664_v60 = vld [vmem:[#allocation5 + $0xc70] sm:$0xff]  ;;  %v665_v32 = vld [vmem:[#allocation5 + $0xc78] sm:$0xff] }
 0x2f1   :  { %7741 = vmatpush1.bf16.msra.mxu0 %v11747_v10  ;;  %8325 = vmatpush1.bf16.msra.mxu1 %v11749_v8  ;;  %v11787_v10 = vcombine.low %v628_v55, %v632_v58  ;;  %v11789_v8 = vcombine.low %v629_v56, %v633_v14  ;;  %v668_v55 = vld [vmem:[#allocation5 + $0xc90] sm:$0xff]  ;;  %v669_v56 = vld [vmem:[#allocation5 + $0xc98] sm:$0xff] }
 0x2f2   :  { %7742 = vmatprep.subr.bf16.mxu0 %v11756_v7  ;;  %8326 = vmatprep.subr.bf16.mxu1 %v11758_v28  ;;  %v11796_v7 = vcombine.high %v636_v52, %v640_v25  ;;  %v11798_v28 = vcombine.high %v637_v12, %v641_v3  ;;  %v672_v58 = vld [vmem:[#allocation5 + $0xcb0] sm:$0xff]  ;;  %v673_v14 = vld [vmem:[#allocation5 + $0xcb8] sm:$0xff] }
 0x2f5   :  { %7743 = vmatpush1.bf16.msra.mxu0 %v11755_v62  ;;  %8327 = vmatpush1.bf16.msra.mxu1 %v11757_v18  ;;  %v11795_v62 = vcombine.low %v636_v52, %v640_v25  ;;  %v11797_v18 = vcombine.low %v637_v12, %v641_v3  ;;  %v676_v52 = vld [vmem:[#allocation5 + $0xcd0] sm:$0xff]  ;;  %v677_v12 = vld [vmem:[#allocation5 + $0xcd8] sm:$0xff] }
 0x2f6   :  { %7744 = vmatprep.subr.bf16.mxu0 %v11764_v38  ;;  %8328 = vmatprep.subr.bf16.mxu1 %v11766_v19  ;;  %v11804_v38 = vcombine.high %v644_v2, %v648_v30  ;;  %v11806_v19 = vcombine.high %v645_v50, %v649_v33  ;;  %v680_v25 = vld [vmem:[#allocation5 + $0xcf0] sm:$0xff]  ;;  %v681_v3 = vld [vmem:[#allocation5 + $0xcf8] sm:$0xff] }
 0x2f9   :  { %7745 = vmatpush1.bf16.msra.mxu0 %v11763_v21  ;;  %8329 = vmatpush1.bf16.msra.mxu1 %v11765_v29  ;;  %v11803_v21 = vcombine.low %v644_v2, %v648_v30  ;;  %v11805_v29 = vcombine.low %v645_v50, %v649_v33  ;;  %v688_v2 = vld [vmem:[#allocation5 + $0xd30] sm:$0xff]  ;;  %v685_v30 = vld [vmem:[#allocation5 + $0xd18] sm:$0xff]  ;;  %v11835_v33 = vcombine.low %v676_v52, %v680_v25 }
 0x2fa   :  { %7746 = vmatprep.subr.bf16.mxu0 %v11772_v31  ;;  %8330 = vmatprep.subr.bf16.mxu1 %v11774_v11  ;;  %v11812_v31 = vcombine.high %v652_v27, %v656_v22  ;;  %v11814_v11 = vcombine.high %v653_v0, %v657_v45  ;;  %v689_v50 = vld [vmem:[#allocation5 + $0xd38] sm:$0xff] }
 0x2fd   :  { %7747 = vmatpush1.bf16.msra.mxu0 %v11771_v41  ;;  %8331 = vmatpush1.bf16.msra.mxu1 %v11773_v15  ;;  %v11811_v41 = vcombine.low %v652_v27, %v656_v22  ;;  %v11813_v15 = vcombine.low %v653_v0, %v657_v45  ;;  %v693_v27 = vld [vmem:[#allocation5 + $0xd58] sm:$0xff]  ;;  %v11845_v45 = vcombine.low %v685_v30, %v689_v50 }
 0x2fe   :  { %7748 = vmatprep.subr.bf16.mxu0 %v11780_v44  ;;  %8332 = vmatprep.subr.bf16.mxu1 %v11782_v51  ;;  %v11820_v44 = vcombine.high %v660_v47, %v664_v60  ;;  %v11822_v51 = vcombine.high %v661_v13, %v665_v32  ;;  %v697_v22 = vld [vmem:[#allocation5 + $0xd78] sm:$0xff] }
 0x301   :  { %7749 = vmatpush1.bf16.msra.mxu0 %v11779_v61  ;;  %8333 = vmatpush1.bf16.msra.mxu1 %v11781_v54  ;;  %v11819_v61 = vcombine.low %v660_v47, %v664_v60  ;;  %v11821_v54 = vcombine.low %v661_v13, %v665_v32  ;;  %v705_v47 = vld [vmem:[#allocation5 + $0xdb8] sm:$0xff]  ;;  %v708_v32 = vld [vmem:[#allocation5 + $0xdd0] sm:$0xff] }
 0x302   :  { %7750 = vmatprep.subr.bf16.mxu0 %v11788_v40  ;;  %8334 = vmatprep.subr.bf16.mxu1 %v11790_v23  ;;  %v11828_v40 = vcombine.high %v668_v55, %v672_v58  ;;  %v11830_v23 = vcombine.high %v669_v56, %v673_v14 }
 0x305   :  { %7751 = vmatpush1.bf16.msra.mxu0 %v11787_v10  ;;  %8335 = vmatpush1.bf16.msra.mxu1 %v11789_v8  ;;  %v11827_v10 = vcombine.low %v668_v55, %v672_v58  ;;  %v11836_v8 = vcombine.high %v676_v52, %v680_v25  ;;  %v713_v55 = vld [vmem:[#allocation5 + $0xdf8] sm:$0xff] }
 0x306   :  { %7752 = vmatprep.subr.bf16.mxu0 %v11796_v7  ;;  %8336 = vmatprep.subr.bf16.mxu1 %v11798_v28  ;;  %v11838_v7 = vcombine.high %v677_v12, %v681_v3  ;;  %v684_v28 = vld [vmem:[#allocation5 + $0xd10] sm:$0xff] }
 0x307   :  { %v11843_v0 = vcombine.low %v684_v28, %v688_v2 }
 0x309   :  { %7753 = vmatpush1.bf16.msra.mxu0 %v11795_v62  ;;  %8337 = vmatpush1.bf16.msra.mxu1 %v11797_v18  ;;  %v11844_v62 = vcombine.high %v684_v28, %v688_v2  ;;  %v11846_v18 = vcombine.high %v685_v30, %v689_v50  ;;  %v720_v2 = vld [vmem:[#allocation5 + $0xe30] sm:$0xff] }
 0x30a   :  { %7754 = vmatprep.subr.bf16.mxu0 %v11804_v38  ;;  %8338 = vmatprep.subr.bf16.mxu1 %v11806_v19  ;;  %v692_v38 = vld [vmem:[#allocation5 + $0xd50] sm:$0xff] }
 0x30b   :  { %v696_v19 = vld [vmem:[#allocation5 + $0xd70] sm:$0xff] }
 0x30c   :  { %v11851_v60 = vcombine.low %v692_v38, %v696_v19 }
 0x30d   :  { %7755 = vmatpush1.bf16.msra.mxu0 %v11803_v21  ;;  %8339 = vmatpush1.bf16.msra.mxu1 %v11805_v29  ;;  %v11854_v21 = vcombine.high %v693_v27, %v697_v22  ;;  %v700_v29 = vld [vmem:[#allocation5 + $0xd90] sm:$0xff] }
 0x30e   :  { %7797 = vmatprep.subr.bf16.mxu0 %v11812_v31  ;;  %8381 = vmatprep.subr.bf16.mxu1 %v11814_v11  ;;  %v704_v31 = vld [vmem:[#allocation5 + $0xdb0] sm:$0xff]  ;;  %v701_v11 = vld [vmem:[#allocation5 + $0xd98] sm:$0xff] }
 0x30f   :  { %v11860_v13 = vcombine.high %v700_v29, %v704_v31 }
 0x310   :  { %7757 = vmatmul.mubr.bf16.vlgmr.msra.gmra.mrb[16].mxu0 %v14063_v59  ;;  %8341 = vmatmul.mubr.bf16.vlgmr.msra.gmra.mrb[16].mxu1 %v14063_v59  ;;  %v11829_v59 = vcombine.low %v669_v56, %v673_v14 }
 0x311   :  { %7798 = vmatpush1.bf16.msra.mxu0 %v11811_v41  ;;  %8382 = vmatpush1.bf16.msra.mxu1 %v11813_v15  ;;  %v11862_v15 = vcombine.high %v701_v11, %v705_v47 }
 0x312   :  { %7799 = vmatprep.subr.bf16.mxu0 %v11820_v44  ;;  %8383 = vmatprep.subr.bf16.mxu1 %v11822_v51  ;;  %v712_v44 = vld [vmem:[#allocation5 + $0xdf0] sm:$0xff]  ;;  %v709_v51 = vld [vmem:[#allocation5 + $0xdd8] sm:$0xff] }
 0x313   :  { %7766 = vmatprep.mubr.bf16.mxu0 %v14065_v6  ;;  %8350 = vmatprep.mubr.bf16.mxu1 %v14065_v6  ;;  %v11837_v6 = vcombine.low %v677_v12, %v681_v3  ;;  %v11868_v12 = vcombine.high %v708_v32, %v712_v44  ;;  %v11870_v3 = vcombine.high %v709_v51, %v713_v55 }
 0x315   :  { %7800 = vmatpush1.bf16.msra.mxu0 %v11819_v61  ;;  %8384 = vmatpush1.bf16.msra.mxu1 %v11821_v54  ;;  %v11861_v54 = vcombine.low %v701_v11, %v705_v47  ;;  %v729_v11 = vld [vmem:[#allocation5 + $0xe78] sm:$0xff] }
 0x316   :  { %7801 = vmatprep.subr.bf16.mxu0 %v11828_v40  ;;  %8385 = vmatprep.subr.bf16.mxu1 %v11830_v23 }
 0x318   :  { %7767 = vmatmul.mubr.bf16.gmra.mrb[20].mxu0 %v14071_v26  ;;  %8351 = vmatmul.mubr.bf16.gmra.mrb[20].mxu1 %v14071_v26  ;;  %v11852_v26 = vcombine.high %v692_v38, %v696_v19  ;;  %v11867_v19 = vcombine.low %v708_v32, %v712_v44 }
 0x319   :  { %7802 = vmatpush1.bf16.msra.mxu0 %v11827_v10  ;;  %8386 = vmatpush1.bf16.msra.mxu1 %v11829_v59  ;;  %v14297_v10 = vld [vmem:[#allocation5 + $0xe10] sm:$0xff] }
 0x31a   :  { %7803 = vmatprep.subr.bf16.mxu0 %v11836_v8  ;;  %8387 = vmatprep.subr.bf16.mxu1 %v11838_v7 }
 0x31b   :  { %7776 = vmatprep.mubr.bf16.mxu0 %v14073_v37  ;;  %8360 = vmatprep.mubr.bf16.mxu1 %v14073_v37  ;;  %v11853_v37 = vcombine.low %v693_v27, %v697_v22  ;;  %v11869_v22 = vcombine.low %v709_v51, %v713_v55 }
 0x31d   :  { %7804 = vmatpush1.bf16.msra.mxu0 %v11835_v33  ;;  %8388 = vmatpush1.bf16.msra.mxu1 %v11837_v6  ;;  %v717_v6 = vld [vmem:[#allocation5 + $0xe18] sm:$0xff] }
 0x31e   :  { %7805 = vmatprep.subr.bf16.mxu0 %v11844_v62  ;;  %8389 = vmatprep.subr.bf16.mxu1 %v11846_v18  ;;  %v721_v62 = vld [vmem:[#allocation5 + $0xe38] sm:$0xff] }
 0x31f   :  { %v11877_v32 = vcombine.low %v717_v6, %v721_v62 }
 0x320   :  { %7777 = vmatmul.mubr.bf16.gmra.mrb[24].mxu0 %v14079_v53  ;;  %8361 = vmatmul.mubr.bf16.gmra.mrb[24].mxu1 %v14079_v53  ;;  %v11859_v53 = vcombine.low %v700_v29, %v704_v31  ;;  %v728_v29 = vld [vmem:[#allocation5 + $0xe70] sm:$0xff]  ;;  %v725_v31 = vld [vmem:[#allocation5 + $0xe58] sm:$0xff] }
 0x321   :  { %7806 = vmatpush1.bf16.msra.mxu0 %v11843_v0  ;;  %8390 = vmatpush1.bf16.msra.mxu1 %v11845_v45  ;;  %v11876_v0 = vcombine.high %v14297_v10, %v720_v2  ;;  %v724_v45 = vld [vmem:[#allocation5 + $0xe50] sm:$0xff] }
 0x322   :  { %7807 = vmatprep.subr.bf16.mxu0 %v11852_v26  ;;  %8391 = vmatprep.subr.bf16.mxu1 %v11854_v21  ;;  %v11878_v21 = vcombine.high %v717_v6, %v721_v62  ;;  %v11884_v55 = vcombine.high %v724_v45, %v728_v29  ;;  %v744_v6 = vld [vmem:[#allocation5 + $0xef0] sm:$0xff]  ;;  %v741_v62 = vld [vmem:[#allocation5 + $0xed8] sm:$0xff] }
 0x323   :  { %v6955_v41 = vpop.f32.mrb[0].mxu0  ;;  %7786 = vmatprep.mubr.bf16.mxu0 %v14081_v4  ;;  %v7539_v58 = vpop.f32.mrb[0].mxu1  ;;  %8370 = vmatprep.mubr.bf16.mxu1 %v14081_v4 }
 0x324   :  { %v6957_v56 = vpop.f32.mrb[1].mxu0  ;;  %v7541_v14 = vpop.f32.mrb[1].mxu1  ;;  %v8746_v40 = vmax.f32 %v6955_v41, 0.0  ;;  %v8748_v59 = vmax.f32 %v7539_v58, 0.0  ;;  %v11886_v58 = vcombine.high %v725_v31, %v729_v11 }
 0x325   :  { %v6959_v61 = vpop.f32.mrb[2].mxu0  ;;  %7808 = vmatpush1.bf16.msra.mxu0 %v11851_v60  ;;  %v7543_v52 = vpop.f32.mrb[2].mxu1  ;;  %8392 = vmatpush1.bf16.msra.mxu1 %v11853_v37  ;;  %v8747_v8 = vmax.f32 %v6957_v56, 0.0  ;;  %v8749_v30 = vmax.f32 %v7541_v14, 0.0  ;;  %v732_v56 = vld [vmem:[#allocation5 + $0xe90] sm:$0xff] }
 0x326   :  { %v8754_v23 = vmax.f32 %v6959_v61, 0.0  ;;  %v6961_v25 = vpop.f32.mrb[3].mxu0  ;;  %7809 = vmatprep.subr.bf16.mxu0 %v11860_v13  ;;  %v8756_v7 = vmax.f32 %v7543_v52, 0.0  ;;  %v7545_v4 = vpop.f32.mrb[3].mxu1  ;;  %8393 = vmatprep.subr.bf16.mxu1 %v11862_v15  ;;  %v11875_v13 = vcombine.low %v14297_v10, %v720_v2  ;;  %v740_v2 = vld [vmem:[#allocation5 + $0xed0] sm:$0xff] }
 0x327   :  { %v8755_v28 = vmax.f32 %v6961_v25, 0.0  ;;  %v8757_v33 = vmax.f32 %v7545_v4, 0.0 }
 0x328   :  { %v14299_v50 = vpack.c.bf16 %v8754_v23, %v8746_v40  ;;  %7787 = vmatmul.mubr.bf16.gmra.mrb[28].mxu0 %v14087_v24  ;;  %v14302_v18 = vpack.c.bf16 %v8756_v7, %v8748_v59  ;;  %8371 = vmatmul.mubr.bf16.gmra.mrb[28].mxu1 %v14087_v24  ;;  %v736_v40 = vld [vmem:[#allocation5 + $0xeb0] sm:$0xff] }
 0x329   :  { %v14304_v38 = vpack.c.bf16 %v8755_v28, %v8747_v8  ;;  %7810 = vmatpush1.bf16.msra.mxu0 %v11859_v53  ;;  %v14307_v27 = vpack.c.bf16 %v8757_v33, %v8749_v30  ;;  %8394 = vmatpush1.bf16.msra.mxu1 %v11861_v54  ;;  %v11883_v8 = vcombine.low %v724_v45, %v728_v29 }
 0x32a   :  { %7811 = vmatprep.subr.bf16.mxu0 %v11868_v12  ;;  %8395 = vmatprep.subr.bf16.mxu1 %v11870_v3  ;;  %v733_v12 = vld [vmem:[#allocation5 + $0xe98] sm:$0xff]  ;;  %v11885_v28 = vcombine.low %v725_v31, %v729_v11  ;;  %v11892_v4 = vcombine.high %v732_v56, %v736_v40  ;;  %v11900_v11 = vcombine.high %v740_v2, %v744_v6 }
 0x32b   :  { %v6965_v26 = vpop.f32.mrb[4].mxu0  ;;  %7829 = vmatprep.mubr.bf16.mxu0 %v14089_v39  ;;  %v7549_v47 = vpop.f32.mrb[4].mxu1  ;;  %8413 = vmatprep.mubr.bf16.mxu1 %v14089_v39  ;;  %v737_v3 = vld [vmem:[#allocation5 + $0xeb8] sm:$0xff] }
 0x32c   :  { %v6967_v60 = vpop.f32.mrb[5].mxu0  ;;  %v7551_v24 = vpop.f32.mrb[5].mxu1  ;;  %v8762_v41 = vmax.f32 %v6965_v26, 0.0  ;;  %v8764_v14 = vmax.f32 %v7549_v47, 0.0  ;;  %v11894_v33 = vcombine.high %v733_v12, %v737_v3  ;;  %v11891_v47 = vcombine.low %v732_v56, %v736_v40 }
 0x32d   :  { %v6969_v37 = vpop.f32.mrb[6].mxu0  ;;  %7812 = vmatpush1.bf16.msra.mxu0 %v11867_v19  ;;  %v7553_v44 = vpop.f32.mrb[6].mxu1  ;;  %8396 = vmatpush1.bf16.msra.mxu1 %v11869_v22  ;;  %v8763_v61 = vmax.f32 %v6967_v60, 0.0  ;;  %v8765_v23 = vmax.f32 %v7551_v24, 0.0  ;;  %v745_v19 = vld [vmem:[#allocation5 + $0xef8] sm:$0xff]  ;;  %v11893_v45 = vcombine.low %v733_v12, %v737_v3  ;;  %v11899_v40 = vcombine.low %v740_v2, %v744_v6  ;;  %v756_v3 = vld [vmem:[#allocation5 + $0xf50] sm:$0xff] }
 0x32e   :  { %v8770_v15 = vmax.f32 %v6969_v37, 0.0  ;;  %v6971_v51 = vpop.f32.mrb[7].mxu0  ;;  %7813 = vmatprep.subr.bf16.mxu0 %v11876_v0  ;;  %v8772_v53 = vmax.f32 %v7553_v44, 0.0  ;;  %v7555_v39 = vpop.f32.mrb[7].mxu1  ;;  %8397 = vmatprep.subr.bf16.mxu1 %v11878_v21  ;;  %v11902_v37 = vcombine.high %v741_v62, %v745_v19 }
 0x32f   :  { %v8771_v54 = vmax.f32 %v6971_v51, 0.0  ;;  %v8773_v25 = vmax.f32 %v7555_v39, 0.0 }
 0x330   :  { %v14313_v52 = vpack.c.bf16 %v8770_v15, %v8762_v41  ;;  %v14315_v10 = vpack.c.bf16 %v8772_v53, %v8764_v14  ;;  %v753_v53 = vld [vmem:[#allocation5 + $0xf38] sm:$0xff] }
 0x331   :  { %v14317_v59 = vpack.c.bf16 %v8771_v54, %v8763_v61  ;;  %7814 = vmatpush1.bf16.msra.mxu0 %v11875_v13  ;;  %v14319_v7 = vpack.c.bf16 %v8773_v25, %v8765_v23  ;;  %8398 = vmatpush1.bf16.msra.mxu1 %v11877_v32  ;;  %v748_v13 = vld [vmem:[#allocation5 + $0xf10] sm:$0xff]  ;;  %v749_v61 = vld [vmem:[#allocation5 + $0xf18] sm:$0xff]  ;;  %v11901_v25 = vcombine.low %v741_v62, %v745_v19 }
 0x332   :  { %7815 = vmatprep.subr.bf16.mxu0 %v11884_v55  ;;  %8399 = vmatprep.subr.bf16.mxu1 %v11886_v58  ;;  %v752_v55 = vld [vmem:[#allocation5 + $0xf30] sm:$0xff]  ;;  %v11909_v2 = vcombine.low %v749_v61, %v753_v53 }
 0x333   :  { %v6975_v30 = vpop.f32.mrb[8].mxu0  ;;  %v7559_v22 = vpop.f32.mrb[8].mxu1  ;;  %v11908_v12 = vcombine.high %v748_v13, %v752_v55 }
 0x334   :  { %v6977_v0 = vpop.f32.mrb[9].mxu0  ;;  %v7561_v26 = vpop.f32.mrb[9].mxu1  ;;  %v8778_v29 = vmax.f32 %v6975_v30, 0.0  ;;  %v8780_v32 = vmax.f32 %v7559_v22, 0.0  ;;  %v757_v30 = vld [vmem:[#allocation5 + $0xf58] sm:$0xff] }
 0x335   :  { %v6979_v21 = vpop.f32.mrb[10].mxu0  ;;  %7816 = vmatpush1.bf16.msra.mxu0 %v11883_v8  ;;  %v7563_v24 = vpop.f32.mrb[10].mxu1  ;;  %8400 = vmatpush1.bf16.msra.mxu1 %v11885_v28  ;;  %v8779_v41 = vmax.f32 %v6977_v0, 0.0  ;;  %v8781_v58 = vmax.f32 %v7561_v26, 0.0  ;;  %v11910_v28 = vcombine.high %v749_v61, %v753_v53 }
 0x336   :  { %v8786_v60 = vmax.f32 %v6979_v21, 0.0  ;;  %v6981_v31 = vpop.f32.mrb[11].mxu0  ;;  %7817 = vmatprep.subr.bf16.mxu0 %v11892_v4  ;;  %v8788_v15 = vmax.f32 %v7563_v24, 0.0  ;;  %v7565_v51 = vpop.f32.mrb[11].mxu1  ;;  %8401 = vmatprep.subr.bf16.mxu1 %v11894_v33  ;;  %v760_v4 = vld [vmem:[#allocation5 + $0xf70] sm:$0xff]  ;;  %v761_v33 = vld [vmem:[#allocation5 + $0xf78] sm:$0xff] }
 0x337   :  { %v8787_v44 = vmax.f32 %v6981_v31, 0.0  ;;  %v8789_v56 = vmax.f32 %v7565_v51, 0.0  ;;  %v11916_v19 = vcombine.high %v756_v3, %v760_v4  ;;  %v764_v24 = vld [vmem:[#allocation5 + $0xf90] sm:$0xff]  ;;  %v11915_v53 = vcombine.low %v756_v3, %v760_v4 }
 0x338   :  { %v14321_v14 = vpack.c.bf16 %v8786_v60, %v8778_v29  ;;  %v14323_v54 = vpack.c.bf16 %v8788_v15, %v8780_v32  ;;  %v11918_v60 = vcombine.high %v757_v30, %v761_v33  ;;  %v768_v15 = vld [vmem:[#allocation5 + $0xfb0] sm:$0xff] }
 0x339   :  { %v14325_v39 = vpack.c.bf16 %v8787_v44, %v8779_v41  ;;  %7818 = vmatpush1.bf16.msra.mxu0 %v11891_v47  ;;  %v14327_v23 = vpack.c.bf16 %v8789_v56, %v8781_v58  ;;  %8402 = vmatpush1.bf16.msra.mxu1 %v11893_v45  ;;  %v11907_v47 = vcombine.low %v748_v13, %v752_v55  ;;  %v765_v55 = vld [vmem:[#allocation5 + $0xf98] sm:$0xff]  ;;  %v780_v4 = vld [vmem:[#allocation5 + $0x1010] sm:$0xff] }
 0x33a   :  { %7819 = vmatprep.subr.bf16.mxu0 %v11900_v11  ;;  %8403 = vmatprep.subr.bf16.mxu1 %v11902_v37  ;;  %v769_v58 = vld [vmem:[#allocation5 + $0xfb8] sm:$0xff] }
 0x33b   :  { %v6985_v8 = vpop.f32.mrb[12].mxu0  ;;  %v7569_v22 = vpop.f32.mrb[12].mxu1 }
 0x33c   :  { %v6987_v0 = vpop.f32.mrb[13].mxu0  ;;  %v7571_v26 = vpop.f32.mrb[13].mxu1  ;;  %v8794_v6 = vmax.f32 %v6985_v8, 0.0  ;;  %v8796_v31 = vmax.f32 %v7569_v22, 0.0  ;;  %v11926_v8 = vcombine.high %v765_v55, %v769_v58  ;;  %v776_v22 = vld [vmem:[#allocation5 + $0xff0] sm:$0xff] }
 0x33d   :  { %v6989_v21 = vpop.f32.mrb[14].mxu0  ;;  %7820 = vmatpush1.bf16.msra.mxu0 %v11899_v40  ;;  %v7573_v45 = vpop.f32.mrb[14].mxu1  ;;  %8404 = vmatpush1.bf16.msra.mxu1 %v11901_v25  ;;  %v8795_v11 = vmax.f32 %v6987_v0, 0.0  ;;  %v8797_v44 = vmax.f32 %v7571_v26, 0.0  ;;  %v11917_v25 = vcombine.low %v757_v30, %v761_v33  ;;  %v773_v0 = vld [vmem:[#allocation5 + $0xfd8] sm:$0xff] }
 0x33e   :  { %v8802_v29 = vmax.f32 %v6989_v21, 0.0  ;;  %v6991_v62 = vpop.f32.mrb[15].mxu0  ;;  %7821 = vmatprep.subr.bf16.mxu0 %v11908_v12  ;;  %v8804_v37 = vmax.f32 %v7573_v45, 0.0  ;;  %v7575_v41 = vpop.f32.mrb[15].mxu1  ;;  %8405 = vmatprep.subr.bf16.mxu1 %v11910_v28  ;;  %v11924_v12 = vcombine.high %v764_v24, %v768_v15  ;;  %v772_v28 = vld [vmem:[#allocation5 + $0xfd0] sm:$0xff]  ;;  %v777_v26 = vld [vmem:[#allocation5 + $0xff8] sm:$0xff]  ;;  %v11923_v21 = vcombine.low %v764_v24, %v768_v15 }
 0x33f   :  { %v8803_v32 = vmax.f32 %v6991_v62, 0.0  ;;  %v8805_v13 = vmax.f32 %v7575_v41, 0.0  ;;  %v11934_v3 = vcombine.high %v773_v0, %v777_v26  ;;  %v785_v45 = vld [vmem:[#allocation5 + $0x1038] sm:$0xff]  ;;  %v11931_v30 = vcombine.low %v772_v28, %v776_v22  ;;  %v792_v24 = vld [vmem:[#allocation5 + $0x1070] sm:$0xff] }
 0x340   :  { %v14329_v51 = vpack.c.bf16 %v8802_v29, %v8794_v6  ;;  %v14331_v56 = vpack.c.bf16 %v8804_v37, %v8796_v31  ;;  %v11925_v6 = vcombine.low %v765_v55, %v769_v58  ;;  %v11932_v29 = vcombine.high %v772_v28, %v776_v22  ;;  %v789_v31 = vld [vmem:[#allocation5 + $0x1058] sm:$0xff]  ;;  %v804_v28 = vld [vmem:[#allocation5 + $0x10d0] sm:$0xff] }
 0x341   :  { %v14333_v61 = vpack.c.bf16 %v8803_v32, %v8795_v11  ;;  %7822 = vmatpush1.bf16.msra.mxu0 %v11907_v47  ;;  %v14335_v40 = vpack.c.bf16 %v8805_v13, %v8797_v44  ;;  %8406 = vmatpush1.bf16.msra.mxu1 %v11909_v2  ;;  %v784_v47 = vld [vmem:[#allocation5 + $0x1030] sm:$0xff]  ;;  %v781_v2 = vld [vmem:[#allocation5 + $0x1018] sm:$0xff]  ;;  %v11933_v33 = vcombine.low %v773_v0, %v777_v26 }
 0x342   :  { %7823 = vmatprep.subr.bf16.mxu0 %v11916_v19  ;;  %8407 = vmatprep.subr.bf16.mxu1 %v11918_v60  ;;  %v11940_v62 = vcombine.high %v780_v4, %v784_v47  ;;  %v11942_v19 = vcombine.high %v781_v2, %v785_v45  ;;  %v788_v60 = vld [vmem:[#allocation5 + $0x1050] sm:$0xff]  ;;  %v793_v11 = vld [vmem:[#allocation5 + $0x1078] sm:$0xff]  ;;  %v11939_v37 = vcombine.low %v780_v4, %v784_v47 }
 0x343   :  { %v11941_v32 = vcombine.low %v781_v2, %v785_v45  ;;  %v11948_v41 = vcombine.high %v788_v60, %v792_v24  ;;  %v11950_v15 = vcombine.high %v789_v31, %v793_v11  ;;  %v796_v44 = vld [vmem:[#allocation5 + $0x1090] sm:$0xff]  ;;  %v797_v55 = vld [vmem:[#allocation5 + $0x1098] sm:$0xff] }
 0x344   :  { %v800_v13 = vld [vmem:[#allocation5 + $0x10b0] sm:$0xff]  ;;  %v801_v58 = vld [vmem:[#allocation5 + $0x10b8] sm:$0xff] }
 0x345   :  { %7824 = vmatpush1.bf16.msra.mxu0 %v11915_v53  ;;  %8408 = vmatpush1.bf16.msra.mxu1 %v11917_v25  ;;  %v11947_v53 = vcombine.low %v788_v60, %v792_v24  ;;  %v11949_v25 = vcombine.low %v789_v31, %v793_v11  ;;  %v808_v22 = vld [vmem:[#allocation5 + $0x10f0] sm:$0xff]  ;;  %v805_v0 = vld [vmem:[#allocation5 + $0x10d8] sm:$0xff] }
 0x346   :  { %7825 = vmatprep.subr.bf16.mxu0 %v11924_v12  ;;  %8409 = vmatprep.subr.bf16.mxu1 %v11926_v8  ;;  %v11956_v12 = vcombine.high %v796_v44, %v800_v13  ;;  %v11958_v8 = vcombine.high %v797_v55, %v801_v58  ;;  %v809_v26 = vld [vmem:[#allocation5 + $0x10f8] sm:$0xff]  ;;  %v816_v4 = vld [vmem:[#allocation5 + $0x1130] sm:$0xff]  ;;  %v11963_v45 = vcombine.low %v804_v28, %v808_v22 }
 0x347   :  { %v813_v47 = vld [vmem:[#allocation5 + $0x1118] sm:$0xff] }
 0x348   :  { %v817_v2 = vld [vmem:[#allocation5 + $0x1138] sm:$0xff] }
 0x349   :  { %7826 = vmatpush1.bf16.msra.mxu0 %v11923_v21  ;;  %8410 = vmatpush1.bf16.msra.mxu1 %v11925_v6  ;;  %v11955_v21 = vcombine.low %v796_v44, %v800_v13  ;;  %v11964_v6 = vcombine.high %v804_v28, %v808_v22  ;;  %v821_v60 = vld [vmem:[#allocation5 + $0x1158] sm:$0xff]  ;;  %v11973_v11 = vcombine.low %v813_v47, %v817_v2 }
 0x34a   :  { %7827 = vmatprep.subr.bf16.mxu0 %v11932_v29  ;;  %8411 = vmatprep.subr.bf16.mxu1 %v11934_v3  ;;  %v11966_v29 = vcombine.high %v805_v0, %v809_v26  ;;  %v812_v3 = vld [vmem:[#allocation5 + $0x1110] sm:$0xff]  ;;  %v825_v24 = vld [vmem:[#allocation5 + $0x1178] sm:$0xff] }
 0x34b   :  { %v11971_v31 = vcombine.low %v812_v3, %v816_v4  ;;  %v833_v44 = vld [vmem:[#allocation5 + $0x11b8] sm:$0xff] }
 0x34d   :  { %7828 = vmatpush1.bf16.msra.mxu0 %v11931_v30  ;;  %8412 = vmatpush1.bf16.msra.mxu1 %v11933_v33  ;;  %v11972_v30 = vcombine.high %v812_v3, %v816_v4  ;;  %v11974_v33 = vcombine.high %v813_v47, %v817_v2  ;;  %v852_v47 = vld [vmem:[#allocation5 + $0x1250] sm:$0xff] }
 0x34e   :  { %7870 = vmatprep.subr.bf16.mxu0 %v11940_v62  ;;  %8454 = vmatprep.subr.bf16.mxu1 %v11942_v19  ;;  %v820_v62 = vld [vmem:[#allocation5 + $0x1150] sm:$0xff] }
 0x34f   :  { %v824_v19 = vld [vmem:[#allocation5 + $0x1170] sm:$0xff] }
 0x350   :  { %7830 = vmatmul.mubr.bf16.vlgmr.msra.gmra.mrb[16].mxu0 %v14095_v35  ;;  %8414 = vmatmul.mubr.bf16.vlgmr.msra.gmra.mrb[16].mxu1 %v14095_v35  ;;  %v11957_v35 = vcombine.low %v797_v55, %v801_v58  ;;  %v11979_v13 = vcombine.low %v820_v62, %v824_v19  ;;  %v856_v2 = vld [vmem:[#allocation5 + $0x1270] sm:$0xff] }
 0x351   :  { %7871 = vmatpush1.bf16.msra.mxu0 %v11939_v37  ;;  %8455 = vmatpush1.bf16.msra.mxu1 %v11941_v32  ;;  %v11982_v37 = vcombine.high %v821_v60, %v825_v24  ;;  %v828_v32 = vld [vmem:[#allocation5 + $0x1190] sm:$0xff] }
 0x352   :  { %7872 = vmatprep.subr.bf16.mxu0 %v11948_v41  ;;  %8456 = vmatprep.subr.bf16.mxu1 %v11950_v15  ;;  %v832_v41 = vld [vmem:[#allocation5 + $0x11b0] sm:$0xff]  ;;  %v829_v15 = vld [vmem:[#allocation5 + $0x1198] sm:$0xff] }
 0x353   :  { %7839 = vmatprep.mubr.bf16.mxu0 %v14097_v49  ;;  %8423 = vmatprep.mubr.bf16.mxu1 %v14097_v49  ;;  %v11965_v49 = vcombine.low %v805_v0, %v809_v26  ;;  %v11988_v55 = vcombine.high %v828_v32, %v832_v41  ;;  %v11990_v58 = vcombine.high %v829_v15, %v833_v44  ;;  %v844_v26 = vld [vmem:[#allocation5 + $0x1210] sm:$0xff] }
 0x354   :  { %v11987_v28 = vcombine.low %v828_v32, %v832_v41  ;;  %v11989_v22 = vcombine.low %v829_v15, %v833_v44  ;;  %v868_v32 = vld [vmem:[#allocation5 + $0x12d0] sm:$0xff]  ;;  %v869_v15 = vld [vmem:[#allocation5 + $0x12d8] sm:$0xff] }
 0x355   :  { %7873 = vmatpush1.bf16.msra.mxu0 %v11947_v53  ;;  %8457 = vmatpush1.bf16.msra.mxu1 %v11949_v25  ;;  %v836_v53 = vld [vmem:[#allocation5 + $0x11d0] sm:$0xff]  ;;  %v873_v44 = vld [vmem:[#allocation5 + $0x12f8] sm:$0xff] }
 0x356   :  { %7874 = vmatprep.subr.bf16.mxu0 %v11956_v12  ;;  %8458 = vmatprep.subr.bf16.mxu1 %v11958_v8  ;;  %v840_v25 = vld [vmem:[#allocation5 + $0x11f0] sm:$0xff]  ;;  %v837_v12 = vld [vmem:[#allocation5 + $0x11d8] sm:$0xff] }
 0x357   :  { %v841_v8 = vld [vmem:[#allocation5 + $0x11f8] sm:$0xff]  ;;  %v872_v41 = vld [vmem:[#allocation5 + $0x12f0] sm:$0xff] }
 0x358   :  { %7840 = vmatmul.mubr.bf16.gmra.mrb[20].mxu0 %v14103_v9  ;;  %8424 = vmatmul.mubr.bf16.gmra.mrb[20].mxu1 %v14103_v9  ;;  %v11980_v9 = vcombine.high %v820_v62, %v824_v19  ;;  %v11998_v0 = vcombine.high %v837_v12, %v841_v8  ;;  %v860_v19 = vld [vmem:[#allocation5 + $0x1290] sm:$0xff] }
 0x359   :  { %7875 = vmatpush1.bf16.msra.mxu0 %v11955_v21  ;;  %8459 = vmatpush1.bf16.msra.mxu1 %v11957_v35  ;;  %v848_v21 = vld [vmem:[#allocation5 + $0x1230] sm:$0xff]  ;;  %v845_v35 = vld [vmem:[#allocation5 + $0x1218] sm:$0xff] }
 0x35a   :  { %7876 = vmatprep.subr.bf16.mxu0 %v11964_v6  ;;  %8460 = vmatprep.subr.bf16.mxu1 %v11966_v29  ;;  %v849_v6 = vld [vmem:[#allocation5 + $0x1238] sm:$0xff]  ;;  %v11995_v29 = vcombine.low %v836_v53, %v840_v25  ;;  %v12004_v3 = vcombine.high %v844_v26, %v848_v21 }
 0x35b   :  { %7849 = vmatprep.mubr.bf16.mxu0 %v14105_v17  ;;  %8433 = vmatprep.mubr.bf16.mxu1 %v14105_v17  ;;  %v11981_v17 = vcombine.low %v821_v60, %v825_v24  ;;  %v12006_v4 = vcombine.high %v845_v35, %v849_v6  ;;  %v864_v60 = vld [vmem:[#allocation5 + $0x12b0] sm:$0xff]  ;;  %v861_v24 = vld [vmem:[#allocation5 + $0x1298] sm:$0xff] }
 0x35d   :  { %7877 = vmatpush1.bf16.msra.mxu0 %v11963_v45  ;;  %8461 = vmatpush1.bf16.msra.mxu1 %v11965_v49  ;;  %v853_v45 = vld [vmem:[#allocation5 + $0x1258] sm:$0xff] }
 0x35e   :  { %7878 = vmatprep.subr.bf16.mxu0 %v11972_v30  ;;  %8462 = vmatprep.subr.bf16.mxu1 %v11974_v33  ;;  %v857_v49 = vld [vmem:[#allocation5 + $0x1278] sm:$0xff]  ;;  %v12003_v30 = vcombine.low %v844_v26, %v848_v21  ;;  %v12005_v33 = vcombine.low %v845_v35, %v849_v6  ;;  %v884_v26 = vld [vmem:[#allocation5 + $0x1350] sm:$0xff] }
 0x35f   :  { %v12014_v62 = vcombine.high %v853_v45, %v857_v49  ;;  %v888_v21 = vld [vmem:[#allocation5 + $0x1370] sm:$0xff]  ;;  %v885_v35 = vld [vmem:[#allocation5 + $0x1358] sm:$0xff] }
 0x360   :  { %7850 = vmatmul.mubr.bf16.gmra.mrb[24].mxu0 %v14111_v42  ;;  %8434 = vmatmul.mubr.bf16.gmra.mrb[24].mxu1 %v14111_v42  ;;  %v11996_v42 = vcombine.high %v836_v53, %v840_v25  ;;  %v876_v53 = vld [vmem:[#allocation5 + $0x1310] sm:$0xff]  ;;  %v889_v6 = vld [vmem:[#allocation5 + $0x1378] sm:$0xff] }
 0x361   :  { %7879 = vmatpush1.bf16.msra.mxu0 %v11971_v31  ;;  %8463 = vmatpush1.bf16.msra.mxu1 %v11973_v11  ;;  %v865_v31 = vld [vmem:[#allocation5 + $0x12b8] sm:$0xff]  ;;  %v12011_v11 = vcombine.low %v852_v47, %v856_v2  ;;  %v880_v25 = vld [vmem:[#allocation5 + $0x1330] sm:$0xff] }
 0x362   :  { %7880 = vmatprep.subr.bf16.mxu0 %v11980_v9  ;;  %8464 = vmatprep.subr.bf16.mxu1 %v11982_v37  ;;  %v12013_v9 = vcombine.low %v853_v45, %v857_v49  ;;  %v12020_v37 = vcombine.high %v860_v19, %v864_v60  ;;  %v893_v45 = vld [vmem:[#allocation5 + $0x1398] sm:$0xff] }
 0x363   :  { %7859 = vmatprep.mubr.bf16.mxu0 %v14113_v57  ;;  %8443 = vmatprep.mubr.bf16.mxu1 %v14113_v57  ;;  %v11997_v57 = vcombine.low %v837_v12, %v841_v8  ;;  %v877_v12 = vld [vmem:[#allocation5 + $0x1318] sm:$0xff] }
 0x364   :  { %v881_v8 = vld [vmem:[#allocation5 + $0x1338] sm:$0xff] }
 0x365   :  { %7881 = vmatpush1.bf16.msra.mxu0 %v11979_v13  ;;  %8465 = vmatpush1.bf16.msra.mxu1 %v11981_v17  ;;  %v12019_v13 = vcombine.low %v860_v19, %v864_v60  ;;  %v12021_v17 = vcombine.low %v861_v24, %v865_v31  ;;  %v897_v49 = vld [vmem:[#allocation5 + $0x13b8] sm:$0xff]  ;;  %v900_v19 = vld [vmem:[#allocation5 + $0x13d0] sm:$0xff] }
 0x366   :  { %7882 = vmatprep.subr.bf16.mxu0 %v11988_v55  ;;  %8466 = vmatprep.subr.bf16.mxu1 %v11990_v58  ;;  %v12028_v55 = vcombine.high %v868_v32, %v872_v41  ;;  %v12030_v58 = vcombine.high %v869_v15, %v873_v44  ;;  %v904_v60 = vld [vmem:[#allocation5 + $0x13f0] sm:$0xff] }
 0x368   :  { %7860 = vmatmul.mubr.bf16.gmra.mrb[28].mxu0 %v14119_v16  ;;  %8444 = vmatmul.mubr.bf16.gmra.mrb[28].mxu1 %v14119_v16  ;;  %v12012_v16 = vcombine.high %v852_v47, %v856_v2  ;;  %v892_v47 = vld [vmem:[#allocation5 + $0x1390] sm:$0xff] }
 0x369   :  { %7883 = vmatpush1.bf16.msra.mxu0 %v11987_v28  ;;  %8467 = vmatpush1.bf16.msra.mxu1 %v11989_v22  ;;  %v12027_v28 = vcombine.low %v868_v32, %v872_v41  ;;  %v12029_v22 = vcombine.low %v869_v15, %v873_v44  ;;  %v896_v2 = vld [vmem:[#allocation5 + $0x13b0] sm:$0xff]  ;;  %v909_v15 = vld [vmem:[#allocation5 + $0x1418] sm:$0xff] }
 0x36a   :  { %7884 = vmatprep.subr.bf16.mxu0 %v11996_v42  ;;  %8468 = vmatprep.subr.bf16.mxu1 %v11998_v0  ;;  %v12036_v42 = vcombine.high %v876_v53, %v880_v25  ;;  %v12038_v0 = vcombine.high %v877_v12, %v881_v8  ;;  %v908_v32 = vld [vmem:[#allocation5 + $0x1410] sm:$0xff]  ;;  %v913_v44 = vld [vmem:[#allocation5 + $0x1438] sm:$0xff] }
 0x36b   :  { %7902 = vmatprep.mubr.bf16.mxu0 %v14121_v34  ;;  %8486 = vmatprep.mubr.bf16.mxu1 %v14121_v34  ;;  %v12022_v34 = vcombine.high %v861_v24, %v865_v31  ;;  %v901_v24 = vld [vmem:[#allocation5 + $0x13d8] sm:$0xff]  ;;  %v912_v41 = vld [vmem:[#allocation5 + $0x1430] sm:$0xff] }
 0x36c   :  { %v905_v31 = vld [vmem:[#allocation5 + $0x13f8] sm:$0xff] }
 0x36d   :  { %7885 = vmatpush1.bf16.msra.mxu0 %v11995_v29  ;;  %8469 = vmatpush1.bf16.msra.mxu1 %v11997_v57  ;;  %v12035_v29 = vcombine.low %v876_v53, %v880_v25  ;;  %v12037_v57 = vcombine.low %v877_v12, %v881_v8  ;;  %v916_v53 = vld [vmem:[#allocation5 + $0x1450] sm:$0xff]  ;;  %v917_v12 = vld [vmem:[#allocation5 + $0x1458] sm:$0xff] }
 0x36e   :  { %7886 = vmatprep.subr.bf16.mxu0 %v12004_v3  ;;  %8470 = vmatprep.subr.bf16.mxu1 %v12006_v4  ;;  %v12044_v3 = vcombine.high %v884_v26, %v888_v21  ;;  %v12046_v4 = vcombine.high %v885_v35, %v889_v6  ;;  %v920_v25 = vld [vmem:[#allocation5 + $0x1470] sm:$0xff]  ;;  %v921_v8 = vld [vmem:[#allocation5 + $0x1478] sm:$0xff] }
 0x371   :  { %7887 = vmatpush1.bf16.msra.mxu0 %v12003_v30  ;;  %8471 = vmatpush1.bf16.msra.mxu1 %v12005_v33  ;;  %v12043_v30 = vcombine.low %v884_v26, %v888_v21  ;;  %v12045_v33 = vcombine.low %v885_v35, %v889_v6  ;;  %v924_v26 = vld [vmem:[#allocation5 + $0x1490] sm:$0xff]  ;;  %v925_v35 = vld [vmem:[#allocation5 + $0x1498] sm:$0xff] }
 0x372   :  { %7888 = vmatprep.subr.bf16.mxu0 %v12012_v16  ;;  %8472 = vmatprep.subr.bf16.mxu1 %v12014_v62  ;;  %v12052_v16 = vcombine.high %v892_v47, %v896_v2  ;;  %v12054_v62 = vcombine.high %v893_v45, %v897_v49  ;;  %v928_v21 = vld [vmem:[#allocation5 + $0x14b0] sm:$0xff]  ;;  %v929_v6 = vld [vmem:[#allocation5 + $0x14b8] sm:$0xff] }
 0x375   :  { %7889 = vmatpush1.bf16.msra.mxu0 %v12011_v11  ;;  %8473 = vmatpush1.bf16.msra.mxu1 %v12013_v9  ;;  %v12051_v11 = vcombine.low %v892_v47, %v896_v2  ;;  %v12053_v9 = vcombine.low %v893_v45, %v897_v49  ;;  %v932_v47 = vld [vmem:[#allocation5 + $0x14d0] sm:$0xff]  ;;  %v933_v45 = vld [vmem:[#allocation5 + $0x14d8] sm:$0xff] }
 0x376   :  { %7890 = vmatprep.subr.bf16.mxu0 %v12020_v37  ;;  %8474 = vmatprep.subr.bf16.mxu1 %v12022_v34  ;;  %v12060_v37 = vcombine.high %v900_v19, %v904_v60  ;;  %v12062_v34 = vcombine.high %v901_v24, %v905_v31  ;;  %v936_v2 = vld [vmem:[#allocation5 + $0x14f0] sm:$0xff]  ;;  %v937_v49 = vld [vmem:[#allocation5 + $0x14f8] sm:$0xff] }
 0x379   :  { %7891 = vmatpush1.bf16.msra.mxu0 %v12019_v13  ;;  %8475 = vmatpush1.bf16.msra.mxu1 %v12021_v17  ;;  %v12059_v13 = vcombine.low %v900_v19, %v904_v60  ;;  %v12061_v17 = vcombine.low %v901_v24, %v905_v31  ;;  %v944_v19 = vld [vmem:[#allocation5 + $0x1530] sm:$0xff]  ;;  %v941_v60 = vld [vmem:[#allocation5 + $0x1518] sm:$0xff]  ;;  %v12091_v31 = vcombine.low %v932_v47, %v936_v2 }
 0x37a   :  { %7892 = vmatprep.subr.bf16.mxu0 %v12028_v55  ;;  %8476 = vmatprep.subr.bf16.mxu1 %v12030_v58  ;;  %v12068_v55 = vcombine.high %v908_v32, %v912_v41  ;;  %v12070_v58 = vcombine.high %v909_v15, %v913_v44  ;;  %v945_v24 = vld [vmem:[#allocation5 + $0x1538] sm:$0xff] }
 0x37d   :  { %7893 = vmatpush1.bf16.msra.mxu0 %v12027_v28  ;;  %8477 = vmatpush1.bf16.msra.mxu1 %v12029_v22  ;;  %v12067_v28 = vcombine.low %v908_v32, %v912_v41  ;;  %v12069_v22 = vcombine.low %v909_v15, %v913_v44  ;;  %v949_v32 = vld [vmem:[#allocation5 + $0x1558] sm:$0xff]  ;;  %v12101_v44 = vcombine.low %v941_v60, %v945_v24 }
 0x37e   :  { %7894 = vmatprep.subr.bf16.mxu0 %v12036_v42  ;;  %8478 = vmatprep.subr.bf16.mxu1 %v12038_v0  ;;  %v12076_v42 = vcombine.high %v916_v53, %v920_v25  ;;  %v12078_v0 = vcombine.high %v917_v12, %v921_v8  ;;  %v953_v41 = vld [vmem:[#allocation5 + $0x1578] sm:$0xff] }
 0x381   :  { %7895 = vmatpush1.bf16.msra.mxu0 %v12035_v29  ;;  %8479 = vmatpush1.bf16.msra.mxu1 %v12037_v57  ;;  %v12075_v29 = vcombine.low %v916_v53, %v920_v25  ;;  %v12077_v57 = vcombine.low %v917_v12, %v921_v8  ;;  %v961_v53 = vld [vmem:[#allocation5 + $0x15b8] sm:$0xff]  ;;  %v14567_v25 = vld [vmem:[#allocation15_spill] sm:$0xff] }
 0x382   :  { %7896 = vmatprep.subr.bf16.mxu0 %v12044_v3  ;;  %8480 = vmatprep.subr.bf16.mxu1 %v12046_v4  ;;  %v12084_v3 = vcombine.high %v924_v26, %v928_v21  ;;  %v12086_v4 = vcombine.high %v925_v35, %v929_v6 }
 0x385   :  { %7897 = vmatpush1.bf16.msra.mxu0 %v12043_v30  ;;  %8481 = vmatpush1.bf16.msra.mxu1 %v12045_v33  ;;  %v12083_v30 = vcombine.low %v924_v26, %v928_v21  ;;  %v12092_v33 = vcombine.high %v932_v47, %v936_v2  ;;  %v965_v26 = vld [vmem:[#allocation5 + $0x15d8] sm:$0xff] }
 0x386   :  { %7898 = vmatprep.subr.bf16.mxu0 %v12052_v16  ;;  %8482 = vmatprep.subr.bf16.mxu1 %v12054_v62  ;;  %v12094_v16 = vcombine.high %v933_v45, %v937_v49  ;;  %v940_v62 = vld [vmem:[#allocation5 + $0x1510] sm:$0xff]  ;;  %v969_v21 = vld [vmem:[#allocation5 + $0x15f8] sm:$0xff] }
 0x387   :  { %v12099_v15 = vcombine.low %v940_v62, %v944_v19  ;;  %v973_v47 = vld [vmem:[#allocation5 + $0x1618] sm:$0xff] }
 0x388   :  { %v977_v2 = vld [vmem:[#allocation5 + $0x1638] sm:$0xff] }
 0x389   :  { %7899 = vmatpush1.bf16.msra.mxu0 %v12051_v11  ;;  %8483 = vmatpush1.bf16.msra.mxu1 %v12053_v9  ;;  %v12100_v11 = vcombine.high %v940_v62, %v944_v19  ;;  %v12102_v9 = vcombine.high %v941_v60, %v945_v24  ;;  %v984_v62 = vld [vmem:[#allocation5 + $0x1670] sm:$0xff]  ;;  %v14570_v19 = vld [vmem:[#allocation18_spill] sm:$0xff] }
 0x38a   :  { %7900 = vmatprep.subr.bf16.mxu0 %v12060_v37  ;;  %8484 = vmatprep.subr.bf16.mxu1 %v12062_v34  ;;  %v948_v37 = vld [vmem:[#allocation5 + $0x1550] sm:$0xff]  ;;  %v981_v60 = vld [vmem:[#allocation5 + $0x1658] sm:$0xff] }
 0x38b   :  { %v952_v34 = vld [vmem:[#allocation5 + $0x1570] sm:$0xff]  ;;  %v985_v24 = vld [vmem:[#allocation5 + $0x1678] sm:$0xff] }
 0x38c   :  { %v12107_v12 = vcombine.low %v948_v37, %v952_v34 }
 0x38d   :  { %7901 = vmatpush1.bf16.msra.mxu0 %v12059_v13  ;;  %8485 = vmatpush1.bf16.msra.mxu1 %v12061_v17  ;;  %v12110_v13 = vcombine.high %v949_v32, %v953_v41  ;;  %v956_v17 = vld [vmem:[#allocation5 + $0x1590] sm:$0xff] }
 0x38e   :  { %7943 = vmatprep.subr.bf16.mxu0 %v12068_v55  ;;  %8527 = vmatprep.subr.bf16.mxu1 %v12070_v58  ;;  %v960_v55 = vld [vmem:[#allocation5 + $0x15b0] sm:$0xff]  ;;  %v957_v58 = vld [vmem:[#allocation5 + $0x1598] sm:$0xff] }
 0x38f   :  { %v12116_v8 = vcombine.high %v956_v17, %v960_v55 }
 0x390   :  { %7903 = vmatmul.mubr.bf16.vlgmr.msra.gmra.mrb[16].mxu0 %v14127_v63  ;;  %8487 = vmatmul.mubr.bf16.vlgmr.msra.gmra.mrb[16].mxu1 %v14127_v63  ;;  %v12085_v63 = vcombine.low %v925_v35, %v929_v6  ;;  %v12115_v35 = vcombine.low %v956_v17, %v960_v55  ;;  %v12117_v6 = vcombine.low %v957_v58, %v961_v53  ;;  %v996_v17 = vld [vmem:[#allocation5 + $0x16d0] sm:$0xff] }
 0x391   :  { %7944 = vmatpush1.bf16.msra.mxu0 %v12067_v28  ;;  %8528 = vmatpush1.bf16.msra.mxu1 %v12069_v22  ;;  %v12118_v28 = vcombine.high %v957_v58, %v961_v53  ;;  %v964_v22 = vld [vmem:[#allocation5 + $0x15d0] sm:$0xff]  ;;  %v997_v58 = vld [vmem:[#allocation5 + $0x16d8] sm:$0xff] }
 0x392   :  { %7945 = vmatprep.subr.bf16.mxu0 %v12076_v42  ;;  %8529 = vmatprep.subr.bf16.mxu1 %v12078_v0  ;;  %v968_v42 = vld [vmem:[#allocation5 + $0x15f0] sm:$0xff]  ;;  %v14568_v0 = vld [vmem:[#allocation16_spill] sm:$0xff]  ;;  %v1001_v53 = vld [vmem:[#allocation5 + $0x16f8] sm:$0xff] }
 0x393   :  { %7912 = vmatprep.mubr.bf16.mxu0 %v14129_v20  ;;  %8496 = vmatprep.mubr.bf16.mxu1 %v14129_v20  ;;  %v12093_v20 = vcombine.low %v933_v45, %v937_v49  ;;  %v14569_v45 = vld [vmem:[#allocation17_spill] sm:$0xff]  ;;  %v12123_v49 = vcombine.low %v964_v22, %v968_v42 }
 0x394   :  { %v1000_v55 = vld [vmem:[#allocation5 + $0x16f0] sm:$0xff] }
 0x395   :  { %7946 = vmatpush1.bf16.msra.mxu0 %v12075_v29  ;;  %8530 = vmatpush1.bf16.msra.mxu1 %v12077_v57  ;;  %v12124_v29 = vcombine.high %v964_v22, %v968_v42  ;;  %v12126_v57 = vcombine.high %v965_v26, %v969_v21  ;;  %v1008_v22 = vld [vmem:[#allocation5 + $0x1730] sm:$0xff]  ;;  %v1005_v42 = vld [vmem:[#allocation5 + $0x1718] sm:$0xff] }
 0x396   :  { %7947 = vmatprep.subr.bf16.mxu0 %v12084_v3  ;;  %8531 = vmatprep.subr.bf16.mxu1 %v12086_v4  ;;  %v972_v3 = vld [vmem:[#allocation5 + $0x1610] sm:$0xff] }
 0x397   :  { %v976_v4 = vld [vmem:[#allocation5 + $0x1630] sm:$0xff] }
 0x398   :  { %7913 = vmatmul.mubr.bf16.gmra.mrb[20].mxu0 %v14135_v46  ;;  %8497 = vmatmul.mubr.bf16.gmra.mrb[20].mxu1 %v14135_v46  ;;  %v12108_v46 = vcombine.high %v948_v37, %v952_v34  ;;  %v988_v37 = vld [vmem:[#allocation5 + $0x1690] sm:$0xff] }
 0x399   :  { %7948 = vmatpush1.bf16.msra.mxu0 %v12083_v30  ;;  %8532 = vmatpush1.bf16.msra.mxu1 %v12085_v63  ;;  %v12125_v30 = vcombine.low %v965_v26, %v969_v21  ;;  %v12132_v63 = vcombine.high %v972_v3, %v976_v4  ;;  %v992_v34 = vld [vmem:[#allocation5 + $0x16b0] sm:$0xff]  ;;  %v12155_v26 = vcombine.low %v996_v17, %v1000_v55 }
 0x39a   :  { %7949 = vmatprep.subr.bf16.mxu0 %v12092_v33  ;;  %8533 = vmatprep.subr.bf16.mxu1 %v12094_v16  ;;  %v12134_v33 = vcombine.high %v973_v47, %v977_v2  ;;  %v980_v16 = vld [vmem:[#allocation5 + $0x1650] sm:$0xff]  ;;  %v12157_v21 = vcombine.low %v997_v58, %v1001_v53 }
 0x39b   :  { %7922 = vmatprep.mubr.bf16.mxu0 %v14137_v1  ;;  %8506 = vmatprep.mubr.bf16.mxu1 %v14137_v1  ;;  %v12109_v1 = vcombine.low %v949_v32, %v953_v41  ;;  %v989_v32 = vld [vmem:[#allocation5 + $0x1698] sm:$0xff] }
 0x39c   :  { %v993_v41 = vld [vmem:[#allocation5 + $0x16b8] sm:$0xff] }
 0x39d   :  { %7950 = vmatpush1.bf16.msra.mxu0 %v12091_v31  ;;  %8534 = vmatpush1.bf16.msra.mxu1 %v12093_v20  ;;  %v12131_v31 = vcombine.low %v972_v3, %v976_v4  ;;  %v12133_v20 = vcombine.low %v973_v47, %v977_v2  ;;  %v1013_v3 = vld [vmem:[#allocation5 + $0x1758] sm:$0xff] }
 0x39e   :  { %7951 = vmatprep.subr.bf16.mxu0 %v12100_v11  ;;  %8535 = vmatprep.subr.bf16.mxu1 %v12102_v9  ;;  %v12140_v11 = vcombine.high %v980_v16, %v984_v62  ;;  %v12142_v9 = vcombine.high %v981_v60, %v985_v24  ;;  %v1017_v4 = vld [vmem:[#allocation5 + $0x1778] sm:$0xff] }
 0x3a0   :  { %7923 = vmatmul.mubr.bf16.gmra.mrb[24].mxu0 %v14567_v25  ;;  %8507 = vmatmul.mubr.bf16.gmra.mrb[24].mxu1 %v14567_v25  ;;  %v12147_v25 = vcombine.low %v988_v37, %v992_v34 }
 0x3a1   :  { %7952 = vmatpush1.bf16.msra.mxu0 %v12099_v15  ;;  %8536 = vmatpush1.bf16.msra.mxu1 %v12101_v44  ;;  %v12139_v15 = vcombine.low %v980_v16, %v984_v62  ;;  %v12141_v44 = vcombine.low %v981_v60, %v985_v24  ;;  %v1025_v16 = vld [vmem:[#allocation5 + $0x17b8] sm:$0xff] }
 0x3a2   :  { %7953 = vmatprep.subr.bf16.mxu0 %v12108_v46  ;;  %8537 = vmatprep.subr.bf16.mxu1 %v12110_v13  ;;  %v12148_v46 = vcombine.high %v988_v37, %v992_v34  ;;  %v12150_v13 = vcombine.high %v989_v32, %v993_v41 }
 0x3a3   :  { %7932 = vmatprep.mubr.bf16.mxu0 %v14568_v0  ;;  %8516 = vmatprep.mubr.bf16.mxu1 %v14568_v0  ;;  %v1009_v0 = vld [vmem:[#allocation5 + $0x1738] sm:$0xff] }
 0x3a4   :  { %v12165_v2 = vcombine.low %v1005_v42, %v1009_v0 }
 0x3a5   :  { %7954 = vmatpush1.bf16.msra.mxu0 %v12107_v12  ;;  %8538 = vmatpush1.bf16.msra.mxu1 %v12109_v1  ;;  %v12149_v12 = vcombine.low %v989_v32, %v993_v41  ;;  %v12156_v1 = vcombine.high %v996_v17, %v1000_v55 }
 0x3a6   :  { %7955 = vmatprep.subr.bf16.mxu0 %v12116_v8  ;;  %8539 = vmatprep.subr.bf16.mxu1 %v12118_v28  ;;  %v12158_v8 = vcombine.high %v997_v58, %v1001_v53  ;;  %v1004_v28 = vld [vmem:[#allocation5 + $0x1710] sm:$0xff] }
 0x3a7   :  { %v12163_v47 = vcombine.low %v1004_v28, %v1008_v22 }
 0x3a8   :  { %7933 = vmatmul.mubr.bf16.gmra.mrb[28].mxu0 %v14569_v45  ;;  %8517 = vmatmul.mubr.bf16.gmra.mrb[28].mxu1 %v14569_v45 }
 0x3a9   :  { %7956 = vmatpush1.bf16.msra.mxu0 %v12115_v35  ;;  %8540 = vmatpush1.bf16.msra.mxu1 %v12117_v6  ;;  %v12164_v35 = vcombine.high %v1004_v28, %v1008_v22  ;;  %v12166_v6 = vcombine.high %v1005_v42, %v1009_v0 }
 0x3aa   :  { %7957 = vmatprep.subr.bf16.mxu0 %v12124_v29  ;;  %8541 = vmatprep.subr.bf16.mxu1 %v12126_v57  ;;  %v1012_v29 = vld [vmem:[#allocation5 + $0x1750] sm:$0xff] }
 0x3ab   :  { %7975 = vmatprep.mubr.bf16.mxu0 %v14570_v19  ;;  %8559 = vmatprep.mubr.bf16.mxu1 %v14570_v19  ;;  %v1016_v57 = vld [vmem:[#allocation5 + $0x1770] sm:$0xff]  ;;  %v12173_v19 = vcombine.low %v1013_v3, %v1017_v4 }
 0x3ac   :  { %v12172_v45 = vcombine.high %v1012_v29, %v1016_v57  ;;  %v12171_v62 = vcombine.low %v1012_v29, %v1016_v57  ;;  %v1057_v29 = vld [vmem:[#allocation5 + $0x18b8] sm:$0xff] }
 0x3ad   :  { %7958 = vmatpush1.bf16.msra.mxu0 %v12123_v49  ;;  %8542 = vmatpush1.bf16.msra.mxu1 %v12125_v30  ;;  %v12174_v49 = vcombine.high %v1013_v3, %v1017_v4  ;;  %v1020_v30 = vld [vmem:[#allocation5 + $0x1790] sm:$0xff] }
 0x3ae   :  { %7959 = vmatprep.subr.bf16.mxu0 %v12132_v63  ;;  %8543 = vmatprep.subr.bf16.mxu1 %v12134_v33  ;;  %v1024_v63 = vld [vmem:[#allocation5 + $0x17b0] sm:$0xff]  ;;  %v1021_v33 = vld [vmem:[#allocation5 + $0x1798] sm:$0xff] }
 0x3af   :  { %v12180_v60 = vcombine.high %v1020_v30, %v1024_v63  ;;  %v12182_v24 = vcombine.high %v1021_v33, %v1025_v16  ;;  %v12179_v37 = vcombine.low %v1020_v30, %v1024_v63  ;;  %v12181_v34 = vcombine.low %v1021_v33, %v1025_v16  ;;  %v1061_v30 = vld [vmem:[#allocation5 + $0x18d8] sm:$0xff] }
 0x3b0   :  { %v1065_v63 = vld [vmem:[#allocation5 + $0x18f8] sm:$0xff] }
 0x3b1   :  { %7960 = vmatpush1.bf16.msra.mxu0 %v12131_v31  ;;  %8544 = vmatpush1.bf16.msra.mxu1 %v12133_v20  ;;  %v1028_v31 = vld [vmem:[#allocation5 + $0x17d0] sm:$0xff] }
 0x3b2   :  { %7961 = vmatprep.subr.bf16.mxu0 %v12140_v11  ;;  %8545 = vmatprep.subr.bf16.mxu1 %v12142_v9  ;;  %v1032_v20 = vld [vmem:[#allocation5 + $0x17f0] sm:$0xff]  ;;  %v1029_v11 = vld [vmem:[#allocation5 + $0x17d8] sm:$0xff] }
 0x3b3   :  { %v1033_v9 = vld [vmem:[#allocation5 + $0x17f8] sm:$0xff]  ;;  %v12188_v32 = vcombine.high %v1028_v31, %v1032_v20  ;;  %v12187_v17 = vcombine.low %v1028_v31, %v1032_v20 }
 0x3b4   :  { %v12190_v41 = vcombine.high %v1029_v11, %v1033_v9  ;;  %v12189_v55 = vcombine.low %v1029_v11, %v1033_v9  ;;  %v1069_v31 = vld [vmem:[#allocation5 + $0x1918] sm:$0xff]  ;;  %v14573_v11 = vld [vmem:[#allocation21_spill] sm:$0xff] }
 0x3b5   :  { %7962 = vmatpush1.bf16.msra.mxu0 %v12139_v15  ;;  %8546 = vmatpush1.bf16.msra.mxu1 %v12141_v44  ;;  %v1036_v15 = vld [vmem:[#allocation5 + $0x1810] sm:$0xff]  ;;  %v1073_v20 = vld [vmem:[#allocation5 + $0x1938] sm:$0xff] }
 0x3b6   :  { %7963 = vmatprep.subr.bf16.mxu0 %v12148_v46  ;;  %8547 = vmatprep.subr.bf16.mxu1 %v12150_v13  ;;  %v1040_v44 = vld [vmem:[#allocation5 + $0x1830] sm:$0xff]  ;;  %v1037_v46 = vld [vmem:[#allocation5 + $0x1818] sm:$0xff] }
 0x3b7   :  { %v1041_v13 = vld [vmem:[#allocation5 + $0x1838] sm:$0xff]  ;;  %v12196_v58 = vcombine.high %v1036_v15, %v1040_v44  ;;  %v12195_v28 = vcombine.low %v1036_v15, %v1040_v44  ;;  %v1080_v15 = vld [vmem:[#allocation5 + $0x1970] sm:$0xff] }
 0x3b8   :  { %v12198_v53 = vcombine.high %v1037_v46, %v1041_v13  ;;  %v12197_v22 = vcombine.low %v1037_v46, %v1041_v13  ;;  %v14574_v44 = vld [vmem:[#allocation22_spill] sm:$0xff] }
 0x3b9   :  { %7964 = vmatpush1.bf16.msra.mxu0 %v12147_v25  ;;  %8548 = vmatpush1.bf16.msra.mxu1 %v12149_v12  ;;  %v1044_v25 = vld [vmem:[#allocation5 + $0x1850] sm:$0xff]  ;;  %v1077_v46 = vld [vmem:[#allocation5 + $0x1958] sm:$0xff] }
 0x3ba   :  { %7965 = vmatprep.subr.bf16.mxu0 %v12156_v1  ;;  %8549 = vmatprep.subr.bf16.mxu1 %v12158_v8  ;;  %v1048_v12 = vld [vmem:[#allocation5 + $0x1870] sm:$0xff]  ;;  %v1045_v1 = vld [vmem:[#allocation5 + $0x1858] sm:$0xff] }
 0x3bb   :  { %v1049_v8 = vld [vmem:[#allocation5 + $0x1878] sm:$0xff]  ;;  %v12204_v42 = vcombine.high %v1044_v25, %v1048_v12  ;;  %v12203_v57 = vcombine.low %v1044_v25, %v1048_v12  ;;  %v1084_v25 = vld [vmem:[#allocation5 + $0x1990] sm:$0xff] }
 0x3bc   :  { %v12206_v0 = vcombine.high %v1045_v1, %v1049_v8  ;;  %v12205_v3 = vcombine.low %v1045_v1, %v1049_v8  ;;  %v1081_v13 = vld [vmem:[#allocation5 + $0x1978] sm:$0xff]  ;;  %v1088_v12 = vld [vmem:[#allocation5 + $0x19b0] sm:$0xff] }
 0x3bd   :  { %7966 = vmatpush1.bf16.msra.mxu0 %v12155_v26  ;;  %8550 = vmatpush1.bf16.msra.mxu1 %v12157_v21  ;;  %v1052_v26 = vld [vmem:[#allocation5 + $0x1890] sm:$0xff]  ;;  %v1085_v1 = vld [vmem:[#allocation5 + $0x1998] sm:$0xff] }
 0x3be   :  { %7967 = vmatprep.subr.bf16.mxu0 %v12164_v35  ;;  %8551 = vmatprep.subr.bf16.mxu1 %v12166_v6  ;;  %v1056_v21 = vld [vmem:[#allocation5 + $0x18b0] sm:$0xff]  ;;  %v14571_v35 = vld [vmem:[#allocation19_spill] sm:$0xff]  ;;  %v1053_v6 = vld [vmem:[#allocation5 + $0x1898] sm:$0xff] }
 0x3bf   :  { %v12212_v4 = vcombine.high %v1052_v26, %v1056_v21  ;;  %v12211_v33 = vcombine.low %v1052_v26, %v1056_v21  ;;  %v12213_v16 = vcombine.low %v1053_v6, %v1057_v29  ;;  %v1089_v8 = vld [vmem:[#allocation5 + $0x19b8] sm:$0xff]  ;;  %v1092_v21 = vld [vmem:[#allocation5 + $0x19d0] sm:$0xff] }
 0x3c0   :  { %v12246_v26 = vcombine.high %v1085_v1, %v1089_v8 }
 0x3c1   :  { %7968 = vmatpush1.bf16.msra.mxu0 %v12163_v47  ;;  %8552 = vmatpush1.bf16.msra.mxu1 %v12165_v2  ;;  %v12214_v47 = vcombine.high %v1053_v6, %v1057_v29  ;;  %v1060_v2 = vld [vmem:[#allocation5 + $0x18d0] sm:$0xff]  ;;  %v14576_v6 = vld [vmem:[#allocation24_spill] sm:$0xff]  ;;  %v1093_v29 = vld [vmem:[#allocation5 + $0x19d8] sm:$0xff] }
 0x3c2   :  { %7969 = vmatprep.subr.bf16.mxu0 %v12172_v45  ;;  %8553 = vmatprep.subr.bf16.mxu1 %v12174_v49  ;;  %v1064_v45 = vld [vmem:[#allocation5 + $0x18f0] sm:$0xff]  ;;  %v14572_v49 = vld [vmem:[#allocation20_spill] sm:$0xff] }
 0x3c3   :  { %v12219_v9 = vcombine.low %v1060_v2, %v1064_v45 }
 0x3c5   :  { %7970 = vmatpush1.bf16.msra.mxu0 %v12171_v62  ;;  %8554 = vmatpush1.bf16.msra.mxu1 %v12173_v19  ;;  %v12220_v62 = vcombine.high %v1060_v2, %v1064_v45  ;;  %v12222_v19 = vcombine.high %v1061_v30, %v1065_v63  ;;  %v1100_v45 = vld [vmem:[#allocation5 + $0x1a10] sm:$0xff] }
 0x3c6   :  { %7971 = vmatprep.subr.bf16.mxu0 %v12180_v60  ;;  %8555 = vmatprep.subr.bf16.mxu1 %v12182_v24  ;;  %v1068_v60 = vld [vmem:[#allocation5 + $0x1910] sm:$0xff] }
 0x3c7   :  { %v1072_v24 = vld [vmem:[#allocation5 + $0x1930] sm:$0xff] }
 0x3c9   :  { %7972 = vmatpush1.bf16.msra.mxu0 %v12179_v37  ;;  %8556 = vmatpush1.bf16.msra.mxu1 %v12181_v34  ;;  %v12221_v37 = vcombine.low %v1061_v30, %v1065_v63  ;;  %v12228_v34 = vcombine.high %v1068_v60, %v1072_v24  ;;  %v1101_v30 = vld [vmem:[#allocation5 + $0x1a18] sm:$0xff] }
 0x3ca   :  { %7973 = vmatprep.subr.bf16.mxu0 %v12188_v32  ;;  %8557 = vmatprep.subr.bf16.mxu1 %v12190_v41  ;;  %v12230_v32 = vcombine.high %v1069_v31, %v1073_v20  ;;  %v1076_v41 = vld [vmem:[#allocation5 + $0x1950] sm:$0xff]  ;;  %v1105_v63 = vld [vmem:[#allocation5 + $0x1a38] sm:$0xff] }
 0x3cd   :  { %7974 = vmatpush1.bf16.msra.mxu0 %v12187_v17  ;;  %8558 = vmatpush1.bf16.msra.mxu1 %v12189_v55  ;;  %v12227_v17 = vcombine.low %v1068_v60, %v1072_v24  ;;  %v12229_v55 = vcombine.low %v1069_v31, %v1073_v20  ;;  %v12262_v60 = vcombine.high %v1101_v30, %v1105_v63  ;;  %v1108_v24 = vld [vmem:[#allocation5 + $0x1a50] sm:$0xff]  ;;  %v14578_v20 = vld [vmem:[#allocation26_spill] sm:$0xff] }
 0x3ce   :  { %8016 = vmatprep.subr.bf16.mxu0 %v12196_v58  ;;  %8600 = vmatprep.subr.bf16.mxu1 %v12198_v53  ;;  %v12236_v58 = vcombine.high %v1076_v41, %v1080_v15  ;;  %v12238_v53 = vcombine.high %v1077_v46, %v1081_v13  ;;  %v1112_v31 = vld [vmem:[#allocation5 + $0x1a70] sm:$0xff] }
 0x3d0   :  { %7976 = vmatmul.mubr.bf16.vlgmr.msra.gmra.mrb[16].mxu0 %v14571_v35  ;;  %8560 = vmatmul.mubr.bf16.vlgmr.msra.gmra.mrb[16].mxu1 %v14571_v35  ;;  %v1096_v35 = vld [vmem:[#allocation5 + $0x19f0] sm:$0xff] }
 0x3d1   :  { %8017 = vmatpush1.bf16.msra.mxu0 %v12195_v28  ;;  %8601 = vmatpush1.bf16.msra.mxu1 %v12197_v22  ;;  %v14575_v28 = vld [vmem:[#allocation23_spill] sm:$0xff]  ;;  %v12235_v22 = vcombine.low %v1076_v41, %v1080_v15  ;;  %v1116_v15 = vld [vmem:[#allocation5 + $0x1a90] sm:$0xff] }
 0x3d2   :  { %8018 = vmatprep.subr.bf16.mxu0 %v12204_v42  ;;  %8602 = vmatprep.subr.bf16.mxu1 %v12206_v0  ;;  %v12237_v42 = vcombine.low %v1077_v46, %v1081_v13  ;;  %v12244_v0 = vcombine.high %v1084_v25, %v1088_v12  ;;  %v1117_v46 = vld [vmem:[#allocation5 + $0x1a98] sm:$0xff] }
 0x3d3   :  { %7985 = vmatprep.mubr.bf16.mxu0 %v14572_v49  ;;  %8569 = vmatprep.mubr.bf16.mxu1 %v14572_v49  ;;  %v1104_v49 = vld [vmem:[#allocation5 + $0x1a30] sm:$0xff]  ;;  %v1121_v13 = vld [vmem:[#allocation5 + $0x1ab8] sm:$0xff] }
 0x3d5   :  { %8019 = vmatpush1.bf16.msra.mxu0 %v12203_v57  ;;  %8603 = vmatpush1.bf16.msra.mxu1 %v12205_v3  ;;  %v1097_v57 = vld [vmem:[#allocation5 + $0x19f8] sm:$0xff]  ;;  %v12243_v3 = vcombine.low %v1084_v25, %v1088_v12  ;;  %v1124_v25 = vld [vmem:[#allocation5 + $0x1ad0] sm:$0xff] }
 0x3d6   :  { %8020 = vmatprep.subr.bf16.mxu0 %v12212_v4  ;;  %8604 = vmatprep.subr.bf16.mxu1 %v12214_v47  ;;  %v12245_v4 = vcombine.low %v1085_v1, %v1089_v8  ;;  %v12252_v47 = vcombine.high %v1092_v21, %v1096_v35  ;;  %v12254_v2 = vcombine.high %v1093_v29, %v1097_v57  ;;  %v1128_v12 = vld [vmem:[#allocation5 + $0x1af0] sm:$0xff]  ;;  %v1125_v1 = vld [vmem:[#allocation5 + $0x1ad8] sm:$0xff] }
 0x3d7   :  { %v1129_v8 = vld [vmem:[#allocation5 + $0x1af8] sm:$0xff] }
 0x3d8   :  { %7986 = vmatmul.mubr.bf16.gmra.mrb[20].mxu0 %v14573_v11  ;;  %8570 = vmatmul.mubr.bf16.gmra.mrb[20].mxu1 %v14573_v11  ;;  %v1109_v11 = vld [vmem:[#allocation5 + $0x1a58] sm:$0xff] }
 0x3d9   :  { %8021 = vmatpush1.bf16.msra.mxu0 %v12211_v33  ;;  %8605 = vmatpush1.bf16.msra.mxu1 %v12213_v16  ;;  %v14577_v33 = vld [vmem:[#allocation25_spill] sm:$0xff]  ;;  %v12251_v16 = vcombine.low %v1092_v21, %v1096_v35  ;;  %v1133_v35 = vld [vmem:[#allocation5 + $0x1b18] sm:$0xff] }
 0x3da   :  { %8022 = vmatprep.subr.bf16.mxu0 %v12220_v62  ;;  %8606 = vmatprep.subr.bf16.mxu1 %v12222_v19  ;;  %v12253_v62 = vcombine.low %v1093_v29, %v1097_v57  ;;  %v12260_v19 = vcombine.high %v1100_v45, %v1104_v49  ;;  %v1136_v21 = vld [vmem:[#allocation5 + $0x1b30] sm:$0xff]  ;;  %v12283_v29 = vcombine.low %v1124_v25, %v1128_v12 }
 0x3db   :  { %7995 = vmatprep.mubr.bf16.mxu0 %v14574_v44  ;;  %8579 = vmatprep.mubr.bf16.mxu1 %v14574_v44  ;;  %v1120_v44 = vld [vmem:[#allocation5 + $0x1ab0] sm:$0xff]  ;;  %v12285_v57 = vcombine.low %v1125_v1, %v1129_v8 }
 0x3dd   :  { %8023 = vmatpush1.bf16.msra.mxu0 %v12219_v9  ;;  %8607 = vmatpush1.bf16.msra.mxu1 %v12221_v37  ;;  %v1113_v9 = vld [vmem:[#allocation5 + $0x1a78] sm:$0xff]  ;;  %v12259_v37 = vcombine.low %v1100_v45, %v1104_v49 }
 0x3de   :  { %8024 = vmatprep.subr.bf16.mxu0 %v12228_v34  ;;  %8608 = vmatprep.subr.bf16.mxu1 %v12230_v32  ;;  %v12261_v34 = vcombine.low %v1101_v30, %v1105_v63  ;;  %v12268_v32 = vcombine.high %v1108_v24, %v1112_v31  ;;  %v12270_v41 = vcombine.high %v1109_v11, %v1113_v9  ;;  %v1141_v45 = vld [vmem:[#allocation5 + $0x1b58] sm:$0xff] }
 0x3df   :  { %v1145_v49 = vld [vmem:[#allocation5 + $0x1b78] sm:$0xff] }
 0x3e0   :  { %7996 = vmatmul.mubr.bf16.gmra.mrb[24].mxu0 %v14575_v28  ;;  %8580 = vmatmul.mubr.bf16.gmra.mrb[24].mxu1 %v14575_v28  ;;  %v12275_v28 = vcombine.low %v1116_v15, %v1120_v44 }
 0x3e1   :  { %8025 = vmatpush1.bf16.msra.mxu0 %v12227_v17  ;;  %8609 = vmatpush1.bf16.msra.mxu1 %v12229_v55  ;;  %v12267_v17 = vcombine.low %v1108_v24, %v1112_v31  ;;  %v12269_v55 = vcombine.low %v1109_v11, %v1113_v9  ;;  %v1153_v24 = vld [vmem:[#allocation5 + $0x1bb8] sm:$0xff] }
 0x3e2   :  { %8026 = vmatprep.subr.bf16.mxu0 %v12236_v58  ;;  %8610 = vmatprep.subr.bf16.mxu1 %v12238_v53  ;;  %v12276_v58 = vcombine.high %v1116_v15, %v1120_v44  ;;  %v12278_v53 = vcombine.high %v1117_v46, %v1121_v13 }
 0x3e3   :  { %8005 = vmatprep.mubr.bf16.mxu0 %v14576_v6  ;;  %8589 = vmatprep.mubr.bf16.mxu1 %v14576_v6  ;;  %v1137_v6 = vld [vmem:[#allocation5 + $0x1b38] sm:$0xff] }
 0x3e4   :  { %v12293_v63 = vcombine.low %v1133_v35, %v1137_v6 }
 0x3e5   :  { %8027 = vmatpush1.bf16.msra.mxu0 %v12235_v22  ;;  %8611 = vmatpush1.bf16.msra.mxu1 %v12237_v42  ;;  %v12277_v22 = vcombine.low %v1117_v46, %v1121_v13  ;;  %v12284_v42 = vcombine.high %v1124_v25, %v1128_v12 }
 0x3e6   :  { %8028 = vmatprep.subr.bf16.mxu0 %v12244_v0  ;;  %8612 = vmatprep.subr.bf16.mxu1 %v12246_v26  ;;  %v12286_v0 = vcombine.high %v1125_v1, %v1129_v8  ;;  %v1132_v26 = vld [vmem:[#allocation5 + $0x1b10] sm:$0xff] }
 0x3e7   :  { %v12291_v30 = vcombine.low %v1132_v26, %v1136_v21 }
 0x3e8   :  { %8006 = vmatmul.mubr.bf16.gmra.mrb[28].mxu0 %v14577_v33  ;;  %8590 = vmatmul.mubr.bf16.gmra.mrb[28].mxu1 %v14577_v33 }
 0x3e9   :  { %8029 = vmatpush1.bf16.msra.mxu0 %v12243_v3  ;;  %8613 = vmatpush1.bf16.msra.mxu1 %v12245_v4  ;;  %v12292_v3 = vcombine.high %v1132_v26, %v1136_v21  ;;  %v12294_v4 = vcombine.high %v1133_v35, %v1137_v6 }
 0x3ea   :  { %8030 = vmatprep.subr.bf16.mxu0 %v12252_v47  ;;  %8614 = vmatprep.subr.bf16.mxu1 %v12254_v2  ;;  %v1140_v47 = vld [vmem:[#allocation5 + $0x1b50] sm:$0xff] }
 0x3eb   :  { %8048 = vmatprep.mubr.bf16.mxu0 %v14578_v20  ;;  %8632 = vmatprep.mubr.bf16.mxu1 %v14578_v20  ;;  %v1144_v2 = vld [vmem:[#allocation5 + $0x1b70] sm:$0xff]  ;;  %v12301_v20 = vcombine.low %v1141_v45, %v1145_v49 }
 0x3ec   :  { %v12300_v33 = vcombine.high %v1140_v47, %v1144_v2  ;;  %v12299_v31 = vcombine.low %v1140_v47, %v1144_v2  ;;  %v1185_v47 = vld [vmem:[#allocation5 + $0x1cb8] sm:$0xff] }
 0x3ed   :  { %8031 = vmatpush1.bf16.msra.mxu0 %v12251_v16  ;;  %8615 = vmatpush1.bf16.msra.mxu1 %v12253_v62  ;;  %v12302_v16 = vcombine.high %v1141_v45, %v1145_v49  ;;  %v1148_v62 = vld [vmem:[#allocation5 + $0x1b90] sm:$0xff] }
 0x3ee   :  { %8032 = vmatprep.subr.bf16.mxu0 %v12260_v19  ;;  %8616 = vmatprep.subr.bf16.mxu1 %v12262_v60  ;;  %v1152_v19 = vld [vmem:[#allocation5 + $0x1bb0] sm:$0xff]  ;;  %v1149_v60 = vld [vmem:[#allocation5 + $0x1b98] sm:$0xff] }
 0x3ef   :  { %v12308_v11 = vcombine.high %v1148_v62, %v1152_v19  ;;  %v12310_v9 = vcombine.high %v1149_v60, %v1153_v24  ;;  %v12307_v15 = vcombine.low %v1148_v62, %v1152_v19  ;;  %v12309_v44 = vcombine.low %v1149_v60, %v1153_v24  ;;  %v1189_v62 = vld [vmem:[#allocation5 + $0x1cd8] sm:$0xff] }
 0x3f0   :  { %v1193_v19 = vld [vmem:[#allocation5 + $0x1cf8] sm:$0xff] }
 0x3f1   :  { %8033 = vmatpush1.bf16.msra.mxu0 %v12259_v37  ;;  %8617 = vmatpush1.bf16.msra.mxu1 %v12261_v34  ;;  %v1156_v37 = vld [vmem:[#allocation5 + $0x1bd0] sm:$0xff] }
 0x3f2   :  { %8034 = vmatprep.subr.bf16.mxu0 %v12268_v32  ;;  %8618 = vmatprep.subr.bf16.mxu1 %v12270_v41  ;;  %v1160_v34 = vld [vmem:[#allocation5 + $0x1bf0] sm:$0xff]  ;;  %v1157_v32 = vld [vmem:[#allocation5 + $0x1bd8] sm:$0xff] }
 0x3f3   :  { %v1161_v41 = vld [vmem:[#allocation5 + $0x1bf8] sm:$0xff]  ;;  %v12316_v46 = vcombine.high %v1156_v37, %v1160_v34  ;;  %v12315_v25 = vcombine.low %v1156_v37, %v1160_v34 }
 0x3f4   :  { %v12318_v13 = vcombine.high %v1157_v32, %v1161_v41  ;;  %v12317_v12 = vcombine.low %v1157_v32, %v1161_v41  ;;  %v1197_v37 = vld [vmem:[#allocation5 + $0x1d18] sm:$0xff]  ;;  %v14581_v32 = vld [vmem:[#allocation29_spill] sm:$0xff] }
 0x3f5   :  { %8035 = vmatpush1.bf16.msra.mxu0 %v12267_v17  ;;  %8619 = vmatpush1.bf16.msra.mxu1 %v12269_v55  ;;  %v1164_v17 = vld [vmem:[#allocation5 + $0x1c10] sm:$0xff]  ;;  %v1201_v34 = vld [vmem:[#allocation5 + $0x1d38] sm:$0xff] }
 0x3f6   :  { %8036 = vmatprep.subr.bf16.mxu0 %v12276_v58  ;;  %8620 = vmatprep.subr.bf16.mxu1 %v12278_v53  ;;  %v1168_v55 = vld [vmem:[#allocation5 + $0x1c30] sm:$0xff]  ;;  %v1165_v58 = vld [vmem:[#allocation5 + $0x1c18] sm:$0xff] }
 0x3f7   :  { %v1169_v53 = vld [vmem:[#allocation5 + $0x1c38] sm:$0xff]  ;;  %v12324_v1 = vcombine.high %v1164_v17, %v1168_v55  ;;  %v12323_v26 = vcombine.low %v1164_v17, %v1168_v55  ;;  %v1208_v17 = vld [vmem:[#allocation5 + $0x1d70] sm:$0xff] }
 0x3f8   :  { %v12326_v8 = vcombine.high %v1165_v58, %v1169_v53  ;;  %v12325_v21 = vcombine.low %v1165_v58, %v1169_v53  ;;  %v14582_v55 = vld [vmem:[#allocation30_spill] sm:$0xff] }
 0x3f9   :  { %8037 = vmatpush1.bf16.msra.mxu0 %v12275_v28  ;;  %8621 = vmatpush1.bf16.msra.mxu1 %v12277_v22  ;;  %v1172_v28 = vld [vmem:[#allocation5 + $0x1c50] sm:$0xff]  ;;  %v1205_v58 = vld [vmem:[#allocation5 + $0x1d58] sm:$0xff] }
 0x3fa   :  { %8038 = vmatprep.subr.bf16.mxu0 %v12284_v42  ;;  %8622 = vmatprep.subr.bf16.mxu1 %v12286_v0  ;;  %v1176_v22 = vld [vmem:[#allocation5 + $0x1c70] sm:$0xff]  ;;  %v1173_v42 = vld [vmem:[#allocation5 + $0x1c58] sm:$0xff] }
 0x3fb   :  { %v1177_v0 = vld [vmem:[#allocation5 + $0x1c78] sm:$0xff]  ;;  %v12332_v35 = vcombine.high %v1172_v28, %v1176_v22  ;;  %v12331_v2 = vcombine.low %v1172_v28, %v1176_v22  ;;  %v1212_v28 = vld [vmem:[#allocation5 + $0x1d90] sm:$0xff] }
 0x3fc   :  { %v12334_v6 = vcombine.high %v1173_v42, %v1177_v0  ;;  %v12333_v45 = vcombine.low %v1173_v42, %v1177_v0  ;;  %v1209_v53 = vld [vmem:[#allocation5 + $0x1d78] sm:$0xff]  ;;  %v1216_v22 = vld [vmem:[#allocation5 + $0x1db0] sm:$0xff] }
 0x3fd   :  { %8039 = vmatpush1.bf16.msra.mxu0 %v12283_v29  ;;  %8623 = vmatpush1.bf16.msra.mxu1 %v12285_v57  ;;  %v1180_v29 = vld [vmem:[#allocation5 + $0x1c90] sm:$0xff]  ;;  %v1213_v42 = vld [vmem:[#allocation5 + $0x1d98] sm:$0xff] }
 0x3fe   :  { %8040 = vmatprep.subr.bf16.mxu0 %v12292_v3  ;;  %8624 = vmatprep.subr.bf16.mxu1 %v12294_v4  ;;  %v1184_v57 = vld [vmem:[#allocation5 + $0x1cb0] sm:$0xff]  ;;  %v14579_v3 = vld [vmem:[#allocation27_spill] sm:$0xff]  ;;  %v1181_v4 = vld [vmem:[#allocation5 + $0x1c98] sm:$0xff] }
 0x3ff   :  { %v12340_v49 = vcombine.high %v1180_v29, %v1184_v57  ;;  %v12339_v60 = vcombine.low %v1180_v29, %v1184_v57  ;;  %v12341_v24 = vcombine.low %v1181_v4, %v1185_v47  ;;  %v1217_v0 = vld [vmem:[#allocation5 + $0x1db8] sm:$0xff]  ;;  %v1220_v57 = vld [vmem:[#allocation5 + $0x1dd0] sm:$0xff] }
 0x400   :  { %v12374_v29 = vcombine.high %v1213_v42, %v1217_v0 }
 0x401   :  { %8041 = vmatpush1.bf16.msra.mxu0 %v12291_v30  ;;  %8625 = vmatpush1.bf16.msra.mxu1 %v12293_v63  ;;  %v12342_v30 = vcombine.high %v1181_v4, %v1185_v47  ;;  %v1188_v63 = vld [vmem:[#allocation5 + $0x1cd0] sm:$0xff]  ;;  %v1221_v4 = vld [vmem:[#allocation5 + $0x1dd8] sm:$0xff] }
 0x402   :  { %8042 = vmatprep.subr.bf16.mxu0 %v12300_v33  ;;  %8626 = vmatprep.subr.bf16.mxu1 %v12302_v16  ;;  %v1192_v33 = vld [vmem:[#allocation5 + $0x1cf0] sm:$0xff]  ;;  %v14580_v16 = vld [vmem:[#allocation28_spill] sm:$0xff]  ;;  %v1225_v47 = vld [vmem:[#allocation5 + $0x1df8] sm:$0xff] }
 0x403   :  { %v12347_v41 = vcombine.low %v1188_v63, %v1192_v33 }
 0x405   :  { %8043 = vmatpush1.bf16.msra.mxu0 %v12299_v31  ;;  %8627 = vmatpush1.bf16.msra.mxu1 %v12301_v20  ;;  %v12348_v31 = vcombine.high %v1188_v63, %v1192_v33  ;;  %v12350_v20 = vcombine.high %v1189_v62, %v1193_v19  ;;  %v1228_v63 = vld [vmem:[#allocation5 + $0x1e10] sm:$0xff] }
 0x406   :  { %8044 = vmatprep.subr.bf16.mxu0 %v12308_v11  ;;  %8628 = vmatprep.subr.bf16.mxu1 %v12310_v9  ;;  %v1196_v11 = vld [vmem:[#allocation5 + $0x1d10] sm:$0xff] }
 0x407   :  { %v1200_v9 = vld [vmem:[#allocation5 + $0x1d30] sm:$0xff] }
 0x408   :  { %v1232_v33 = vld [vmem:[#allocation5 + $0x1e30] sm:$0xff] }
 0x409   :  { %8045 = vmatpush1.bf16.msra.mxu0 %v12307_v15  ;;  %8629 = vmatpush1.bf16.msra.mxu1 %v12309_v44  ;;  %v12349_v15 = vcombine.low %v1189_v62, %v1193_v19  ;;  %v12356_v44 = vcombine.high %v1196_v11, %v1200_v9  ;;  %v1233_v62 = vld [vmem:[#allocation5 + $0x1e38] sm:$0xff]  ;;  %v14584_v19 = vld [vmem:[#allocation32_spill] sm:$0xff] }
 0x40a   :  { %8046 = vmatprep.subr.bf16.mxu0 %v12316_v46  ;;  %8630 = vmatprep.subr.bf16.mxu1 %v12318_v13  ;;  %v12358_v46 = vcombine.high %v1197_v37, %v1201_v34  ;;  %v1204_v13 = vld [vmem:[#allocation5 + $0x1d50] sm:$0xff] }
 0x40d   :  { %8047 = vmatpush1.bf16.msra.mxu0 %v12315_v25  ;;  %8631 = vmatpush1.bf16.msra.mxu1 %v12317_v12  ;;  %v12355_v25 = vcombine.low %v1196_v11, %v1200_v9  ;;  %v12357_v12 = vcombine.low %v1197_v37, %v1201_v34  ;;  %v1240_v11 = vld [vmem:[#allocation5 + $0x1e70] sm:$0xff]  ;;  %v1237_v37 = vld [vmem:[#allocation5 + $0x1e58] sm:$0xff] }
 0x40e   :  { %8089 = vmatprep.subr.bf16.mxu0 %v12324_v1  ;;  %8673 = vmatprep.subr.bf16.mxu1 %v12326_v8  ;;  %v12364_v1 = vcombine.high %v1204_v13, %v1208_v17  ;;  %v12366_v8 = vcombine.high %v1205_v58, %v1209_v53  ;;  %v14585_v9 = vld [vmem:[#allocation33_spill] sm:$0xff]  ;;  %v1241_v34 = vld [vmem:[#allocation5 + $0x1e78] sm:$0xff] }
 0x410   :  { %8049 = vmatmul.mubr.bf16.vlgmr.msra.gmra.mrb[16].mxu0 %v14579_v3  ;;  %8633 = vmatmul.mubr.bf16.vlgmr.msra.gmra.mrb[16].mxu1 %v14579_v3  ;;  %v1224_v3 = vld [vmem:[#allocation5 + $0x1df0] sm:$0xff] }
 0x411   :  { %8090 = vmatpush1.bf16.msra.mxu0 %v12323_v26  ;;  %8674 = vmatpush1.bf16.msra.mxu1 %v12325_v21  ;;  %v14583_v26 = vld [vmem:[#allocation31_spill] sm:$0xff]  ;;  %v12363_v21 = vcombine.low %v1204_v13, %v1208_v17  ;;  %v1248_v13 = vld [vmem:[#allocation5 + $0x1eb0] sm:$0xff]  ;;  %v1245_v17 = vld [vmem:[#allocation5 + $0x1e98] sm:$0xff] }
 0x412   :  { %8091 = vmatprep.subr.bf16.mxu0 %v12332_v35  ;;  %8675 = vmatprep.subr.bf16.mxu1 %v12334_v6  ;;  %v12365_v35 = vcombine.low %v1205_v58, %v1209_v53  ;;  %v12372_v6 = vcombine.high %v1212_v28, %v1216_v22  ;;  %v12397_v53 = vcombine.low %v1237_v37, %v1241_v34 }
 0x413   :  { %8058 = vmatprep.mubr.bf16.mxu0 %v14580_v16  ;;  %8642 = vmatprep.mubr.bf16.mxu1 %v14580_v16  ;;  %v1229_v16 = vld [vmem:[#allocation5 + $0x1e18] sm:$0xff] }
 0x415   :  { %8092 = vmatpush1.bf16.msra.mxu0 %v12331_v2  ;;  %8676 = vmatpush1.bf16.msra.mxu1 %v12333_v45  ;;  %v12371_v2 = vcombine.low %v1212_v28, %v1216_v22  ;;  %v12373_v45 = vcombine.low %v1213_v42, %v1217_v0  ;;  %v1253_v28 = vld [vmem:[#allocation5 + $0x1ed8] sm:$0xff] }
 0x416   :  { %8093 = vmatprep.subr.bf16.mxu0 %v12340_v49  ;;  %8677 = vmatprep.subr.bf16.mxu1 %v12342_v30  ;;  %v12380_v49 = vcombine.high %v1220_v57, %v1224_v3  ;;  %v12382_v30 = vcombine.high %v1221_v4, %v1225_v47  ;;  %v1257_v22 = vld [vmem:[#allocation5 + $0x1ef8] sm:$0xff] }
 0x418   :  { %8059 = vmatmul.mubr.bf16.gmra.mrb[20].mxu0 %v14581_v32  ;;  %8643 = vmatmul.mubr.bf16.gmra.mrb[20].mxu1 %v14581_v32  ;;  %v12387_v32 = vcombine.low %v1228_v63, %v1232_v33 }
 0x419   :  { %8094 = vmatpush1.bf16.msra.mxu0 %v12339_v60  ;;  %8678 = vmatpush1.bf16.msra.mxu1 %v12341_v24  ;;  %v12379_v60 = vcombine.low %v1220_v57, %v1224_v3  ;;  %v12388_v24 = vcombine.high %v1228_v63, %v1232_v33  ;;  %v1265_v57 = vld [vmem:[#allocation5 + $0x1f38] sm:$0xff] }
 0x41a   :  { %8095 = vmatprep.subr.bf16.mxu0 %v12348_v31  ;;  %8679 = vmatprep.subr.bf16.mxu1 %v12350_v20  ;;  %v12390_v31 = vcombine.high %v1229_v16, %v1233_v62  ;;  %v1236_v20 = vld [vmem:[#allocation5 + $0x1e50] sm:$0xff]  ;;  %v1273_v63 = vld [vmem:[#allocation5 + $0x1f78] sm:$0xff] }
 0x41b   :  { %8068 = vmatprep.mubr.bf16.mxu0 %v14582_v55  ;;  %8652 = vmatprep.mubr.bf16.mxu1 %v14582_v55  ;;  %v1249_v55 = vld [vmem:[#allocation5 + $0x1eb8] sm:$0xff]  ;;  %v12395_v58 = vcombine.low %v1236_v20, %v1240_v11 }
 0x41c   :  { %v12405_v0 = vcombine.low %v1245_v17, %v1249_v55 }
 0x41d   :  { %8096 = vmatpush1.bf16.msra.mxu0 %v12347_v41  ;;  %8680 = vmatpush1.bf16.msra.mxu1 %v12349_v15  ;;  %v12389_v41 = vcombine.low %v1229_v16, %v1233_v62  ;;  %v12396_v15 = vcombine.high %v1236_v20, %v1240_v11 }
 0x41e   :  { %8097 = vmatprep.subr.bf16.mxu0 %v12356_v44  ;;  %8681 = vmatprep.subr.bf16.mxu1 %v12358_v46  ;;  %v12398_v44 = vcombine.high %v1237_v37, %v1241_v34  ;;  %v1244_v46 = vld [vmem:[#allocation5 + $0x1e90] sm:$0xff] }
 0x41f   :  { %v12403_v42 = vcombine.low %v1244_v46, %v1248_v13  ;;  %v1284_v34 = vld [vmem:[#allocation5 + $0x1fd0] sm:$0xff] }
 0x420   :  { %8069 = vmatmul.mubr.bf16.gmra.mrb[24].mxu0 %v14583_v26  ;;  %8653 = vmatmul.mubr.bf16.gmra.mrb[24].mxu1 %v14583_v26 }
 0x421   :  { %8098 = vmatpush1.bf16.msra.mxu0 %v12355_v25  ;;  %8682 = vmatpush1.bf16.msra.mxu1 %v12357_v12  ;;  %v12404_v25 = vcombine.high %v1244_v46, %v1248_v13  ;;  %v12406_v12 = vcombine.high %v1245_v17, %v1249_v55 }
 0x422   :  { %8099 = vmatprep.subr.bf16.mxu0 %v12364_v1  ;;  %8683 = vmatprep.subr.bf16.mxu1 %v12366_v8  ;;  %v1252_v1 = vld [vmem:[#allocation5 + $0x1ed0] sm:$0xff] }
 0x423   :  { %8078 = vmatprep.mubr.bf16.mxu0 %v14209_v5  ;;  %8662 = vmatprep.mubr.bf16.mxu1 %v14209_v5  ;;  %v12381_v5 = vcombine.low %v1221_v4, %v1225_v47  ;;  %v1256_v8 = vld [vmem:[#allocation5 + $0x1ef0] sm:$0xff]  ;;  %v12413_v4 = vcombine.low %v1253_v28, %v1257_v22 }
 0x424   :  { %v12412_v26 = vcombine.high %v1252_v1, %v1256_v8  ;;  %v12411_v3 = vcombine.low %v1252_v1, %v1256_v8  ;;  %v13376_v1 = vld [vmem:[#allocation7 + $0x8] ss:$16 sps:$4 sm:$0xff]   ;;  %v13381_v8 = vld [vmem:[#allocation7 + $0x24] ss:$16 sps:$4 sm:$0xff]  }
 0x425   :  { %8100 = vmatpush1.bf16.msra.mxu0 %v12363_v21  ;;  %8684 = vmatpush1.bf16.msra.mxu1 %v12365_v35  ;;  %v12414_v21 = vcombine.high %v1253_v28, %v1257_v22  ;;  %v1260_v35 = vld [vmem:[#allocation5 + $0x1f10] sm:$0xff]  ;;  %v13384_v28 = vld [vmem:[#allocation7 + $0x2c] ss:$16 sps:$4 sm:$0xff]  }
 0x426   :  { %8101 = vmatprep.subr.bf16.mxu0 %v12372_v6  ;;  %8685 = vmatprep.subr.bf16.mxu1 %v12374_v29  ;;  %v1264_v6 = vld [vmem:[#allocation5 + $0x1f30] sm:$0xff]  ;;  %v1261_v29 = vld [vmem:[#allocation5 + $0x1f18] sm:$0xff] }
 0x427   :  { %v12420_v47 = vcombine.high %v1260_v35, %v1264_v6  ;;  %v12419_v33 = vcombine.low %v1260_v35, %v1264_v6  ;;  %v12421_v16 = vcombine.low %v1261_v29, %v1265_v57  ;;  %v13379_v22 = vld [vmem:[#allocation7 + $0x20] ss:$16 sps:$4 sm:$0xff]   ;;  %v13388_v6 = vld [vmem:[#allocation7 + $0x48] ss:$16 sps:$4 sm:$0xff]  }
 0x428   :  { %8079 = vmatmul.mubr.bf16.gmra.mrb[28].mxu0 %v14584_v19  ;;  %8663 = vmatmul.mubr.bf16.gmra.mrb[28].mxu1 %v14584_v19  ;;  %v13385_v35 = vld [vmem:[#allocation7 + $0x40] ss:$16 sps:$4 sm:$0xff]  }
 0x429   :  { %8102 = vmatpush1.bf16.msra.mxu0 %v12371_v2  ;;  %8686 = vmatpush1.bf16.msra.mxu1 %v12373_v45  ;;  %v12422_v2 = vcombine.high %v1261_v29, %v1265_v57  ;;  %v1268_v45 = vld [vmem:[#allocation5 + $0x1f50] sm:$0xff]  ;;  %v14587_v57 = vld [vmem:[#allocation35_spill] sm:$0xff] }
 0x42a   :  { %8103 = vmatprep.subr.bf16.mxu0 %v12380_v49  ;;  %8687 = vmatprep.subr.bf16.mxu1 %v12382_v30  ;;  %v1272_v49 = vld [vmem:[#allocation5 + $0x1f70] sm:$0xff]  ;;  %v1269_v30 = vld [vmem:[#allocation5 + $0x1f58] sm:$0xff] }
 0x42b   :  { %8121 = vmatprep.mubr.bf16.mxu0 %v14585_v9  ;;  %8705 = vmatprep.mubr.bf16.mxu1 %v14585_v9  ;;  %v12428_v62 = vcombine.high %v1268_v45, %v1272_v49  ;;  %v12430_v19 = vcombine.high %v1269_v30, %v1273_v63  ;;  %v12427_v20 = vcombine.low %v1268_v45, %v1272_v49  ;;  %v13393_v29 = vld [vmem:[#allocation7 + $0x64] ss:$16 sps:$4 sm:$0xff]   ;;  %v13402_v45 = vld [vmem:[#allocation7 + $0x8c] ss:$16 sps:$4 sm:$0xff]   ;;  %v13397_v49 = vld [vmem:[#allocation7 + $0x80] ss:$16 sps:$4 sm:$0xff]  }
 0x42c   :  { %v12429_v11 = vcombine.low %v1269_v30, %v1273_v63  ;;  %v13400_v30 = vld [vmem:[#allocation7 + $0x88] ss:$16 sps:$4 sm:$0xff]   ;;  %v13405_v63 = vld [vmem:[#allocation7 + $0xa4] ss:$16 sps:$4 sm:$0xff]  }
 0x42d   :  { %8104 = vmatpush1.bf16.msra.mxu0 %v12379_v60  ;;  %8688 = vmatpush1.bf16.msra.mxu1 %v12381_v5  ;;  %v1276_v60 = vld [vmem:[#allocation5 + $0x1f90] sm:$0xff] }
 0x42e   :  { %8105 = vmatprep.subr.bf16.mxu0 %v12388_v24  ;;  %8689 = vmatprep.subr.bf16.mxu1 %v12390_v31  ;;  %v1280_v5 = vld [vmem:[#allocation5 + $0x1fb0] sm:$0xff]  ;;  %v1277_v24 = vld [vmem:[#allocation5 + $0x1f98] sm:$0xff] }
 0x42f   :  { %v1281_v31 = vld [vmem:[#allocation5 + $0x1fb8] sm:$0xff]  ;;  %v12436_v9 = vcombine.high %v1276_v60, %v1280_v5 }
 0x430   :  { %v12438_v37 = vcombine.high %v1277_v24, %v1281_v31  ;;  %v12437_v46 = vcombine.low %v1277_v24, %v1281_v31  ;;  %v13412_v24 = vld [vmem:[#allocation7 + $0xc8] ss:$16 sps:$4 sm:$0xff]   ;;  %v13417_v31 = vld [vmem:[#allocation7 + $0xe4] ss:$16 sps:$4 sm:$0xff]  }
 0x431   :  { %8106 = vmatpush1.bf16.msra.mxu0 %v12387_v32  ;;  %8690 = vmatpush1.bf16.msra.mxu1 %v12389_v41  ;;  %v1288_v32 = vld [vmem:[#allocation5 + $0x1ff0] sm:$0xff]  ;;  %v1285_v41 = vld [vmem:[#allocation5 + $0x1fd8] sm:$0xff] }
 0x432   :  { %8107 = vmatprep.subr.bf16.mxu0 %v12396_v15  ;;  %8691 = vmatprep.subr.bf16.mxu1 %v12398_v44  ;;  %v1289_v15 = vld [vmem:[#allocation5 + $0x1ff8] sm:$0xff]  ;;  %v12435_v44 = vcombine.low %v1276_v60, %v1280_v5  ;;  %v12444_v13 = vcombine.high %v1284_v34, %v1288_v32  ;;  %v12443_v55 = vcombine.low %v1284_v34, %v1288_v32  ;;  %v13409_v5 = vld [vmem:[#allocation7 + $0xc0] ss:$16 sps:$4 sm:$0xff]  }
 0x433   :  { %v12446_v17 = vcombine.high %v1285_v41, %v1289_v15  ;;  %v13414_v60 = vld [vmem:[#allocation7 + $0xcc] ss:$16 sps:$4 sm:$0xff]   ;;  %v13421_v34 = vld [vmem:[#allocation7 + $0x100] ss:$16 sps:$4 sm:$0xff]   ;;  %v13424_v32 = vld [vmem:[#allocation7 + $0x108] ss:$16 sps:$4 sm:$0xff]  }
 0x435   :  { %8108 = vmatpush1.bf16.msra.mxu0 %v12395_v58  ;;  %8692 = vmatpush1.bf16.msra.mxu1 %v12397_v53  ;;  %v12445_v58 = vcombine.low %v1285_v41, %v1289_v15  ;;  %v13375_v53 = vld [vmem:[#allocation7 + $0x4] ss:$16 sps:$4 sm:$0xff]   ;;  %v13432_v15 = vld [vmem:[#allocation7 + $0x12c] ss:$16 sps:$4 sm:$0xff]  }
 0x436   :  { %8109 = vmatprep.subr.bf16.mxu0 %v12404_v25  ;;  %8693 = vmatprep.subr.bf16.mxu1 %v12406_v12  ;;  %v13378_v25 = vld [vmem:[#allocation7 + $0xc] ss:$16 sps:$4 sm:$0xff]   ;;  %v13373_v12 = vld [vmem:[#allocation7] ss:$16 sps:$4 sm:$0xff]   ;;  %v13429_v41 = vld [vmem:[#allocation7 + $0x124] ss:$16 sps:$4 sm:$0xff]  }
 0x439   :  { %8110 = vmatpush1.bf16.msra.mxu0 %v12403_v42  ;;  %8694 = vmatpush1.bf16.msra.mxu1 %v12405_v0  ;;  %v13382_v42 = vld [vmem:[#allocation7 + $0x28] ss:$16 sps:$4 sm:$0xff]   ;;  %v13387_v0 = vld [vmem:[#allocation7 + $0x44] ss:$16 sps:$4 sm:$0xff]  }
 0x43a   :  { %8111 = vmatprep.subr.bf16.mxu0 %v12412_v26  ;;  %8695 = vmatprep.subr.bf16.mxu1 %v12414_v21  ;;  %v14586_v26 = vld [vmem:[#allocation34_spill] sm:$0xff] }
 0x43b   :  { %v13390_v21 = vld [vmem:[#allocation7 + $0x4c] ss:$16 sps:$4 sm:$0xff]  }
 0x43d   :  { %8112 = vmatpush1.bf16.msra.mxu0 %v12411_v3  ;;  %8696 = vmatpush1.bf16.msra.mxu1 %v12413_v4  ;;  %v13391_v3 = vld [vmem:[#allocation7 + $0x60] ss:$16 sps:$4 sm:$0xff]   ;;  %v13394_v4 = vld [vmem:[#allocation7 + $0x68] ss:$16 sps:$4 sm:$0xff]  }
 0x43e   :  { %8113 = vmatprep.subr.bf16.mxu0 %v12420_v47  ;;  %8697 = vmatprep.subr.bf16.mxu1 %v12422_v2  ;;  %v13399_v47 = vld [vmem:[#allocation7 + $0x84] ss:$16 sps:$4 sm:$0xff]   ;;  %v14588_v2 = vld [vmem:[#allocation36_spill] sm:$0xff] }
 0x441   :  { %8114 = vmatpush1.bf16.msra.mxu0 %v12419_v33  ;;  %8698 = vmatpush1.bf16.msra.mxu1 %v12421_v16  ;;  %v13408_v33 = vld [vmem:[#allocation7 + $0xac] ss:$16 sps:$4 sm:$0xff]   ;;  %v13403_v16 = vld [vmem:[#allocation7 + $0xa0] ss:$16 sps:$4 sm:$0xff]  }
 0x442   :  { %8115 = vmatprep.subr.bf16.mxu0 %v12428_v62  ;;  %8699 = vmatprep.subr.bf16.mxu1 %v12430_v19  ;;  %v13406_v62 = vld [vmem:[#allocation7 + $0xa8] ss:$16 sps:$4 sm:$0xff]   ;;  %v13411_v19 = vld [vmem:[#allocation7 + $0xc4] ss:$16 sps:$4 sm:$0xff]  }
 0x445   :  { %8116 = vmatpush1.bf16.msra.mxu0 %v12427_v20  ;;  %8700 = vmatpush1.bf16.msra.mxu1 %v12429_v11  ;;  %v13420_v20 = vld [vmem:[#allocation7 + $0xec] ss:$16 sps:$4 sm:$0xff]   ;;  %v13415_v11 = vld [vmem:[#allocation7 + $0xe0] ss:$16 sps:$4 sm:$0xff]  }
 0x446   :  { %8117 = vmatprep.subr.bf16.mxu0 %v12436_v9  ;;  %8701 = vmatprep.subr.bf16.mxu1 %v12438_v37  ;;  %v13418_v9 = vld [vmem:[#allocation7 + $0xe8] ss:$16 sps:$4 sm:$0xff]   ;;  %v13423_v37 = vld [vmem:[#allocation7 + $0x104] ss:$16 sps:$4 sm:$0xff]  }
 0x449   :  { %8118 = vmatpush1.bf16.msra.mxu0 %v12435_v44  ;;  %8702 = vmatpush1.bf16.msra.mxu1 %v12437_v46  ;;  %v13427_v44 = vld [vmem:[#allocation7 + $0x120] ss:$16 sps:$4 sm:$0xff]   ;;  %v13430_v46 = vld [vmem:[#allocation7 + $0x128] ss:$16 sps:$4 sm:$0xff]  }
 0x44a   :  { %8119 = vmatprep.subr.bf16.mxu0 %v12444_v13  ;;  %8703 = vmatprep.subr.bf16.mxu1 %v12446_v17  ;;  %v13435_v13 = vld [vmem:[#allocation7 + $0x144] ss:$16 sps:$4 sm:$0xff]   ;;  %v13438_v17 = vld [vmem:[#allocation7 + $0x14c] ss:$16 sps:$4 sm:$0xff]  }
 0x44d   :  { %8120 = vmatpush1.bf16.msra.mxu0 %v12443_v55  ;;  %8704 = vmatpush1.bf16.msra.mxu1 %v12445_v58  ;;  %v13436_v55 = vld [vmem:[#allocation7 + $0x148] ss:$16 sps:$4 sm:$0xff]   ;;  %v13441_v58 = vld [vmem:[#allocation7 + $0x164] ss:$16 sps:$4 sm:$0xff]  }
 0x44e   :  { %10378 = vmatprep.subr.bf16.mxu0 %v13375_v53  ;;  %10670 = vmatprep.subr.bf16.mxu1 %v13378_v25  ;;  %v13444_v53 = vld [vmem:[#allocation7 + $0x16c] ss:$16 sps:$4 sm:$0xff]   ;;  %v13439_v25 = vld [vmem:[#allocation7 + $0x160] ss:$16 sps:$4 sm:$0xff]  }
 0x450   :  { %8122 = vmatmul.mubr.bf16.vlgmr.msra.gmra.mrb[16].mxu0 %v14223_v48  ;;  %8706 = vmatmul.mubr.bf16.vlgmr.msra.gmra.mrb[16].mxu1 %v14223_v48  ;;  %v13396_v48 = vld [vmem:[#allocation7 + $0x6c] ss:$16 sps:$4 sm:$0xff]  }
 0x451   :  { %10379 = vmatpush1.bf16.msra.mxu0 %v13373_v12  ;;  %10671 = vmatpush1.bf16.msra.mxu1 %v13376_v1  ;;  %v13442_v12 = vld [vmem:[#allocation7 + $0x168] ss:$16 sps:$4 sm:$0xff]   ;;  %v13447_v1 = vld [vmem:[#allocation7 + $0x184] ss:$16 sps:$4 sm:$0xff]  }
 0x452   :  { %10380 = vmatprep.subr.bf16.mxu0 %v13381_v8  ;;  %10672 = vmatprep.subr.bf16.mxu1 %v13384_v28  ;;  %v13450_v8 = vld [vmem:[#allocation7 + $0x18c] ss:$16 sps:$4 sm:$0xff]   ;;  %v13445_v28 = vld [vmem:[#allocation7 + $0x180] ss:$16 sps:$4 sm:$0xff]  }
 0x453   :  { %8131 = vmatprep.mubr.bf16.mxu0 %v14586_v26  ;;  %8715 = vmatprep.mubr.bf16.mxu1 %v14586_v26  ;;  %v13451_v26 = vld [vmem:[#allocation7 + $0x1a0] ss:$16 sps:$4 sm:$0xff]  }
 0x455   :  { %10381 = vmatpush1.bf16.msra.mxu0 %v13379_v22  ;;  %10673 = vmatpush1.bf16.msra.mxu1 %v13382_v42  ;;  %v13448_v22 = vld [vmem:[#allocation7 + $0x188] ss:$16 sps:$4 sm:$0xff]   ;;  %v13453_v42 = vld [vmem:[#allocation7 + $0x1a4] ss:$16 sps:$4 sm:$0xff]  }
 0x456   :  { %10382 = vmatprep.subr.bf16.mxu0 %v13387_v0  ;;  %10674 = vmatprep.subr.bf16.mxu1 %v13390_v21  ;;  %v13456_v0 = vld [vmem:[#allocation7 + $0x1ac] ss:$16 sps:$4 sm:$0xff]   ;;  %v13454_v21 = vld [vmem:[#allocation7 + $0x1a8] ss:$16 sps:$4 sm:$0xff]  }
 0x458   :  { %8132 = vmatmul.mubr.bf16.gmra.mrb[20].mxu0 %v14587_v57  ;;  %8716 = vmatmul.mubr.bf16.gmra.mrb[20].mxu1 %v14587_v57  ;;  %v13465_v57 = vld [vmem:[#allocation7 + $0x1e4] ss:$16 sps:$4 sm:$0xff]  }
 0x459   :  { %10383 = vmatpush1.bf16.msra.mxu0 %v13385_v35  ;;  %10675 = vmatpush1.bf16.msra.mxu1 %v13388_v6  ;;  %v13459_v35 = vld [vmem:[#allocation7 + $0x1c4] ss:$16 sps:$4 sm:$0xff]   ;;  %v13462_v6 = vld [vmem:[#allocation7 + $0x1cc] ss:$16 sps:$4 sm:$0xff]  }
 0x45a   :  { %10384 = vmatprep.subr.bf16.mxu0 %v13393_v29  ;;  %10676 = vmatprep.subr.bf16.mxu1 %v13396_v48  ;;  %v13457_v29 = vld [vmem:[#allocation7 + $0x1c0] ss:$16 sps:$4 sm:$0xff]   ;;  %v13460_v48 = vld [vmem:[#allocation7 + $0x1c8] ss:$16 sps:$4 sm:$0xff]  }
 0x45b   :  { %8141 = vmatprep.mubr.bf16.mxu0 %v14588_v2  ;;  %8725 = vmatprep.mubr.bf16.mxu1 %v14588_v2  ;;  %v13471_v2 = vld [vmem:[#allocation7 + $0x204] ss:$16 sps:$4 sm:$0xff]  }
 0x45d   :  { %10385 = vmatpush1.bf16.msra.mxu0 %v13391_v3  ;;  %10677 = vmatpush1.bf16.msra.mxu1 %v13394_v4  ;;  %v13468_v3 = vld [vmem:[#allocation7 + $0x1ec] ss:$16 sps:$4 sm:$0xff]   ;;  %v13463_v4 = vld [vmem:[#allocation7 + $0x1e0] ss:$16 sps:$4 sm:$0xff]  }
 0x45e   :  { %10386 = vmatprep.subr.bf16.mxu0 %v13399_v47  ;;  %10678 = vmatprep.subr.bf16.mxu1 %v13402_v45  ;;  %v13466_v47 = vld [vmem:[#allocation7 + $0x1e8] ss:$16 sps:$4 sm:$0xff]   ;;  %v13474_v45 = vld [vmem:[#allocation7 + $0x20c] ss:$16 sps:$4 sm:$0xff]  }
 0x460   :  { %8142 = vmatmul.mubr.bf16.gmra.mrb[24].mxu0 %v14239_v43  ;;  %8726 = vmatmul.mubr.bf16.gmra.mrb[24].mxu1 %v14239_v43  ;;  %v14589_v43 = vld [vmem:[#allocation37_spill] sm:$0xff] }
 0x461   :  { %10387 = vmatpush1.bf16.msra.mxu0 %v13397_v49  ;;  %10679 = vmatpush1.bf16.msra.mxu1 %v13400_v30  ;;  %v13469_v49 = vld [vmem:[#allocation7 + $0x200] ss:$16 sps:$4 sm:$0xff]   ;;  %v13472_v30 = vld [vmem:[#allocation7 + $0x208] ss:$16 sps:$4 sm:$0xff]  }
 0x462   :  { %10388 = vmatprep.subr.bf16.mxu0 %v13405_v63  ;;  %10680 = vmatprep.subr.bf16.mxu1 %v13408_v33  ;;  %v13477_v63 = vld [vmem:[#allocation7 + $0x224] ss:$16 sps:$4 sm:$0xff]   ;;  %v13480_v33 = vld [vmem:[#allocation7 + $0x22c] ss:$16 sps:$4 sm:$0xff]  }
 0x463   :  { %8151 = vmatprep.mubr.bf16.mxu0 %v14241_v36  ;;  %8735 = vmatprep.mubr.bf16.mxu1 %v14241_v36  ;;  %v13426_v36 = vld [vmem:[#allocation7 + $0x10c] ss:$16 sps:$4 sm:$0xff]  }
 0x465   :  { %10389 = vmatpush1.bf16.msra.mxu0 %v13403_v16  ;;  %10681 = vmatpush1.bf16.msra.mxu1 %v13406_v62  ;;  %v13475_v16 = vld [vmem:[#allocation7 + $0x220] ss:$16 sps:$4 sm:$0xff]   ;;  %v13478_v62 = vld [vmem:[#allocation7 + $0x228] ss:$16 sps:$4 sm:$0xff]  }
 0x466   :  { %10390 = vmatprep.subr.bf16.mxu0 %v13411_v19  ;;  %10682 = vmatprep.subr.bf16.mxu1 %v13414_v60  ;;  %v13483_v19 = vld [vmem:[#allocation7 + $0x244] ss:$16 sps:$4 sm:$0xff]   ;;  %v13486_v60 = vld [vmem:[#allocation7 + $0x24c] ss:$16 sps:$4 sm:$0xff]  }
 0x468   :  { %8152 = vmatmul.mubr.bf16.gmra.mrb[28].mxu0 %v14589_v43  ;;  %8736 = vmatmul.mubr.bf16.gmra.mrb[28].mxu1 %v14589_v43  ;;  %v13490_v43 = vld [vmem:[#allocation7 + $0x268] ss:$16 sps:$4 sm:$0xff]  }
 0x469   :  { %10391 = vmatpush1.bf16.msra.mxu0 %v13409_v5  ;;  %10410 = vmatprep.mubr.bf16.mxu0 %v14304_v38  ;;  %v13481_v5 = vld [vmem:[#allocation7 + $0x240] ss:$16 sps:$4 sm:$0xff]  }
 0x46a   :  { %10683 = vmatpush1.bf16.msra.mxu1 %v13412_v24  ;;  %10702 = vmatprep.mubr.bf16.mxu1 %v14304_v38  ;;  %v13433_v38 = vld [vmem:[#allocation7 + $0x140] ss:$16 sps:$4 sm:$0xff]   ;;  %v13484_v24 = vld [vmem:[#allocation7 + $0x248] ss:$16 sps:$4 sm:$0xff]  }
 0x46b   :  { %10392 = vmatprep.subr.bf16.mxu0 %v13417_v31  ;;  %10684 = vmatprep.subr.bf16.mxu1 %v13420_v20  ;;  %v13489_v31 = vld [vmem:[#allocation7 + $0x264] ss:$16 sps:$4 sm:$0xff]  }
 0x46c   :  { %v13495_v20 = vld [vmem:[#allocation7 + $0x284] ss:$16 sps:$4 sm:$0xff]  }
 0x46d   :  { %10393 = vmatpush1.bf16.msra.mxu0 %v13415_v11  ;;  %v13498_v11 = vld [vmem:[#allocation7 + $0x28c] ss:$16 sps:$4 sm:$0xff]  }
 0x46e   :  { %10685 = vmatpush1.bf16.msra.mxu1 %v13418_v9  ;;  %10394 = vmatprep.subr.bf16.mxu0 %v13423_v37  ;;  %v13493_v9 = vld [vmem:[#allocation7 + $0x280] ss:$16 sps:$4 sm:$0xff]   ;;  %v13496_v37 = vld [vmem:[#allocation7 + $0x288] ss:$16 sps:$4 sm:$0xff]  }
 0x46f   :  { %10686 = vmatprep.subr.bf16.mxu1 %v13426_v36  ;;  %v13501_v36 = vld [vmem:[#allocation7 + $0x2a4] ss:$16 sps:$4 sm:$0xff]  }
 0x471   :  { %10395 = vmatpush1.bf16.msra.mxu0 %v13421_v34  ;;  %v13502_v34 = vld [vmem:[#allocation7 + $0x2a8] ss:$16 sps:$4 sm:$0xff]  }
 0x472   :  { %10687 = vmatpush1.bf16.msra.mxu1 %v13424_v32  ;;  %10396 = vmatprep.subr.bf16.mxu0 %v13429_v41  ;;  %v13507_v32 = vld [vmem:[#allocation7 + $0x2c4] ss:$16 sps:$4 sm:$0xff]   ;;  %v13510_v41 = vld [vmem:[#allocation7 + $0x2cc] ss:$16 sps:$4 sm:$0xff]  }
 0x473   :  { %10688 = vmatprep.subr.bf16.mxu1 %v13432_v15  ;;  %v13505_v15 = vld [vmem:[#allocation7 + $0x2c0] ss:$16 sps:$4 sm:$0xff]  }
 0x475   :  { %10397 = vmatpush1.bf16.msra.mxu0 %v13427_v44  ;;  %v13508_v44 = vld [vmem:[#allocation7 + $0x2c8] ss:$16 sps:$4 sm:$0xff]  }
 0x476   :  { %10689 = vmatpush1.bf16.msra.mxu1 %v13430_v46  ;;  %10398 = vmatprep.subr.bf16.mxu0 %v13435_v13  ;;  %v13513_v46 = vld [vmem:[#allocation7 + $0x2e4] ss:$16 sps:$4 sm:$0xff]   ;;  %v13514_v13 = vld [vmem:[#allocation7 + $0x2e8] ss:$16 sps:$4 sm:$0xff]  }
 0x477   :  { %10690 = vmatprep.subr.bf16.mxu1 %v13438_v17  ;;  %v13519_v17 = vld [vmem:[#allocation7 + $0x304] ss:$16 sps:$4 sm:$0xff]  }
 0x479   :  { %10399 = vmatpush1.bf16.msra.mxu0 %v13433_v38  ;;  %v13522_v38 = vld [vmem:[#allocation7 + $0x30c] ss:$16 sps:$4 sm:$0xff]  }
 0x47a   :  { %10691 = vmatpush1.bf16.msra.mxu1 %v13436_v55  ;;  %10400 = vmatprep.subr.bf16.mxu0 %v13441_v58  ;;  %v13517_v55 = vld [vmem:[#allocation7 + $0x300] ss:$16 sps:$4 sm:$0xff]   ;;  %v13520_v58 = vld [vmem:[#allocation7 + $0x308] ss:$16 sps:$4 sm:$0xff]  }
 0x47b   :  { %10692 = vmatprep.subr.bf16.mxu1 %v13444_v53  ;;  %v13525_v53 = vld [vmem:[#allocation7 + $0x324] ss:$16 sps:$4 sm:$0xff]  }
 0x47d   :  { %10401 = vmatpush1.bf16.msra.mxu0 %v13439_v25  ;;  %v13523_v25 = vld [vmem:[#allocation7 + $0x320] ss:$16 sps:$4 sm:$0xff]  }
 0x47e   :  { %10693 = vmatpush1.bf16.msra.mxu1 %v13442_v12  ;;  %10402 = vmatprep.subr.bf16.mxu0 %v13447_v1  ;;  %v13531_v12 = vld [vmem:[#allocation7 + $0x344] ss:$16 sps:$4 sm:$0xff]   ;;  %v13534_v1 = vld [vmem:[#allocation7 + $0x34c] ss:$16 sps:$4 sm:$0xff]  }
 0x47f   :  { %10694 = vmatprep.subr.bf16.mxu1 %v13450_v8  ;;  %v13529_v8 = vld [vmem:[#allocation7 + $0x340] ss:$16 sps:$4 sm:$0xff]  }
 0x481   :  { %10403 = vmatpush1.bf16.msra.mxu0 %v13445_v28  ;;  %v13532_v28 = vld [vmem:[#allocation7 + $0x348] ss:$16 sps:$4 sm:$0xff]  }
 0x482   :  { %10695 = vmatpush1.bf16.msra.mxu1 %v13448_v22  ;;  %10404 = vmatprep.subr.bf16.mxu0 %v13453_v42  ;;  %v13537_v22 = vld [vmem:[#allocation7 + $0x364] ss:$16 sps:$4 sm:$0xff]   ;;  %v13540_v42 = vld [vmem:[#allocation7 + $0x36c] ss:$16 sps:$4 sm:$0xff]  }
 0x483   :  { %10696 = vmatprep.subr.bf16.mxu1 %v13456_v0  ;;  %v13535_v0 = vld [vmem:[#allocation7 + $0x360] ss:$16 sps:$4 sm:$0xff]  }
 0x485   :  { %10405 = vmatpush1.bf16.msra.mxu0 %v13451_v26  ;;  %v13538_v26 = vld [vmem:[#allocation7 + $0x368] ss:$16 sps:$4 sm:$0xff]  }
 0x486   :  { %10697 = vmatpush1.bf16.msra.mxu1 %v13454_v21  ;;  %10406 = vmatprep.subr.bf16.mxu0 %v13459_v35  ;;  %v13543_v21 = vld [vmem:[#allocation7 + $0x384] ss:$16 sps:$4 sm:$0xff]   ;;  %v13546_v35 = vld [vmem:[#allocation7 + $0x38c] ss:$16 sps:$4 sm:$0xff]  }
 0x487   :  { %10698 = vmatprep.subr.bf16.mxu1 %v13462_v6  ;;  %v13541_v6 = vld [vmem:[#allocation7 + $0x380] ss:$16 sps:$4 sm:$0xff]  }
 0x489   :  { %10407 = vmatpush1.bf16.msra.mxu0 %v13457_v29  ;;  %v13544_v29 = vld [vmem:[#allocation7 + $0x388] ss:$16 sps:$4 sm:$0xff]  }
 0x48a   :  { %10699 = vmatpush1.bf16.msra.mxu1 %v13460_v48  ;;  %10408 = vmatprep.subr.bf16.mxu0 %v13465_v57  ;;  %v13549_v48 = vld [vmem:[#allocation7 + $0x3a4] ss:$16 sps:$4 sm:$0xff]   ;;  %v13552_v57 = vld [vmem:[#allocation7 + $0x3ac] ss:$16 sps:$4 sm:$0xff]  }
 0x48b   :  { %10700 = vmatprep.subr.bf16.mxu1 %v13468_v3  ;;  %v13547_v3 = vld [vmem:[#allocation7 + $0x3a0] ss:$16 sps:$4 sm:$0xff]  }
 0x48d   :  { %10409 = vmatpush1.bf16.msra.mxu0 %v13463_v4  ;;  %v13550_v4 = vld [vmem:[#allocation7 + $0x3a8] ss:$16 sps:$4 sm:$0xff]  }
 0x48e   :  { %10701 = vmatpush1.bf16.msra.mxu1 %v13466_v47  ;;  %10451 = vmatprep.subr.bf16.mxu0 %v13471_v2  ;;  %v13555_v47 = vld [vmem:[#allocation7 + $0x3c4] ss:$16 sps:$4 sm:$0xff]   ;;  %v13558_v2 = vld [vmem:[#allocation7 + $0x3cc] ss:$16 sps:$4 sm:$0xff]  }
 0x48f   :  { %10743 = vmatprep.subr.bf16.mxu1 %v13474_v45  ;;  %v13553_v45 = vld [vmem:[#allocation7 + $0x3c0] ss:$16 sps:$4 sm:$0xff]  }
 0x490   :  { %10411 = vmatmul.mubr.bf16.vlgmr.msra.gmra.mrb[32].mxu0 %v14299_v50 }
 0x491   :  { %10703 = vmatmul.mubr.bf16.vlgmr.msra.gmra.mrb[32].mxu1 %v14299_v50  ;;  %10420 = vmatprep.mubr.bf16.mxu0 %v14317_v59  ;;  %v13492_v50 = vld [vmem:[#allocation7 + $0x26c] ss:$16 sps:$4 sm:$0xff]  }
 0x492   :  { %10452 = vmatpush1.bf16.msra.mxu0 %v13469_v49  ;;  %10712 = vmatprep.mubr.bf16.mxu1 %v14317_v59  ;;  %v13487_v59 = vld [vmem:[#allocation7 + $0x260] ss:$16 sps:$4 sm:$0xff]   ;;  %v13556_v49 = vld [vmem:[#allocation7 + $0x3c8] ss:$16 sps:$4 sm:$0xff]  }
 0x493   :  { %10744 = vmatpush1.bf16.msra.mxu1 %v13472_v30  ;;  %10453 = vmatprep.subr.bf16.mxu0 %v13477_v63  ;;  %v13561_v30 = vld [vmem:[#allocation7 + $0x3e4] ss:$16 sps:$4 sm:$0xff]   ;;  %v13564_v63 = vld [vmem:[#allocation7 + $0x3ec] ss:$16 sps:$4 sm:$0xff]  }
 0x494   :  { %10745 = vmatprep.subr.bf16.mxu1 %v13480_v33  ;;  %v13559_v33 = vld [vmem:[#allocation7 + $0x3e0] ss:$16 sps:$4 sm:$0xff]  }
 0x496   :  { %10454 = vmatpush1.bf16.msra.mxu0 %v13475_v16  ;;  %v13562_v16 = vld [vmem:[#allocation7 + $0x3e8] ss:$16 sps:$4 sm:$0xff]  }
 0x497   :  { %10746 = vmatpush1.bf16.msra.mxu1 %v13478_v62  ;;  %10455 = vmatprep.subr.bf16.mxu0 %v13483_v19  ;;  %v13567_v62 = vld [vmem:[#allocation7 + $0x404] ss:$16 sps:$4 sm:$0xff]   ;;  %v13570_v19 = vld [vmem:[#allocation7 + $0x40c] ss:$16 sps:$4 sm:$0xff]  }
 0x498   :  { %10421 = vmatmul.mubr.bf16.gmra.mrb[36].mxu0 %v14313_v52  ;;  %10747 = vmatprep.subr.bf16.mxu1 %v13486_v60  ;;  %v13565_v60 = vld [vmem:[#allocation7 + $0x400] ss:$16 sps:$4 sm:$0xff]  }
 0x499   :  { %10713 = vmatmul.mubr.bf16.gmra.mrb[36].mxu1 %v14313_v52  ;;  %10430 = vmatprep.mubr.bf16.mxu0 %v14325_v39  ;;  %v13504_v52 = vld [vmem:[#allocation7 + $0x2ac] ss:$16 sps:$4 sm:$0xff]  }
 0x49a   :  { %10456 = vmatpush1.bf16.msra.mxu0 %v13481_v5  ;;  %10722 = vmatprep.mubr.bf16.mxu1 %v14325_v39  ;;  %v13499_v39 = vld [vmem:[#allocation7 + $0x2a0] ss:$16 sps:$4 sm:$0xff]   ;;  %v13568_v5 = vld [vmem:[#allocation7 + $0x408] ss:$16 sps:$4 sm:$0xff]  }
 0x49b   :  { %10748 = vmatpush1.bf16.msra.mxu1 %v13484_v24  ;;  %10457 = vmatprep.subr.bf16.mxu0 %v13489_v31  ;;  %v13573_v24 = vld [vmem:[#allocation7 + $0x424] ss:$16 sps:$4 sm:$0xff]   ;;  %v13576_v31 = vld [vmem:[#allocation7 + $0x42c] ss:$16 sps:$4 sm:$0xff]  }
 0x49c   :  { %10749 = vmatprep.subr.bf16.mxu1 %v13492_v50  ;;  %v13571_v50 = vld [vmem:[#allocation7 + $0x420] ss:$16 sps:$4 sm:$0xff]  }
 0x49e   :  { %10458 = vmatpush1.bf16.msra.mxu0 %v13487_v59  ;;  %v13574_v59 = vld [vmem:[#allocation7 + $0x428] ss:$16 sps:$4 sm:$0xff]  }
 0x49f   :  { %10750 = vmatpush1.bf16.msra.mxu1 %v13490_v43  ;;  %10459 = vmatprep.subr.bf16.mxu0 %v13495_v20  ;;  %v13579_v43 = vld [vmem:[#allocation7 + $0x444] ss:$16 sps:$4 sm:$0xff]   ;;  %v13582_v20 = vld [vmem:[#allocation7 + $0x44c] ss:$16 sps:$4 sm:$0xff]  }
 0x4a0   :  { %10431 = vmatmul.mubr.bf16.gmra.mrb[40].mxu0 %v14321_v14  ;;  %10751 = vmatprep.subr.bf16.mxu1 %v13498_v11  ;;  %v13577_v11 = vld [vmem:[#allocation7 + $0x440] ss:$16 sps:$4 sm:$0xff]  }
 0x4a1   :  { %10723 = vmatmul.mubr.bf16.gmra.mrb[40].mxu1 %v14321_v14  ;;  %10440 = vmatprep.mubr.bf16.mxu0 %v14333_v61  ;;  %v13516_v14 = vld [vmem:[#allocation7 + $0x2ec] ss:$16 sps:$4 sm:$0xff]  }
 0x4a2   :  { %10460 = vmatpush1.bf16.msra.mxu0 %v13493_v9  ;;  %10732 = vmatprep.mubr.bf16.mxu1 %v14333_v61  ;;  %v13511_v61 = vld [vmem:[#allocation7 + $0x2e0] ss:$16 sps:$4 sm:$0xff]   ;;  %v13580_v9 = vld [vmem:[#allocation7 + $0x448] ss:$16 sps:$4 sm:$0xff]  }
 0x4a3   :  { %10752 = vmatpush1.bf16.msra.mxu1 %v13496_v37  ;;  %10461 = vmatprep.subr.bf16.mxu0 %v13501_v36  ;;  %v13585_v37 = vld [vmem:[#allocation7 + $0x464] ss:$16 sps:$4 sm:$0xff]   ;;  %v13586_v36 = vld [vmem:[#allocation7 + $0x468] ss:$16 sps:$4 sm:$0xff]  }
 0x4a4   :  { %10753 = vmatprep.subr.bf16.mxu1 %v13504_v52  ;;  %v13591_v52 = vld [vmem:[#allocation7 + $0x484] ss:$16 sps:$4 sm:$0xff]  }
 0x4a6   :  { %10462 = vmatpush1.bf16.msra.mxu0 %v13499_v39  ;;  %v13594_v39 = vld [vmem:[#allocation7 + $0x48c] ss:$16 sps:$4 sm:$0xff]  }
 0x4a7   :  { %10754 = vmatpush1.bf16.msra.mxu1 %v13502_v34  ;;  %10463 = vmatprep.subr.bf16.mxu0 %v13507_v32  ;;  %v13589_v34 = vld [vmem:[#allocation7 + $0x480] ss:$16 sps:$4 sm:$0xff]   ;;  %v13592_v32 = vld [vmem:[#allocation7 + $0x488] ss:$16 sps:$4 sm:$0xff]  }
 0x4a8   :  { %10441 = vmatmul.mubr.bf16.gmra.mrb[44].mxu0 %v14329_v51  ;;  %10755 = vmatprep.subr.bf16.mxu1 %v13510_v41  ;;  %v13597_v41 = vld [vmem:[#allocation7 + $0x4a4] ss:$16 sps:$4 sm:$0xff]  }
 0x4a9   :  { %10733 = vmatmul.mubr.bf16.gmra.mrb[44].mxu1 %v14329_v51  ;;  %10483 = vmatprep.mubr.bf16.mxu0 %v14307_v27  ;;  %v13528_v51 = vld [vmem:[#allocation7 + $0x32c] ss:$16 sps:$4 sm:$0xff]  }
 0x4aa   :  { %10464 = vmatpush1.bf16.msra.mxu0 %v13505_v15  ;;  %10775 = vmatprep.mubr.bf16.mxu1 %v14307_v27  ;;  %v13526_v27 = vld [vmem:[#allocation7 + $0x328] ss:$16 sps:$4 sm:$0xff]  }
 0x4ab   :  { %10756 = vmatpush1.bf16.msra.mxu1 %v13508_v44  ;;  %10465 = vmatprep.subr.bf16.mxu0 %v13513_v46  ;;  %v13598_v15 = vld [vmem:[#allocation7 + $0x4a8] ss:$16 sps:$4 sm:$0xff]   ;;  %v13603_v44 = vld [vmem:[#allocation7 + $0x4c4] ss:$16 sps:$4 sm:$0xff]   ;;  %v13606_v46 = vld [vmem:[#allocation7 + $0x4cc] ss:$16 sps:$4 sm:$0xff]  }
 0x4ac   :  { %10757 = vmatprep.subr.bf16.mxu1 %v13516_v14  ;;  %v13601_v14 = vld [vmem:[#allocation7 + $0x4c0] ss:$16 sps:$4 sm:$0xff]  }
 0x4ae   :  { %10466 = vmatpush1.bf16.msra.mxu0 %v13511_v61  ;;  %v13604_v61 = vld [vmem:[#allocation7 + $0x4c8] ss:$16 sps:$4 sm:$0xff]  }
 0x4af   :  { %10758 = vmatpush1.bf16.msra.mxu1 %v13514_v13  ;;  %10467 = vmatprep.subr.bf16.mxu0 %v13519_v17  ;;  %v13609_v13 = vld [vmem:[#allocation7 + $0x4e4] ss:$16 sps:$4 sm:$0xff]   ;;  %v13610_v17 = vld [vmem:[#allocation7 + $0x4e8] ss:$16 sps:$4 sm:$0xff]  }
 0x4b0   :  { %10759 = vmatprep.subr.bf16.mxu1 %v13522_v38  ;;  %v13615_v38 = vld [vmem:[#allocation7 + $0x504] ss:$16 sps:$4 sm:$0xff]  }
 0x4b2   :  { %10468 = vmatpush1.bf16.msra.mxu0 %v13517_v55  ;;  %v13618_v55 = vld [vmem:[#allocation7 + $0x50c] ss:$16 sps:$4 sm:$0xff]  }
 0x4b3   :  { %10760 = vmatpush1.bf16.msra.mxu1 %v13520_v58  ;;  %10469 = vmatprep.subr.bf16.mxu0 %v13525_v53  ;;  %v13613_v58 = vld [vmem:[#allocation7 + $0x500] ss:$16 sps:$4 sm:$0xff]   ;;  %v13616_v53 = vld [vmem:[#allocation7 + $0x508] ss:$16 sps:$4 sm:$0xff]  }
 0x4b4   :  { %10761 = vmatprep.subr.bf16.mxu1 %v13528_v51  ;;  %v13621_v51 = vld [vmem:[#allocation7 + $0x524] ss:$16 sps:$4 sm:$0xff]  }
 0x4b6   :  { %10470 = vmatpush1.bf16.msra.mxu0 %v13523_v25  ;;  %v13624_v25 = vld [vmem:[#allocation7 + $0x52c] ss:$16 sps:$4 sm:$0xff]  }
 0x4b7   :  { %10762 = vmatpush1.bf16.msra.mxu1 %v13526_v27  ;;  %10471 = vmatprep.subr.bf16.mxu0 %v13531_v12  ;;  %v13619_v27 = vld [vmem:[#allocation7 + $0x520] ss:$16 sps:$4 sm:$0xff]   ;;  %v13627_v12 = vld [vmem:[#allocation7 + $0x544] ss:$16 sps:$4 sm:$0xff]  }
 0x4b8   :  { %10763 = vmatprep.subr.bf16.mxu1 %v13534_v1  ;;  %v13630_v1 = vld [vmem:[#allocation7 + $0x54c] ss:$16 sps:$4 sm:$0xff]  }
 0x4ba   :  { %10472 = vmatpush1.bf16.msra.mxu0 %v13529_v8  ;;  %v13625_v8 = vld [vmem:[#allocation7 + $0x540] ss:$16 sps:$4 sm:$0xff]  }
 0x4bb   :  { %10764 = vmatpush1.bf16.msra.mxu1 %v13532_v28  ;;  %10473 = vmatprep.subr.bf16.mxu0 %v13537_v22  ;;  %v13628_v28 = vld [vmem:[#allocation7 + $0x548] ss:$16 sps:$4 sm:$0xff]   ;;  %v13633_v22 = vld [vmem:[#allocation7 + $0x564] ss:$16 sps:$4 sm:$0xff]  }
 0x4bc   :  { %10765 = vmatprep.subr.bf16.mxu1 %v13540_v42  ;;  %v13636_v42 = vld [vmem:[#allocation7 + $0x56c] ss:$16 sps:$4 sm:$0xff]  }
 0x4be   :  { %10474 = vmatpush1.bf16.msra.mxu0 %v13535_v0  ;;  %v13631_v0 = vld [vmem:[#allocation7 + $0x560] ss:$16 sps:$4 sm:$0xff]  }
 0x4bf   :  { %10766 = vmatpush1.bf16.msra.mxu1 %v13538_v26  ;;  %10475 = vmatprep.subr.bf16.mxu0 %v13543_v21  ;;  %v13634_v26 = vld [vmem:[#allocation7 + $0x568] ss:$16 sps:$4 sm:$0xff]   ;;  %v13639_v21 = vld [vmem:[#allocation7 + $0x584] ss:$16 sps:$4 sm:$0xff]  }
 0x4c0   :  { %10767 = vmatprep.subr.bf16.mxu1 %v13546_v35  ;;  %v13642_v35 = vld [vmem:[#allocation7 + $0x58c] ss:$16 sps:$4 sm:$0xff]  }
 0x4c2   :  { %10476 = vmatpush1.bf16.msra.mxu0 %v13541_v6  ;;  %v13637_v6 = vld [vmem:[#allocation7 + $0x580] ss:$16 sps:$4 sm:$0xff]  }
 0x4c3   :  { %10768 = vmatpush1.bf16.msra.mxu1 %v13544_v29  ;;  %10477 = vmatprep.subr.bf16.mxu0 %v13549_v48  ;;  %v13640_v29 = vld [vmem:[#allocation7 + $0x588] ss:$16 sps:$4 sm:$0xff]   ;;  %v13645_v48 = vld [vmem:[#allocation7 + $0x5a4] ss:$16 sps:$4 sm:$0xff]  }
 0x4c4   :  { %10769 = vmatprep.subr.bf16.mxu1 %v13552_v57  ;;  %v13648_v57 = vld [vmem:[#allocation7 + $0x5ac] ss:$16 sps:$4 sm:$0xff]  }
 0x4c6   :  { %10478 = vmatpush1.bf16.msra.mxu0 %v13547_v3  ;;  %v13643_v3 = vld [vmem:[#allocation7 + $0x5a0] ss:$16 sps:$4 sm:$0xff]  }
 0x4c7   :  { %10770 = vmatpush1.bf16.msra.mxu1 %v13550_v4  ;;  %10479 = vmatprep.subr.bf16.mxu0 %v13555_v47  ;;  %v13646_v4 = vld [vmem:[#allocation7 + $0x5a8] ss:$16 sps:$4 sm:$0xff]   ;;  %v13651_v47 = vld [vmem:[#allocation7 + $0x5c4] ss:$16 sps:$4 sm:$0xff]  }
 0x4c8   :  { %10771 = vmatprep.subr.bf16.mxu1 %v13558_v2  ;;  %v13654_v2 = vld [vmem:[#allocation7 + $0x5cc] ss:$16 sps:$4 sm:$0xff]  }
 0x4ca   :  { %10480 = vmatpush1.bf16.msra.mxu0 %v13553_v45  ;;  %v13649_v45 = vld [vmem:[#allocation7 + $0x5c0] ss:$16 sps:$4 sm:$0xff]  }
 0x4cb   :  { %10772 = vmatpush1.bf16.msra.mxu1 %v13556_v49  ;;  %10481 = vmatprep.subr.bf16.mxu0 %v13561_v30  ;;  %v13652_v49 = vld [vmem:[#allocation7 + $0x5c8] ss:$16 sps:$4 sm:$0xff]   ;;  %v13657_v30 = vld [vmem:[#allocation7 + $0x5e4] ss:$16 sps:$4 sm:$0xff]  }
 0x4cc   :  { %10773 = vmatprep.subr.bf16.mxu1 %v13564_v63  ;;  %v13660_v63 = vld [vmem:[#allocation7 + $0x5ec] ss:$16 sps:$4 sm:$0xff]  }
 0x4ce   :  { %10482 = vmatpush1.bf16.msra.mxu0 %v13559_v33  ;;  %v13655_v33 = vld [vmem:[#allocation7 + $0x5e0] ss:$16 sps:$4 sm:$0xff]  }
 0x4cf   :  { %10774 = vmatpush1.bf16.msra.mxu1 %v13562_v16  ;;  %10524 = vmatprep.subr.bf16.mxu0 %v13567_v62  ;;  %v13658_v16 = vld [vmem:[#allocation7 + $0x5e8] ss:$16 sps:$4 sm:$0xff]   ;;  %v13663_v62 = vld [vmem:[#allocation7 + $0x604] ss:$16 sps:$4 sm:$0xff]  }
 0x4d0   :  { %10816 = vmatprep.subr.bf16.mxu1 %v13570_v19  ;;  %v13666_v19 = vld [vmem:[#allocation7 + $0x60c] ss:$16 sps:$4 sm:$0xff]  }
 0x4d1   :  { %10484 = vmatmul.mubr.bf16.vlgmr.msra.gmra.mrb[32].mxu0 %v14302_v18 }
 0x4d2   :  { %10776 = vmatmul.mubr.bf16.vlgmr.msra.gmra.mrb[32].mxu1 %v14302_v18  ;;  %10493 = vmatprep.mubr.bf16.mxu0 %v14319_v7  ;;  %v13588_v18 = vld [vmem:[#allocation7 + $0x46c] ss:$16 sps:$4 sm:$0xff]  }
 0x4d3   :  { %10785 = vmatprep.mubr.bf16.mxu1 %v14319_v7  ;;  %10525 = vmatpush1.bf16.msra.mxu0 %v13565_v60  ;;  %v13583_v7 = vld [vmem:[#allocation7 + $0x460] ss:$16 sps:$4 sm:$0xff]  }
 0x4d4   :  { %10817 = vmatpush1.bf16.msra.mxu1 %v13568_v5  ;;  %10526 = vmatprep.subr.bf16.mxu0 %v13573_v24 }
 0x4d5   :  { %10818 = vmatprep.subr.bf16.mxu1 %v13576_v31 }
 0x4d7   :  { %10527 = vmatpush1.bf16.msra.mxu0 %v13571_v50 }
 0x4d8   :  { %10819 = vmatpush1.bf16.msra.mxu1 %v13574_v59  ;;  %10528 = vmatprep.subr.bf16.mxu0 %v13579_v43 }
 0x4d9   :  { %10494 = vmatmul.mubr.bf16.gmra.mrb[36].mxu0 %v14315_v10  ;;  %10820 = vmatprep.subr.bf16.mxu1 %v13582_v20 }
 0x4da   :  { %10786 = vmatmul.mubr.bf16.gmra.mrb[36].mxu1 %v14315_v10  ;;  %10503 = vmatprep.mubr.bf16.mxu0 %v14327_v23  ;;  %v13600_v10 = vld [vmem:[#allocation7 + $0x4ac] ss:$16 sps:$4 sm:$0xff]  }
 0x4db   :  { %10795 = vmatprep.mubr.bf16.mxu1 %v14327_v23  ;;  %10529 = vmatpush1.bf16.msra.mxu0 %v13577_v11  ;;  %v13595_v23 = vld [vmem:[#allocation7 + $0x4a0] ss:$16 sps:$4 sm:$0xff]  }
 0x4dc   :  { %10821 = vmatpush1.bf16.msra.mxu1 %v13580_v9  ;;  %10530 = vmatprep.subr.bf16.mxu0 %v13585_v37 }
 0x4dd   :  { %10822 = vmatprep.subr.bf16.mxu1 %v13588_v18 }
 0x4df   :  { %10531 = vmatpush1.bf16.msra.mxu0 %v13583_v7 }
 0x4e0   :  { %10823 = vmatpush1.bf16.msra.mxu1 %v13586_v36  ;;  %10532 = vmatprep.subr.bf16.mxu0 %v13591_v52 }
 0x4e1   :  { %10504 = vmatmul.mubr.bf16.gmra.mrb[40].mxu0 %v14323_v54  ;;  %10824 = vmatprep.subr.bf16.mxu1 %v13594_v39 }
 0x4e2   :  { %10796 = vmatmul.mubr.bf16.gmra.mrb[40].mxu1 %v14323_v54  ;;  %10513 = vmatprep.mubr.bf16.mxu0 %v14335_v40  ;;  %v13612_v54 = vld [vmem:[#allocation7 + $0x4ec] ss:$16 sps:$4 sm:$0xff]  }
 0x4e3   :  { %10805 = vmatprep.mubr.bf16.mxu1 %v14335_v40  ;;  %10533 = vmatpush1.bf16.msra.mxu0 %v13589_v34  ;;  %v13607_v40 = vld [vmem:[#allocation7 + $0x4e0] ss:$16 sps:$4 sm:$0xff]  }
 0x4e4   :  { %10825 = vmatpush1.bf16.msra.mxu1 %v13592_v32  ;;  %10534 = vmatprep.subr.bf16.mxu0 %v13597_v41 }
 0x4e5   :  { %10826 = vmatprep.subr.bf16.mxu1 %v13600_v10  ;;  %v13661_v10 = vld [vmem:[#allocation7 + $0x600] ss:$16 sps:$4 sm:$0xff]  }
 0x4e7   :  { %10535 = vmatpush1.bf16.msra.mxu0 %v13595_v23  ;;  %v13664_v23 = vld [vmem:[#allocation7 + $0x608] ss:$16 sps:$4 sm:$0xff]  }
 0x4e8   :  { %10827 = vmatpush1.bf16.msra.mxu1 %v13598_v15  ;;  %10536 = vmatprep.subr.bf16.mxu0 %v13603_v44  ;;  %v13669_v44 = vld [vmem:[#allocation7 + $0x624] ss:$16 sps:$4 sm:$0xff]  }
 0x4e9   :  { %10514 = vmatmul.mubr.bf16.gmra.mrb[44].mxu0 %v14331_v56  ;;  %10828 = vmatprep.subr.bf16.mxu1 %v13606_v46  ;;  %v13672_v46 = vld [vmem:[#allocation7 + $0x62c] ss:$16 sps:$4 sm:$0xff]  }
 0x4ea   :  { %10806 = vmatmul.mubr.bf16.gmra.mrb[44].mxu1 %v14331_v56  ;;  %v13622_v56 = vld [vmem:[#allocation7 + $0x528] ss:$16 sps:$4 sm:$0xff]  }
 0x4eb   :  { %10537 = vmatpush1.bf16.msra.mxu0 %v13601_v14 }
 0x4ec   :  { %10829 = vmatpush1.bf16.msra.mxu1 %v13604_v61  ;;  %10538 = vmatprep.subr.bf16.mxu0 %v13609_v13 }
 0x4ed   :  { %10830 = vmatprep.subr.bf16.mxu1 %v13612_v54  ;;  %v13667_v54 = vld [vmem:[#allocation7 + $0x620] ss:$16 sps:$4 sm:$0xff]  }
 0x4ef   :  { %10539 = vmatpush1.bf16.msra.mxu0 %v13607_v40 }
 0x4f0   :  { %10831 = vmatpush1.bf16.msra.mxu1 %v13610_v17  ;;  %10540 = vmatprep.subr.bf16.mxu0 %v13615_v38  ;;  %v13670_v38 = vld [vmem:[#allocation7 + $0x628] ss:$16 sps:$4 sm:$0xff]  }
 0x4f1   :  { %10832 = vmatprep.subr.bf16.mxu1 %v13618_v55  ;;  %v13675_v55 = vld [vmem:[#allocation7 + $0x644] ss:$16 sps:$4 sm:$0xff]  }
 0x4f3   :  { %10541 = vmatpush1.bf16.msra.mxu0 %v13613_v58 }
 0x4f4   :  { %10833 = vmatpush1.bf16.msra.mxu1 %v13616_v53  ;;  %10542 = vmatprep.subr.bf16.mxu0 %v13621_v51 }
 0x4f5   :  { %10834 = vmatprep.subr.bf16.mxu1 %v13624_v25 }
 0x4f7   :  { %10543 = vmatpush1.bf16.msra.mxu0 %v13619_v27  ;;  %v13678_v27 = vld [vmem:[#allocation7 + $0x64c] ss:$16 sps:$4 sm:$0xff]  }
 0x4f8   :  { %10835 = vmatpush1.bf16.msra.mxu1 %v13622_v56  ;;  %10544 = vmatprep.subr.bf16.mxu0 %v13627_v12 }
 0x4f9   :  { %10836 = vmatprep.subr.bf16.mxu1 %v13630_v1 }
 0x4fb   :  { %10545 = vmatpush1.bf16.msra.mxu0 %v13625_v8 }
 0x4fc   :  { %10837 = vmatpush1.bf16.msra.mxu1 %v13628_v28  ;;  %10546 = vmatprep.subr.bf16.mxu0 %v13633_v22 }
 0x4fd   :  { %10838 = vmatprep.subr.bf16.mxu1 %v13636_v42 }
 0x4ff   :  { %10547 = vmatpush1.bf16.msra.mxu0 %v13631_v0 }
 0x500   :  { %10839 = vmatpush1.bf16.msra.mxu1 %v13634_v26  ;;  %10548 = vmatprep.subr.bf16.mxu0 %v13639_v21 }
 0x501   :  { %10840 = vmatprep.subr.bf16.mxu1 %v13642_v35  ;;  %v13673_v35 = vld [vmem:[#allocation7 + $0x640] ss:$16 sps:$4 sm:$0xff]  }
 0x503   :  { %10549 = vmatpush1.bf16.msra.mxu0 %v13637_v6  ;;  %v13676_v6 = vld [vmem:[#allocation7 + $0x648] ss:$16 sps:$4 sm:$0xff]  }
 0x504   :  { %10841 = vmatpush1.bf16.msra.mxu1 %v13640_v29  ;;  %10550 = vmatprep.subr.bf16.mxu0 %v13645_v48  ;;  %v13681_v48 = vld [vmem:[#allocation7 + $0x664] ss:$16 sps:$4 sm:$0xff]  }
 0x505   :  { %10842 = vmatprep.subr.bf16.mxu1 %v13648_v57  ;;  %v13684_v57 = vld [vmem:[#allocation7 + $0x66c] ss:$16 sps:$4 sm:$0xff]  }
 0x507   :  { %10551 = vmatpush1.bf16.msra.mxu0 %v13643_v3 }
 0x508   :  { %10843 = vmatpush1.bf16.msra.mxu1 %v13646_v4  ;;  %10552 = vmatprep.subr.bf16.mxu0 %v13651_v47 }
 0x509   :  { %10844 = vmatprep.subr.bf16.mxu1 %v13654_v2  ;;  %v13679_v2 = vld [vmem:[#allocation7 + $0x660] ss:$16 sps:$4 sm:$0xff]  }
 0x50b   :  { %10553 = vmatpush1.bf16.msra.mxu0 %v13649_v45 }
 0x50c   :  { %10845 = vmatpush1.bf16.msra.mxu1 %v13652_v49  ;;  %10554 = vmatprep.subr.bf16.mxu0 %v13657_v30  ;;  %v13682_v30 = vld [vmem:[#allocation7 + $0x668] ss:$16 sps:$4 sm:$0xff]  }
 0x50d   :  { %10846 = vmatprep.subr.bf16.mxu1 %v13660_v63  ;;  %v13687_v63 = vld [vmem:[#allocation7 + $0x684] ss:$16 sps:$4 sm:$0xff]  }
 0x50f   :  { %10555 = vmatpush1.bf16.msra.mxu0 %v13655_v33 }
 0x510   :  { %10847 = vmatpush1.bf16.msra.mxu1 %v13658_v16  ;;  %10597 = vmatprep.subr.bf16.mxu0 %v13663_v62 }
 0x511   :  { %10889 = vmatprep.subr.bf16.mxu1 %v13666_v19 }
 0x523   :  { %v8123_v60 = vpop.f32.mrb[16].mxu0  ;;  %v8707_v5 = vpop.f32.mrb[16].mxu1 }
 0x524   :  { %v8125_v24 = vpop.f32.mrb[17].mxu0  ;;  %v8709_v31 = vpop.f32.mrb[17].mxu1  ;;  %v8750_v59 = vmax.f32 %v8123_v60, 0.0  ;;  %v8752_v9 = vmax.f32 %v8707_v5, 0.0  ;;  %v13690_v60 = vld [vmem:[#allocation7 + $0x68c] ss:$16 sps:$4 sm:$0xff]  }
 0x525   :  { %v8127_v50 = vpop.f32.mrb[18].mxu0  ;;  %v8711_v20 = vpop.f32.mrb[18].mxu1  ;;  %v8751_v37 = vmax.f32 %v8125_v24, 0.0  ;;  %v8753_v52 = vmax.f32 %v8709_v31, 0.0 }
 0x526   :  { %v8758_v43 = vmax.f32 %v8127_v50, 0.0  ;;  %v8129_v11 = vpop.f32.mrb[19].mxu0  ;;  %v8760_v18 = vmax.f32 %v8711_v20, 0.0  ;;  %v8713_v36 = vpop.f32.mrb[19].mxu1 }
 0x527   :  { %v8759_v7 = vmax.f32 %v8129_v11, 0.0  ;;  %v8761_v34 = vmax.f32 %v8713_v36, 0.0 }
 0x528   :  { %v8814_v39 = vpack.c.bf16 %v8758_v43, %v8750_v59  ;;  %v14447_v32 = vpack.c.bf16 %v8760_v18, %v8752_v9  ;;  %v13685_v18 = vld [vmem:[#allocation7 + $0x680] ss:$16 sps:$4 sm:$0xff]  }
 0x529   :  { %v8815_v41 = vpack.c.bf16 %v8759_v7, %v8751_v37  ;;  %v14449_v15 = vpack.c.bf16 %v8761_v34, %v8753_v52  ;;  %v13688_v7 = vld [vmem:[#allocation7 + $0x688] ss:$16 sps:$4 sm:$0xff]   ;;  %v13693_v52 = vld [vmem:[#allocation7 + $0x6a4] ss:$16 sps:$4 sm:$0xff]  }
 0x52b   :  { %v8133_v14 = vpop.f32.mrb[20].mxu0  ;;  %10556 = vmatprep.mubr.bf16.mxu0 %v8815_v41  ;;  %10848 = vmatprep.mubr.bf16.mxu1 %v8815_v41  ;;  %v8717_v61 = vpop.f32.mrb[20].mxu1 }
 0x52c   :  { %v8135_v13 = vpop.f32.mrb[21].mxu0  ;;  %10557 = vmatmul.mubr.bf16.vlgmr.msra.gmra.mrb[32].mxu0 %v8814_v39  ;;  %10849 = vmatmul.mubr.bf16.vlgmr.msra.gmra.mrb[32].mxu1 %v8814_v39  ;;  %v8719_v40 = vpop.f32.mrb[21].mxu1  ;;  %v8766_v58 = vmax.f32 %v8133_v14, 0.0  ;;  %v8768_v56 = vmax.f32 %v8717_v61, 0.0  ;;  %v13696_v39 = vld [vmem:[#allocation7 + $0x6ac] ss:$16 sps:$4 sm:$0xff]  }
 0x52d   :  { %10598 = vmatpush1.bf16.msra.mxu0 %v13661_v10  ;;  %10890 = vmatpush1.bf16.msra.mxu1 %v13664_v23  ;;  %v8137_v17 = vpop.f32.mrb[22].mxu0  ;;  %v8721_v51 = vpop.f32.mrb[22].mxu1  ;;  %v8767_v12 = vmax.f32 %v8135_v13, 0.0  ;;  %v8769_v22 = vmax.f32 %v8719_v40, 0.0  ;;  %v13691_v23 = vld [vmem:[#allocation7 + $0x6a0] ss:$16 sps:$4 sm:$0xff]  }
 0x52e   :  { %v8774_v53 = vmax.f32 %v8137_v17, 0.0  ;;  %v8139_v25 = vpop.f32.mrb[23].mxu0  ;;  %10599 = vmatprep.subr.bf16.mxu0 %v13669_v44  ;;  %10891 = vmatprep.subr.bf16.mxu1 %v13672_v46  ;;  %v8776_v1 = vmax.f32 %v8721_v51, 0.0  ;;  %v8723_v28 = vpop.f32.mrb[23].mxu1  ;;  %v13694_v14 = vld [vmem:[#allocation7 + $0x6a8] ss:$16 sps:$4 sm:$0xff]  }
 0x52f   :  { %v8775_v8 = vmax.f32 %v8139_v25, 0.0  ;;  %v8777_v0 = vmax.f32 %v8723_v28, 0.0  ;;  %v13699_v61 = vld [vmem:[#allocation7 + $0x6c4] ss:$16 sps:$4 sm:$0xff]   ;;  %v13697_v28 = vld [vmem:[#allocation7 + $0x6c0] ss:$16 sps:$4 sm:$0xff]  }
 0x530   :  { %v8822_v42 = vpack.c.bf16 %v8774_v53, %v8766_v58  ;;  %v14451_v26 = vpack.c.bf16 %v8776_v1, %v8768_v56 }
 0x531   :  { %v8823_v21 = vpack.c.bf16 %v8775_v8, %v8767_v12  ;;  %10600 = vmatpush1.bf16.msra.mxu0 %v13667_v54  ;;  %10892 = vmatpush1.bf16.msra.mxu1 %v13670_v38  ;;  %v14453_v29 = vpack.c.bf16 %v8777_v0, %v8769_v22  ;;  %v13702_v38 = vld [vmem:[#allocation7 + $0x6cc] ss:$16 sps:$4 sm:$0xff]   ;;  %v13700_v22 = vld [vmem:[#allocation7 + $0x6c8] ss:$16 sps:$4 sm:$0xff]   ;;  %v13705_v0 = vld [vmem:[#allocation7 + $0x6e4] ss:$16 sps:$4 sm:$0xff]  }
 0x532   :  { %10601 = vmatprep.subr.bf16.mxu0 %v13675_v55  ;;  %10893 = vmatprep.subr.bf16.mxu1 %v13678_v27 }
 0x533   :  { %v8143_v3 = vpop.f32.mrb[24].mxu0  ;;  %10566 = vmatprep.mubr.bf16.mxu0 %v8823_v21  ;;  %10858 = vmatprep.mubr.bf16.mxu1 %v8823_v21  ;;  %v8727_v4 = vpop.f32.mrb[24].mxu1  ;;  %v13708_v21 = vld [vmem:[#allocation7 + $0x6ec] ss:$16 sps:$4 sm:$0xff]  }
 0x534   :  { %v8145_v47 = vpop.f32.mrb[25].mxu0  ;;  %10567 = vmatmul.mubr.bf16.gmra.mrb[36].mxu0 %v8822_v42  ;;  %10859 = vmatmul.mubr.bf16.gmra.mrb[36].mxu1 %v8822_v42  ;;  %v8729_v45 = vpop.f32.mrb[25].mxu1  ;;  %v8782_v33 = vmax.f32 %v8143_v3, 0.0  ;;  %v8784_v5 = vmax.f32 %v8727_v4, 0.0  ;;  %v13709_v3 = vld [vmem:[#allocation7 + $0x700] ss:$16 sps:$4 sm:$0xff]  }
 0x535   :  { %10602 = vmatpush1.bf16.msra.mxu0 %v13673_v35  ;;  %10894 = vmatpush1.bf16.msra.mxu1 %v13676_v6  ;;  %v8147_v49 = vpop.f32.mrb[26].mxu0  ;;  %v8731_v62 = vpop.f32.mrb[26].mxu1  ;;  %v8783_v24 = vmax.f32 %v8145_v47, 0.0  ;;  %v8785_v43 = vmax.f32 %v8729_v45, 0.0  ;;  %v13703_v35 = vld [vmem:[#allocation7 + $0x6e0] ss:$16 sps:$4 sm:$0xff]  }
 0x536   :  { %v8790_v16 = vmax.f32 %v8147_v49, 0.0  ;;  %v8149_v19 = vpop.f32.mrb[27].mxu0  ;;  %10603 = vmatprep.subr.bf16.mxu0 %v13681_v48  ;;  %10895 = vmatprep.subr.bf16.mxu1 %v13684_v57  ;;  %v8792_v31 = vmax.f32 %v8731_v62, 0.0  ;;  %v8733_v59 = vpop.f32.mrb[27].mxu1  ;;  %v13706_v6 = vld [vmem:[#allocation7 + $0x6e8] ss:$16 sps:$4 sm:$0xff]  }
 0x537   :  { %v8791_v50 = vmax.f32 %v8149_v19, 0.0  ;;  %v8793_v11 = vmax.f32 %v8733_v59, 0.0  ;;  %v13711_v48 = vld [vmem:[#allocation7 + $0x704] ss:$16 sps:$4 sm:$0xff]   ;;  %v13714_v57 = vld [vmem:[#allocation7 + $0x70c] ss:$16 sps:$4 sm:$0xff]  }
 0x538   :  { %v8830_v20 = vpack.c.bf16 %v8790_v16, %v8782_v33  ;;  %v14455_v9 = vpack.c.bf16 %v8792_v31, %v8784_v5  ;;  %v13712_v4 = vld [vmem:[#allocation7 + $0x708] ss:$16 sps:$4 sm:$0xff]   ;;  %v13717_v47 = vld [vmem:[#allocation7 + $0x724] ss:$16 sps:$4 sm:$0xff]   ;;  %v13715_v45 = vld [vmem:[#allocation7 + $0x720] ss:$16 sps:$4 sm:$0xff]  }
 0x539   :  { %v8831_v37 = vpack.c.bf16 %v8791_v50, %v8783_v24  ;;  %10604 = vmatpush1.bf16.msra.mxu0 %v13679_v2  ;;  %10896 = vmatpush1.bf16.msra.mxu1 %v13682_v30  ;;  %v14457_v36 = vpack.c.bf16 %v8793_v11, %v8785_v43  ;;  %v13720_v2 = vld [vmem:[#allocation7 + $0x72c] ss:$16 sps:$4 sm:$0xff]   ;;  %v13718_v49 = vld [vmem:[#allocation7 + $0x728] ss:$16 sps:$4 sm:$0xff]   ;;  %v13723_v30 = vld [vmem:[#allocation7 + $0x744] ss:$16 sps:$4 sm:$0xff]  }
 0x53a   :  { %10605 = vmatprep.subr.bf16.mxu0 %v13687_v63  ;;  %10897 = vmatprep.subr.bf16.mxu1 %v13690_v60  ;;  %v13721_v63 = vld [vmem:[#allocation7 + $0x740] ss:$16 sps:$4 sm:$0xff]   ;;  %v13724_v33 = vld [vmem:[#allocation7 + $0x748] ss:$16 sps:$4 sm:$0xff]   ;;  %v13729_v16 = vld [vmem:[#allocation7 + $0x764] ss:$16 sps:$4 sm:$0xff]  }
 0x53b   :  { %v8153_v34 = vpop.f32.mrb[28].mxu0  ;;  %10576 = vmatprep.mubr.bf16.mxu0 %v8831_v37  ;;  %10868 = vmatprep.mubr.bf16.mxu1 %v8831_v37  ;;  %v8737_v41 = vpop.f32.mrb[28].mxu1  ;;  %v13732_v62 = vld [vmem:[#allocation7 + $0x76c] ss:$16 sps:$4 sm:$0xff]   ;;  %v13727_v19 = vld [vmem:[#allocation7 + $0x760] ss:$16 sps:$4 sm:$0xff]  }
 0x53c   :  { %v8155_v10 = vpop.f32.mrb[29].mxu0  ;;  %10577 = vmatmul.mubr.bf16.gmra.mrb[40].mxu0 %v8830_v20  ;;  %10869 = vmatmul.mubr.bf16.gmra.mrb[40].mxu1 %v8830_v20  ;;  %v8739_v44 = vpop.f32.mrb[29].mxu1  ;;  %v8798_v13 = vmax.f32 %v8153_v34, 0.0  ;;  %v8800_v55 = vmax.f32 %v8737_v41, 0.0  ;;  %v13730_v60 = vld [vmem:[#allocation7 + $0x768] ss:$16 sps:$4 sm:$0xff]  }
 0x53d   :  { %10606 = vmatpush1.bf16.msra.mxu0 %v13685_v18  ;;  %10898 = vmatpush1.bf16.msra.mxu1 %v13688_v7  ;;  %v8157_v46 = vpop.f32.mrb[30].mxu0  ;;  %v8741_v40 = vpop.f32.mrb[30].mxu1  ;;  %v8799_v58 = vmax.f32 %v8155_v10, 0.0  ;;  %v8801_v27 = vmax.f32 %v8739_v44, 0.0  ;;  %v13735_v5 = vld [vmem:[#allocation7 + $0x784] ss:$16 sps:$4 sm:$0xff]  }
 0x53e   :  { %v8806_v54 = vmax.f32 %v8157_v46, 0.0  ;;  %v8159_v17 = vpop.f32.mrb[31].mxu0  ;;  %10607 = vmatprep.subr.bf16.mxu0 %v13693_v52  ;;  %10899 = vmatprep.subr.bf16.mxu1 %v13696_v39  ;;  %v8808_v53 = vmax.f32 %v8741_v40, 0.0  ;;  %v8743_v25 = vpop.f32.mrb[31].mxu1  ;;  %v13738_v24 = vld [vmem:[#allocation7 + $0x78c] ss:$16 sps:$4 sm:$0xff]  }
 0x53f   :  { %v8807_v51 = vmax.f32 %v8159_v17, 0.0  ;;  %v8809_v12 = vmax.f32 %v8743_v25, 0.0  ;;  %v13733_v31 = vld [vmem:[#allocation7 + $0x780] ss:$16 sps:$4 sm:$0xff]   ;;  %v13736_v50 = vld [vmem:[#allocation7 + $0x788] ss:$16 sps:$4 sm:$0xff]  }
 0x540   :  { %v8838_v56 = vpack.c.bf16 %v8806_v54, %v8798_v13  ;;  %v14459_v1 = vpack.c.bf16 %v8808_v53, %v8800_v55  ;;  %v13741_v59 = vld [vmem:[#allocation7 + $0x7a4] ss:$16 sps:$4 sm:$0xff]   ;;  %v13744_v43 = vld [vmem:[#allocation7 + $0x7ac] ss:$16 sps:$4 sm:$0xff]   ;;  %v13739_v20 = vld [vmem:[#allocation7 + $0x7a0] ss:$16 sps:$4 sm:$0xff]  }
 0x541   :  { %v8839_v8 = vpack.c.bf16 %v8807_v51, %v8799_v58  ;;  %10608 = vmatpush1.bf16.msra.mxu0 %v13691_v23  ;;  %10900 = vmatpush1.bf16.msra.mxu1 %v13694_v14  ;;  %v14461_v42 = vpack.c.bf16 %v8809_v12, %v8801_v27  ;;  %v13742_v11 = vld [vmem:[#allocation7 + $0x7a8] ss:$16 sps:$4 sm:$0xff]   ;;  %v13747_v37 = vld [vmem:[#allocation7 + $0x7c4] ss:$16 sps:$4 sm:$0xff]   ;;  %v13750_v18 = vld [vmem:[#allocation7 + $0x7cc] ss:$16 sps:$4 sm:$0xff]  }
 0x542   :  { %10609 = vmatprep.subr.bf16.mxu0 %v13699_v61  ;;  %10901 = vmatprep.subr.bf16.mxu1 %v13702_v38  ;;  %v13745_v7 = vld [vmem:[#allocation7 + $0x7c0] ss:$16 sps:$4 sm:$0xff]   ;;  %v13748_v52 = vld [vmem:[#allocation7 + $0x7c8] ss:$16 sps:$4 sm:$0xff]   ;;  %v13753_v39 = vld [vmem:[#allocation7 + $0x7e4] ss:$16 sps:$4 sm:$0xff]  }
 0x543   :  { %10586 = vmatprep.mubr.bf16.mxu0 %v8839_v8  ;;  %10878 = vmatprep.mubr.bf16.mxu1 %v8839_v8  ;;  %v13756_v34 = vld [vmem:[#allocation7 + $0x7ec] ss:$16 sps:$4 sm:$0xff]   ;;  %v13751_v41 = vld [vmem:[#allocation7 + $0x7e0] ss:$16 sps:$4 sm:$0xff]   ;;  %v13754_v10 = vld [vmem:[#allocation7 + $0x7e8] ss:$16 sps:$4 sm:$0xff]  }
 0x544   :  { %10587 = vmatmul.mubr.bf16.gmra.mrb[44].mxu0 %v8838_v56  ;;  %10879 = vmatmul.mubr.bf16.gmra.mrb[44].mxu1 %v8838_v56  ;;  %v13757_v23 = vld [vmem:[#allocation8 + $0x40] sm:$0xff]   ;;  %v13761_v61 = vld [vmem:[#allocation8 + $0x48] sm:$0xff]   ;;  %v13765_v17 = vld [vmem:[#allocation8 + $0x50] sm:$0xff]  }
 0x545   :  { %10610 = vmatpush1.bf16.msra.mxu0 %v13697_v28  ;;  %10902 = vmatpush1.bf16.msra.mxu1 %v13700_v22  ;;  %v13758_v44 = vld [vmem:[#allocation8 + $0xc0] sm:$0xff]   ;;  %v13762_v13 = vld [vmem:[#allocation8 + $0xc8] sm:$0xff]   ;;  %v13766_v38 = vld [vmem:[#allocation8 + $0xd0] sm:$0xff]  }
 0x546   :  { %10629 = vmatprep.mubr.bf16.mxu0 %v14449_v15  ;;  %10921 = vmatprep.mubr.bf16.mxu1 %v14449_v15  ;;  %v13726_v15 = vld [vmem:[#allocation7 + $0x74c] ss:$16 sps:$4 sm:$0xff]   ;;  %v13759_v46 = vld [vmem:[#allocation8] sm:$0xff]   ;;  %v13767_v55 = vld [vmem:[#allocation8 + $0x10] sm:$0xff]  }
 0x547   :  { %10611 = vmatprep.subr.bf16.mxu0 %v13705_v0  ;;  %10903 = vmatprep.subr.bf16.mxu1 %v13708_v21  ;;  %v13760_v14 = vld [vmem:[#allocation8 + $0x80] sm:$0xff]   ;;  %v13763_v54 = vld [vmem:[#allocation8 + $0x8] sm:$0xff]   ;;  %v13768_v58 = vld [vmem:[#allocation8 + $0x90] sm:$0xff]  }
 0x548   :  { %v13764_v40 = vld [vmem:[#allocation8 + $0x88] sm:$0xff]   ;;  %v13769_v53 = vld [vmem:[#allocation8 + $0x58] sm:$0xff]   ;;  %v13773_v25 = vld [vmem:[#allocation8 + $0x60] sm:$0xff]  }
 0x549   :  { %10612 = vmatpush1.bf16.msra.mxu0 %v13703_v35  ;;  %10904 = vmatpush1.bf16.msra.mxu1 %v13706_v6  ;;  %v13772_v51 = vld [vmem:[#allocation8 + $0x98] sm:$0xff]   ;;  %v13774_v27 = vld [vmem:[#allocation8 + $0xe0] sm:$0xff]   ;;  %v13777_v8 = vld [vmem:[#allocation8 + $0x68] sm:$0xff]  }
 0x54a   :  { %10613 = vmatprep.subr.bf16.mxu0 %v13711_v48  ;;  %10905 = vmatprep.subr.bf16.mxu1 %v13714_v57  ;;  %v13775_v56 = vld [vmem:[#allocation8 + $0x20] sm:$0xff]   ;;  %v13780_v28 = vld [vmem:[#allocation8 + $0xa8] sm:$0xff]   ;;  %v13781_v22 = vld [vmem:[#allocation8 + $0x70] sm:$0xff]  }
 0x54b   :  { %v13776_v12 = vld [vmem:[#allocation8 + $0xa0] sm:$0xff]   ;;  %v13782_v0 = vld [vmem:[#allocation8 + $0xf0] sm:$0xff]   ;;  %v13786_v35 = vld [vmem:[#allocation8 + $0xf8] sm:$0xff]  }
 0x54c   :  { %v13783_v21 = vld [vmem:[#allocation8 + $0x30] sm:$0xff]   ;;  %v13787_v6 = vld [vmem:[#allocation8 + $0x38] sm:$0xff]  }
 0x54d   :  { %10614 = vmatpush1.bf16.msra.mxu0 %v13709_v3  ;;  %10906 = vmatpush1.bf16.msra.mxu1 %v13712_v4  ;;  %v13788_v48 = vld [vmem:[#allocation8 + $0xb8] sm:$0xff]  }
 0x54e   :  { %10615 = vmatprep.subr.bf16.mxu0 %v13717_v47  ;;  %10907 = vmatprep.subr.bf16.mxu1 %v13720_v2 }
 0x551   :  { %10616 = vmatpush1.bf16.msra.mxu0 %v13715_v45  ;;  %10908 = vmatpush1.bf16.msra.mxu1 %v13718_v49 }
 0x552   :  { %10617 = vmatprep.subr.bf16.mxu0 %v13723_v30  ;;  %10909 = vmatprep.subr.bf16.mxu1 %v13726_v15 }
 0x555   :  { %10618 = vmatpush1.bf16.msra.mxu0 %v13721_v63  ;;  %10910 = vmatpush1.bf16.msra.mxu1 %v13724_v33 }
 0x556   :  { %10619 = vmatprep.subr.bf16.mxu0 %v13729_v16  ;;  %10911 = vmatprep.subr.bf16.mxu1 %v13732_v62 }
 0x559   :  { %10620 = vmatpush1.bf16.msra.mxu0 %v13727_v19  ;;  %10912 = vmatpush1.bf16.msra.mxu1 %v13730_v60 }
 0x55a   :  { %10621 = vmatprep.subr.bf16.mxu0 %v13735_v5  ;;  %10913 = vmatprep.subr.bf16.mxu1 %v13738_v24 }
 0x55d   :  { %10622 = vmatpush1.bf16.msra.mxu0 %v13733_v31  ;;  %10914 = vmatpush1.bf16.msra.mxu1 %v13736_v50 }
 0x55e   :  { %10623 = vmatprep.subr.bf16.mxu0 %v13741_v59  ;;  %10915 = vmatprep.subr.bf16.mxu1 %v13744_v43 }
 0x561   :  { %10624 = vmatpush1.bf16.msra.mxu0 %v13739_v20  ;;  %10916 = vmatpush1.bf16.msra.mxu1 %v13742_v11 }
 0x562   :  { %10625 = vmatprep.subr.bf16.mxu0 %v13747_v37  ;;  %10917 = vmatprep.subr.bf16.mxu1 %v13750_v18 }
 0x565   :  { %10626 = vmatpush1.bf16.msra.mxu0 %v13745_v7  ;;  %10918 = vmatpush1.bf16.msra.mxu1 %v13748_v52 }
 0x566   :  { %10627 = vmatprep.subr.bf16.mxu0 %v13753_v39  ;;  %10919 = vmatprep.subr.bf16.mxu1 %v13756_v34 }
 0x569   :  { %10628 = vmatpush1.bf16.msra.mxu0 %v13751_v41  ;;  %10920 = vmatpush1.bf16.msra.mxu1 %v13754_v10 }
 0x56a   :  { %12735 = vmatprep.subr.bf16.mxu0 %v13757_v23  ;;  %12775 = vmatprep.subr.bf16.mxu1 %v13758_v44 }
 0x56c   :  { %10630 = vmatmul.mubr.bf16.vlgmr.msra.gmra.mrb[32].mxu0 %v14447_v32  ;;  %10922 = vmatmul.mubr.bf16.vlgmr.msra.gmra.mrb[32].mxu1 %v14447_v32  ;;  %v13770_v32 = vld [vmem:[#allocation8 + $0xd8] sm:$0xff]  }
 0x56d   :  { %10639 = vmatprep.mubr.bf16.mxu0 %v14453_v29  ;;  %10931 = vmatprep.mubr.bf16.mxu1 %v14453_v29  ;;  %v13771_v29 = vld [vmem:[#allocation8 + $0x18] sm:$0xff]  }
 0x56e   :  { %12736 = vmatpush3.bf16.msra.mxu0 %v13759_v46  ;;  %12776 = vmatpush3.bf16.msra.mxu1 %v13760_v14 }
 0x56f   :  { %12737 = vmatprep.subr.bf16.mxu0 %v13761_v61  ;;  %12777 = vmatprep.subr.bf16.mxu1 %v13762_v13 }
 0x572   :  { %12738 = vmatpush3.bf16.msra.mxu0 %v13763_v54  ;;  %12778 = vmatpush3.bf16.msra.mxu1 %v13764_v40 }
 0x573   :  { %12739 = vmatprep.subr.bf16.mxu0 %v13765_v17  ;;  %12779 = vmatprep.subr.bf16.mxu1 %v13766_v38 }
 0x574   :  { %10640 = vmatmul.mubr.bf16.gmra.mrb[36].mxu0 %v14451_v26  ;;  %10932 = vmatmul.mubr.bf16.gmra.mrb[36].mxu1 %v14451_v26  ;;  %v13778_v26 = vld [vmem:[#allocation8 + $0xe8] sm:$0xff]  }
 0x575   :  { %10649 = vmatprep.mubr.bf16.mxu0 %v14457_v36  ;;  %10941 = vmatprep.mubr.bf16.mxu1 %v14457_v36  ;;  %v13779_v36 = vld [vmem:[#allocation8 + $0x28] sm:$0xff]  }
 0x576   :  { %12740 = vmatpush3.bf16.msra.mxu0 %v13767_v55  ;;  %12780 = vmatpush3.bf16.msra.mxu1 %v13768_v58 }
 0x577   :  { %12741 = vmatprep.subr.bf16.mxu0 %v13769_v53  ;;  %12781 = vmatprep.subr.bf16.mxu1 %v13770_v32 }
 0x57a   :  { %12742 = vmatpush3.bf16.msra.mxu0 %v13771_v29  ;;  %12782 = vmatpush3.bf16.msra.mxu1 %v13772_v51 }
 0x57b   :  { %12743 = vmatprep.subr.bf16.mxu0 %v13773_v25  ;;  %12783 = vmatprep.subr.bf16.mxu1 %v13774_v27 }
 0x57c   :  { %10650 = vmatmul.mubr.bf16.gmra.mrb[40].mxu0 %v14455_v9  ;;  %10942 = vmatmul.mubr.bf16.gmra.mrb[40].mxu1 %v14455_v9  ;;  %v13784_v9 = vld [vmem:[#allocation8 + $0xb0] sm:$0xff]  }
 0x57d   :  { %10659 = vmatprep.mubr.bf16.mxu0 %v14461_v42  ;;  %10951 = vmatprep.mubr.bf16.mxu1 %v14461_v42  ;;  %v13785_v42 = vld [vmem:[#allocation8 + $0x78] sm:$0xff]  }
 0x57e   :  { %12744 = vmatpush3.bf16.msra.mxu0 %v13775_v56  ;;  %12784 = vmatpush3.bf16.msra.mxu1 %v13776_v12 }
 0x57f   :  { %12745 = vmatprep.subr.bf16.mxu0 %v13777_v8  ;;  %12785 = vmatprep.subr.bf16.mxu1 %v13778_v26 }
 0x582   :  { %12746 = vmatpush3.bf16.msra.mxu0 %v13779_v36  ;;  %12786 = vmatpush3.bf16.msra.mxu1 %v13780_v28 }
 0x583   :  { %12747 = vmatprep.subr.bf16.mxu0 %v13781_v22  ;;  %12787 = vmatprep.subr.bf16.mxu1 %v13782_v0 }
 0x584   :  { %10660 = vmatmul.mubr.bf16.gmra.mrb[44].mxu0 %v14459_v1  ;;  %10952 = vmatmul.mubr.bf16.gmra.mrb[44].mxu1 %v14459_v1 }
 0x586   :  { %12748 = vmatpush3.bf16.msra.mxu0 %v13783_v21  ;;  %12788 = vmatpush3.bf16.msra.mxu1 %v13784_v9 }
 0x587   :  { %12749 = vmatprep.subr.bf16.mxu0 %v13785_v42  ;;  %12789 = vmatprep.subr.bf16.mxu1 %v13786_v35 }
 0x58a   :  { %12750 = vmatpush3.bf16.msra.mxu0 %v13787_v6  ;;  %12790 = vmatpush3.bf16.msra.mxu1 %v13788_v48 }
 0x63f   :  { %v10631_v57 = vpop.f32.mrb[32].mxu0  ;;  %v10923_v3 = vpop.f32.mrb[32].mxu1 }
 0x640   :  { %v10633_v4 = vpop.f32.mrb[33].mxu0  ;;  %v10925_v1 = vpop.f32.mrb[33].mxu1  ;;  %v10962_v45 = vmax.f32 %v10631_v57, 0.0  ;;  %v10964_v49 = vmax.f32 %v10923_v3, 0.0 }
 0x641   :  { %v10635_v47 = vpop.f32.mrb[34].mxu0  ;;  %v10927_v2 = vpop.f32.mrb[34].mxu1  ;;  %v10963_v16 = vmax.f32 %v10633_v4, 0.0  ;;  %v10965_v62 = vmax.f32 %v10925_v1, 0.0 }
 0x642   :  { %v10966_v30 = vmax.f32 %v10635_v47, 0.0  ;;  %v10968_v15 = vmax.f32 %v10927_v2, 0.0  ;;  %v10637_v63 = vpop.f32.mrb[35].mxu0  ;;  %v10929_v33 = vpop.f32.mrb[35].mxu1 }
 0x643   :  { %v10967_v19 = vmax.f32 %v10637_v63, 0.0  ;;  %v10969_v60 = vmax.f32 %v10929_v33, 0.0 }
 0x644   :  { %v10994_v5 = vpack.c.bf16 %v10966_v30, %v10962_v45  ;;  %v10996_v24 = vpack.c.bf16 %v10968_v15, %v10964_v49 }
 0x645   :  { %v10995_v31 = vpack.c.bf16 %v10967_v19, %v10963_v16  ;;  %v10997_v50 = vpack.c.bf16 %v10969_v60, %v10965_v62 }
 0x647   :  { %v10641_v59 = vpop.f32.mrb[36].mxu0  ;;  %v10933_v43 = vpop.f32.mrb[36].mxu1  ;;  %11298 = vmatprep.mubr.bf16.mxu0 %v10995_v31  ;;  %11363 = vmatprep.mubr.bf16.mxu1 %v10997_v50 }
 0x648   :  { %v10643_v20 = vpop.f32.mrb[37].mxu0  ;;  %v10935_v11 = vpop.f32.mrb[37].mxu1  ;;  %11299 = vmatmul.mubr.bf16.vlgmr.msra.gmra.mrb[48].mxu0 %v10994_v5  ;;  %11364 = vmatmul.mubr.bf16.vlgmr.msra.gmra.mrb[48].mxu1 %v10996_v24  ;;  %v10970_v7 = vmax.f32 %v10641_v59, 0.0  ;;  %v10972_v52 = vmax.f32 %v10933_v43, 0.0 }
 0x649   :  { %v10645_v37 = vpop.f32.mrb[38].mxu0  ;;  %v10937_v18 = vpop.f32.mrb[38].mxu1  ;;  %v10971_v23 = vmax.f32 %v10643_v20, 0.0  ;;  %v10973_v44 = vmax.f32 %v10935_v11, 0.0 }
 0x64a   :  { %v10974_v39 = vmax.f32 %v10645_v37, 0.0  ;;  %v10976_v34 = vmax.f32 %v10937_v18, 0.0  ;;  %v10647_v41 = vpop.f32.mrb[39].mxu0  ;;  %v10939_v10 = vpop.f32.mrb[39].mxu1 }
 0x64b   :  { %v10975_v46 = vmax.f32 %v10647_v41, 0.0  ;;  %v10977_v14 = vmax.f32 %v10939_v10, 0.0 }
 0x64c   :  { %v10998_v61 = vpack.c.bf16 %v10974_v39, %v10970_v7  ;;  %v11000_v13 = vpack.c.bf16 %v10976_v34, %v10972_v52 }
 0x64d   :  { %v10999_v54 = vpack.c.bf16 %v10975_v46, %v10971_v23  ;;  %v11001_v40 = vpack.c.bf16 %v10977_v14, %v10973_v44 }
 0x64f   :  { %v10651_v17 = vpop.f32.mrb[40].mxu0  ;;  %v10943_v38 = vpop.f32.mrb[40].mxu1  ;;  %11306 = vmatprep.mubr.bf16.mxu0 %v10999_v54  ;;  %11371 = vmatprep.mubr.bf16.mxu1 %v11001_v40 }
 0x650   :  { %v10653_v55 = vpop.f32.mrb[41].mxu0  ;;  %v10945_v58 = vpop.f32.mrb[41].mxu1  ;;  %11307 = vmatmul.mubr.bf16.gmra.mrb[52].mxu0 %v10998_v61  ;;  %11372 = vmatmul.mubr.bf16.gmra.mrb[52].mxu1 %v11000_v13  ;;  %v10978_v29 = vmax.f32 %v10651_v17, 0.0  ;;  %v10980_v51 = vmax.f32 %v10943_v38, 0.0 }
 0x651   :  { %v10655_v53 = vpop.f32.mrb[42].mxu0  ;;  %v10947_v32 = vpop.f32.mrb[42].mxu1  ;;  %v10979_v8 = vmax.f32 %v10653_v55, 0.0  ;;  %v10981_v26 = vmax.f32 %v10945_v58, 0.0 }
 0x652   :  { %v10982_v25 = vmax.f32 %v10655_v53, 0.0  ;;  %v10984_v27 = vmax.f32 %v10947_v32, 0.0  ;;  %v10657_v56 = vpop.f32.mrb[43].mxu0  ;;  %v10949_v12 = vpop.f32.mrb[43].mxu1 }
 0x653   :  { %v10983_v36 = vmax.f32 %v10657_v56, 0.0  ;;  %v10985_v28 = vmax.f32 %v10949_v12, 0.0 }
 0x654   :  { %v11002_v22 = vpack.c.bf16 %v10982_v25, %v10978_v29  ;;  %v11004_v0 = vpack.c.bf16 %v10984_v27, %v10980_v51 }
 0x655   :  { %v11003_v21 = vpack.c.bf16 %v10983_v36, %v10979_v8  ;;  %v11005_v9 = vpack.c.bf16 %v10985_v28, %v10981_v26 }
 0x657   :  { %v10661_v42 = vpop.f32.mrb[44].mxu0  ;;  %v10953_v35 = vpop.f32.mrb[44].mxu1  ;;  %11314 = vmatprep.mubr.bf16.mxu0 %v11003_v21  ;;  %11379 = vmatprep.mubr.bf16.mxu1 %v11005_v9 }
 0x658   :  { %v10663_v6 = vpop.f32.mrb[45].mxu0  ;;  %v10955_v48 = vpop.f32.mrb[45].mxu1  ;;  %11315 = vmatmul.mubr.bf16.gmra.mrb[56].mxu0 %v11002_v22  ;;  %11380 = vmatmul.mubr.bf16.gmra.mrb[56].mxu1 %v11004_v0  ;;  %v10986_v4 = vmax.f32 %v10661_v42, 0.0  ;;  %v10988_v1 = vmax.f32 %v10953_v35, 0.0 }
 0x659   :  { %v10665_v57 = vpop.f32.mrb[46].mxu0  ;;  %v10957_v3 = vpop.f32.mrb[46].mxu1  ;;  %v10987_v30 = vmax.f32 %v10663_v6, 0.0  ;;  %v10989_v15 = vmax.f32 %v10955_v48, 0.0 }
 0x65a   :  { %v10990_v47 = vmax.f32 %v10665_v57, 0.0  ;;  %v10992_v2 = vmax.f32 %v10957_v3, 0.0  ;;  %v10667_v45 = vpop.f32.mrb[47].mxu0  ;;  %v10959_v49 = vpop.f32.mrb[47].mxu1 }
 0x65b   :  { %v10991_v63 = vmax.f32 %v10667_v45, 0.0  ;;  %v10993_v33 = vmax.f32 %v10959_v49, 0.0 }
 0x65c   :  { %v11006_v16 = vpack.c.bf16 %v10990_v47, %v10986_v4  ;;  %v11008_v62 = vpack.c.bf16 %v10992_v2, %v10988_v1 }
 0x65d   :  { %v11007_v19 = vpack.c.bf16 %v10991_v63, %v10987_v30  ;;  %v11009_v60 = vpack.c.bf16 %v10993_v33, %v10989_v15 }
 0x65f   :  { %11322 = vmatprep.mubr.bf16.mxu0 %v11007_v19  ;;  %11387 = vmatprep.mubr.bf16.mxu1 %v11009_v60 }
 0x660   :  { %11323 = vmatmul.mubr.bf16.gmra.mrb[60].mxu0 %v11006_v16  ;;  %11388 = vmatmul.mubr.bf16.gmra.mrb[60].mxu1 %v11008_v62 }
 0x71b   :  { %v12751_v5 = vpop.f32.mrb[48].mxu0  ;;  %v12791_v24 = vpop.f32.mrb[48].mxu1 }
 0x71c   :  { %v12752_v31 = vpop.f32.mrb[49].mxu0  ;;  %v12792_v50 = vpop.f32.mrb[49].mxu1 }
 0x71d   :  { %v12753_v59 = vadd.f32 %v12752_v31, %v12751_v5  ;;  %v12793_v43 = vadd.f32 %v12792_v50, %v12791_v24  ;;  %v12754_v20 = vpop.f32.mrb[50].mxu0  ;;  %v12794_v11 = vpop.f32.mrb[50].mxu1 }
 0x71e   :  { %v12755_v37 = vpop.f32.mrb[51].mxu0  ;;  %v12795_v18 = vpop.f32.mrb[51].mxu1 }
 0x71f   :  { %v11366_v7 = vadd.f32 %v12793_v43, %v12753_v59  ;;  %v12756_v52 = vadd.f32 %v12755_v37, %v12754_v20  ;;  %v12796_v39 = vadd.f32 %v12795_v18, %v12794_v11 }
 0x721   :  { %11396 = vst [vmem:[#allocation10] sm:$0xff] %v11366_v7  ;;  %v11369_v34 = vadd.f32 %v12796_v39, %v12756_v52 }
 0x723   :  { %11397 = vst [vmem:[#allocation10 + $0x8] sm:$0xff] %v11369_v34  ;;  %v12757_v41 = vpop.f32.mrb[52].mxu0  ;;  %v12797_v10 = vpop.f32.mrb[52].mxu1 }
 0x724   :  { %v12758_v23 = vpop.f32.mrb[53].mxu0  ;;  %v12798_v44 = vpop.f32.mrb[53].mxu1 }
 0x725   :  { %v12759_v46 = vadd.f32 %v12758_v23, %v12757_v41  ;;  %v12799_v14 = vadd.f32 %v12798_v44, %v12797_v10  ;;  %v12760_v61 = vpop.f32.mrb[54].mxu0  ;;  %v12800_v13 = vpop.f32.mrb[54].mxu1 }
 0x726   :  { %v12761_v54 = vpop.f32.mrb[55].mxu0  ;;  %v12801_v40 = vpop.f32.mrb[55].mxu1 }
 0x727   :  { %v11374_v17 = vadd.f32 %v12799_v14, %v12759_v46  ;;  %v12762_v38 = vadd.f32 %v12761_v54, %v12760_v61  ;;  %v12802_v55 = vadd.f32 %v12801_v40, %v12800_v13 }
 0x729   :  { %11398 = vst [vmem:[#allocation10 + $0x10] sm:$0xff] %v11374_v17  ;;  %v11377_v58 = vadd.f32 %v12802_v55, %v12762_v38 }
 0x72b   :  { %11399 = vst [vmem:[#allocation10 + $0x18] sm:$0xff] %v11377_v58  ;;  %v12763_v53 = vpop.f32.mrb[56].mxu0  ;;  %v12803_v32 = vpop.f32.mrb[56].mxu1 }
 0x72c   :  { %v12764_v29 = vpop.f32.mrb[57].mxu0  ;;  %v12804_v51 = vpop.f32.mrb[57].mxu1 }
 0x72d   :  { %v12765_v25 = vadd.f32 %v12764_v29, %v12763_v53  ;;  %v12805_v27 = vadd.f32 %v12804_v51, %v12803_v32  ;;  %v12766_v56 = vpop.f32.mrb[58].mxu0  ;;  %v12806_v12 = vpop.f32.mrb[58].mxu1 }
 0x72e   :  { %v12767_v8 = vpop.f32.mrb[59].mxu0  ;;  %v12807_v26 = vpop.f32.mrb[59].mxu1 }
 0x72f   :  { %v11382_v36 = vadd.f32 %v12805_v27, %v12765_v25  ;;  %v12768_v28 = vadd.f32 %v12767_v8, %v12766_v56  ;;  %v12808_v22 = vadd.f32 %v12807_v26, %v12806_v12 }
 0x731   :  { %11400 = vst [vmem:[#allocation10 + $0x20] sm:$0xff] %v11382_v36  ;;  %v11385_v0 = vadd.f32 %v12808_v22, %v12768_v28 }
 0x733   :  { %11401 = vst [vmem:[#allocation10 + $0x28] sm:$0xff] %v11385_v0  ;;  %v12769_v21 = vpop.f32.mrb[60].mxu0  ;;  %v12809_v9 = vpop.f32.mrb[60].mxu1 }
 0x734   :  { %v12770_v42 = vpop.f32.mrb[61].mxu0  ;;  %v12810_v35 = vpop.f32.mrb[61].mxu1 }
 0x735   :  { %v12771_v6 = vadd.f32 %v12770_v42, %v12769_v21  ;;  %v12811_v48 = vadd.f32 %v12810_v35, %v12809_v9  ;;  %v12772_v57 = vpop.f32.mrb[62].mxu0  ;;  %v12812_v3 = vpop.f32.mrb[62].mxu1 }
 0x736   :  { %v12773_v4 = vpop.f32.mrb[63].mxu0  ;;  %v12813_v1 = vpop.f32.mrb[63].mxu1 }
 0x737   :  { %v11390_v47 = vadd.f32 %v12811_v48, %v12771_v6  ;;  %v12774_v2 = vadd.f32 %v12773_v4, %v12772_v57  ;;  %v12814_v45 = vadd.f32 %v12813_v1, %v12812_v3 }
 0x739   :  { %11402 = vst [vmem:[#allocation10 + $0x30] sm:$0xff] %v11390_v47  ;;  %v11393_v49 = vadd.f32 %v12814_v45, %v12774_v2 }
 0x73b   :  { %11403 = vst [vmem:[#allocation10 + $0x38] sm:$0xff] %v11393_v49 }
 0x73c   :  { %13888 = shalt.err (!%p13885_p8)
}
 0x73d   :  { %s13889_s20 = scalar_lea.hbm %s14497_s4, 1024 }
 0x73e   :  { %p13890_p9 = scmp.ne.s32.totalorder %s14497_s4, %s13889_s20  ;;  %p13893_p10 = scmp.lt.u32.totalorder %s13889_s20, %s14497_s4 }
 0x740   :  { %p13895_p11 = pnand %p13893_p10, %p13890_p9 }
 0x742   :  { %13898 = shalt.err (!%p13895_p11)
}
 0x743   :  { %s13920_s25 = smov 8  }
 0x744   :  { %11415 = dma.vmem_to_hbm [thread:$0]  %s11410_s16, 1024, %s14497_s4, [#allocation4], %s13912_s13, %s13912_s13, %s13920_s25  }
 0x745   :  { %13905 = dma.done.wait [#allocation4], 1024  }
 0x746   :  { %13906 = vsyncadd [#allocation4], 4294966272 }
 0x747   :  { %11419 = vsyncpa [#allocation3], 1 }
 0x748   :  { %11420 = vsyncpa [#allocation6], 1 }
 0x749   :  { %11421 = vsyncpa [#allocation9], 1 }
 0x74a   :  { %11422 = vsyncpa [#allocation4], 1 }

</bundles_post_ra>
